<compile_context>
chip_gen: v7x
topology: tpu7x:2x2x1
jax: 0.10.0
libtpu: 0.0.40
codegen_flags: <defaults>
</compile_context>

<pallas_src>
import functools
import math

import jax
import jax.numpy as jnp
from jax.experimental import pallas as pl
from jax.experimental.pallas import tpu as pltpu


_VMEM_LIMIT = 32 * 1024 * 1024  # raised scoped-VMEM limit (safe on v5e/v6e/v7x)


# ----------------------------- tiling helpers ------------------------------

def _row_tile(m):
    """Largest power-of-two row tile <= 512 that divides m and leaves >= 2 grid
    steps (so both v7x TensorCores get work); falls back to one full block."""
    tm = m
    for cand in (8, 16, 32, 64, 128, 256, 512):
        if m % cand == 0 and m // cand >= 2:
            tm = cand
    return tm


# ----------------------------- Pallas kernels ------------------------------

def _mm_kernel(x_ref, w_ref, b_ref, o_ref, *, relu):
    # out = [relu](x @ w + b)   (1x1 conv as matmul, BN folded into w/b)
    acc = jnp.dot(x_ref[...], w_ref[...], preferred_element_type=jnp.float32)
    acc = acc + b_ref[...]
    if relu:
        acc = jnp.maximum(acc, 0.0)
    o_ref[...] = acc.astype(o_ref.dtype)


def _mm_res_kernel(x_ref, w_ref, b_ref, r_ref, o_ref):
    # out = relu(x @ w + b + residual)   (last 1x1 conv of a bottleneck, fused)
    acc = jnp.dot(x_ref[...], w_ref[...], preferred_element_type=jnp.float32)
    acc = acc + b_ref[...] + r_ref[...].astype(jnp.float32)
    o_ref[...] = jnp.maximum(acc, 0.0).astype(o_ref.dtype)


def _mm_ds_kernel(x_ref, w_ref, b_ref, s_ref, wd_ref, bd_ref, o_ref):
    # out = relu(x @ w + b + (xs @ wd + bd))  — conv3 fused with the 1x1 downsample
    # conv of the identity branch, so the identity never round-trips HBM.
    acc = jnp.dot(x_ref[...], w_ref[...], preferred_element_type=jnp.float32)
    acc = acc + jnp.dot(s_ref[...], wd_ref[...], preferred_element_type=jnp.float32)
    acc = acc + b_ref[...] + bd_ref[...]
    o_ref[...] = jnp.maximum(acc, 0.0).astype(o_ref.dtype)


def _conv3x3_kernel(x_ref, w_ref, b_ref, o_ref, *, stride, out_rows, width):
    """Fused 3x3 conv (+BN bias +ReLU) for one image, no im2col.

    x_ref: (H+2, W+2, C1) bf16  — spatially padded activation (1-px halo) in VMEM
    w_ref: (3, 3, C1, C2) bf16  — BN-folded weight
    b_ref: (1, C2) f32          — BN-folded bias
    o_ref: (out_rows, width, C2) bf16 — full-width output; the H stride is handled
           here (only out_rows rows are computed); the W stride (if any) is a cheap
           column subsample done by the wrapper.
    """
    taps = [[w_ref[dy, dx] for dx in range(3)] for dy in range(3)]  # 9 x (C1, C2)
    bias = b_ref[...]                                               # (1, C2) f32
    c2 = bias.shape[-1]

    def row_body(i, carry):
        acc = jnp.zeros((width, c2), jnp.float32) + bias
        for dy in range(3):
            row = x_ref[i * stride + dy]                 # (W+2, C1)
            for dx in range(3):
                acc += jnp.dot(row[dx:dx + width, :], taps[dy][dx],
                               preferred_element_type=jnp.float32)
        o_ref[i] = jnp.maximum(acc, 0.0).astype(o_ref.dtype)
        return carry

    jax.lax.fori_loop(0, out_rows, row_body, 0)


# ---------------------------- pallas_call drivers ---------------------------

def _matmul_pallas(kernel, arrays, row_tiled, out_cols, out_dtype, flops, bytes_acc):
    """(M, K)-style fused matmul call; rows tiled (no padding), weights full-block."""
    m = arrays[0].shape[0]
    tm = _row_tile(m)
    in_specs = []
    for a, tiled in zip(arrays, row_tiled):
        if tiled:
            in_specs.append(pl.BlockSpec((tm, a.shape[1]), lambda i: (i, 0)))
        else:
            in_specs.append(pl.BlockSpec(a.shape, lambda i: (0, 0)))
    return pl.pallas_call(
        kernel,
        out_shape=jax.ShapeDtypeStruct((m, out_cols), out_dtype),
        grid=(m // tm,),
        in_specs=in_specs,
        out_specs=pl.BlockSpec((tm, out_cols), lambda i: (i, 0)),
        compiler_params=pltpu.CompilerParams(
            dimension_semantics=("parallel",),
            vmem_limit_bytes=_VMEM_LIMIT),
        cost_estimate=pl.CostEstimate(flops=flops, transcendentals=0,
                                      bytes_accessed=bytes_acc),
    )(*arrays)


def _mm_call(x2d, w, b, relu=True):
    m, k = x2d.shape
    c = w.shape[1]
    b2 = b.reshape(1, c)
    flops = 2 * m * k * c
    bytes_acc = (x2d.size + w.size + m * c) * x2d.dtype.itemsize + b2.size * 4
    return _matmul_pallas(functools.partial(_mm_kernel, relu=relu),
                          [x2d, w, b2], [True, False, False],
                          c, x2d.dtype, flops, bytes_acc)


def _conv3_res_call(x2d, w, b, r2d):
    m, k = x2d.shape
    c = w.shape[1]
    b2 = b.reshape(1, c)
    flops = 2 * m * k * c
    bytes_acc = (x2d.size + r2d.size + w.size + m * c) * x2d.dtype.itemsize + c * 4
    return _matmul_pallas(_mm_res_kernel, [x2d, w, b2, r2d],
                          [True, False, False, True],
                          c, x2d.dtype, flops, bytes_acc)


def _conv3_ds_call(x2d, w, b, s2d, wd, bd):
    m, k = x2d.shape
    c = w.shape[1]
    kd = s2d.shape[1]
    b2 = b.reshape(1, c)
    bd2 = bd.reshape(1, c)
    flops = 2 * m * (k + kd) * c
    bytes_acc = ((x2d.size + s2d.size + w.size + wd.size + m * c)
                 * x2d.dtype.itemsize + 2 * c * 4)
    return _matmul_pallas(_mm_ds_kernel, [x2d, w, b2, s2d, wd, bd2],
                          [True, False, False, True, False, False],
                          c, x2d.dtype, flops, bytes_acc)


def _conv3x3_call(x, w2, b2, stride):
    """x: (N, H, W, C1) bf16.  Returns (N, Ho, W, C2) bf16 (full width)."""
    n, h, wdt, c1 = x.shape
    c2 = w2.shape[-1]
    ho = (h + 2 - 3) // stride + 1
    # 1-pixel halo pad: a single ~1x copy (replaces the old 9x im2col HBM tensor).
    xp = jnp.pad(x, ((0, 0), (1, 1), (1, 1), (0, 0)))
    hp, wp = h + 2, wdt + 2
    flops = 2 * n * ho * wdt * 9 * c1 * c2
    bytes_acc = (xp.size + w2.size + n * ho * wdt * c2) * x.dtype.itemsize + c2 * 4
    kernel = functools.partial(_conv3x3_kernel, stride=stride,
                               out_rows=ho, width=wdt)
    return pl.pallas_call(
        kernel,
        out_shape=jax.ShapeDtypeStruct((n, ho, wdt, c2), x.dtype),
        grid=(n,),
        in_specs=[
            pl.BlockSpec((None, hp, wp, c1), lambda b: (b, 0, 0, 0)),
            pl.BlockSpec((3, 3, c1, c2), lambda b: (0, 0, 0, 0)),
            pl.BlockSpec((1, c2), lambda b: (0, 0)),
        ],
        out_specs=pl.BlockSpec((None, ho, wdt, c2), lambda b: (b, 0, 0, 0)),
        compiler_params=pltpu.CompilerParams(
            dimension_semantics=("parallel",),
            vmem_limit_bytes=_VMEM_LIMIT),
        cost_estimate=pl.CostEstimate(flops=flops, transcendentals=0,
                                      bytes_accessed=bytes_acc),
    )(xp, w2, b2.reshape(1, c2))


# ----------------------- parameters (synthetic, folded BN) -----------------

def _fold_conv_bn(key, kh, kw, cin, cout):
    kw_, kg, kb, km, kv = jax.random.split(key, 5)
    w = jax.random.normal(kw_, (kh, kw, cin, cout), jnp.float32) / math.sqrt(kh * kw * cin)
    gamma = 1.0 + 0.1 * jax.random.normal(kg, (cout,), jnp.float32)
    beta = 0.1 * jax.random.normal(kb, (cout,), jnp.float32)
    mean = 0.1 * jax.random.normal(km, (cout,), jnp.float32)
    var = jax.random.uniform(kv, (cout,), jnp.float32, minval=0.5, maxval=1.5)
    scale = gamma / jnp.sqrt(var + 1e-5)              # BN (eval) folded into conv
    wf = (w * scale).astype(jnp.bfloat16)             # bf16 weights for the MXU
    bias = (beta - mean * scale).astype(jnp.float32)  # bias stays f32
    if kh == 1:
        wf = wf.reshape(cin, cout)
    return wf, bias


def _make_bottleneck(key, inplanes, planes, stride):
    keys = jax.random.split(key, 4)
    p = {}
    p["w1"], p["b1"] = _fold_conv_bn(keys[0], 1, 1, inplanes, planes)       # 1x1
    p["w2"], p["b2"] = _fold_conv_bn(keys[1], 3, 3, planes, planes)         # 3x3 (stride)
    p["w3"], p["b3"] = _fold_conv_bn(keys[2], 1, 1, planes, planes * 4)     # 1x1
    if stride != 1 or inplanes != planes * 4:                               # downsample
        p["wd"], p["bd"] = _fold_conv_bn(keys[3], 1, 1, inplanes, planes * 4)
    return p


def make_params(key, inplanes, layer_cfg):
    # layer_cfg: tuple of (planes, num_blocks, stride) for layer1..layer4
    params = []
    for planes, blocks, stride in layer_cfg:
        lkeys = jax.random.split(key, blocks + 1)
        key = lkeys[0]
        layer = []
        for bi in range(blocks):
            s = stride if bi == 0 else 1
            layer.append(_make_bottleneck(lkeys[bi + 1], inplanes, planes, s))
            inplanes = planes * 4
        params.append(layer)
    return params


# ------------------------------ forward pass -------------------------------

def _bottleneck_forward(x, p, stride):
    # x: (N, H, W, Cin) bf16
    n, h, wdt, cin = x.shape
    c1 = p["w1"].shape[1]
    c3 = p["w3"].shape[1]

    # conv1: 1x1 + folded BN + ReLU (single fused matmul kernel)
    h1 = _mm_call(x.reshape(n * h * wdt, cin), p["w1"], p["b1"], relu=True)
    h1 = h1.reshape(n, h, wdt, c1)

    # conv2: 3x3 + BN + ReLU, fused in one pallas_call (9 in-VMEM tap matmuls,
    # no im2col).  H stride handled in-kernel; W stride via a cheap subsample.
    h2 = _conv3x3_call(h1, p["w2"], p["b2"], stride)       # (N, Ho, W, C2)
    if stride != 1:
        h2 = h2[:, :, ::stride, :]
    ho, wo = h2.shape[1], h2.shape[2]
    c2 = h2.shape[3]
    h2_2d = h2.reshape(n * ho * wo, c2)

    # conv3: 1x1 + BN, fused with the residual branch (and the 1x1 downsample
    # conv when present) and the final ReLU in one matmul kernel.
    if "wd" in p:
        xs = x if stride == 1 else x[:, ::stride, ::stride, :]
        out = _conv3_ds_call(h2_2d, p["w3"], p["b3"],
                             xs.reshape(n * ho * wo, cin), p["wd"], p["bd"])
    else:
        out = _conv3_res_call(h2_2d, p["w3"], p["b3"], x.reshape(n * h * wdt, cin))
    return out.reshape(n, ho, wo, c3)


def base_resnet_forward(x_nchw, params, layer_cfg):
    # share_net=1  =>  x -> layer1 -> layer2 -> layer3 -> layer4
    x = jnp.transpose(x_nchw, (0, 2, 3, 1)).astype(jnp.bfloat16)  # NCHW -> NHWC bf16
    for layer_params, (planes, blocks, stride) in zip(params, layer_cfg):
        for bi, bp in enumerate(layer_params):
            x = _bottleneck_forward(x, bp, stride if bi == 0 else 1)
    return jnp.transpose(x, (0, 3, 1, 2)).astype(jnp.float32)     # NHWC -> NCHW f32


# ---------------------- pure-JAX reference (for checking) ------------------
# The reference applies the same bf16 rounding discipline as the Pallas path
# (bf16 weights / bf16-stored activations, f32 accumulation), so the two only
# differ by accumulation order.

def _q(x):
    return x.astype(jnp.bfloat16).astype(jnp.float32)


def _ref_conv(x, w, b, stride, relu, pad):
    w4 = w.astype(jnp.float32)
    if w4.ndim == 2:
        w4 = w4.reshape(1, 1, *w4.shape)
    y = jax.lax.conv_general_dilated(
        x, w4, (stride, stride), [(pad, pad), (pad, pad)],
        dimension_numbers=("NHWC", "HWIO", "NHWC"),
        precision=jax.lax.Precision.HIGHEST)
    y = y + b
    return jnp.maximum(y, 0.0) if relu else y


def _ref_bottleneck(x, p, stride):
    h1 = _q(_ref_conv(x, p["w1"], p["b1"], 1, True, 0))
    h2 = _q(_ref_conv(h1, p["w2"], p["b2"], stride, True, 1))
    y = _ref_conv(h2, p["w3"], p["b3"], 1, False, 0)
    if "wd" in p:
        idn = _ref_conv(x, p["wd"], p["bd"], stride, False, 0)
    else:
        idn = x
    return _q(jnp.maximum(y + idn, 0.0))


def ref_forward(x_nchw, params, layer_cfg):
    x = _q(jnp.transpose(x_nchw, (0, 2, 3, 1)))
    for layer_params, (planes, blocks, stride) in zip(params, layer_cfg):
        for bi, bp in enumerate(layer_params):
            x = _ref_bottleneck(x, bp, stride if bi == 0 else 1)
    return jnp.transpose(x, (0, 3, 1, 2))


# ---------------------------------- main ------------------------------------

if __name__ == "__main__":
    # Scaled-down ResNet-50 trunk (real base width is 64; base=8 keeps the
    # synthetic example small).  Layer strides (1, 2, 2, 1): layer4 stride 1
    # reproduces last_conv_stride=1 from the PyTorch module.
    # TODO(synk): pretrained torchvision weights are replaced by deterministic
    # synthetic folded-BN init (synthetic kernel, no checkpoint load).
    base = 8
    layer_cfg = ((base, 3, 1), (2 * base, 4, 2), (4 * base, 6, 2), (8 * base, 3, 1))

    key = jax.random.PRNGKey(0)
    kx, kp = jax.random.split(key)
    x = jax.random.normal(kx, (2, base, 16, 16), jnp.float32)   # NCHW input
    params = make_params(kp, base, layer_cfg)

    fwd = jax.jit(functools.partial(base_resnet_forward, layer_cfg=layer_cfg))
    out = jax.block_until_ready(fwd(x, params))

    # sanity check against a pure-JAX conv reference (same bf16 rounding rules;
    # remaining tolerance covers accumulation-order / rounding-tie differences)
    ref = jax.jit(functools.partial(ref_forward, layer_cfg=layer_cfg))(x, params)
    rel_err = float(jnp.max(jnp.abs(out - ref)) / (jnp.max(jnp.abs(ref)) + 1e-6))
    assert out.shape == (2, 8 * base * 4, 4, 4), out.shape
    assert rel_err < 2e-2, rel_err

    print("KERNEL_OK")
</pallas_src>

<mosaic_0001>
module attributes {stable_mosaic.version = 11 : i64} {
  func.func @_mm_kernel(%arg0: i32, %arg1: memref<256x8xbf16, #tpu.memory_space<vmem>>, %arg2: memref<8x8xbf16, #tpu.memory_space<vmem>>, %arg3: memref<1x8xf32, #tpu.memory_space<vmem>>, %arg4: memref<256x8xbf16, #tpu.memory_space<vmem>>) attributes {dimension_semantics = [#tpu.dimension_semantics<parallel>], iteration_bounds = array<i64: 2>, scalar_prefetch = 0 : i64, scratch_operands = 0 : i64, tpu.core_type = #tpu.core_type<tc>, window_params = [{transform_indices = @transform_0, window_bounds = array<i64: 256, 8>}, {pipeline_mode = #tpu.pipeline_mode<synchronous>, transform_indices = @transform_1, window_bounds = array<i64: 8, 8>}, {pipeline_mode = #tpu.pipeline_mode<synchronous>, transform_indices = @transform_2, window_bounds = array<i64: 1, 8>}, {transform_indices = @transform_3, window_bounds = array<i64: 256, 8>}]} {
    %c0 = arith.constant 0 : index
    %c0_0 = arith.constant 0 : index
    %0 = vector.load %arg1[%c0, %c0_0] : memref<256x8xbf16, #tpu.memory_space<vmem>>, vector<256x8xbf16>
    %c0_1 = arith.constant 0 : index
    %c0_2 = arith.constant 0 : index
    %1 = vector.load %arg2[%c0_1, %c0_2] : memref<8x8xbf16, #tpu.memory_space<vmem>>, vector<8x8xbf16>
    %cst = arith.constant dense<0.000000e+00> : vector<256x8xf32>
    %2 = tpu.matmul %0, %1, %cst {dimension_numbers = #tpu.dot_dimension_numbers<[1], [0], [0], [1], [0, 0, 1, 1], [], []>} : vector<256x8xbf16>, vector<8x8xbf16>, vector<256x8xf32> -> vector<256x8xf32>
    %c0_3 = arith.constant 0 : index
    %c0_4 = arith.constant 0 : index
    %3 = vector.load %arg3[%c0_3, %c0_4] : memref<1x8xf32, #tpu.memory_space<vmem>>, vector<1x8xf32>
    %4 = vector.broadcast %3 : vector<1x8xf32> to vector<256x8xf32>
    %5 = arith.addf %2, %4 : vector<256x8xf32>
    %cst_5 = arith.constant 0.000000e+00 : f32
    %6 = vector.broadcast %cst_5 : f32 to vector<256x8xf32>
    %7 = arith.maximumf %5, %6 : vector<256x8xf32>
    %8 = arith.truncf %7 : vector<256x8xf32> to vector<256x8xbf16>
    %c0_6 = arith.constant 0 : index
    %c0_7 = arith.constant 0 : index
    %9 = vector.load %arg4[%c0_6, %c0_7] : memref<256x8xbf16, #tpu.memory_space<vmem>>, vector<256x8xbf16>
    tpu.vector_store %arg4[%c0_6, %c0_7], %8 {strides = array<i32>} : memref<256x8xbf16, #tpu.memory_space<vmem>>, vector<256x8xbf16>,
    return
  }
  func.func @transform_0(%arg0: i32) -> (i32, i32) {
    %c0_i32 = arith.constant 0 : i32
    %c0_i32_0 = arith.constant 0 : i32
    return %arg0, %c0_i32 : i32, i32
  }
  func.func @transform_1(%arg0: i32) -> (i32, i32) {
    %c0_i32 = arith.constant 0 : i32
    %c0_i32_0 = arith.constant 0 : i32
    %c0_i32_1 = arith.constant 0 : i32
    return %c0_i32, %c0_i32_0 : i32, i32
  }
  func.func @transform_2(%arg0: i32) -> (i32, i32) {
    %c0_i32 = arith.constant 0 : i32
    %c0_i32_0 = arith.constant 0 : i32
    %c0_i32_1 = arith.constant 0 : i32
    return %c0_i32, %c0_i32_0 : i32, i32
  }
  func.func @transform_3(%arg0: i32) -> (i32, i32) {
    %c0_i32 = arith.constant 0 : i32
    %c0_i32_0 = arith.constant 0 : i32
    return %arg0, %c0_i32 : i32, i32
  }
}

module attributes {stable_mosaic.version = 11 : i64} {
  func.func @_conv3x3_kernel(%arg0: i32, %arg1: memref<1x18x18x8xbf16, #tpu.memory_space<vmem>>, %arg2: memref<3x3x8x8xbf16, #tpu.memory_space<vmem>>, %arg3: memref<1x8xf32, #tpu.memory_space<vmem>>, %arg4: memref<1x16x16x8xbf16, #tpu.memory_space<vmem>>) attributes {dimension_semantics = [#tpu.dimension_semantics<parallel>], iteration_bounds = array<i64: 2>, scalar_prefetch = 0 : i64, scratch_operands = 0 : i64, tpu.core_type = #tpu.core_type<tc>, window_params = [{transform_indices = @transform_0, window_bounds = array<i64: 1, 18, 18, 8>}, {pipeline_mode = #tpu.pipeline_mode<synchronous>, transform_indices = @transform_1, window_bounds = array<i64: 3, 3, 8, 8>}, {pipeline_mode = #tpu.pipeline_mode<synchronous>, transform_indices = @transform_2, window_bounds = array<i64: 1, 8>}, {transform_indices = @transform_3, window_bounds = array<i64: 1, 16, 16, 8>}]} {
    %c0 = arith.constant 0 : index
    %c0_0 = arith.constant 0 : index
    %c0_1 = arith.constant 0 : index
    %c0_2 = arith.constant 0 : index
    %0 = vector.load %arg2[%c0, %c0_0, %c0_1, %c0_2] : memref<3x3x8x8xbf16, #tpu.memory_space<vmem>>, vector<1x1x8x8xbf16>
    %1 = vector.shape_cast %0 : vector<1x1x8x8xbf16> to vector<8x8xbf16>
    %c0_3 = arith.constant 0 : index
    %c1 = arith.constant 1 : index
    %c0_4 = arith.constant 0 : index
    %c0_5 = arith.constant 0 : index
    %2 = vector.load %arg2[%c0_3, %c1, %c0_4, %c0_5] : memref<3x3x8x8xbf16, #tpu.memory_space<vmem>>, vector<1x1x8x8xbf16>
    %3 = vector.shape_cast %2 : vector<1x1x8x8xbf16> to vector<8x8xbf16>
    %c0_6 = arith.constant 0 : index
    %c2 = arith.constant 2 : index
    %c0_7 = arith.constant 0 : index
    %c0_8 = arith.constant 0 : index
    %4 = vector.load %arg2[%c0_6, %c2, %c0_7, %c0_8] : memref<3x3x8x8xbf16, #tpu.memory_space<vmem>>, vector<1x1x8x8xbf16>
    %5 = vector.shape_cast %4 : vector<1x1x8x8xbf16> to vector<8x8xbf16>
    %c1_9 = arith.constant 1 : index
    %c0_10 = arith.constant 0 : index
    %c0_11 = arith.constant 0 : index
    %c0_12 = arith.constant 0 : index
    %6 = vector.load %arg2[%c1_9, %c0_10, %c0_11, %c0_12] : memref<3x3x8x8xbf16, #tpu.memory_space<vmem>>, vector<1x1x8x8xbf16>
    %7 = vector.shape_cast %6 : vector<1x1x8x8xbf16> to vector<8x8xbf16>
    %c1_13 = arith.constant 1 : index
    %c1_14 = arith.constant 1 : index
    %c0_15 = arith.constant 0 : index
    %c0_16 = arith.constant 0 : index
    %8 = vector.load %arg2[%c1_13, %c1_14, %c0_15, %c0_16] : memref<3x3x8x8xbf16, #tpu.memory_space<vmem>>, vector<1x1x8x8xbf16>
    %9 = vector.shape_cast %8 : vector<1x1x8x8xbf16> to vector<8x8xbf16>
    %c1_17 = arith.constant 1 : index
    %c2_18 = arith.constant 2 : index
    %c0_19 = arith.constant 0 : index
    %c0_20 = arith.constant 0 : index
    %10 = vector.load %arg2[%c1_17, %c2_18, %c0_19, %c0_20] : memref<3x3x8x8xbf16, #tpu.memory_space<vmem>>, vector<1x1x8x8xbf16>
    %11 = vector.shape_cast %10 : vector<1x1x8x8xbf16> to vector<8x8xbf16>
    %c2_21 = arith.constant 2 : index
    %c0_22 = arith.constant 0 : index
    %c0_23 = arith.constant 0 : index
    %c0_24 = arith.constant 0 : index
    %12 = vector.load %arg2[%c2_21, %c0_22, %c0_23, %c0_24] : memref<3x3x8x8xbf16, #tpu.memory_space<vmem>>, vector<1x1x8x8xbf16>
    %13 = vector.shape_cast %12 : vector<1x1x8x8xbf16> to vector<8x8xbf16>
    %c2_25 = arith.constant 2 : index
    %c1_26 = arith.constant 1 : index
    %c0_27 = arith.constant 0 : index
    %c0_28 = arith.constant 0 : index
    %14 = vector.load %arg2[%c2_25, %c1_26, %c0_27, %c0_28] : memref<3x3x8x8xbf16, #tpu.memory_space<vmem>>, vector<1x1x8x8xbf16>
    %15 = vector.shape_cast %14 : vector<1x1x8x8xbf16> to vector<8x8xbf16>
    %c2_29 = arith.constant 2 : index
    %c2_30 = arith.constant 2 : index
    %c0_31 = arith.constant 0 : index
    %c0_32 = arith.constant 0 : index
    %16 = vector.load %arg2[%c2_29, %c2_30, %c0_31, %c0_32] : memref<3x3x8x8xbf16, #tpu.memory_space<vmem>>, vector<1x1x8x8xbf16>
    %17 = vector.shape_cast %16 : vector<1x1x8x8xbf16> to vector<8x8xbf16>
    %c0_33 = arith.constant 0 : index
    %c0_34 = arith.constant 0 : index
    %18 = vector.load %arg3[%c0_33, %c0_34] : memref<1x8xf32, #tpu.memory_space<vmem>>, vector<1x8xf32>
    %c0_i32 = arith.constant 0 : i32
    %c16_i32 = arith.constant 16 : i32
    %19 = arith.addi %c0_i32, %c16_i32 : i32
    %c1_i32 = arith.constant 1 : i32
    scf.for %arg5 = %c0_i32 to %19 step %c1_i32  : i32 {
      %cst = arith.constant 0.000000e+00 : f32
      %20 = vector.broadcast %cst : f32 to vector<16x8xf32>
      %21 = vector.broadcast %18 : vector<1x8xf32> to vector<16x8xf32>
      %22 = arith.addf %20, %21 : vector<16x8xf32>
      %c1_i32_36 = arith.constant 1 : i32
      %23 = arith.muli %arg5, %c1_i32_36 : i32
      %c0_i32_37 = arith.constant 0 : i32
      %24 = arith.addi %23, %c0_i32_37 : i32
      %c0_38 = arith.constant 0 : index
      %25 = arith.index_cast %24 : i32 to index
      %c0_39 = arith.constant 0 : index
      %c0_40 = arith.constant 0 : index
      %26 = vector.load %arg1[%c0_38, %25, %c0_39, %c0_40] : memref<1x18x18x8xbf16, #tpu.memory_space<vmem>>, vector<1x1x18x8xbf16>
      %27 = vector.shape_cast %26 : vector<1x1x18x8xbf16> to vector<18x8xbf16>
      %28 = vector.extract_strided_slice %27 {offsets = [0, 0], sizes = [16, 8], strides = [1, 1]} : vector<18x8xbf16> to vector<16x8xbf16>
      %cst_41 = arith.constant dense<0.000000e+00> : vector<16x8xf32>
      %29 = tpu.matmul %28, %1, %cst_41 {dimension_numbers = #tpu.dot_dimension_numbers<[1], [0], [0], [1], [0, 0, 1, 1], [], []>} : vector<16x8xbf16>, vector<8x8xbf16>, vector<16x8xf32> -> vector<16x8xf32>
      %30 = arith.addf %22, %29 : vector<16x8xf32>
      %31 = vector.extract_strided_slice %27 {offsets = [1, 0], sizes = [16, 8], strides = [1, 1]} : vector<18x8xbf16> to vector<16x8xbf16>
      %cst_42 = arith.constant dense<0.000000e+00> : vector<16x8xf32>
      %32 = tpu.matmul %31, %3, %cst_42 {dimension_numbers = #tpu.dot_dimension_numbers<[1], [0], [0], [1], [0, 0, 1, 1], [], []>} : vector<16x8xbf16>, vector<8x8xbf16>, vector<16x8xf32> -> vector<16x8xf32>
      %33 = arith.addf %30, %32 : vector<16x8xf32>
      %34 = vector.extract_strided_slice %27 {offsets = [2, 0], sizes = [16, 8], strides = [1, 1]} : vector<18x8xbf16> to vector<16x8xbf16>
      %cst_43 = arith.constant dense<0.000000e+00> : vector<16x8xf32>
      %35 = tpu.matmul %34, %5, %cst_43 {dimension_numbers = #tpu.dot_dimension_numbers<[1], [0], [0], [1], [0, 0, 1, 1], [], []>} : vector<16x8xbf16>, vector<8x8xbf16>, vector<16x8xf32> -> vector<16x8xf32>
      %36 = arith.addf %33, %35 : vector<16x8xf32>
      %c1_i32_44 = arith.constant 1 : i32
      %37 = arith.muli %arg5, %c1_i32_44 : i32
      %c1_i32_45 = arith.constant 1 : i32
      %38 = arith.addi %37, %c1_i32_45 : i32
      %c0_46 = arith.constant 0 : index
      %39 = arith.index_cast %38 : i32 to index
      %c0_47 = arith.constant 0 : index
      %c0_48 = arith.constant 0 : index
      %40 = vector.load %arg1[%c0_46, %39, %c0_47, %c0_48] : memref<1x18x18x8xbf16, #tpu.memory_space<vmem>>, vector<1x1x18x8xbf16>
      %41 = vector.shape_cast %40 : vector<1x1x18x8xbf16> to vector<18x8xbf16>
      %42 = vector.extract_strided_slice %41 {offsets = [0, 0], sizes = [16, 8], strides = [1, 1]} : vector<18x8xbf16> to vector<16x8xbf16>
      %cst_49 = arith.constant dense<0.000000e+00> : vector<16x8xf32>
      %43 = tpu.matmul %42, %7, %cst_49 {dimension_numbers = #tpu.dot_dimension_numbers<[1], [0], [0], [1], [0, 0, 1, 1], [], []>} : vector<16x8xbf16>, vector<8x8xbf16>, vector<16x8xf32> -> vector<16x8xf32>
      %44 = arith.addf %36, %43 : vector<16x8xf32>
      %45 = vector.extract_strided_slice %41 {offsets = [1, 0], sizes = [16, 8], strides = [1, 1]} : vector<18x8xbf16> to vector<16x8xbf16>
      %cst_50 = arith.constant dense<0.000000e+00> : vector<16x8xf32>
      %46 = tpu.matmul %45, %9, %cst_50 {dimension_numbers = #tpu.dot_dimension_numbers<[1], [0], [0], [1], [0, 0, 1, 1], [], []>} : vector<16x8xbf16>, vector<8x8xbf16>, vector<16x8xf32> -> vector<16x8xf32>
      %47 = arith.addf %44, %46 : vector<16x8xf32>
      %48 = vector.extract_strided_slice %41 {offsets = [2, 0], sizes = [16, 8], strides = [1, 1]} : vector<18x8xbf16> to vector<16x8xbf16>
      %cst_51 = arith.constant dense<0.000000e+00> : vector<16x8xf32>
      %49 = tpu.matmul %48, %11, %cst_51 {dimension_numbers = #tpu.dot_dimension_numbers<[1], [0], [0], [1], [0, 0, 1, 1], [], []>} : vector<16x8xbf16>, vector<8x8xbf16>, vector<16x8xf32> -> vector<16x8xf32>
      %50 = arith.addf %47, %49 : vector<16x8xf32>
      %c1_i32_52 = arith.constant 1 : i32
      %51 = arith.muli %arg5, %c1_i32_52 : i32
      %c2_i32 = arith.constant 2 : i32
      %52 = arith.addi %51, %c2_i32 : i32
      %c0_53 = arith.constant 0 : index
      %53 = arith.index_cast %52 : i32 to index
      %c0_54 = arith.constant 0 : index
      %c0_55 = arith.constant 0 : index
      %54 = vector.load %arg1[%c0_53, %53, %c0_54, %c0_55] : memref<1x18x18x8xbf16, #tpu.memory_space<vmem>>, vector<1x1x18x8xbf16>
      %55 = vector.shape_cast %54 : vector<1x1x18x8xbf16> to vector<18x8xbf16>
      %56 = vector.extract_strided_slice %55 {offsets = [0, 0], sizes = [16, 8], strides = [1, 1]} : vector<18x8xbf16> to vector<16x8xbf16>
      %cst_56 = arith.constant dense<0.000000e+00> : vector<16x8xf32>
      %57 = tpu.matmul %56, %13, %cst_56 {dimension_numbers = #tpu.dot_dimension_numbers<[1], [0], [0], [1], [0, 0, 1, 1], [], []>} : vector<16x8xbf16>, vector<8x8xbf16>, vector<16x8xf32> -> vector<16x8xf32>
      %58 = arith.addf %50, %57 : vector<16x8xf32>
      %59 = vector.extract_strided_slice %55 {offsets = [1, 0], sizes = [16, 8], strides = [1, 1]} : vector<18x8xbf16> to vector<16x8xbf16>
      %cst_57 = arith.constant dense<0.000000e+00> : vector<16x8xf32>
      %60 = tpu.matmul %59, %15, %cst_57 {dimension_numbers = #tpu.dot_dimension_numbers<[1], [0], [0], [1], [0, 0, 1, 1], [], []>} : vector<16x8xbf16>, vector<8x8xbf16>, vector<16x8xf32> -> vector<16x8xf32>
      %61 = arith.addf %58, %60 : vector<16x8xf32>
      %62 = vector.extract_strided_slice %55 {offsets = [2, 0], sizes = [16, 8], strides = [1, 1]} : vector<18x8xbf16> to vector<16x8xbf16>
      %cst_58 = arith.constant dense<0.000000e+00> : vector<16x8xf32>
      %63 = tpu.matmul %62, %17, %cst_58 {dimension_numbers = #tpu.dot_dimension_numbers<[1], [0], [0], [1], [0, 0, 1, 1], [], []>} : vector<16x8xbf16>, vector<8x8xbf16>, vector<16x8xf32> -> vector<16x8xf32>
      %64 = arith.addf %61, %63 : vector<16x8xf32>
      %cst_59 = arith.constant 0.000000e+00 : f32
      %65 = vector.broadcast %cst_59 : f32 to vector<16x8xf32>
      %66 = arith.maximumf %64, %65 : vector<16x8xf32>
      %67 = arith.truncf %66 : vector<16x8xf32> to vector<16x8xbf16>
      %c0_60 = arith.constant 0 : index
      %68 = arith.index_cast %arg5 : i32 to index
      %c0_61 = arith.constant 0 : index
      %c0_62 = arith.constant 0 : index
      %69 = vector.load %arg4[%c0_60, %68, %c0_61, %c0_62] : memref<1x16x16x8xbf16, #tpu.memory_space<vmem>>, vector<1x1x16x8xbf16>
      %70 = vector.shape_cast %69 : vector<1x1x16x8xbf16> to vector<16x8xbf16>
      %71 = vector.shape_cast %67 : vector<16x8xbf16> to vector<1x1x16x8xbf16>
      tpu.vector_store %arg4[%c0_60, %68, %c0_61, %c0_62], %71 {strides = array<i32>} : memref<1x16x16x8xbf16, #tpu.memory_space<vmem>>, vector<1x1x16x8xbf16>,
    }
    %c16_i32_35 = arith.constant 16 : i32
    return
  }
  func.func @transform_0(%arg0: i32) -> (i32, i32, i32, i32) {
    %c0_i32 = arith.constant 0 : i32
    %c0_i32_0 = arith.constant 0 : i32
    %c0_i32_1 = arith.constant 0 : i32
    %c0_i32_2 = arith.constant 0 : i32
    return %arg0, %c0_i32, %c0_i32_0, %c0_i32_1 : i32, i32, i32, i32
  }
  func.func @transform_1(%arg0: i32) -> (i32, i32, i32, i32) {
    %c0_i32 = arith.constant 0 : i32
    %c0_i32_0 = arith.constant 0 : i32
    %c0_i32_1 = arith.constant 0 : i32
    %c0_i32_2 = arith.constant 0 : i32
    %c0_i32_3 = arith.constant 0 : i32
    return %c0_i32, %c0_i32_0, %c0_i32_1, %c0_i32_2 : i32, i32, i32, i32
  }
  func.func @transform_2(%arg0: i32) -> (i32, i32) {
    %c0_i32 = arith.constant 0 : i32
    %c0_i32_0 = arith.constant 0 : i32
    %c0_i32_1 = arith.constant 0 : i32
    return %c0_i32, %c0_i32_0 : i32, i32
  }
  func.func @transform_3(%arg0: i32) -> (i32, i32, i32, i32) {
    %c0_i32 = arith.constant 0 : i32
    %c0_i32_0 = arith.constant 0 : i32
    %c0_i32_1 = arith.constant 0 : i32
    %c0_i32_2 = arith.constant 0 : i32
    return %arg0, %c0_i32, %c0_i32_0, %c0_i32_1 : i32, i32, i32, i32
  }
}

module attributes {stable_mosaic.version = 11 : i64} {
  func.func @_mm_ds_kernel(%arg0: i32, %arg1: memref<256x8xbf16, #tpu.memory_space<vmem>>, %arg2: memref<8x32xbf16, #tpu.memory_space<vmem>>, %arg3: memref<1x32xf32, #tpu.memory_space<vmem>>, %arg4: memref<256x8xbf16, #tpu.memory_space<vmem>>, %arg5: memref<8x32xbf16, #tpu.memory_space<vmem>>, %arg6: memref<1x32xf32, #tpu.memory_space<vmem>>, %arg7: memref<256x32xbf16, #tpu.memory_space<vmem>>) attributes {dimension_semantics = [#tpu.dimension_semantics<parallel>], iteration_bounds = array<i64: 2>, scalar_prefetch = 0 : i64, scratch_operands = 0 : i64, tpu.core_type = #tpu.core_type<tc>, window_params = [{transform_indices = @transform_0, window_bounds = array<i64: 256, 8>}, {pipeline_mode = #tpu.pipeline_mode<synchronous>, transform_indices = @transform_1, window_bounds = array<i64: 8, 32>}, {pipeline_mode = #tpu.pipeline_mode<synchronous>, transform_indices = @transform_2, window_bounds = array<i64: 1, 32>}, {transform_indices = @transform_3, window_bounds = array<i64: 256, 8>}, {pipeline_mode = #tpu.pipeline_mode<synchronous>, transform_indices = @transform_4, window_bounds = array<i64: 8, 32>}, {pipeline_mode = #tpu.pipeline_mode<synchronous>, transform_indices = @transform_5, window_bounds = array<i64: 1, 32>}, {transform_indices = @transform_6, window_bounds = array<i64: 256, 32>}]} {
    %c0 = arith.constant 0 : index
    %c0_0 = arith.constant 0 : index
    %0 = vector.load %arg1[%c0, %c0_0] : memref<256x8xbf16, #tpu.memory_space<vmem>>, vector<256x8xbf16>
    %c0_1 = arith.constant 0 : index
    %c0_2 = arith.constant 0 : index
    %1 = vector.load %arg2[%c0_1, %c0_2] : memref<8x32xbf16, #tpu.memory_space<vmem>>, vector<8x32xbf16>
    %cst = arith.constant dense<0.000000e+00> : vector<256x32xf32>
    %2 = tpu.matmul %0, %1, %cst {dimension_numbers = #tpu.dot_dimension_numbers<[1], [0], [0], [1], [0, 0, 1, 1], [], []>} : vector<256x8xbf16>, vector<8x32xbf16>, vector<256x32xf32> -> vector<256x32xf32>
    %c0_3 = arith.constant 0 : index
    %c0_4 = arith.constant 0 : index
    %3 = vector.load %arg4[%c0_3, %c0_4] : memref<256x8xbf16, #tpu.memory_space<vmem>>, vector<256x8xbf16>
    %c0_5 = arith.constant 0 : index
    %c0_6 = arith.constant 0 : index
    %4 = vector.load %arg5[%c0_5, %c0_6] : memref<8x32xbf16, #tpu.memory_space<vmem>>, vector<8x32xbf16>
    %cst_7 = arith.constant dense<0.000000e+00> : vector<256x32xf32>
    %5 = tpu.matmul %3, %4, %cst_7 {dimension_numbers = #tpu.dot_dimension_numbers<[1], [0], [0], [1], [0, 0, 1, 1], [], []>} : vector<256x8xbf16>, vector<8x32xbf16>, vector<256x32xf32> -> vector<256x32xf32>
    %6 = arith.addf %2, %5 : vector<256x32xf32>
    %c0_8 = arith.constant 0 : index
    %c0_9 = arith.constant 0 : index
    %7 = vector.load %arg3[%c0_8, %c0_9] : memref<1x32xf32, #tpu.memory_space<vmem>>, vector<1x32xf32>
    %8 = vector.broadcast %7 : vector<1x32xf32> to vector<256x32xf32>
    %9 = arith.addf %6, %8 : vector<256x32xf32>
    %c0_10 = arith.constant 0 : index
    %c0_11 = arith.constant 0 : index
    %10 = vector.load %arg6[%c0_10, %c0_11] : memref<1x32xf32, #tpu.memory_space<vmem>>, vector<1x32xf32>
    %11 = vector.broadcast %10 : vector<1x32xf32> to vector<256x32xf32>
    %12 = arith.addf %9, %11 : vector<256x32xf32>
    %cst_12 = arith.constant 0.000000e+00 : f32
    %13 = vector.broadcast %cst_12 : f32 to vector<256x32xf32>
    %14 = arith.maximumf %12, %13 : vector<256x32xf32>
    %15 = arith.truncf %14 : vector<256x32xf32> to vector<256x32xbf16>
    %c0_13 = arith.constant 0 : index
    %c0_14 = arith.constant 0 : index
    %16 = vector.load %arg7[%c0_13, %c0_14] : memref<256x32xbf16, #tpu.memory_space<vmem>>, vector<256x32xbf16>
    tpu.vector_store %arg7[%c0_13, %c0_14], %15 {strides = array<i32>} : memref<256x32xbf16, #tpu.memory_space<vmem>>, vector<256x32xbf16>,
    return
  }
  func.func @transform_0(%arg0: i32) -> (i32, i32) {
    %c0_i32 = arith.constant 0 : i32
    %c0_i32_0 = arith.constant 0 : i32
    return %arg0, %c0_i32 : i32, i32
  }
  func.func @transform_1(%arg0: i32) -> (i32, i32) {
    %c0_i32 = arith.constant 0 : i32
    %c0_i32_0 = arith.constant 0 : i32
    %c0_i32_1 = arith.constant 0 : i32
    return %c0_i32, %c0_i32_0 : i32, i32
  }
  func.func @transform_2(%arg0: i32) -> (i32, i32) {
    %c0_i32 = arith.constant 0 : i32
    %c0_i32_0 = arith.constant 0 : i32
    %c0_i32_1 = arith.constant 0 : i32
    return %c0_i32, %c0_i32_0 : i32, i32
  }
  func.func @transform_3(%arg0: i32) -> (i32, i32) {
    %c0_i32 = arith.constant 0 : i32
    %c0_i32_0 = arith.constant 0 : i32
    return %arg0, %c0_i32 : i32, i32
  }
  func.func @transform_4(%arg0: i32) -> (i32, i32) {
    %c0_i32 = arith.constant 0 : i32
    %c0_i32_0 = arith.constant 0 : i32
    %c0_i32_1 = arith.constant 0 : i32
    return %c0_i32, %c0_i32_0 : i32, i32
  }
  func.func @transform_5(%arg0: i32) -> (i32, i32) {
    %c0_i32 = arith.constant 0 : i32
    %c0_i32_0 = arith.constant 0 : i32
    %c0_i32_1 = arith.constant 0 : i32
    return %c0_i32, %c0_i32_0 : i32, i32
  }
  func.func @transform_6(%arg0: i32) -> (i32, i32) {
    %c0_i32 = arith.constant 0 : i32
    %c0_i32_0 = arith.constant 0 : i32
    return %arg0, %c0_i32 : i32, i32
  }
}

module attributes {stable_mosaic.version = 11 : i64} {
  func.func @_mm_kernel(%arg0: i32, %arg1: memref<256x32xbf16, #tpu.memory_space<vmem>>, %arg2: memref<32x8xbf16, #tpu.memory_space<vmem>>, %arg3: memref<1x8xf32, #tpu.memory_space<vmem>>, %arg4: memref<256x8xbf16, #tpu.memory_space<vmem>>) attributes {dimension_semantics = [#tpu.dimension_semantics<parallel>], iteration_bounds = array<i64: 2>, scalar_prefetch = 0 : i64, scratch_operands = 0 : i64, tpu.core_type = #tpu.core_type<tc>, window_params = [{transform_indices = @transform_0, window_bounds = array<i64: 256, 32>}, {pipeline_mode = #tpu.pipeline_mode<synchronous>, transform_indices = @transform_1, window_bounds = array<i64: 32, 8>}, {pipeline_mode = #tpu.pipeline_mode<synchronous>, transform_indices = @transform_2, window_bounds = array<i64: 1, 8>}, {transform_indices = @transform_3, window_bounds = array<i64: 256, 8>}]} {
    %c0 = arith.constant 0 : index
    %c0_0 = arith.constant 0 : index
    %0 = vector.load %arg1[%c0, %c0_0] : memref<256x32xbf16, #tpu.memory_space<vmem>>, vector<256x32xbf16>
    %c0_1 = arith.constant 0 : index
    %c0_2 = arith.constant 0 : index
    %1 = vector.load %arg2[%c0_1, %c0_2] : memref<32x8xbf16, #tpu.memory_space<vmem>>, vector<32x8xbf16>
    %cst = arith.constant dense<0.000000e+00> : vector<256x8xf32>
    %2 = tpu.matmul %0, %1, %cst {dimension_numbers = #tpu.dot_dimension_numbers<[1], [0], [0], [1], [0, 0, 1, 1], [], []>} : vector<256x32xbf16>, vector<32x8xbf16>, vector<256x8xf32> -> vector<256x8xf32>
    %c0_3 = arith.constant 0 : index
    %c0_4 = arith.constant 0 : index
    %3 = vector.load %arg3[%c0_3, %c0_4] : memref<1x8xf32, #tpu.memory_space<vmem>>, vector<1x8xf32>
    %4 = vector.broadcast %3 : vector<1x8xf32> to vector<256x8xf32>
    %5 = arith.addf %2, %4 : vector<256x8xf32>
    %cst_5 = arith.constant 0.000000e+00 : f32
    %6 = vector.broadcast %cst_5 : f32 to vector<256x8xf32>
    %7 = arith.maximumf %5, %6 : vector<256x8xf32>
    %8 = arith.truncf %7 : vector<256x8xf32> to vector<256x8xbf16>
    %c0_6 = arith.constant 0 : index
    %c0_7 = arith.constant 0 : index
    %9 = vector.load %arg4[%c0_6, %c0_7] : memref<256x8xbf16, #tpu.memory_space<vmem>>, vector<256x8xbf16>
    tpu.vector_store %arg4[%c0_6, %c0_7], %8 {strides = array<i32>} : memref<256x8xbf16, #tpu.memory_space<vmem>>, vector<256x8xbf16>,
    return
  }
  func.func @transform_0(%arg0: i32) -> (i32, i32) {
    %c0_i32 = arith.constant 0 : i32
    %c0_i32_0 = arith.constant 0 : i32
    return %arg0, %c0_i32 : i32, i32
  }
  func.func @transform_1(%arg0: i32) -> (i32, i32) {
    %c0_i32 = arith.constant 0 : i32
    %c0_i32_0 = arith.constant 0 : i32
    %c0_i32_1 = arith.constant 0 : i32
    return %c0_i32, %c0_i32_0 : i32, i32
  }
  func.func @transform_2(%arg0: i32) -> (i32, i32) {
    %c0_i32 = arith.constant 0 : i32
    %c0_i32_0 = arith.constant 0 : i32
    %c0_i32_1 = arith.constant 0 : i32
    return %c0_i32, %c0_i32_0 : i32, i32
  }
  func.func @transform_3(%arg0: i32) -> (i32, i32) {
    %c0_i32 = arith.constant 0 : i32
    %c0_i32_0 = arith.constant 0 : i32
    return %arg0, %c0_i32 : i32, i32
  }
}

module attributes {stable_mosaic.version = 11 : i64} {
  func.func @_mm_res_kernel(%arg0: i32, %arg1: memref<256x8xbf16, #tpu.memory_space<vmem>>, %arg2: memref<8x32xbf16, #tpu.memory_space<vmem>>, %arg3: memref<1x32xf32, #tpu.memory_space<vmem>>, %arg4: memref<256x32xbf16, #tpu.memory_space<vmem>>, %arg5: memref<256x32xbf16, #tpu.memory_space<vmem>>) attributes {dimension_semantics = [#tpu.dimension_semantics<parallel>], iteration_bounds = array<i64: 2>, scalar_prefetch = 0 : i64, scratch_operands = 0 : i64, tpu.core_type = #tpu.core_type<tc>, window_params = [{transform_indices = @transform_0, window_bounds = array<i64: 256, 8>}, {pipeline_mode = #tpu.pipeline_mode<synchronous>, transform_indices = @transform_1, window_bounds = array<i64: 8, 32>}, {pipeline_mode = #tpu.pipeline_mode<synchronous>, transform_indices = @transform_2, window_bounds = array<i64: 1, 32>}, {transform_indices = @transform_3, window_bounds = array<i64: 256, 32>}, {transform_indices = @transform_4, window_bounds = array<i64: 256, 32>}]} {
    %c0 = arith.constant 0 : index
    %c0_0 = arith.constant 0 : index
    %0 = vector.load %arg1[%c0, %c0_0] : memref<256x8xbf16, #tpu.memory_space<vmem>>, vector<256x8xbf16>
    %c0_1 = arith.constant 0 : index
    %c0_2 = arith.constant 0 : index
    %1 = vector.load %arg2[%c0_1, %c0_2] : memref<8x32xbf16, #tpu.memory_space<vmem>>, vector<8x32xbf16>
    %cst = arith.constant dense<0.000000e+00> : vector<256x32xf32>
    %2 = tpu.matmul %0, %1, %cst {dimension_numbers = #tpu.dot_dimension_numbers<[1], [0], [0], [1], [0, 0, 1, 1], [], []>} : vector<256x8xbf16>, vector<8x32xbf16>, vector<256x32xf32> -> vector<256x32xf32>
    %c0_3 = arith.constant 0 : index
    %c0_4 = arith.constant 0 : index
    %3 = vector.load %arg3[%c0_3, %c0_4] : memref<1x32xf32, #tpu.memory_space<vmem>>, vector<1x32xf32>
    %4 = vector.broadcast %3 : vector<1x32xf32> to vector<256x32xf32>
    %5 = arith.addf %2, %4 : vector<256x32xf32>
    %c0_5 = arith.constant 0 : index
    %c0_6 = arith.constant 0 : index
    %6 = vector.load %arg4[%c0_5, %c0_6] : memref<256x32xbf16, #tpu.memory_space<vmem>>, vector<256x32xbf16>
    %7 = arith.extf %6 : vector<256x32xbf16> to vector<256x32xf32>
    %8 = arith.addf %5, %7 : vector<256x32xf32>
    %cst_7 = arith.constant 0.000000e+00 : f32
    %9 = vector.broadcast %cst_7 : f32 to vector<256x32xf32>
    %10 = arith.maximumf %8, %9 : vector<256x32xf32>
    %11 = arith.truncf %10 : vector<256x32xf32> to vector<256x32xbf16>
    %c0_8 = arith.constant 0 : index
    %c0_9 = arith.constant 0 : index
    %12 = vector.load %arg5[%c0_8, %c0_9] : memref<256x32xbf16, #tpu.memory_space<vmem>>, vector<256x32xbf16>
    tpu.vector_store %arg5[%c0_8, %c0_9], %11 {strides = array<i32>} : memref<256x32xbf16, #tpu.memory_space<vmem>>, vector<256x32xbf16>,
    return
  }
  func.func @transform_0(%arg0: i32) -> (i32, i32) {
    %c0_i32 = arith.constant 0 : i32
    %c0_i32_0 = arith.constant 0 : i32
    return %arg0, %c0_i32 : i32, i32
  }
  func.func @transform_1(%arg0: i32) -> (i32, i32) {
    %c0_i32 = arith.constant 0 : i32
    %c0_i32_0 = arith.constant 0 : i32
    %c0_i32_1 = arith.constant 0 : i32
    return %c0_i32, %c0_i32_0 : i32, i32
  }
  func.func @transform_2(%arg0: i32) -> (i32, i32) {
    %c0_i32 = arith.constant 0 : i32
    %c0_i32_0 = arith.constant 0 : i32
    %c0_i32_1 = arith.constant 0 : i32
    return %c0_i32, %c0_i32_0 : i32, i32
  }
  func.func @transform_3(%arg0: i32) -> (i32, i32) {
    %c0_i32 = arith.constant 0 : i32
    %c0_i32_0 = arith.constant 0 : i32
    return %arg0, %c0_i32 : i32, i32
  }
  func.func @transform_4(%arg0: i32) -> (i32, i32) {
    %c0_i32 = arith.constant 0 : i32
    %c0_i32_0 = arith.constant 0 : i32
    return %arg0, %c0_i32 : i32, i32
  }
}

module attributes {stable_mosaic.version = 11 : i64} {
  func.func @_mm_kernel(%arg0: i32, %arg1: memref<256x32xbf16, #tpu.memory_space<vmem>>, %arg2: memref<32x16xbf16, #tpu.memory_space<vmem>>, %arg3: memref<1x16xf32, #tpu.memory_space<vmem>>, %arg4: memref<256x16xbf16, #tpu.memory_space<vmem>>) attributes {dimension_semantics = [#tpu.dimension_semantics<parallel>], iteration_bounds = array<i64: 2>, scalar_prefetch = 0 : i64, scratch_operands = 0 : i64, tpu.core_type = #tpu.core_type<tc>, window_params = [{transform_indices = @transform_0, window_bounds = array<i64: 256, 32>}, {pipeline_mode = #tpu.pipeline_mode<synchronous>, transform_indices = @transform_1, window_bounds = array<i64: 32, 16>}, {pipeline_mode = #tpu.pipeline_mode<synchronous>, transform_indices = @transform_2, window_bounds = array<i64: 1, 16>}, {transform_indices = @transform_3, window_bounds = array<i64: 256, 16>}]} {
    %c0 = arith.constant 0 : index
    %c0_0 = arith.constant 0 : index
    %0 = vector.load %arg1[%c0, %c0_0] : memref<256x32xbf16, #tpu.memory_space<vmem>>, vector<256x32xbf16>
    %c0_1 = arith.constant 0 : index
    %c0_2 = arith.constant 0 : index
    %1 = vector.load %arg2[%c0_1, %c0_2] : memref<32x16xbf16, #tpu.memory_space<vmem>>, vector<32x16xbf16>
    %cst = arith.constant dense<0.000000e+00> : vector<256x16xf32>
    %2 = tpu.matmul %0, %1, %cst {dimension_numbers = #tpu.dot_dimension_numbers<[1], [0], [0], [1], [0, 0, 1, 1], [], []>} : vector<256x32xbf16>, vector<32x16xbf16>, vector<256x16xf32> -> vector<256x16xf32>
    %c0_3 = arith.constant 0 : index
    %c0_4 = arith.constant 0 : index
    %3 = vector.load %arg3[%c0_3, %c0_4] : memref<1x16xf32, #tpu.memory_space<vmem>>, vector<1x16xf32>
    %4 = vector.broadcast %3 : vector<1x16xf32> to vector<256x16xf32>
    %5 = arith.addf %2, %4 : vector<256x16xf32>
    %cst_5 = arith.constant 0.000000e+00 : f32
    %6 = vector.broadcast %cst_5 : f32 to vector<256x16xf32>
    %7 = arith.maximumf %5, %6 : vector<256x16xf32>
    %8 = arith.truncf %7 : vector<256x16xf32> to vector<256x16xbf16>
    %c0_6 = arith.constant 0 : index
    %c0_7 = arith.constant 0 : index
    %9 = vector.load %arg4[%c0_6, %c0_7] : memref<256x16xbf16, #tpu.memory_space<vmem>>, vector<256x16xbf16>
    tpu.vector_store %arg4[%c0_6, %c0_7], %8 {strides = array<i32>} : memref<256x16xbf16, #tpu.memory_space<vmem>>, vector<256x16xbf16>,
    return
  }
  func.func @transform_0(%arg0: i32) -> (i32, i32) {
    %c0_i32 = arith.constant 0 : i32
    %c0_i32_0 = arith.constant 0 : i32
    return %arg0, %c0_i32 : i32, i32
  }
  func.func @transform_1(%arg0: i32) -> (i32, i32) {
    %c0_i32 = arith.constant 0 : i32
    %c0_i32_0 = arith.constant 0 : i32
    %c0_i32_1 = arith.constant 0 : i32
    return %c0_i32, %c0_i32_0 : i32, i32
  }
  func.func @transform_2(%arg0: i32) -> (i32, i32) {
    %c0_i32 = arith.constant 0 : i32
    %c0_i32_0 = arith.constant 0 : i32
    %c0_i32_1 = arith.constant 0 : i32
    return %c0_i32, %c0_i32_0 : i32, i32
  }
  func.func @transform_3(%arg0: i32) -> (i32, i32) {
    %c0_i32 = arith.constant 0 : i32
    %c0_i32_0 = arith.constant 0 : i32
    return %arg0, %c0_i32 : i32, i32
  }
}

module attributes {stable_mosaic.version = 11 : i64} {
  func.func @_conv3x3_kernel(%arg0: i32, %arg1: memref<1x18x18x16xbf16, #tpu.memory_space<vmem>>, %arg2: memref<3x3x16x16xbf16, #tpu.memory_space<vmem>>, %arg3: memref<1x16xf32, #tpu.memory_space<vmem>>, %arg4: memref<1x8x16x16xbf16, #tpu.memory_space<vmem>>) attributes {dimension_semantics = [#tpu.dimension_semantics<parallel>], iteration_bounds = array<i64: 2>, scalar_prefetch = 0 : i64, scratch_operands = 0 : i64, tpu.core_type = #tpu.core_type<tc>, window_params = [{transform_indices = @transform_0, window_bounds = array<i64: 1, 18, 18, 16>}, {pipeline_mode = #tpu.pipeline_mode<synchronous>, transform_indices = @transform_1, window_bounds = array<i64: 3, 3, 16, 16>}, {pipeline_mode = #tpu.pipeline_mode<synchronous>, transform_indices = @transform_2, window_bounds = array<i64: 1, 16>}, {transform_indices = @transform_3, window_bounds = array<i64: 1, 8, 16, 16>}]} {
    %c0 = arith.constant 0 : index
    %c0_0 = arith.constant 0 : index
    %c0_1 = arith.constant 0 : index
    %c0_2 = arith.constant 0 : index
    %0 = vector.load %arg2[%c0, %c0_0, %c0_1, %c0_2] : memref<3x3x16x16xbf16, #tpu.memory_space<vmem>>, vector<1x1x16x16xbf16>
    %1 = vector.shape_cast %0 : vector<1x1x16x16xbf16> to vector<16x16xbf16>
    %c0_3 = arith.constant 0 : index
    %c1 = arith.constant 1 : index
    %c0_4 = arith.constant 0 : index
    %c0_5 = arith.constant 0 : index
    %2 = vector.load %arg2[%c0_3, %c1, %c0_4, %c0_5] : memref<3x3x16x16xbf16, #tpu.memory_space<vmem>>, vector<1x1x16x16xbf16>
    %3 = vector.shape_cast %2 : vector<1x1x16x16xbf16> to vector<16x16xbf16>
    %c0_6 = arith.constant 0 : index
    %c2 = arith.constant 2 : index
    %c0_7 = arith.constant 0 : index
    %c0_8 = arith.constant 0 : index
    %4 = vector.load %arg2[%c0_6, %c2, %c0_7, %c0_8] : memref<3x3x16x16xbf16, #tpu.memory_space<vmem>>, vector<1x1x16x16xbf16>
    %5 = vector.shape_cast %4 : vector<1x1x16x16xbf16> to vector<16x16xbf16>
    %c1_9 = arith.constant 1 : index
    %c0_10 = arith.constant 0 : index
    %c0_11 = arith.constant 0 : index
    %c0_12 = arith.constant 0 : index
    %6 = vector.load %arg2[%c1_9, %c0_10, %c0_11, %c0_12] : memref<3x3x16x16xbf16, #tpu.memory_space<vmem>>, vector<1x1x16x16xbf16>
    %7 = vector.shape_cast %6 : vector<1x1x16x16xbf16> to vector<16x16xbf16>
    %c1_13 = arith.constant 1 : index
    %c1_14 = arith.constant 1 : index
    %c0_15 = arith.constant 0 : index
    %c0_16 = arith.constant 0 : index
    %8 = vector.load %arg2[%c1_13, %c1_14, %c0_15, %c0_16] : memref<3x3x16x16xbf16, #tpu.memory_space<vmem>>, vector<1x1x16x16xbf16>
    %9 = vector.shape_cast %8 : vector<1x1x16x16xbf16> to vector<16x16xbf16>
    %c1_17 = arith.constant 1 : index
    %c2_18 = arith.constant 2 : index
    %c0_19 = arith.constant 0 : index
    %c0_20 = arith.constant 0 : index
    %10 = vector.load %arg2[%c1_17, %c2_18, %c0_19, %c0_20] : memref<3x3x16x16xbf16, #tpu.memory_space<vmem>>, vector<1x1x16x16xbf16>
    %11 = vector.shape_cast %10 : vector<1x1x16x16xbf16> to vector<16x16xbf16>
    %c2_21 = arith.constant 2 : index
    %c0_22 = arith.constant 0 : index
    %c0_23 = arith.constant 0 : index
    %c0_24 = arith.constant 0 : index
    %12 = vector.load %arg2[%c2_21, %c0_22, %c0_23, %c0_24] : memref<3x3x16x16xbf16, #tpu.memory_space<vmem>>, vector<1x1x16x16xbf16>
    %13 = vector.shape_cast %12 : vector<1x1x16x16xbf16> to vector<16x16xbf16>
    %c2_25 = arith.constant 2 : index
    %c1_26 = arith.constant 1 : index
    %c0_27 = arith.constant 0 : index
    %c0_28 = arith.constant 0 : index
    %14 = vector.load %arg2[%c2_25, %c1_26, %c0_27, %c0_28] : memref<3x3x16x16xbf16, #tpu.memory_space<vmem>>, vector<1x1x16x16xbf16>
    %15 = vector.shape_cast %14 : vector<1x1x16x16xbf16> to vector<16x16xbf16>
    %c2_29 = arith.constant 2 : index
    %c2_30 = arith.constant 2 : index
    %c0_31 = arith.constant 0 : index
    %c0_32 = arith.constant 0 : index
    %16 = vector.load %arg2[%c2_29, %c2_30, %c0_31, %c0_32] : memref<3x3x16x16xbf16, #tpu.memory_space<vmem>>, vector<1x1x16x16xbf16>
    %17 = vector.shape_cast %16 : vector<1x1x16x16xbf16> to vector<16x16xbf16>
    %c0_33 = arith.constant 0 : index
    %c0_34 = arith.constant 0 : index
    %18 = vector.load %arg3[%c0_33, %c0_34] : memref<1x16xf32, #tpu.memory_space<vmem>>, vector<1x16xf32>
    %c0_i32 = arith.constant 0 : i32
    %c8_i32 = arith.constant 8 : i32
    %19 = arith.addi %c0_i32, %c8_i32 : i32
    %c1_i32 = arith.constant 1 : i32
    scf.for %arg5 = %c0_i32 to %19 step %c1_i32  : i32 {
      %cst = arith.constant 0.000000e+00 : f32
      %20 = vector.broadcast %cst : f32 to vector<16x16xf32>
      %21 = vector.broadcast %18 : vector<1x16xf32> to vector<16x16xf32>
      %22 = arith.addf %20, %21 : vector<16x16xf32>
      %c2_i32 = arith.constant 2 : i32
      %23 = arith.muli %arg5, %c2_i32 : i32
      %c0_i32_36 = arith.constant 0 : i32
      %24 = arith.addi %23, %c0_i32_36 : i32
      %c0_37 = arith.constant 0 : index
      %25 = arith.index_cast %24 : i32 to index
      %c0_38 = arith.constant 0 : index
      %c0_39 = arith.constant 0 : index
      %26 = vector.load %arg1[%c0_37, %25, %c0_38, %c0_39] : memref<1x18x18x16xbf16, #tpu.memory_space<vmem>>, vector<1x1x18x16xbf16>
      %27 = vector.shape_cast %26 : vector<1x1x18x16xbf16> to vector<18x16xbf16>
      %28 = vector.extract_strided_slice %27 {offsets = [0, 0], sizes = [16, 16], strides = [1, 1]} : vector<18x16xbf16> to vector<16x16xbf16>
      %cst_40 = arith.constant dense<0.000000e+00> : vector<16x16xf32>
      %29 = tpu.matmul %28, %1, %cst_40 {dimension_numbers = #tpu.dot_dimension_numbers<[1], [0], [0], [1], [0, 0, 1, 1], [], []>} : vector<16x16xbf16>, vector<16x16xbf16>, vector<16x16xf32> -> vector<16x16xf32>
      %30 = arith.addf %22, %29 : vector<16x16xf32>
      %31 = vector.extract_strided_slice %27 {offsets = [1, 0], sizes = [16, 16], strides = [1, 1]} : vector<18x16xbf16> to vector<16x16xbf16>
      %cst_41 = arith.constant dense<0.000000e+00> : vector<16x16xf32>
      %32 = tpu.matmul %31, %3, %cst_41 {dimension_numbers = #tpu.dot_dimension_numbers<[1], [0], [0], [1], [0, 0, 1, 1], [], []>} : vector<16x16xbf16>, vector<16x16xbf16>, vector<16x16xf32> -> vector<16x16xf32>
      %33 = arith.addf %30, %32 : vector<16x16xf32>
      %34 = vector.extract_strided_slice %27 {offsets = [2, 0], sizes = [16, 16], strides = [1, 1]} : vector<18x16xbf16> to vector<16x16xbf16>
      %cst_42 = arith.constant dense<0.000000e+00> : vector<16x16xf32>
      %35 = tpu.matmul %34, %5, %cst_42 {dimension_numbers = #tpu.dot_dimension_numbers<[1], [0], [0], [1], [0, 0, 1, 1], [], []>} : vector<16x16xbf16>, vector<16x16xbf16>, vector<16x16xf32> -> vector<16x16xf32>
      %36 = arith.addf %33, %35 : vector<16x16xf32>
      %c2_i32_43 = arith.constant 2 : i32
      %37 = arith.muli %arg5, %c2_i32_43 : i32
      %c1_i32_44 = arith.constant 1 : i32
      %38 = arith.addi %37, %c1_i32_44 : i32
      %c0_45 = arith.constant 0 : index
      %39 = arith.index_cast %38 : i32 to index
      %c0_46 = arith.constant 0 : index
      %c0_47 = arith.constant 0 : index
      %40 = vector.load %arg1[%c0_45, %39, %c0_46, %c0_47] : memref<1x18x18x16xbf16, #tpu.memory_space<vmem>>, vector<1x1x18x16xbf16>
      %41 = vector.shape_cast %40 : vector<1x1x18x16xbf16> to vector<18x16xbf16>
      %42 = vector.extract_strided_slice %41 {offsets = [0, 0], sizes = [16, 16], strides = [1, 1]} : vector<18x16xbf16> to vector<16x16xbf16>
      %cst_48 = arith.constant dense<0.000000e+00> : vector<16x16xf32>
      %43 = tpu.matmul %42, %7, %cst_48 {dimension_numbers = #tpu.dot_dimension_numbers<[1], [0], [0], [1], [0, 0, 1, 1], [], []>} : vector<16x16xbf16>, vector<16x16xbf16>, vector<16x16xf32> -> vector<16x16xf32>
      %44 = arith.addf %36, %43 : vector<16x16xf32>
      %45 = vector.extract_strided_slice %41 {offsets = [1, 0], sizes = [16, 16], strides = [1, 1]} : vector<18x16xbf16> to vector<16x16xbf16>
      %cst_49 = arith.constant dense<0.000000e+00> : vector<16x16xf32>
      %46 = tpu.matmul %45, %9, %cst_49 {dimension_numbers = #tpu.dot_dimension_numbers<[1], [0], [0], [1], [0, 0, 1, 1], [], []>} : vector<16x16xbf16>, vector<16x16xbf16>, vector<16x16xf32> -> vector<16x16xf32>
      %47 = arith.addf %44, %46 : vector<16x16xf32>
      %48 = vector.extract_strided_slice %41 {offsets = [2, 0], sizes = [16, 16], strides = [1, 1]} : vector<18x16xbf16> to vector<16x16xbf16>
      %cst_50 = arith.constant dense<0.000000e+00> : vector<16x16xf32>
      %49 = tpu.matmul %48, %11, %cst_50 {dimension_numbers = #tpu.dot_dimension_numbers<[1], [0], [0], [1], [0, 0, 1, 1], [], []>} : vector<16x16xbf16>, vector<16x16xbf16>, vector<16x16xf32> -> vector<16x16xf32>
      %50 = arith.addf %47, %49 : vector<16x16xf32>
      %c2_i32_51 = arith.constant 2 : i32
      %51 = arith.muli %arg5, %c2_i32_51 : i32
      %c2_i32_52 = arith.constant 2 : i32
      %52 = arith.addi %51, %c2_i32_52 : i32
      %c0_53 = arith.constant 0 : index
      %53 = arith.index_cast %52 : i32 to index
      %c0_54 = arith.constant 0 : index
      %c0_55 = arith.constant 0 : index
      %54 = vector.load %arg1[%c0_53, %53, %c0_54, %c0_55] : memref<1x18x18x16xbf16, #tpu.memory_space<vmem>>, vector<1x1x18x16xbf16>
      %55 = vector.shape_cast %54 : vector<1x1x18x16xbf16> to vector<18x16xbf16>
      %56 = vector.extract_strided_slice %55 {offsets = [0, 0], sizes = [16, 16], strides = [1, 1]} : vector<18x16xbf16> to vector<16x16xbf16>
      %cst_56 = arith.constant dense<0.000000e+00> : vector<16x16xf32>
      %57 = tpu.matmul %56, %13, %cst_56 {dimension_numbers = #tpu.dot_dimension_numbers<[1], [0], [0], [1], [0, 0, 1, 1], [], []>} : vector<16x16xbf16>, vector<16x16xbf16>, vector<16x16xf32> -> vector<16x16xf32>
      %58 = arith.addf %50, %57 : vector<16x16xf32>
      %59 = vector.extract_strided_slice %55 {offsets = [1, 0], sizes = [16, 16], strides = [1, 1]} : vector<18x16xbf16> to vector<16x16xbf16>
      %cst_57 = arith.constant dense<0.000000e+00> : vector<16x16xf32>
      %60 = tpu.matmul %59, %15, %cst_57 {dimension_numbers = #tpu.dot_dimension_numbers<[1], [0], [0], [1], [0, 0, 1, 1], [], []>} : vector<16x16xbf16>, vector<16x16xbf16>, vector<16x16xf32> -> vector<16x16xf32>
      %61 = arith.addf %58, %60 : vector<16x16xf32>
      %62 = vector.extract_strided_slice %55 {offsets = [2, 0], sizes = [16, 16], strides = [1, 1]} : vector<18x16xbf16> to vector<16x16xbf16>
      %cst_58 = arith.constant dense<0.000000e+00> : vector<16x16xf32>
      %63 = tpu.matmul %62, %17, %cst_58 {dimension_numbers = #tpu.dot_dimension_numbers<[1], [0], [0], [1], [0, 0, 1, 1], [], []>} : vector<16x16xbf16>, vector<16x16xbf16>, vector<16x16xf32> -> vector<16x16xf32>
      %64 = arith.addf %61, %63 : vector<16x16xf32>
      %cst_59 = arith.constant 0.000000e+00 : f32
      %65 = vector.broadcast %cst_59 : f32 to vector<16x16xf32>
      %66 = arith.maximumf %64, %65 : vector<16x16xf32>
      %67 = arith.truncf %66 : vector<16x16xf32> to vector<16x16xbf16>
      %c0_60 = arith.constant 0 : index
      %68 = arith.index_cast %arg5 : i32 to index
      %c0_61 = arith.constant 0 : index
      %c0_62 = arith.constant 0 : index
      %69 = vector.load %arg4[%c0_60, %68, %c0_61, %c0_62] : memref<1x8x16x16xbf16, #tpu.memory_space<vmem>>, vector<1x1x16x16xbf16>
      %70 = vector.shape_cast %69 : vector<1x1x16x16xbf16> to vector<16x16xbf16>
      %71 = vector.shape_cast %67 : vector<16x16xbf16> to vector<1x1x16x16xbf16>
      tpu.vector_store %arg4[%c0_60, %68, %c0_61, %c0_62], %71 {strides = array<i32>} : memref<1x8x16x16xbf16, #tpu.memory_space<vmem>>, vector<1x1x16x16xbf16>,
    }
    %c8_i32_35 = arith.constant 8 : i32
    return
  }
  func.func @transform_0(%arg0: i32) -> (i32, i32, i32, i32) {
    %c0_i32 = arith.constant 0 : i32
    %c0_i32_0 = arith.constant 0 : i32
    %c0_i32_1 = arith.constant 0 : i32
    %c0_i32_2 = arith.constant 0 : i32
    return %arg0, %c0_i32, %c0_i32_0, %c0_i32_1 : i32, i32, i32, i32
  }
  func.func @transform_1(%arg0: i32) -> (i32, i32, i32, i32) {
    %c0_i32 = arith.constant 0 : i32
    %c0_i32_0 = arith.constant 0 : i32
    %c0_i32_1 = arith.constant 0 : i32
    %c0_i32_2 = arith.constant 0 : i32
    %c0_i32_3 = arith.constant 0 : i32
    return %c0_i32, %c0_i32_0, %c0_i32_1, %c0_i32_2 : i32, i32, i32, i32
  }
  func.func @transform_2(%arg0: i32) -> (i32, i32) {
    %c0_i32 = arith.constant 0 : i32
    %c0_i32_0 = arith.constant 0 : i32
    %c0_i32_1 = arith.constant 0 : i32
    return %c0_i32, %c0_i32_0 : i32, i32
  }
  func.func @transform_3(%arg0: i32) -> (i32, i32, i32, i32) {
    %c0_i32 = arith.constant 0 : i32
    %c0_i32_0 = arith.constant 0 : i32
    %c0_i32_1 = arith.constant 0 : i32
    %c0_i32_2 = arith.constant 0 : i32
    return %arg0, %c0_i32, %c0_i32_0, %c0_i32_1 : i32, i32, i32, i32
  }
}

module attributes {stable_mosaic.version = 11 : i64} {
  func.func @_mm_ds_kernel(%arg0: i32, %arg1: memref<64x16xbf16, #tpu.memory_space<vmem>>, %arg2: memref<16x64xbf16, #tpu.memory_space<vmem>>, %arg3: memref<1x64xf32, #tpu.memory_space<vmem>>, %arg4: memref<64x32xbf16, #tpu.memory_space<vmem>>, %arg5: memref<32x64xbf16, #tpu.memory_space<vmem>>, %arg6: memref<1x64xf32, #tpu.memory_space<vmem>>, %arg7: memref<64x64xbf16, #tpu.memory_space<vmem>>) attributes {dimension_semantics = [#tpu.dimension_semantics<parallel>], iteration_bounds = array<i64: 2>, scalar_prefetch = 0 : i64, scratch_operands = 0 : i64, tpu.core_type = #tpu.core_type<tc>, window_params = [{transform_indices = @transform_0, window_bounds = array<i64: 64, 16>}, {pipeline_mode = #tpu.pipeline_mode<synchronous>, transform_indices = @transform_1, window_bounds = array<i64: 16, 64>}, {pipeline_mode = #tpu.pipeline_mode<synchronous>, transform_indices = @transform_2, window_bounds = array<i64: 1, 64>}, {transform_indices = @transform_3, window_bounds = array<i64: 64, 32>}, {pipeline_mode = #tpu.pipeline_mode<synchronous>, transform_indices = @transform_4, window_bounds = array<i64: 32, 64>}, {pipeline_mode = #tpu.pipeline_mode<synchronous>, transform_indices = @transform_5, window_bounds = array<i64: 1, 64>}, {transform_indices = @transform_6, window_bounds = array<i64: 64, 64>}]} {
    %c0 = arith.constant 0 : index
    %c0_0 = arith.constant 0 : index
    %0 = vector.load %arg1[%c0, %c0_0] : memref<64x16xbf16, #tpu.memory_space<vmem>>, vector<64x16xbf16>
    %c0_1 = arith.constant 0 : index
    %c0_2 = arith.constant 0 : index
    %1 = vector.load %arg2[%c0_1, %c0_2] : memref<16x64xbf16, #tpu.memory_space<vmem>>, vector<16x64xbf16>
    %cst = arith.constant dense<0.000000e+00> : vector<64x64xf32>
    %2 = tpu.matmul %0, %1, %cst {dimension_numbers = #tpu.dot_dimension_numbers<[1], [0], [0], [1], [0, 0, 1, 1], [], []>} : vector<64x16xbf16>, vector<16x64xbf16>, vector<64x64xf32> -> vector<64x64xf32>
    %c0_3 = arith.constant 0 : index
    %c0_4 = arith.constant 0 : index
    %3 = vector.load %arg4[%c0_3, %c0_4] : memref<64x32xbf16, #tpu.memory_space<vmem>>, vector<64x32xbf16>
    %c0_5 = arith.constant 0 : index
    %c0_6 = arith.constant 0 : index
    %4 = vector.load %arg5[%c0_5, %c0_6] : memref<32x64xbf16, #tpu.memory_space<vmem>>, vector<32x64xbf16>
    %cst_7 = arith.constant dense<0.000000e+00> : vector<64x64xf32>
    %5 = tpu.matmul %3, %4, %cst_7 {dimension_numbers = #tpu.dot_dimension_numbers<[1], [0], [0], [1], [0, 0, 1, 1], [], []>} : vector<64x32xbf16>, vector<32x64xbf16>, vector<64x64xf32> -> vector<64x64xf32>
    %6 = arith.addf %2, %5 : vector<64x64xf32>
    %c0_8 = arith.constant 0 : index
    %c0_9 = arith.constant 0 : index
    %7 = vector.load %arg3[%c0_8, %c0_9] : memref<1x64xf32, #tpu.memory_space<vmem>>, vector<1x64xf32>
    %8 = vector.broadcast %7 : vector<1x64xf32> to vector<64x64xf32>
    %9 = arith.addf %6, %8 : vector<64x64xf32>
    %c0_10 = arith.constant 0 : index
    %c0_11 = arith.constant 0 : index
    %10 = vector.load %arg6[%c0_10, %c0_11] : memref<1x64xf32, #tpu.memory_space<vmem>>, vector<1x64xf32>
    %11 = vector.broadcast %10 : vector<1x64xf32> to vector<64x64xf32>
    %12 = arith.addf %9, %11 : vector<64x64xf32>
    %cst_12 = arith.constant 0.000000e+00 : f32
    %13 = vector.broadcast %cst_12 : f32 to vector<64x64xf32>
    %14 = arith.maximumf %12, %13 : vector<64x64xf32>
    %15 = arith.truncf %14 : vector<64x64xf32> to vector<64x64xbf16>
    %c0_13 = arith.constant 0 : index
    %c0_14 = arith.constant 0 : index
    %16 = vector.load %arg7[%c0_13, %c0_14] : memref<64x64xbf16, #tpu.memory_space<vmem>>, vector<64x64xbf16>
    tpu.vector_store %arg7[%c0_13, %c0_14], %15 {strides = array<i32>} : memref<64x64xbf16, #tpu.memory_space<vmem>>, vector<64x64xbf16>,
    return
  }
  func.func @transform_0(%arg0: i32) -> (i32, i32) {
    %c0_i32 = arith.constant 0 : i32
    %c0_i32_0 = arith.constant 0 : i32
    return %arg0, %c0_i32 : i32, i32
  }
  func.func @transform_1(%arg0: i32) -> (i32, i32) {
    %c0_i32 = arith.constant 0 : i32
    %c0_i32_0 = arith.constant 0 : i32
    %c0_i32_1 = arith.constant 0 : i32
    return %c0_i32, %c0_i32_0 : i32, i32
  }
  func.func @transform_2(%arg0: i32) -> (i32, i32) {
    %c0_i32 = arith.constant 0 : i32
    %c0_i32_0 = arith.constant 0 : i32
    %c0_i32_1 = arith.constant 0 : i32
    return %c0_i32, %c0_i32_0 : i32, i32
  }
  func.func @transform_3(%arg0: i32) -> (i32, i32) {
    %c0_i32 = arith.constant 0 : i32
    %c0_i32_0 = arith.constant 0 : i32
    return %arg0, %c0_i32 : i32, i32
  }
  func.func @transform_4(%arg0: i32) -> (i32, i32) {
    %c0_i32 = arith.constant 0 : i32
    %c0_i32_0 = arith.constant 0 : i32
    %c0_i32_1 = arith.constant 0 : i32
    return %c0_i32, %c0_i32_0 : i32, i32
  }
  func.func @transform_5(%arg0: i32) -> (i32, i32) {
    %c0_i32 = arith.constant 0 : i32
    %c0_i32_0 = arith.constant 0 : i32
    %c0_i32_1 = arith.constant 0 : i32
    return %c0_i32, %c0_i32_0 : i32, i32
  }
  func.func @transform_6(%arg0: i32) -> (i32, i32) {
    %c0_i32 = arith.constant 0 : i32
    %c0_i32_0 = arith.constant 0 : i32
    return %arg0, %c0_i32 : i32, i32
  }
}

module attributes {stable_mosaic.version = 11 : i64} {
  func.func @_mm_kernel(%arg0: i32, %arg1: memref<64x64xbf16, #tpu.memory_space<vmem>>, %arg2: memref<64x16xbf16, #tpu.memory_space<vmem>>, %arg3: memref<1x16xf32, #tpu.memory_space<vmem>>, %arg4: memref<64x16xbf16, #tpu.memory_space<vmem>>) attributes {dimension_semantics = [#tpu.dimension_semantics<parallel>], iteration_bounds = array<i64: 2>, scalar_prefetch = 0 : i64, scratch_operands = 0 : i64, tpu.core_type = #tpu.core_type<tc>, window_params = [{transform_indices = @transform_0, window_bounds = array<i64: 64, 64>}, {pipeline_mode = #tpu.pipeline_mode<synchronous>, transform_indices = @transform_1, window_bounds = array<i64: 64, 16>}, {pipeline_mode = #tpu.pipeline_mode<synchronous>, transform_indices = @transform_2, window_bounds = array<i64: 1, 16>}, {transform_indices = @transform_3, window_bounds = array<i64: 64, 16>}]} {
    %c0 = arith.constant 0 : index
    %c0_0 = arith.constant 0 : index
    %0 = vector.load %arg1[%c0, %c0_0] : memref<64x64xbf16, #tpu.memory_space<vmem>>, vector<64x64xbf16>
    %c0_1 = arith.constant 0 : index
    %c0_2 = arith.constant 0 : index
    %1 = vector.load %arg2[%c0_1, %c0_2] : memref<64x16xbf16, #tpu.memory_space<vmem>>, vector<64x16xbf16>
    %cst = arith.constant dense<0.000000e+00> : vector<64x16xf32>
    %2 = tpu.matmul %0, %1, %cst {dimension_numbers = #tpu.dot_dimension_numbers<[1], [0], [0], [1], [0, 0, 1, 1], [], []>} : vector<64x64xbf16>, vector<64x16xbf16>, vector<64x16xf32> -> vector<64x16xf32>
    %c0_3 = arith.constant 0 : index
    %c0_4 = arith.constant 0 : index
    %3 = vector.load %arg3[%c0_3, %c0_4] : memref<1x16xf32, #tpu.memory_space<vmem>>, vector<1x16xf32>
    %4 = vector.broadcast %3 : vector<1x16xf32> to vector<64x16xf32>
    %5 = arith.addf %2, %4 : vector<64x16xf32>
    %cst_5 = arith.constant 0.000000e+00 : f32
    %6 = vector.broadcast %cst_5 : f32 to vector<64x16xf32>
    %7 = arith.maximumf %5, %6 : vector<64x16xf32>
    %8 = arith.truncf %7 : vector<64x16xf32> to vector<64x16xbf16>
    %c0_6 = arith.constant 0 : index
    %c0_7 = arith.constant 0 : index
    %9 = vector.load %arg4[%c0_6, %c0_7] : memref<64x16xbf16, #tpu.memory_space<vmem>>, vector<64x16xbf16>
    tpu.vector_store %arg4[%c0_6, %c0_7], %8 {strides = array<i32>} : memref<64x16xbf16, #tpu.memory_space<vmem>>, vector<64x16xbf16>,
    return
  }
  func.func @transform_0(%arg0: i32) -> (i32, i32) {
    %c0_i32 = arith.constant 0 : i32
    %c0_i32_0 = arith.constant 0 : i32
    return %arg0, %c0_i32 : i32, i32
  }
  func.func @transform_1(%arg0: i32) -> (i32, i32) {
    %c0_i32 = arith.constant 0 : i32
    %c0_i32_0 = arith.constant 0 : i32
    %c0_i32_1 = arith.constant 0 : i32
    return %c0_i32, %c0_i32_0 : i32, i32
  }
  func.func @transform_2(%arg0: i32) -> (i32, i32) {
    %c0_i32 = arith.constant 0 : i32
    %c0_i32_0 = arith.constant 0 : i32
    %c0_i32_1 = arith.constant 0 : i32
    return %c0_i32, %c0_i32_0 : i32, i32
  }
  func.func @transform_3(%arg0: i32) -> (i32, i32) {
    %c0_i32 = arith.constant 0 : i32
    %c0_i32_0 = arith.constant 0 : i32
    return %arg0, %c0_i32 : i32, i32
  }
}

module attributes {stable_mosaic.version = 11 : i64} {
  func.func @_conv3x3_kernel(%arg0: i32, %arg1: memref<1x10x10x16xbf16, #tpu.memory_space<vmem>>, %arg2: memref<3x3x16x16xbf16, #tpu.memory_space<vmem>>, %arg3: memref<1x16xf32, #tpu.memory_space<vmem>>, %arg4: memref<1x8x8x16xbf16, #tpu.memory_space<vmem>>) attributes {dimension_semantics = [#tpu.dimension_semantics<parallel>], iteration_bounds = array<i64: 2>, scalar_prefetch = 0 : i64, scratch_operands = 0 : i64, tpu.core_type = #tpu.core_type<tc>, window_params = [{transform_indices = @transform_0, window_bounds = array<i64: 1, 10, 10, 16>}, {pipeline_mode = #tpu.pipeline_mode<synchronous>, transform_indices = @transform_1, window_bounds = array<i64: 3, 3, 16, 16>}, {pipeline_mode = #tpu.pipeline_mode<synchronous>, transform_indices = @transform_2, window_bounds = array<i64: 1, 16>}, {transform_indices = @transform_3, window_bounds = array<i64: 1, 8, 8, 16>}]} {
    %c0 = arith.constant 0 : index
    %c0_0 = arith.constant 0 : index
    %c0_1 = arith.constant 0 : index
    %c0_2 = arith.constant 0 : index
    %0 = vector.load %arg2[%c0, %c0_0, %c0_1, %c0_2] : memref<3x3x16x16xbf16, #tpu.memory_space<vmem>>, vector<1x1x16x16xbf16>
    %1 = vector.shape_cast %0 : vector<1x1x16x16xbf16> to vector<16x16xbf16>
    %c0_3 = arith.constant 0 : index
    %c1 = arith.constant 1 : index
    %c0_4 = arith.constant 0 : index
    %c0_5 = arith.constant 0 : index
    %2 = vector.load %arg2[%c0_3, %c1, %c0_4, %c0_5] : memref<3x3x16x16xbf16, #tpu.memory_space<vmem>>, vector<1x1x16x16xbf16>
    %3 = vector.shape_cast %2 : vector<1x1x16x16xbf16> to vector<16x16xbf16>
    %c0_6 = arith.constant 0 : index
    %c2 = arith.constant 2 : index
    %c0_7 = arith.constant 0 : index
    %c0_8 = arith.constant 0 : index
    %4 = vector.load %arg2[%c0_6, %c2, %c0_7, %c0_8] : memref<3x3x16x16xbf16, #tpu.memory_space<vmem>>, vector<1x1x16x16xbf16>
    %5 = vector.shape_cast %4 : vector<1x1x16x16xbf16> to vector<16x16xbf16>
    %c1_9 = arith.constant 1 : index
    %c0_10 = arith.constant 0 : index
    %c0_11 = arith.constant 0 : index
    %c0_12 = arith.constant 0 : index
    %6 = vector.load %arg2[%c1_9, %c0_10, %c0_11, %c0_12] : memref<3x3x16x16xbf16, #tpu.memory_space<vmem>>, vector<1x1x16x16xbf16>
    %7 = vector.shape_cast %6 : vector<1x1x16x16xbf16> to vector<16x16xbf16>
    %c1_13 = arith.constant 1 : index
    %c1_14 = arith.constant 1 : index
    %c0_15 = arith.constant 0 : index
    %c0_16 = arith.constant 0 : index
    %8 = vector.load %arg2[%c1_13, %c1_14, %c0_15, %c0_16] : memref<3x3x16x16xbf16, #tpu.memory_space<vmem>>, vector<1x1x16x16xbf16>
    %9 = vector.shape_cast %8 : vector<1x1x16x16xbf16> to vector<16x16xbf16>
    %c1_17 = arith.constant 1 : index
    %c2_18 = arith.constant 2 : index
    %c0_19 = arith.constant 0 : index
    %c0_20 = arith.constant 0 : index
    %10 = vector.load %arg2[%c1_17, %c2_18, %c0_19, %c0_20] : memref<3x3x16x16xbf16, #tpu.memory_space<vmem>>, vector<1x1x16x16xbf16>
    %11 = vector.shape_cast %10 : vector<1x1x16x16xbf16> to vector<16x16xbf16>
    %c2_21 = arith.constant 2 : index
    %c0_22 = arith.constant 0 : index
    %c0_23 = arith.constant 0 : index
    %c0_24 = arith.constant 0 : index
    %12 = vector.load %arg2[%c2_21, %c0_22, %c0_23, %c0_24] : memref<3x3x16x16xbf16, #tpu.memory_space<vmem>>, vector<1x1x16x16xbf16>
    %13 = vector.shape_cast %12 : vector<1x1x16x16xbf16> to vector<16x16xbf16>
    %c2_25 = arith.constant 2 : index
    %c1_26 = arith.constant 1 : index
    %c0_27 = arith.constant 0 : index
    %c0_28 = arith.constant 0 : index
    %14 = vector.load %arg2[%c2_25, %c1_26, %c0_27, %c0_28] : memref<3x3x16x16xbf16, #tpu.memory_space<vmem>>, vector<1x1x16x16xbf16>
    %15 = vector.shape_cast %14 : vector<1x1x16x16xbf16> to vector<16x16xbf16>
    %c2_29 = arith.constant 2 : index
    %c2_30 = arith.constant 2 : index
    %c0_31 = arith.constant 0 : index
    %c0_32 = arith.constant 0 : index
    %16 = vector.load %arg2[%c2_29, %c2_30, %c0_31, %c0_32] : memref<3x3x16x16xbf16, #tpu.memory_space<vmem>>, vector<1x1x16x16xbf16>
    %17 = vector.shape_cast %16 : vector<1x1x16x16xbf16> to vector<16x16xbf16>
    %c0_33 = arith.constant 0 : index
    %c0_34 = arith.constant 0 : index
    %18 = vector.load %arg3[%c0_33, %c0_34] : memref<1x16xf32, #tpu.memory_space<vmem>>, vector<1x16xf32>
    %c0_i32 = arith.constant 0 : i32
    %c8_i32 = arith.constant 8 : i32
    %19 = arith.addi %c0_i32, %c8_i32 : i32
    %c1_i32 = arith.constant 1 : i32
    scf.for %arg5 = %c0_i32 to %19 step %c1_i32  : i32 {
      %cst = arith.constant 0.000000e+00 : f32
      %20 = vector.broadcast %cst : f32 to vector<8x16xf32>
      %21 = vector.broadcast %18 : vector<1x16xf32> to vector<8x16xf32>
      %22 = arith.addf %20, %21 : vector<8x16xf32>
      %c1_i32_36 = arith.constant 1 : i32
      %23 = arith.muli %arg5, %c1_i32_36 : i32
      %c0_i32_37 = arith.constant 0 : i32
      %24 = arith.addi %23, %c0_i32_37 : i32
      %c0_38 = arith.constant 0 : index
      %25 = arith.index_cast %24 : i32 to index
      %c0_39 = arith.constant 0 : index
      %c0_40 = arith.constant 0 : index
      %26 = vector.load %arg1[%c0_38, %25, %c0_39, %c0_40] : memref<1x10x10x16xbf16, #tpu.memory_space<vmem>>, vector<1x1x10x16xbf16>
      %27 = vector.shape_cast %26 : vector<1x1x10x16xbf16> to vector<10x16xbf16>
      %28 = vector.extract_strided_slice %27 {offsets = [0, 0], sizes = [8, 16], strides = [1, 1]} : vector<10x16xbf16> to vector<8x16xbf16>
      %cst_41 = arith.constant dense<0.000000e+00> : vector<8x16xf32>
      %29 = tpu.matmul %28, %1, %cst_41 {dimension_numbers = #tpu.dot_dimension_numbers<[1], [0], [0], [1], [0, 0, 1, 1], [], []>} : vector<8x16xbf16>, vector<16x16xbf16>, vector<8x16xf32> -> vector<8x16xf32>
      %30 = arith.addf %22, %29 : vector<8x16xf32>
      %31 = vector.extract_strided_slice %27 {offsets = [1, 0], sizes = [8, 16], strides = [1, 1]} : vector<10x16xbf16> to vector<8x16xbf16>
      %cst_42 = arith.constant dense<0.000000e+00> : vector<8x16xf32>
      %32 = tpu.matmul %31, %3, %cst_42 {dimension_numbers = #tpu.dot_dimension_numbers<[1], [0], [0], [1], [0, 0, 1, 1], [], []>} : vector<8x16xbf16>, vector<16x16xbf16>, vector<8x16xf32> -> vector<8x16xf32>
      %33 = arith.addf %30, %32 : vector<8x16xf32>
      %34 = vector.extract_strided_slice %27 {offsets = [2, 0], sizes = [8, 16], strides = [1, 1]} : vector<10x16xbf16> to vector<8x16xbf16>
      %cst_43 = arith.constant dense<0.000000e+00> : vector<8x16xf32>
      %35 = tpu.matmul %34, %5, %cst_43 {dimension_numbers = #tpu.dot_dimension_numbers<[1], [0], [0], [1], [0, 0, 1, 1], [], []>} : vector<8x16xbf16>, vector<16x16xbf16>, vector<8x16xf32> -> vector<8x16xf32>
      %36 = arith.addf %33, %35 : vector<8x16xf32>
      %c1_i32_44 = arith.constant 1 : i32
      %37 = arith.muli %arg5, %c1_i32_44 : i32
      %c1_i32_45 = arith.constant 1 : i32
      %38 = arith.addi %37, %c1_i32_45 : i32
      %c0_46 = arith.constant 0 : index
      %39 = arith.index_cast %38 : i32 to index
      %c0_47 = arith.constant 0 : index
      %c0_48 = arith.constant 0 : index
      %40 = vector.load %arg1[%c0_46, %39, %c0_47, %c0_48] : memref<1x10x10x16xbf16, #tpu.memory_space<vmem>>, vector<1x1x10x16xbf16>
      %41 = vector.shape_cast %40 : vector<1x1x10x16xbf16> to vector<10x16xbf16>
      %42 = vector.extract_strided_slice %41 {offsets = [0, 0], sizes = [8, 16], strides = [1, 1]} : vector<10x16xbf16> to vector<8x16xbf16>
      %cst_49 = arith.constant dense<0.000000e+00> : vector<8x16xf32>
      %43 = tpu.matmul %42, %7, %cst_49 {dimension_numbers = #tpu.dot_dimension_numbers<[1], [0], [0], [1], [0, 0, 1, 1], [], []>} : vector<8x16xbf16>, vector<16x16xbf16>, vector<8x16xf32> -> vector<8x16xf32>
      %44 = arith.addf %36, %43 : vector<8x16xf32>
      %45 = vector.extract_strided_slice %41 {offsets = [1, 0], sizes = [8, 16], strides = [1, 1]} : vector<10x16xbf16> to vector<8x16xbf16>
      %cst_50 = arith.constant dense<0.000000e+00> : vector<8x16xf32>
      %46 = tpu.matmul %45, %9, %cst_50 {dimension_numbers = #tpu.dot_dimension_numbers<[1], [0], [0], [1], [0, 0, 1, 1], [], []>} : vector<8x16xbf16>, vector<16x16xbf16>, vector<8x16xf32> -> vector<8x16xf32>
      %47 = arith.addf %44, %46 : vector<8x16xf32>
      %48 = vector.extract_strided_slice %41 {offsets = [2, 0], sizes = [8, 16], strides = [1, 1]} : vector<10x16xbf16> to vector<8x16xbf16>
      %cst_51 = arith.constant dense<0.000000e+00> : vector<8x16xf32>
      %49 = tpu.matmul %48, %11, %cst_51 {dimension_numbers = #tpu.dot_dimension_numbers<[1], [0], [0], [1], [0, 0, 1, 1], [], []>} : vector<8x16xbf16>, vector<16x16xbf16>, vector<8x16xf32> -> vector<8x16xf32>
      %50 = arith.addf %47, %49 : vector<8x16xf32>
      %c1_i32_52 = arith.constant 1 : i32
      %51 = arith.muli %arg5, %c1_i32_52 : i32
      %c2_i32 = arith.constant 2 : i32
      %52 = arith.addi %51, %c2_i32 : i32
      %c0_53 = arith.constant 0 : index
      %53 = arith.index_cast %52 : i32 to index
      %c0_54 = arith.constant 0 : index
      %c0_55 = arith.constant 0 : index
      %54 = vector.load %arg1[%c0_53, %53, %c0_54, %c0_55] : memref<1x10x10x16xbf16, #tpu.memory_space<vmem>>, vector<1x1x10x16xbf16>
      %55 = vector.shape_cast %54 : vector<1x1x10x16xbf16> to vector<10x16xbf16>
      %56 = vector.extract_strided_slice %55 {offsets = [0, 0], sizes = [8, 16], strides = [1, 1]} : vector<10x16xbf16> to vector<8x16xbf16>
      %cst_56 = arith.constant dense<0.000000e+00> : vector<8x16xf32>
      %57 = tpu.matmul %56, %13, %cst_56 {dimension_numbers = #tpu.dot_dimension_numbers<[1], [0], [0], [1], [0, 0, 1, 1], [], []>} : vector<8x16xbf16>, vector<16x16xbf16>, vector<8x16xf32> -> vector<8x16xf32>
      %58 = arith.addf %50, %57 : vector<8x16xf32>
      %59 = vector.extract_strided_slice %55 {offsets = [1, 0], sizes = [8, 16], strides = [1, 1]} : vector<10x16xbf16> to vector<8x16xbf16>
      %cst_57 = arith.constant dense<0.000000e+00> : vector<8x16xf32>
      %60 = tpu.matmul %59, %15, %cst_57 {dimension_numbers = #tpu.dot_dimension_numbers<[1], [0], [0], [1], [0, 0, 1, 1], [], []>} : vector<8x16xbf16>, vector<16x16xbf16>, vector<8x16xf32> -> vector<8x16xf32>
      %61 = arith.addf %58, %60 : vector<8x16xf32>
      %62 = vector.extract_strided_slice %55 {offsets = [2, 0], sizes = [8, 16], strides = [1, 1]} : vector<10x16xbf16> to vector<8x16xbf16>
      %cst_58 = arith.constant dense<0.000000e+00> : vector<8x16xf32>
      %63 = tpu.matmul %62, %17, %cst_58 {dimension_numbers = #tpu.dot_dimension_numbers<[1], [0], [0], [1], [0, 0, 1, 1], [], []>} : vector<8x16xbf16>, vector<16x16xbf16>, vector<8x16xf32> -> vector<8x16xf32>
      %64 = arith.addf %61, %63 : vector<8x16xf32>
      %cst_59 = arith.constant 0.000000e+00 : f32
      %65 = vector.broadcast %cst_59 : f32 to vector<8x16xf32>
      %66 = arith.maximumf %64, %65 : vector<8x16xf32>
      %67 = arith.truncf %66 : vector<8x16xf32> to vector<8x16xbf16>
      %c0_60 = arith.constant 0 : index
      %68 = arith.index_cast %arg5 : i32 to index
      %c0_61 = arith.constant 0 : index
      %c0_62 = arith.constant 0 : index
      %69 = vector.load %arg4[%c0_60, %68, %c0_61, %c0_62] : memref<1x8x8x16xbf16, #tpu.memory_space<vmem>>, vector<1x1x8x16xbf16>
      %70 = vector.shape_cast %69 : vector<1x1x8x16xbf16> to vector<8x16xbf16>
      %71 = vector.shape_cast %67 : vector<8x16xbf16> to vector<1x1x8x16xbf16>
      tpu.vector_store %arg4[%c0_60, %68, %c0_61, %c0_62], %71 {strides = array<i32>} : memref<1x8x8x16xbf16, #tpu.memory_space<vmem>>, vector<1x1x8x16xbf16>,
    }
    %c8_i32_35 = arith.constant 8 : i32
    return
  }
  func.func @transform_0(%arg0: i32) -> (i32, i32, i32, i32) {
    %c0_i32 = arith.constant 0 : i32
    %c0_i32_0 = arith.constant 0 : i32
    %c0_i32_1 = arith.constant 0 : i32
    %c0_i32_2 = arith.constant 0 : i32
    return %arg0, %c0_i32, %c0_i32_0, %c0_i32_1 : i32, i32, i32, i32
  }
  func.func @transform_1(%arg0: i32) -> (i32, i32, i32, i32) {
    %c0_i32 = arith.constant 0 : i32
    %c0_i32_0 = arith.constant 0 : i32
    %c0_i32_1 = arith.constant 0 : i32
    %c0_i32_2 = arith.constant 0 : i32
    %c0_i32_3 = arith.constant 0 : i32
    return %c0_i32, %c0_i32_0, %c0_i32_1, %c0_i32_2 : i32, i32, i32, i32
  }
  func.func @transform_2(%arg0: i32) -> (i32, i32) {
    %c0_i32 = arith.constant 0 : i32
    %c0_i32_0 = arith.constant 0 : i32
    %c0_i32_1 = arith.constant 0 : i32
    return %c0_i32, %c0_i32_0 : i32, i32
  }
  func.func @transform_3(%arg0: i32) -> (i32, i32, i32, i32) {
    %c0_i32 = arith.constant 0 : i32
    %c0_i32_0 = arith.constant 0 : i32
    %c0_i32_1 = arith.constant 0 : i32
    %c0_i32_2 = arith.constant 0 : i32
    return %arg0, %c0_i32, %c0_i32_0, %c0_i32_1 : i32, i32, i32, i32
  }
}

module attributes {stable_mosaic.version = 11 : i64} {
  func.func @_mm_res_kernel(%arg0: i32, %arg1: memref<64x16xbf16, #tpu.memory_space<vmem>>, %arg2: memref<16x64xbf16, #tpu.memory_space<vmem>>, %arg3: memref<1x64xf32, #tpu.memory_space<vmem>>, %arg4: memref<64x64xbf16, #tpu.memory_space<vmem>>, %arg5: memref<64x64xbf16, #tpu.memory_space<vmem>>) attributes {dimension_semantics = [#tpu.dimension_semantics<parallel>], iteration_bounds = array<i64: 2>, scalar_prefetch = 0 : i64, scratch_operands = 0 : i64, tpu.core_type = #tpu.core_type<tc>, window_params = [{transform_indices = @transform_0, window_bounds = array<i64: 64, 16>}, {pipeline_mode = #tpu.pipeline_mode<synchronous>, transform_indices = @transform_1, window_bounds = array<i64: 16, 64>}, {pipeline_mode = #tpu.pipeline_mode<synchronous>, transform_indices = @transform_2, window_bounds = array<i64: 1, 64>}, {transform_indices = @transform_3, window_bounds = array<i64: 64, 64>}, {transform_indices = @transform_4, window_bounds = array<i64: 64, 64>}]} {
    %c0 = arith.constant 0 : index
    %c0_0 = arith.constant 0 : index
    %0 = vector.load %arg1[%c0, %c0_0] : memref<64x16xbf16, #tpu.memory_space<vmem>>, vector<64x16xbf16>
    %c0_1 = arith.constant 0 : index
    %c0_2 = arith.constant 0 : index
    %1 = vector.load %arg2[%c0_1, %c0_2] : memref<16x64xbf16, #tpu.memory_space<vmem>>, vector<16x64xbf16>
    %cst = arith.constant dense<0.000000e+00> : vector<64x64xf32>
    %2 = tpu.matmul %0, %1, %cst {dimension_numbers = #tpu.dot_dimension_numbers<[1], [0], [0], [1], [0, 0, 1, 1], [], []>} : vector<64x16xbf16>, vector<16x64xbf16>, vector<64x64xf32> -> vector<64x64xf32>
    %c0_3 = arith.constant 0 : index
    %c0_4 = arith.constant 0 : index
    %3 = vector.load %arg3[%c0_3, %c0_4] : memref<1x64xf32, #tpu.memory_space<vmem>>, vector<1x64xf32>
    %4 = vector.broadcast %3 : vector<1x64xf32> to vector<64x64xf32>
    %5 = arith.addf %2, %4 : vector<64x64xf32>
    %c0_5 = arith.constant 0 : index
    %c0_6 = arith.constant 0 : index
    %6 = vector.load %arg4[%c0_5, %c0_6] : memref<64x64xbf16, #tpu.memory_space<vmem>>, vector<64x64xbf16>
    %7 = arith.extf %6 : vector<64x64xbf16> to vector<64x64xf32>
    %8 = arith.addf %5, %7 : vector<64x64xf32>
    %cst_7 = arith.constant 0.000000e+00 : f32
    %9 = vector.broadcast %cst_7 : f32 to vector<64x64xf32>
    %10 = arith.maximumf %8, %9 : vector<64x64xf32>
    %11 = arith.truncf %10 : vector<64x64xf32> to vector<64x64xbf16>
    %c0_8 = arith.constant 0 : index
    %c0_9 = arith.constant 0 : index
    %12 = vector.load %arg5[%c0_8, %c0_9] : memref<64x64xbf16, #tpu.memory_space<vmem>>, vector<64x64xbf16>
    tpu.vector_store %arg5[%c0_8, %c0_9], %11 {strides = array<i32>} : memref<64x64xbf16, #tpu.memory_space<vmem>>, vector<64x64xbf16>,
    return
  }
  func.func @transform_0(%arg0: i32) -> (i32, i32) {
    %c0_i32 = arith.constant 0 : i32
    %c0_i32_0 = arith.constant 0 : i32
    return %arg0, %c0_i32 : i32, i32
  }
  func.func @transform_1(%arg0: i32) -> (i32, i32) {
    %c0_i32 = arith.constant 0 : i32
    %c0_i32_0 = arith.constant 0 : i32
    %c0_i32_1 = arith.constant 0 : i32
    return %c0_i32, %c0_i32_0 : i32, i32
  }
  func.func @transform_2(%arg0: i32) -> (i32, i32) {
    %c0_i32 = arith.constant 0 : i32
    %c0_i32_0 = arith.constant 0 : i32
    %c0_i32_1 = arith.constant 0 : i32
    return %c0_i32, %c0_i32_0 : i32, i32
  }
  func.func @transform_3(%arg0: i32) -> (i32, i32) {
    %c0_i32 = arith.constant 0 : i32
    %c0_i32_0 = arith.constant 0 : i32
    return %arg0, %c0_i32 : i32, i32
  }
  func.func @transform_4(%arg0: i32) -> (i32, i32) {
    %c0_i32 = arith.constant 0 : i32
    %c0_i32_0 = arith.constant 0 : i32
    return %arg0, %c0_i32 : i32, i32
  }
}

module attributes {stable_mosaic.version = 11 : i64} {
  func.func @_mm_kernel(%arg0: i32, %arg1: memref<64x64xbf16, #tpu.memory_space<vmem>>, %arg2: memref<64x32xbf16, #tpu.memory_space<vmem>>, %arg3: memref<1x32xf32, #tpu.memory_space<vmem>>, %arg4: memref<64x32xbf16, #tpu.memory_space<vmem>>) attributes {dimension_semantics = [#tpu.dimension_semantics<parallel>], iteration_bounds = array<i64: 2>, scalar_prefetch = 0 : i64, scratch_operands = 0 : i64, tpu.core_type = #tpu.core_type<tc>, window_params = [{transform_indices = @transform_0, window_bounds = array<i64: 64, 64>}, {pipeline_mode = #tpu.pipeline_mode<synchronous>, transform_indices = @transform_1, window_bounds = array<i64: 64, 32>}, {pipeline_mode = #tpu.pipeline_mode<synchronous>, transform_indices = @transform_2, window_bounds = array<i64: 1, 32>}, {transform_indices = @transform_3, window_bounds = array<i64: 64, 32>}]} {
    %c0 = arith.constant 0 : index
    %c0_0 = arith.constant 0 : index
    %0 = vector.load %arg1[%c0, %c0_0] : memref<64x64xbf16, #tpu.memory_space<vmem>>, vector<64x64xbf16>
    %c0_1 = arith.constant 0 : index
    %c0_2 = arith.constant 0 : index
    %1 = vector.load %arg2[%c0_1, %c0_2] : memref<64x32xbf16, #tpu.memory_space<vmem>>, vector<64x32xbf16>
    %cst = arith.constant dense<0.000000e+00> : vector<64x32xf32>
    %2 = tpu.matmul %0, %1, %cst {dimension_numbers = #tpu.dot_dimension_numbers<[1], [0], [0], [1], [0, 0, 1, 1], [], []>} : vector<64x64xbf16>, vector<64x32xbf16>, vector<64x32xf32> -> vector<64x32xf32>
    %c0_3 = arith.constant 0 : index
    %c0_4 = arith.constant 0 : index
    %3 = vector.load %arg3[%c0_3, %c0_4] : memref<1x32xf32, #tpu.memory_space<vmem>>, vector<1x32xf32>
    %4 = vector.broadcast %3 : vector<1x32xf32> to vector<64x32xf32>
    %5 = arith.addf %2, %4 : vector<64x32xf32>
    %cst_5 = arith.constant 0.000000e+00 : f32
    %6 = vector.broadcast %cst_5 : f32 to vector<64x32xf32>
    %7 = arith.maximumf %5, %6 : vector<64x32xf32>
    %8 = arith.truncf %7 : vector<64x32xf32> to vector<64x32xbf16>
    %c0_6 = arith.constant 0 : index
    %c0_7 = arith.constant 0 : index
    %9 = vector.load %arg4[%c0_6, %c0_7] : memref<64x32xbf16, #tpu.memory_space<vmem>>, vector<64x32xbf16>
    tpu.vector_store %arg4[%c0_6, %c0_7], %8 {strides = array<i32>} : memref<64x32xbf16, #tpu.memory_space<vmem>>, vector<64x32xbf16>,
    return
  }
  func.func @transform_0(%arg0: i32) -> (i32, i32) {
    %c0_i32 = arith.constant 0 : i32
    %c0_i32_0 = arith.constant 0 : i32
    return %arg0, %c0_i32 : i32, i32
  }
  func.func @transform_1(%arg0: i32) -> (i32, i32) {
    %c0_i32 = arith.constant 0 : i32
    %c0_i32_0 = arith.constant 0 : i32
    %c0_i32_1 = arith.constant 0 : i32
    return %c0_i32, %c0_i32_0 : i32, i32
  }
  func.func @transform_2(%arg0: i32) -> (i32, i32) {
    %c0_i32 = arith.constant 0 : i32
    %c0_i32_0 = arith.constant 0 : i32
    %c0_i32_1 = arith.constant 0 : i32
    return %c0_i32, %c0_i32_0 : i32, i32
  }
  func.func @transform_3(%arg0: i32) -> (i32, i32) {
    %c0_i32 = arith.constant 0 : i32
    %c0_i32_0 = arith.constant 0 : i32
    return %arg0, %c0_i32 : i32, i32
  }
}

module attributes {stable_mosaic.version = 11 : i64} {
  func.func @_conv3x3_kernel(%arg0: i32, %arg1: memref<1x10x10x32xbf16, #tpu.memory_space<vmem>>, %arg2: memref<3x3x32x32xbf16, #tpu.memory_space<vmem>>, %arg3: memref<1x32xf32, #tpu.memory_space<vmem>>, %arg4: memref<1x4x8x32xbf16, #tpu.memory_space<vmem>>) attributes {dimension_semantics = [#tpu.dimension_semantics<parallel>], iteration_bounds = array<i64: 2>, scalar_prefetch = 0 : i64, scratch_operands = 0 : i64, tpu.core_type = #tpu.core_type<tc>, window_params = [{transform_indices = @transform_0, window_bounds = array<i64: 1, 10, 10, 32>}, {pipeline_mode = #tpu.pipeline_mode<synchronous>, transform_indices = @transform_1, window_bounds = array<i64: 3, 3, 32, 32>}, {pipeline_mode = #tpu.pipeline_mode<synchronous>, transform_indices = @transform_2, window_bounds = array<i64: 1, 32>}, {transform_indices = @transform_3, window_bounds = array<i64: 1, 4, 8, 32>}]} {
    %c0 = arith.constant 0 : index
    %c0_0 = arith.constant 0 : index
    %c0_1 = arith.constant 0 : index
    %c0_2 = arith.constant 0 : index
    %0 = vector.load %arg2[%c0, %c0_0, %c0_1, %c0_2] : memref<3x3x32x32xbf16, #tpu.memory_space<vmem>>, vector<1x1x32x32xbf16>
    %1 = vector.shape_cast %0 : vector<1x1x32x32xbf16> to vector<32x32xbf16>
    %c0_3 = arith.constant 0 : index
    %c1 = arith.constant 1 : index
    %c0_4 = arith.constant 0 : index
    %c0_5 = arith.constant 0 : index
    %2 = vector.load %arg2[%c0_3, %c1, %c0_4, %c0_5] : memref<3x3x32x32xbf16, #tpu.memory_space<vmem>>, vector<1x1x32x32xbf16>
    %3 = vector.shape_cast %2 : vector<1x1x32x32xbf16> to vector<32x32xbf16>
    %c0_6 = arith.constant 0 : index
    %c2 = arith.constant 2 : index
    %c0_7 = arith.constant 0 : index
    %c0_8 = arith.constant 0 : index
    %4 = vector.load %arg2[%c0_6, %c2, %c0_7, %c0_8] : memref<3x3x32x32xbf16, #tpu.memory_space<vmem>>, vector<1x1x32x32xbf16>
    %5 = vector.shape_cast %4 : vector<1x1x32x32xbf16> to vector<32x32xbf16>
    %c1_9 = arith.constant 1 : index
    %c0_10 = arith.constant 0 : index
    %c0_11 = arith.constant 0 : index
    %c0_12 = arith.constant 0 : index
    %6 = vector.load %arg2[%c1_9, %c0_10, %c0_11, %c0_12] : memref<3x3x32x32xbf16, #tpu.memory_space<vmem>>, vector<1x1x32x32xbf16>
    %7 = vector.shape_cast %6 : vector<1x1x32x32xbf16> to vector<32x32xbf16>
    %c1_13 = arith.constant 1 : index
    %c1_14 = arith.constant 1 : index
    %c0_15 = arith.constant 0 : index
    %c0_16 = arith.constant 0 : index
    %8 = vector.load %arg2[%c1_13, %c1_14, %c0_15, %c0_16] : memref<3x3x32x32xbf16, #tpu.memory_space<vmem>>, vector<1x1x32x32xbf16>
    %9 = vector.shape_cast %8 : vector<1x1x32x32xbf16> to vector<32x32xbf16>
    %c1_17 = arith.constant 1 : index
    %c2_18 = arith.constant 2 : index
    %c0_19 = arith.constant 0 : index
    %c0_20 = arith.constant 0 : index
    %10 = vector.load %arg2[%c1_17, %c2_18, %c0_19, %c0_20] : memref<3x3x32x32xbf16, #tpu.memory_space<vmem>>, vector<1x1x32x32xbf16>
    %11 = vector.shape_cast %10 : vector<1x1x32x32xbf16> to vector<32x32xbf16>
    %c2_21 = arith.constant 2 : index
    %c0_22 = arith.constant 0 : index
    %c0_23 = arith.constant 0 : index
    %c0_24 = arith.constant 0 : index
    %12 = vector.load %arg2[%c2_21, %c0_22, %c0_23, %c0_24] : memref<3x3x32x32xbf16, #tpu.memory_space<vmem>>, vector<1x1x32x32xbf16>
    %13 = vector.shape_cast %12 : vector<1x1x32x32xbf16> to vector<32x32xbf16>
    %c2_25 = arith.constant 2 : index
    %c1_26 = arith.constant 1 : index
    %c0_27 = arith.constant 0 : index
    %c0_28 = arith.constant 0 : index
    %14 = vector.load %arg2[%c2_25, %c1_26, %c0_27, %c0_28] : memref<3x3x32x32xbf16, #tpu.memory_space<vmem>>, vector<1x1x32x32xbf16>
    %15 = vector.shape_cast %14 : vector<1x1x32x32xbf16> to vector<32x32xbf16>
    %c2_29 = arith.constant 2 : index
    %c2_30 = arith.constant 2 : index
    %c0_31 = arith.constant 0 : index
    %c0_32 = arith.constant 0 : index
    %16 = vector.load %arg2[%c2_29, %c2_30, %c0_31, %c0_32] : memref<3x3x32x32xbf16, #tpu.memory_space<vmem>>, vector<1x1x32x32xbf16>
    %17 = vector.shape_cast %16 : vector<1x1x32x32xbf16> to vector<32x32xbf16>
    %c0_33 = arith.constant 0 : index
    %c0_34 = arith.constant 0 : index
    %18 = vector.load %arg3[%c0_33, %c0_34] : memref<1x32xf32, #tpu.memory_space<vmem>>, vector<1x32xf32>
    %c0_i32 = arith.constant 0 : i32
    %c4_i32 = arith.constant 4 : i32
    %19 = arith.addi %c0_i32, %c4_i32 : i32
    %c1_i32 = arith.constant 1 : i32
    scf.for %arg5 = %c0_i32 to %19 step %c1_i32  : i32 {
      %cst = arith.constant 0.000000e+00 : f32
      %20 = vector.broadcast %cst : f32 to vector<8x32xf32>
      %21 = vector.broadcast %18 : vector<1x32xf32> to vector<8x32xf32>
      %22 = arith.addf %20, %21 : vector<8x32xf32>
      %c2_i32 = arith.constant 2 : i32
      %23 = arith.muli %arg5, %c2_i32 : i32
      %c0_i32_36 = arith.constant 0 : i32
      %24 = arith.addi %23, %c0_i32_36 : i32
      %c0_37 = arith.constant 0 : index
      %25 = arith.index_cast %24 : i32 to index
      %c0_38 = arith.constant 0 : index
      %c0_39 = arith.constant 0 : index
      %26 = vector.load %arg1[%c0_37, %25, %c0_38, %c0_39] : memref<1x10x10x32xbf16, #tpu.memory_space<vmem>>, vector<1x1x10x32xbf16>
      %27 = vector.shape_cast %26 : vector<1x1x10x32xbf16> to vector<10x32xbf16>
      %28 = vector.extract_strided_slice %27 {offsets = [0, 0], sizes = [8, 32], strides = [1, 1]} : vector<10x32xbf16> to vector<8x32xbf16>
      %cst_40 = arith.constant dense<0.000000e+00> : vector<8x32xf32>
      %29 = tpu.matmul %28, %1, %cst_40 {dimension_numbers = #tpu.dot_dimension_numbers<[1], [0], [0], [1], [0, 0, 1, 1], [], []>} : vector<8x32xbf16>, vector<32x32xbf16>, vector<8x32xf32> -> vector<8x32xf32>
      %30 = arith.addf %22, %29 : vector<8x32xf32>
      %31 = vector.extract_strided_slice %27 {offsets = [1, 0], sizes = [8, 32], strides = [1, 1]} : vector<10x32xbf16> to vector<8x32xbf16>
      %cst_41 = arith.constant dense<0.000000e+00> : vector<8x32xf32>
      %32 = tpu.matmul %31, %3, %cst_41 {dimension_numbers = #tpu.dot_dimension_numbers<[1], [0], [0], [1], [0, 0, 1, 1], [], []>} : vector<8x32xbf16>, vector<32x32xbf16>, vector<8x32xf32> -> vector<8x32xf32>
      %33 = arith.addf %30, %32 : vector<8x32xf32>
      %34 = vector.extract_strided_slice %27 {offsets = [2, 0], sizes = [8, 32], strides = [1, 1]} : vector<10x32xbf16> to vector<8x32xbf16>
      %cst_42 = arith.constant dense<0.000000e+00> : vector<8x32xf32>
      %35 = tpu.matmul %34, %5, %cst_42 {dimension_numbers = #tpu.dot_dimension_numbers<[1], [0], [0], [1], [0, 0, 1, 1], [], []>} : vector<8x32xbf16>, vector<32x32xbf16>, vector<8x32xf32> -> vector<8x32xf32>
      %36 = arith.addf %33, %35 : vector<8x32xf32>
      %c2_i32_43 = arith.constant 2 : i32
      %37 = arith.muli %arg5, %c2_i32_43 : i32
      %c1_i32_44 = arith.constant 1 : i32
      %38 = arith.addi %37, %c1_i32_44 : i32
      %c0_45 = arith.constant 0 : index
      %39 = arith.index_cast %38 : i32 to index
      %c0_46 = arith.constant 0 : index
      %c0_47 = arith.constant 0 : index
      %40 = vector.load %arg1[%c0_45, %39, %c0_46, %c0_47] : memref<1x10x10x32xbf16, #tpu.memory_space<vmem>>, vector<1x1x10x32xbf16>
      %41 = vector.shape_cast %40 : vector<1x1x10x32xbf16> to vector<10x32xbf16>
      %42 = vector.extract_strided_slice %41 {offsets = [0, 0], sizes = [8, 32], strides = [1, 1]} : vector<10x32xbf16> to vector<8x32xbf16>
      %cst_48 = arith.constant dense<0.000000e+00> : vector<8x32xf32>
      %43 = tpu.matmul %42, %7, %cst_48 {dimension_numbers = #tpu.dot_dimension_numbers<[1], [0], [0], [1], [0, 0, 1, 1], [], []>} : vector<8x32xbf16>, vector<32x32xbf16>, vector<8x32xf32> -> vector<8x32xf32>
      %44 = arith.addf %36, %43 : vector<8x32xf32>
      %45 = vector.extract_strided_slice %41 {offsets = [1, 0], sizes = [8, 32], strides = [1, 1]} : vector<10x32xbf16> to vector<8x32xbf16>
      %cst_49 = arith.constant dense<0.000000e+00> : vector<8x32xf32>
      %46 = tpu.matmul %45, %9, %cst_49 {dimension_numbers = #tpu.dot_dimension_numbers<[1], [0], [0], [1], [0, 0, 1, 1], [], []>} : vector<8x32xbf16>, vector<32x32xbf16>, vector<8x32xf32> -> vector<8x32xf32>
      %47 = arith.addf %44, %46 : vector<8x32xf32>
      %48 = vector.extract_strided_slice %41 {offsets = [2, 0], sizes = [8, 32], strides = [1, 1]} : vector<10x32xbf16> to vector<8x32xbf16>
      %cst_50 = arith.constant dense<0.000000e+00> : vector<8x32xf32>
      %49 = tpu.matmul %48, %11, %cst_50 {dimension_numbers = #tpu.dot_dimension_numbers<[1], [0], [0], [1], [0, 0, 1, 1], [], []>} : vector<8x32xbf16>, vector<32x32xbf16>, vector<8x32xf32> -> vector<8x32xf32>
      %50 = arith.addf %47, %49 : vector<8x32xf32>
      %c2_i32_51 = arith.constant 2 : i32
      %51 = arith.muli %arg5, %c2_i32_51 : i32
      %c2_i32_52 = arith.constant 2 : i32
      %52 = arith.addi %51, %c2_i32_52 : i32
      %c0_53 = arith.constant 0 : index
      %53 = arith.index_cast %52 : i32 to index
      %c0_54 = arith.constant 0 : index
      %c0_55 = arith.constant 0 : index
      %54 = vector.load %arg1[%c0_53, %53, %c0_54, %c0_55] : memref<1x10x10x32xbf16, #tpu.memory_space<vmem>>, vector<1x1x10x32xbf16>
      %55 = vector.shape_cast %54 : vector<1x1x10x32xbf16> to vector<10x32xbf16>
      %56 = vector.extract_strided_slice %55 {offsets = [0, 0], sizes = [8, 32], strides = [1, 1]} : vector<10x32xbf16> to vector<8x32xbf16>
      %cst_56 = arith.constant dense<0.000000e+00> : vector<8x32xf32>
      %57 = tpu.matmul %56, %13, %cst_56 {dimension_numbers = #tpu.dot_dimension_numbers<[1], [0], [0], [1], [0, 0, 1, 1], [], []>} : vector<8x32xbf16>, vector<32x32xbf16>, vector<8x32xf32> -> vector<8x32xf32>
      %58 = arith.addf %50, %57 : vector<8x32xf32>
      %59 = vector.extract_strided_slice %55 {offsets = [1, 0], sizes = [8, 32], strides = [1, 1]} : vector<10x32xbf16> to vector<8x32xbf16>
      %cst_57 = arith.constant dense<0.000000e+00> : vector<8x32xf32>
      %60 = tpu.matmul %59, %15, %cst_57 {dimension_numbers = #tpu.dot_dimension_numbers<[1], [0], [0], [1], [0, 0, 1, 1], [], []>} : vector<8x32xbf16>, vector<32x32xbf16>, vector<8x32xf32> -> vector<8x32xf32>
      %61 = arith.addf %58, %60 : vector<8x32xf32>
      %62 = vector.extract_strided_slice %55 {offsets = [2, 0], sizes = [8, 32], strides = [1, 1]} : vector<10x32xbf16> to vector<8x32xbf16>
      %cst_58 = arith.constant dense<0.000000e+00> : vector<8x32xf32>
      %63 = tpu.matmul %62, %17, %cst_58 {dimension_numbers = #tpu.dot_dimension_numbers<[1], [0], [0], [1], [0, 0, 1, 1], [], []>} : vector<8x32xbf16>, vector<32x32xbf16>, vector<8x32xf32> -> vector<8x32xf32>
      %64 = arith.addf %61, %63 : vector<8x32xf32>
      %cst_59 = arith.constant 0.000000e+00 : f32
      %65 = vector.broadcast %cst_59 : f32 to vector<8x32xf32>
      %66 = arith.maximumf %64, %65 : vector<8x32xf32>
      %67 = arith.truncf %66 : vector<8x32xf32> to vector<8x32xbf16>
      %c0_60 = arith.constant 0 : index
      %68 = arith.index_cast %arg5 : i32 to index
      %c0_61 = arith.constant 0 : index
      %c0_62 = arith.constant 0 : index
      %69 = vector.load %arg4[%c0_60, %68, %c0_61, %c0_62] : memref<1x4x8x32xbf16, #tpu.memory_space<vmem>>, vector<1x1x8x32xbf16>
      %70 = vector.shape_cast %69 : vector<1x1x8x32xbf16> to vector<8x32xbf16>
      %71 = vector.shape_cast %67 : vector<8x32xbf16> to vector<1x1x8x32xbf16>
      tpu.vector_store %arg4[%c0_60, %68, %c0_61, %c0_62], %71 {strides = array<i32>} : memref<1x4x8x32xbf16, #tpu.memory_space<vmem>>, vector<1x1x8x32xbf16>,
    }
    %c4_i32_35 = arith.constant 4 : i32
    return
  }
  func.func @transform_0(%arg0: i32) -> (i32, i32, i32, i32) {
    %c0_i32 = arith.constant 0 : i32
    %c0_i32_0 = arith.constant 0 : i32
    %c0_i32_1 = arith.constant 0 : i32
    %c0_i32_2 = arith.constant 0 : i32
    return %arg0, %c0_i32, %c0_i32_0, %c0_i32_1 : i32, i32, i32, i32
  }
  func.func @transform_1(%arg0: i32) -> (i32, i32, i32, i32) {
    %c0_i32 = arith.constant 0 : i32
    %c0_i32_0 = arith.constant 0 : i32
    %c0_i32_1 = arith.constant 0 : i32
    %c0_i32_2 = arith.constant 0 : i32
    %c0_i32_3 = arith.constant 0 : i32
    return %c0_i32, %c0_i32_0, %c0_i32_1, %c0_i32_2 : i32, i32, i32, i32
  }
  func.func @transform_2(%arg0: i32) -> (i32, i32) {
    %c0_i32 = arith.constant 0 : i32
    %c0_i32_0 = arith.constant 0 : i32
    %c0_i32_1 = arith.constant 0 : i32
    return %c0_i32, %c0_i32_0 : i32, i32
  }
  func.func @transform_3(%arg0: i32) -> (i32, i32, i32, i32) {
    %c0_i32 = arith.constant 0 : i32
    %c0_i32_0 = arith.constant 0 : i32
    %c0_i32_1 = arith.constant 0 : i32
    %c0_i32_2 = arith.constant 0 : i32
    return %arg0, %c0_i32, %c0_i32_0, %c0_i32_1 : i32, i32, i32, i32
  }
}

module attributes {stable_mosaic.version = 11 : i64} {
  func.func @_mm_kernel(%arg0: i32, %arg1: memref<16x128xbf16, #tpu.memory_space<vmem>>, %arg2: memref<128x32xbf16, #tpu.memory_space<vmem>>, %arg3: memref<1x32xf32, #tpu.memory_space<vmem>>, %arg4: memref<16x32xbf16, #tpu.memory_space<vmem>>) attributes {dimension_semantics = [#tpu.dimension_semantics<parallel>], iteration_bounds = array<i64: 2>, scalar_prefetch = 0 : i64, scratch_operands = 0 : i64, tpu.core_type = #tpu.core_type<tc>, window_params = [{transform_indices = @transform_0, window_bounds = array<i64: 16, 128>}, {pipeline_mode = #tpu.pipeline_mode<synchronous>, transform_indices = @transform_1, window_bounds = array<i64: 128, 32>}, {pipeline_mode = #tpu.pipeline_mode<synchronous>, transform_indices = @transform_2, window_bounds = array<i64: 1, 32>}, {transform_indices = @transform_3, window_bounds = array<i64: 16, 32>}]} {
    %c0 = arith.constant 0 : index
    %c0_0 = arith.constant 0 : index
    %0 = vector.load %arg1[%c0, %c0_0] : memref<16x128xbf16, #tpu.memory_space<vmem>>, vector<16x128xbf16>
    %c0_1 = arith.constant 0 : index
    %c0_2 = arith.constant 0 : index
    %1 = vector.load %arg2[%c0_1, %c0_2] : memref<128x32xbf16, #tpu.memory_space<vmem>>, vector<128x32xbf16>
    %cst = arith.constant dense<0.000000e+00> : vector<16x32xf32>
    %2 = tpu.matmul %0, %1, %cst {dimension_numbers = #tpu.dot_dimension_numbers<[1], [0], [0], [1], [0, 0, 1, 1], [], []>} : vector<16x128xbf16>, vector<128x32xbf16>, vector<16x32xf32> -> vector<16x32xf32>
    %c0_3 = arith.constant 0 : index
    %c0_4 = arith.constant 0 : index
    %3 = vector.load %arg3[%c0_3, %c0_4] : memref<1x32xf32, #tpu.memory_space<vmem>>, vector<1x32xf32>
    %4 = vector.broadcast %3 : vector<1x32xf32> to vector<16x32xf32>
    %5 = arith.addf %2, %4 : vector<16x32xf32>
    %cst_5 = arith.constant 0.000000e+00 : f32
    %6 = vector.broadcast %cst_5 : f32 to vector<16x32xf32>
    %7 = arith.maximumf %5, %6 : vector<16x32xf32>
    %8 = arith.truncf %7 : vector<16x32xf32> to vector<16x32xbf16>
    %c0_6 = arith.constant 0 : index
    %c0_7 = arith.constant 0 : index
    %9 = vector.load %arg4[%c0_6, %c0_7] : memref<16x32xbf16, #tpu.memory_space<vmem>>, vector<16x32xbf16>
    tpu.vector_store %arg4[%c0_6, %c0_7], %8 {strides = array<i32>} : memref<16x32xbf16, #tpu.memory_space<vmem>>, vector<16x32xbf16>,
    return
  }
  func.func @transform_0(%arg0: i32) -> (i32, i32) {
    %c0_i32 = arith.constant 0 : i32
    %c0_i32_0 = arith.constant 0 : i32
    return %arg0, %c0_i32 : i32, i32
  }
  func.func @transform_1(%arg0: i32) -> (i32, i32) {
    %c0_i32 = arith.constant 0 : i32
    %c0_i32_0 = arith.constant 0 : i32
    %c0_i32_1 = arith.constant 0 : i32
    return %c0_i32, %c0_i32_0 : i32, i32
  }
  func.func @transform_2(%arg0: i32) -> (i32, i32) {
    %c0_i32 = arith.constant 0 : i32
    %c0_i32_0 = arith.constant 0 : i32
    %c0_i32_1 = arith.constant 0 : i32
    return %c0_i32, %c0_i32_0 : i32, i32
  }
  func.func @transform_3(%arg0: i32) -> (i32, i32) {
    %c0_i32 = arith.constant 0 : i32
    %c0_i32_0 = arith.constant 0 : i32
    return %arg0, %c0_i32 : i32, i32
  }
}

module attributes {stable_mosaic.version = 11 : i64} {
  func.func @_mm_ds_kernel(%arg0: i32, %arg1: memref<16x32xbf16, #tpu.memory_space<vmem>>, %arg2: memref<32x128xbf16, #tpu.memory_space<vmem>>, %arg3: memref<1x128xf32, #tpu.memory_space<vmem>>, %arg4: memref<16x64xbf16, #tpu.memory_space<vmem>>, %arg5: memref<64x128xbf16, #tpu.memory_space<vmem>>, %arg6: memref<1x128xf32, #tpu.memory_space<vmem>>, %arg7: memref<16x128xbf16, #tpu.memory_space<vmem>>) attributes {dimension_semantics = [#tpu.dimension_semantics<parallel>], iteration_bounds = array<i64: 2>, scalar_prefetch = 0 : i64, scratch_operands = 0 : i64, tpu.core_type = #tpu.core_type<tc>, window_params = [{transform_indices = @transform_0, window_bounds = array<i64: 16, 32>}, {pipeline_mode = #tpu.pipeline_mode<synchronous>, transform_indices = @transform_1, window_bounds = array<i64: 32, 128>}, {pipeline_mode = #tpu.pipeline_mode<synchronous>, transform_indices = @transform_2, window_bounds = array<i64: 1, 128>}, {transform_indices = @transform_3, window_bounds = array<i64: 16, 64>}, {pipeline_mode = #tpu.pipeline_mode<synchronous>, transform_indices = @transform_4, window_bounds = array<i64: 64, 128>}, {pipeline_mode = #tpu.pipeline_mode<synchronous>, transform_indices = @transform_5, window_bounds = array<i64: 1, 128>}, {transform_indices = @transform_6, window_bounds = array<i64: 16, 128>}]} {
    %c0 = arith.constant 0 : index
    %c0_0 = arith.constant 0 : index
    %0 = vector.load %arg1[%c0, %c0_0] : memref<16x32xbf16, #tpu.memory_space<vmem>>, vector<16x32xbf16>
    %c0_1 = arith.constant 0 : index
    %c0_2 = arith.constant 0 : index
    %1 = vector.load %arg2[%c0_1, %c0_2] : memref<32x128xbf16, #tpu.memory_space<vmem>>, vector<32x128xbf16>
    %cst = arith.constant dense<0.000000e+00> : vector<16x128xf32>
    %2 = tpu.matmul %0, %1, %cst {dimension_numbers = #tpu.dot_dimension_numbers<[1], [0], [0], [1], [0, 0, 1, 1], [], []>} : vector<16x32xbf16>, vector<32x128xbf16>, vector<16x128xf32> -> vector<16x128xf32>
    %c0_3 = arith.constant 0 : index
    %c0_4 = arith.constant 0 : index
    %3 = vector.load %arg4[%c0_3, %c0_4] : memref<16x64xbf16, #tpu.memory_space<vmem>>, vector<16x64xbf16>
    %c0_5 = arith.constant 0 : index
    %c0_6 = arith.constant 0 : index
    %4 = vector.load %arg5[%c0_5, %c0_6] : memref<64x128xbf16, #tpu.memory_space<vmem>>, vector<64x128xbf16>
    %cst_7 = arith.constant dense<0.000000e+00> : vector<16x128xf32>
    %5 = tpu.matmul %3, %4, %cst_7 {dimension_numbers = #tpu.dot_dimension_numbers<[1], [0], [0], [1], [0, 0, 1, 1], [], []>} : vector<16x64xbf16>, vector<64x128xbf16>, vector<16x128xf32> -> vector<16x128xf32>
    %6 = arith.addf %2, %5 : vector<16x128xf32>
    %c0_8 = arith.constant 0 : index
    %c0_9 = arith.constant 0 : index
    %7 = vector.load %arg3[%c0_8, %c0_9] : memref<1x128xf32, #tpu.memory_space<vmem>>, vector<1x128xf32>
    %8 = vector.broadcast %7 : vector<1x128xf32> to vector<16x128xf32>
    %9 = arith.addf %6, %8 : vector<16x128xf32>
    %c0_10 = arith.constant 0 : index
    %c0_11 = arith.constant 0 : index
    %10 = vector.load %arg6[%c0_10, %c0_11] : memref<1x128xf32, #tpu.memory_space<vmem>>, vector<1x128xf32>
    %11 = vector.broadcast %10 : vector<1x128xf32> to vector<16x128xf32>
    %12 = arith.addf %9, %11 : vector<16x128xf32>
    %cst_12 = arith.constant 0.000000e+00 : f32
    %13 = vector.broadcast %cst_12 : f32 to vector<16x128xf32>
    %14 = arith.maximumf %12, %13 : vector<16x128xf32>
    %15 = arith.truncf %14 : vector<16x128xf32> to vector<16x128xbf16>
    %c0_13 = arith.constant 0 : index
    %c0_14 = arith.constant 0 : index
    %16 = vector.load %arg7[%c0_13, %c0_14] : memref<16x128xbf16, #tpu.memory_space<vmem>>, vector<16x128xbf16>
    tpu.vector_store %arg7[%c0_13, %c0_14], %15 {strides = array<i32>} : memref<16x128xbf16, #tpu.memory_space<vmem>>, vector<16x128xbf16>,
    return
  }
  func.func @transform_0(%arg0: i32) -> (i32, i32) {
    %c0_i32 = arith.constant 0 : i32
    %c0_i32_0 = arith.constant 0 : i32
    return %arg0, %c0_i32 : i32, i32
  }
  func.func @transform_1(%arg0: i32) -> (i32, i32) {
    %c0_i32 = arith.constant 0 : i32
    %c0_i32_0 = arith.constant 0 : i32
    %c0_i32_1 = arith.constant 0 : i32
    return %c0_i32, %c0_i32_0 : i32, i32
  }
  func.func @transform_2(%arg0: i32) -> (i32, i32) {
    %c0_i32 = arith.constant 0 : i32
    %c0_i32_0 = arith.constant 0 : i32
    %c0_i32_1 = arith.constant 0 : i32
    return %c0_i32, %c0_i32_0 : i32, i32
  }
  func.func @transform_3(%arg0: i32) -> (i32, i32) {
    %c0_i32 = arith.constant 0 : i32
    %c0_i32_0 = arith.constant 0 : i32
    return %arg0, %c0_i32 : i32, i32
  }
  func.func @transform_4(%arg0: i32) -> (i32, i32) {
    %c0_i32 = arith.constant 0 : i32
    %c0_i32_0 = arith.constant 0 : i32
    %c0_i32_1 = arith.constant 0 : i32
    return %c0_i32, %c0_i32_0 : i32, i32
  }
  func.func @transform_5(%arg0: i32) -> (i32, i32) {
    %c0_i32 = arith.constant 0 : i32
    %c0_i32_0 = arith.constant 0 : i32
    %c0_i32_1 = arith.constant 0 : i32
    return %c0_i32, %c0_i32_0 : i32, i32
  }
  func.func @transform_6(%arg0: i32) -> (i32, i32) {
    %c0_i32 = arith.constant 0 : i32
    %c0_i32_0 = arith.constant 0 : i32
    return %arg0, %c0_i32 : i32, i32
  }
}

module attributes {stable_mosaic.version = 11 : i64} {
  func.func @_conv3x3_kernel(%arg0: i32, %arg1: memref<1x6x6x32xbf16, #tpu.memory_space<vmem>>, %arg2: memref<3x3x32x32xbf16, #tpu.memory_space<vmem>>, %arg3: memref<1x32xf32, #tpu.memory_space<vmem>>, %arg4: memref<1x4x4x32xbf16, #tpu.memory_space<vmem>>) attributes {dimension_semantics = [#tpu.dimension_semantics<parallel>], iteration_bounds = array<i64: 2>, scalar_prefetch = 0 : i64, scratch_operands = 0 : i64, tpu.core_type = #tpu.core_type<tc>, window_params = [{transform_indices = @transform_0, window_bounds = array<i64: 1, 6, 6, 32>}, {pipeline_mode = #tpu.pipeline_mode<synchronous>, transform_indices = @transform_1, window_bounds = array<i64: 3, 3, 32, 32>}, {pipeline_mode = #tpu.pipeline_mode<synchronous>, transform_indices = @transform_2, window_bounds = array<i64: 1, 32>}, {transform_indices = @transform_3, window_bounds = array<i64: 1, 4, 4, 32>}]} {
    %c0 = arith.constant 0 : index
    %c0_0 = arith.constant 0 : index
    %c0_1 = arith.constant 0 : index
    %c0_2 = arith.constant 0 : index
    %0 = vector.load %arg2[%c0, %c0_0, %c0_1, %c0_2] : memref<3x3x32x32xbf16, #tpu.memory_space<vmem>>, vector<1x1x32x32xbf16>
    %1 = vector.shape_cast %0 : vector<1x1x32x32xbf16> to vector<32x32xbf16>
    %c0_3 = arith.constant 0 : index
    %c1 = arith.constant 1 : index
    %c0_4 = arith.constant 0 : index
    %c0_5 = arith.constant 0 : index
    %2 = vector.load %arg2[%c0_3, %c1, %c0_4, %c0_5] : memref<3x3x32x32xbf16, #tpu.memory_space<vmem>>, vector<1x1x32x32xbf16>
    %3 = vector.shape_cast %2 : vector<1x1x32x32xbf16> to vector<32x32xbf16>
    %c0_6 = arith.constant 0 : index
    %c2 = arith.constant 2 : index
    %c0_7 = arith.constant 0 : index
    %c0_8 = arith.constant 0 : index
    %4 = vector.load %arg2[%c0_6, %c2, %c0_7, %c0_8] : memref<3x3x32x32xbf16, #tpu.memory_space<vmem>>, vector<1x1x32x32xbf16>
    %5 = vector.shape_cast %4 : vector<1x1x32x32xbf16> to vector<32x32xbf16>
    %c1_9 = arith.constant 1 : index
    %c0_10 = arith.constant 0 : index
    %c0_11 = arith.constant 0 : index
    %c0_12 = arith.constant 0 : index
    %6 = vector.load %arg2[%c1_9, %c0_10, %c0_11, %c0_12] : memref<3x3x32x32xbf16, #tpu.memory_space<vmem>>, vector<1x1x32x32xbf16>
    %7 = vector.shape_cast %6 : vector<1x1x32x32xbf16> to vector<32x32xbf16>
    %c1_13 = arith.constant 1 : index
    %c1_14 = arith.constant 1 : index
    %c0_15 = arith.constant 0 : index
    %c0_16 = arith.constant 0 : index
    %8 = vector.load %arg2[%c1_13, %c1_14, %c0_15, %c0_16] : memref<3x3x32x32xbf16, #tpu.memory_space<vmem>>, vector<1x1x32x32xbf16>
    %9 = vector.shape_cast %8 : vector<1x1x32x32xbf16> to vector<32x32xbf16>
    %c1_17 = arith.constant 1 : index
    %c2_18 = arith.constant 2 : index
    %c0_19 = arith.constant 0 : index
    %c0_20 = arith.constant 0 : index
    %10 = vector.load %arg2[%c1_17, %c2_18, %c0_19, %c0_20] : memref<3x3x32x32xbf16, #tpu.memory_space<vmem>>, vector<1x1x32x32xbf16>
    %11 = vector.shape_cast %10 : vector<1x1x32x32xbf16> to vector<32x32xbf16>
    %c2_21 = arith.constant 2 : index
    %c0_22 = arith.constant 0 : index
    %c0_23 = arith.constant 0 : index
    %c0_24 = arith.constant 0 : index
    %12 = vector.load %arg2[%c2_21, %c0_22, %c0_23, %c0_24] : memref<3x3x32x32xbf16, #tpu.memory_space<vmem>>, vector<1x1x32x32xbf16>
    %13 = vector.shape_cast %12 : vector<1x1x32x32xbf16> to vector<32x32xbf16>
    %c2_25 = arith.constant 2 : index
    %c1_26 = arith.constant 1 : index
    %c0_27 = arith.constant 0 : index
    %c0_28 = arith.constant 0 : index
    %14 = vector.load %arg2[%c2_25, %c1_26, %c0_27, %c0_28] : memref<3x3x32x32xbf16, #tpu.memory_space<vmem>>, vector<1x1x32x32xbf16>
    %15 = vector.shape_cast %14 : vector<1x1x32x32xbf16> to vector<32x32xbf16>
    %c2_29 = arith.constant 2 : index
    %c2_30 = arith.constant 2 : index
    %c0_31 = arith.constant 0 : index
    %c0_32 = arith.constant 0 : index
    %16 = vector.load %arg2[%c2_29, %c2_30, %c0_31, %c0_32] : memref<3x3x32x32xbf16, #tpu.memory_space<vmem>>, vector<1x1x32x32xbf16>
    %17 = vector.shape_cast %16 : vector<1x1x32x32xbf16> to vector<32x32xbf16>
    %c0_33 = arith.constant 0 : index
    %c0_34 = arith.constant 0 : index
    %18 = vector.load %arg3[%c0_33, %c0_34] : memref<1x32xf32, #tpu.memory_space<vmem>>, vector<1x32xf32>
    %c0_i32 = arith.constant 0 : i32
    %c4_i32 = arith.constant 4 : i32
    %19 = arith.addi %c0_i32, %c4_i32 : i32
    %c1_i32 = arith.constant 1 : i32
    scf.for %arg5 = %c0_i32 to %19 step %c1_i32  : i32 {
      %cst = arith.constant 0.000000e+00 : f32
      %20 = vector.broadcast %cst : f32 to vector<4x32xf32>
      %21 = vector.broadcast %18 : vector<1x32xf32> to vector<4x32xf32>
      %22 = arith.addf %20, %21 : vector<4x32xf32>
      %c1_i32_36 = arith.constant 1 : i32
      %23 = arith.muli %arg5, %c1_i32_36 : i32
      %c0_i32_37 = arith.constant 0 : i32
      %24 = arith.addi %23, %c0_i32_37 : i32
      %c0_38 = arith.constant 0 : index
      %25 = arith.index_cast %24 : i32 to index
      %c0_39 = arith.constant 0 : index
      %c0_40 = arith.constant 0 : index
      %26 = vector.load %arg1[%c0_38, %25, %c0_39, %c0_40] : memref<1x6x6x32xbf16, #tpu.memory_space<vmem>>, vector<1x1x6x32xbf16>
      %27 = vector.shape_cast %26 : vector<1x1x6x32xbf16> to vector<6x32xbf16>
      %28 = vector.extract_strided_slice %27 {offsets = [0, 0], sizes = [4, 32], strides = [1, 1]} : vector<6x32xbf16> to vector<4x32xbf16>
      %cst_41 = arith.constant dense<0.000000e+00> : vector<4x32xf32>
      %29 = tpu.matmul %28, %1, %cst_41 {dimension_numbers = #tpu.dot_dimension_numbers<[1], [0], [0], [1], [0, 0, 1, 1], [], []>} : vector<4x32xbf16>, vector<32x32xbf16>, vector<4x32xf32> -> vector<4x32xf32>
      %30 = arith.addf %22, %29 : vector<4x32xf32>
      %31 = vector.extract_strided_slice %27 {offsets = [1, 0], sizes = [4, 32], strides = [1, 1]} : vector<6x32xbf16> to vector<4x32xbf16>
      %cst_42 = arith.constant dense<0.000000e+00> : vector<4x32xf32>
      %32 = tpu.matmul %31, %3, %cst_42 {dimension_numbers = #tpu.dot_dimension_numbers<[1], [0], [0], [1], [0, 0, 1, 1], [], []>} : vector<4x32xbf16>, vector<32x32xbf16>, vector<4x32xf32> -> vector<4x32xf32>
      %33 = arith.addf %30, %32 : vector<4x32xf32>
      %34 = vector.extract_strided_slice %27 {offsets = [2, 0], sizes = [4, 32], strides = [1, 1]} : vector<6x32xbf16> to vector<4x32xbf16>
      %cst_43 = arith.constant dense<0.000000e+00> : vector<4x32xf32>
      %35 = tpu.matmul %34, %5, %cst_43 {dimension_numbers = #tpu.dot_dimension_numbers<[1], [0], [0], [1], [0, 0, 1, 1], [], []>} : vector<4x32xbf16>, vector<32x32xbf16>, vector<4x32xf32> -> vector<4x32xf32>
      %36 = arith.addf %33, %35 : vector<4x32xf32>
      %c1_i32_44 = arith.constant 1 : i32
      %37 = arith.muli %arg5, %c1_i32_44 : i32
      %c1_i32_45 = arith.constant 1 : i32
      %38 = arith.addi %37, %c1_i32_45 : i32
      %c0_46 = arith.constant 0 : index
      %39 = arith.index_cast %38 : i32 to index
      %c0_47 = arith.constant 0 : index
      %c0_48 = arith.constant 0 : index
      %40 = vector.load %arg1[%c0_46, %39, %c0_47, %c0_48] : memref<1x6x6x32xbf16, #tpu.memory_space<vmem>>, vector<1x1x6x32xbf16>
      %41 = vector.shape_cast %40 : vector<1x1x6x32xbf16> to vector<6x32xbf16>
      %42 = vector.extract_strided_slice %41 {offsets = [0, 0], sizes = [4, 32], strides = [1, 1]} : vector<6x32xbf16> to vector<4x32xbf16>
      %cst_49 = arith.constant dense<0.000000e+00> : vector<4x32xf32>
      %43 = tpu.matmul %42, %7, %cst_49 {dimension_numbers = #tpu.dot_dimension_numbers<[1], [0], [0], [1], [0, 0, 1, 1], [], []>} : vector<4x32xbf16>, vector<32x32xbf16>, vector<4x32xf32> -> vector<4x32xf32>
      %44 = arith.addf %36, %43 : vector<4x32xf32>
      %45 = vector.extract_strided_slice %41 {offsets = [1, 0], sizes = [4, 32], strides = [1, 1]} : vector<6x32xbf16> to vector<4x32xbf16>
      %cst_50 = arith.constant dense<0.000000e+00> : vector<4x32xf32>
      %46 = tpu.matmul %45, %9, %cst_50 {dimension_numbers = #tpu.dot_dimension_numbers<[1], [0], [0], [1], [0, 0, 1, 1], [], []>} : vector<4x32xbf16>, vector<32x32xbf16>, vector<4x32xf32> -> vector<4x32xf32>
      %47 = arith.addf %44, %46 : vector<4x32xf32>
      %48 = vector.extract_strided_slice %41 {offsets = [2, 0], sizes = [4, 32], strides = [1, 1]} : vector<6x32xbf16> to vector<4x32xbf16>
      %cst_51 = arith.constant dense<0.000000e+00> : vector<4x32xf32>
      %49 = tpu.matmul %48, %11, %cst_51 {dimension_numbers = #tpu.dot_dimension_numbers<[1], [0], [0], [1], [0, 0, 1, 1], [], []>} : vector<4x32xbf16>, vector<32x32xbf16>, vector<4x32xf32> -> vector<4x32xf32>
      %50 = arith.addf %47, %49 : vector<4x32xf32>
      %c1_i32_52 = arith.constant 1 : i32
      %51 = arith.muli %arg5, %c1_i32_52 : i32
      %c2_i32 = arith.constant 2 : i32
      %52 = arith.addi %51, %c2_i32 : i32
      %c0_53 = arith.constant 0 : index
      %53 = arith.index_cast %52 : i32 to index
      %c0_54 = arith.constant 0 : index
      %c0_55 = arith.constant 0 : index
      %54 = vector.load %arg1[%c0_53, %53, %c0_54, %c0_55] : memref<1x6x6x32xbf16, #tpu.memory_space<vmem>>, vector<1x1x6x32xbf16>
      %55 = vector.shape_cast %54 : vector<1x1x6x32xbf16> to vector<6x32xbf16>
      %56 = vector.extract_strided_slice %55 {offsets = [0, 0], sizes = [4, 32], strides = [1, 1]} : vector<6x32xbf16> to vector<4x32xbf16>
      %cst_56 = arith.constant dense<0.000000e+00> : vector<4x32xf32>
      %57 = tpu.matmul %56, %13, %cst_56 {dimension_numbers = #tpu.dot_dimension_numbers<[1], [0], [0], [1], [0, 0, 1, 1], [], []>} : vector<4x32xbf16>, vector<32x32xbf16>, vector<4x32xf32> -> vector<4x32xf32>
      %58 = arith.addf %50, %57 : vector<4x32xf32>
      %59 = vector.extract_strided_slice %55 {offsets = [1, 0], sizes = [4, 32], strides = [1, 1]} : vector<6x32xbf16> to vector<4x32xbf16>
      %cst_57 = arith.constant dense<0.000000e+00> : vector<4x32xf32>
      %60 = tpu.matmul %59, %15, %cst_57 {dimension_numbers = #tpu.dot_dimension_numbers<[1], [0], [0], [1], [0, 0, 1, 1], [], []>} : vector<4x32xbf16>, vector<32x32xbf16>, vector<4x32xf32> -> vector<4x32xf32>
      %61 = arith.addf %58, %60 : vector<4x32xf32>
      %62 = vector.extract_strided_slice %55 {offsets = [2, 0], sizes = [4, 32], strides = [1, 1]} : vector<6x32xbf16> to vector<4x32xbf16>
      %cst_58 = arith.constant dense<0.000000e+00> : vector<4x32xf32>
      %63 = tpu.matmul %62, %17, %cst_58 {dimension_numbers = #tpu.dot_dimension_numbers<[1], [0], [0], [1], [0, 0, 1, 1], [], []>} : vector<4x32xbf16>, vector<32x32xbf16>, vector<4x32xf32> -> vector<4x32xf32>
      %64 = arith.addf %61, %63 : vector<4x32xf32>
      %cst_59 = arith.constant 0.000000e+00 : f32
      %65 = vector.broadcast %cst_59 : f32 to vector<4x32xf32>
      %66 = arith.maximumf %64, %65 : vector<4x32xf32>
      %67 = arith.truncf %66 : vector<4x32xf32> to vector<4x32xbf16>
      %c0_60 = arith.constant 0 : index
      %68 = arith.index_cast %arg5 : i32 to index
      %c0_61 = arith.constant 0 : index
      %c0_62 = arith.constant 0 : index
      %69 = vector.load %arg4[%c0_60, %68, %c0_61, %c0_62] : memref<1x4x4x32xbf16, #tpu.memory_space<vmem>>, vector<1x1x4x32xbf16>
      %70 = vector.shape_cast %69 : vector<1x1x4x32xbf16> to vector<4x32xbf16>
      %71 = vector.shape_cast %67 : vector<4x32xbf16> to vector<1x1x4x32xbf16>
      tpu.vector_store %arg4[%c0_60, %68, %c0_61, %c0_62], %71 {strides = array<i32>} : memref<1x4x4x32xbf16, #tpu.memory_space<vmem>>, vector<1x1x4x32xbf16>,
    }
    %c4_i32_35 = arith.constant 4 : i32
    return
  }
  func.func @transform_0(%arg0: i32) -> (i32, i32, i32, i32) {
    %c0_i32 = arith.constant 0 : i32
    %c0_i32_0 = arith.constant 0 : i32
    %c0_i32_1 = arith.constant 0 : i32
    %c0_i32_2 = arith.constant 0 : i32
    return %arg0, %c0_i32, %c0_i32_0, %c0_i32_1 : i32, i32, i32, i32
  }
  func.func @transform_1(%arg0: i32) -> (i32, i32, i32, i32) {
    %c0_i32 = arith.constant 0 : i32
    %c0_i32_0 = arith.constant 0 : i32
    %c0_i32_1 = arith.constant 0 : i32
    %c0_i32_2 = arith.constant 0 : i32
    %c0_i32_3 = arith.constant 0 : i32
    return %c0_i32, %c0_i32_0, %c0_i32_1, %c0_i32_2 : i32, i32, i32, i32
  }
  func.func @transform_2(%arg0: i32) -> (i32, i32) {
    %c0_i32 = arith.constant 0 : i32
    %c0_i32_0 = arith.constant 0 : i32
    %c0_i32_1 = arith.constant 0 : i32
    return %c0_i32, %c0_i32_0 : i32, i32
  }
  func.func @transform_3(%arg0: i32) -> (i32, i32, i32, i32) {
    %c0_i32 = arith.constant 0 : i32
    %c0_i32_0 = arith.constant 0 : i32
    %c0_i32_1 = arith.constant 0 : i32
    %c0_i32_2 = arith.constant 0 : i32
    return %arg0, %c0_i32, %c0_i32_0, %c0_i32_1 : i32, i32, i32, i32
  }
}

module attributes {stable_mosaic.version = 11 : i64} {
  func.func @_mm_res_kernel(%arg0: i32, %arg1: memref<16x32xbf16, #tpu.memory_space<vmem>>, %arg2: memref<32x128xbf16, #tpu.memory_space<vmem>>, %arg3: memref<1x128xf32, #tpu.memory_space<vmem>>, %arg4: memref<16x128xbf16, #tpu.memory_space<vmem>>, %arg5: memref<16x128xbf16, #tpu.memory_space<vmem>>) attributes {dimension_semantics = [#tpu.dimension_semantics<parallel>], iteration_bounds = array<i64: 2>, scalar_prefetch = 0 : i64, scratch_operands = 0 : i64, tpu.core_type = #tpu.core_type<tc>, window_params = [{transform_indices = @transform_0, window_bounds = array<i64: 16, 32>}, {pipeline_mode = #tpu.pipeline_mode<synchronous>, transform_indices = @transform_1, window_bounds = array<i64: 32, 128>}, {pipeline_mode = #tpu.pipeline_mode<synchronous>, transform_indices = @transform_2, window_bounds = array<i64: 1, 128>}, {transform_indices = @transform_3, window_bounds = array<i64: 16, 128>}, {transform_indices = @transform_4, window_bounds = array<i64: 16, 128>}]} {
    %c0 = arith.constant 0 : index
    %c0_0 = arith.constant 0 : index
    %0 = vector.load %arg1[%c0, %c0_0] : memref<16x32xbf16, #tpu.memory_space<vmem>>, vector<16x32xbf16>
    %c0_1 = arith.constant 0 : index
    %c0_2 = arith.constant 0 : index
    %1 = vector.load %arg2[%c0_1, %c0_2] : memref<32x128xbf16, #tpu.memory_space<vmem>>, vector<32x128xbf16>
    %cst = arith.constant dense<0.000000e+00> : vector<16x128xf32>
    %2 = tpu.matmul %0, %1, %cst {dimension_numbers = #tpu.dot_dimension_numbers<[1], [0], [0], [1], [0, 0, 1, 1], [], []>} : vector<16x32xbf16>, vector<32x128xbf16>, vector<16x128xf32> -> vector<16x128xf32>
    %c0_3 = arith.constant 0 : index
    %c0_4 = arith.constant 0 : index
    %3 = vector.load %arg3[%c0_3, %c0_4] : memref<1x128xf32, #tpu.memory_space<vmem>>, vector<1x128xf32>
    %4 = vector.broadcast %3 : vector<1x128xf32> to vector<16x128xf32>
    %5 = arith.addf %2, %4 : vector<16x128xf32>
    %c0_5 = arith.constant 0 : index
    %c0_6 = arith.constant 0 : index
    %6 = vector.load %arg4[%c0_5, %c0_6] : memref<16x128xbf16, #tpu.memory_space<vmem>>, vector<16x128xbf16>
    %7 = arith.extf %6 : vector<16x128xbf16> to vector<16x128xf32>
    %8 = arith.addf %5, %7 : vector<16x128xf32>
    %cst_7 = arith.constant 0.000000e+00 : f32
    %9 = vector.broadcast %cst_7 : f32 to vector<16x128xf32>
    %10 = arith.maximumf %8, %9 : vector<16x128xf32>
    %11 = arith.truncf %10 : vector<16x128xf32> to vector<16x128xbf16>
    %c0_8 = arith.constant 0 : index
    %c0_9 = arith.constant 0 : index
    %12 = vector.load %arg5[%c0_8, %c0_9] : memref<16x128xbf16, #tpu.memory_space<vmem>>, vector<16x128xbf16>
    tpu.vector_store %arg5[%c0_8, %c0_9], %11 {strides = array<i32>} : memref<16x128xbf16, #tpu.memory_space<vmem>>, vector<16x128xbf16>,
    return
  }
  func.func @transform_0(%arg0: i32) -> (i32, i32) {
    %c0_i32 = arith.constant 0 : i32
    %c0_i32_0 = arith.constant 0 : i32
    return %arg0, %c0_i32 : i32, i32
  }
  func.func @transform_1(%arg0: i32) -> (i32, i32) {
    %c0_i32 = arith.constant 0 : i32
    %c0_i32_0 = arith.constant 0 : i32
    %c0_i32_1 = arith.constant 0 : i32
    return %c0_i32, %c0_i32_0 : i32, i32
  }
  func.func @transform_2(%arg0: i32) -> (i32, i32) {
    %c0_i32 = arith.constant 0 : i32
    %c0_i32_0 = arith.constant 0 : i32
    %c0_i32_1 = arith.constant 0 : i32
    return %c0_i32, %c0_i32_0 : i32, i32
  }
  func.func @transform_3(%arg0: i32) -> (i32, i32) {
    %c0_i32 = arith.constant 0 : i32
    %c0_i32_0 = arith.constant 0 : i32
    return %arg0, %c0_i32 : i32, i32
  }
  func.func @transform_4(%arg0: i32) -> (i32, i32) {
    %c0_i32 = arith.constant 0 : i32
    %c0_i32_0 = arith.constant 0 : i32
    return %arg0, %c0_i32 : i32, i32
  }
}

module attributes {stable_mosaic.version = 11 : i64} {
  func.func @_mm_kernel(%arg0: i32, %arg1: memref<16x128xbf16, #tpu.memory_space<vmem>>, %arg2: memref<128x64xbf16, #tpu.memory_space<vmem>>, %arg3: memref<1x64xf32, #tpu.memory_space<vmem>>, %arg4: memref<16x64xbf16, #tpu.memory_space<vmem>>) attributes {dimension_semantics = [#tpu.dimension_semantics<parallel>], iteration_bounds = array<i64: 2>, scalar_prefetch = 0 : i64, scratch_operands = 0 : i64, tpu.core_type = #tpu.core_type<tc>, window_params = [{transform_indices = @transform_0, window_bounds = array<i64: 16, 128>}, {pipeline_mode = #tpu.pipeline_mode<synchronous>, transform_indices = @transform_1, window_bounds = array<i64: 128, 64>}, {pipeline_mode = #tpu.pipeline_mode<synchronous>, transform_indices = @transform_2, window_bounds = array<i64: 1, 64>}, {transform_indices = @transform_3, window_bounds = array<i64: 16, 64>}]} {
    %c0 = arith.constant 0 : index
    %c0_0 = arith.constant 0 : index
    %0 = vector.load %arg1[%c0, %c0_0] : memref<16x128xbf16, #tpu.memory_space<vmem>>, vector<16x128xbf16>
    %c0_1 = arith.constant 0 : index
    %c0_2 = arith.constant 0 : index
    %1 = vector.load %arg2[%c0_1, %c0_2] : memref<128x64xbf16, #tpu.memory_space<vmem>>, vector<128x64xbf16>
    %cst = arith.constant dense<0.000000e+00> : vector<16x64xf32>
    %2 = tpu.matmul %0, %1, %cst {dimension_numbers = #tpu.dot_dimension_numbers<[1], [0], [0], [1], [0, 0, 1, 1], [], []>} : vector<16x128xbf16>, vector<128x64xbf16>, vector<16x64xf32> -> vector<16x64xf32>
    %c0_3 = arith.constant 0 : index
    %c0_4 = arith.constant 0 : index
    %3 = vector.load %arg3[%c0_3, %c0_4] : memref<1x64xf32, #tpu.memory_space<vmem>>, vector<1x64xf32>
    %4 = vector.broadcast %3 : vector<1x64xf32> to vector<16x64xf32>
    %5 = arith.addf %2, %4 : vector<16x64xf32>
    %cst_5 = arith.constant 0.000000e+00 : f32
    %6 = vector.broadcast %cst_5 : f32 to vector<16x64xf32>
    %7 = arith.maximumf %5, %6 : vector<16x64xf32>
    %8 = arith.truncf %7 : vector<16x64xf32> to vector<16x64xbf16>
    %c0_6 = arith.constant 0 : index
    %c0_7 = arith.constant 0 : index
    %9 = vector.load %arg4[%c0_6, %c0_7] : memref<16x64xbf16, #tpu.memory_space<vmem>>, vector<16x64xbf16>
    tpu.vector_store %arg4[%c0_6, %c0_7], %8 {strides = array<i32>} : memref<16x64xbf16, #tpu.memory_space<vmem>>, vector<16x64xbf16>,
    return
  }
  func.func @transform_0(%arg0: i32) -> (i32, i32) {
    %c0_i32 = arith.constant 0 : i32
    %c0_i32_0 = arith.constant 0 : i32
    return %arg0, %c0_i32 : i32, i32
  }
  func.func @transform_1(%arg0: i32) -> (i32, i32) {
    %c0_i32 = arith.constant 0 : i32
    %c0_i32_0 = arith.constant 0 : i32
    %c0_i32_1 = arith.constant 0 : i32
    return %c0_i32, %c0_i32_0 : i32, i32
  }
  func.func @transform_2(%arg0: i32) -> (i32, i32) {
    %c0_i32 = arith.constant 0 : i32
    %c0_i32_0 = arith.constant 0 : i32
    %c0_i32_1 = arith.constant 0 : i32
    return %c0_i32, %c0_i32_0 : i32, i32
  }
  func.func @transform_3(%arg0: i32) -> (i32, i32) {
    %c0_i32 = arith.constant 0 : i32
    %c0_i32_0 = arith.constant 0 : i32
    return %arg0, %c0_i32 : i32, i32
  }
}

module attributes {stable_mosaic.version = 11 : i64} {
  func.func @_conv3x3_kernel(%arg0: i32, %arg1: memref<1x6x6x64xbf16, #tpu.memory_space<vmem>>, %arg2: memref<3x3x64x64xbf16, #tpu.memory_space<vmem>>, %arg3: memref<1x64xf32, #tpu.memory_space<vmem>>, %arg4: memref<1x4x4x64xbf16, #tpu.memory_space<vmem>>) attributes {dimension_semantics = [#tpu.dimension_semantics<parallel>], iteration_bounds = array<i64: 2>, scalar_prefetch = 0 : i64, scratch_operands = 0 : i64, tpu.core_type = #tpu.core_type<tc>, window_params = [{transform_indices = @transform_0, window_bounds = array<i64: 1, 6, 6, 64>}, {pipeline_mode = #tpu.pipeline_mode<synchronous>, transform_indices = @transform_1, window_bounds = array<i64: 3, 3, 64, 64>}, {pipeline_mode = #tpu.pipeline_mode<synchronous>, transform_indices = @transform_2, window_bounds = array<i64: 1, 64>}, {transform_indices = @transform_3, window_bounds = array<i64: 1, 4, 4, 64>}]} {
    %c0 = arith.constant 0 : index
    %c0_0 = arith.constant 0 : index
    %c0_1 = arith.constant 0 : index
    %c0_2 = arith.constant 0 : index
    %0 = vector.load %arg2[%c0, %c0_0, %c0_1, %c0_2] : memref<3x3x64x64xbf16, #tpu.memory_space<vmem>>, vector<1x1x64x64xbf16>
    %1 = vector.shape_cast %0 : vector<1x1x64x64xbf16> to vector<64x64xbf16>
    %c0_3 = arith.constant 0 : index
    %c1 = arith.constant 1 : index
    %c0_4 = arith.constant 0 : index
    %c0_5 = arith.constant 0 : index
    %2 = vector.load %arg2[%c0_3, %c1, %c0_4, %c0_5] : memref<3x3x64x64xbf16, #tpu.memory_space<vmem>>, vector<1x1x64x64xbf16>
    %3 = vector.shape_cast %2 : vector<1x1x64x64xbf16> to vector<64x64xbf16>
    %c0_6 = arith.constant 0 : index
    %c2 = arith.constant 2 : index
    %c0_7 = arith.constant 0 : index
    %c0_8 = arith.constant 0 : index
    %4 = vector.load %arg2[%c0_6, %c2, %c0_7, %c0_8] : memref<3x3x64x64xbf16, #tpu.memory_space<vmem>>, vector<1x1x64x64xbf16>
    %5 = vector.shape_cast %4 : vector<1x1x64x64xbf16> to vector<64x64xbf16>
    %c1_9 = arith.constant 1 : index
    %c0_10 = arith.constant 0 : index
    %c0_11 = arith.constant 0 : index
    %c0_12 = arith.constant 0 : index
    %6 = vector.load %arg2[%c1_9, %c0_10, %c0_11, %c0_12] : memref<3x3x64x64xbf16, #tpu.memory_space<vmem>>, vector<1x1x64x64xbf16>
    %7 = vector.shape_cast %6 : vector<1x1x64x64xbf16> to vector<64x64xbf16>
    %c1_13 = arith.constant 1 : index
    %c1_14 = arith.constant 1 : index
    %c0_15 = arith.constant 0 : index
    %c0_16 = arith.constant 0 : index
    %8 = vector.load %arg2[%c1_13, %c1_14, %c0_15, %c0_16] : memref<3x3x64x64xbf16, #tpu.memory_space<vmem>>, vector<1x1x64x64xbf16>
    %9 = vector.shape_cast %8 : vector<1x1x64x64xbf16> to vector<64x64xbf16>
    %c1_17 = arith.constant 1 : index
    %c2_18 = arith.constant 2 : index
    %c0_19 = arith.constant 0 : index
    %c0_20 = arith.constant 0 : index
    %10 = vector.load %arg2[%c1_17, %c2_18, %c0_19, %c0_20] : memref<3x3x64x64xbf16, #tpu.memory_space<vmem>>, vector<1x1x64x64xbf16>
    %11 = vector.shape_cast %10 : vector<1x1x64x64xbf16> to vector<64x64xbf16>
    %c2_21 = arith.constant 2 : index
    %c0_22 = arith.constant 0 : index
    %c0_23 = arith.constant 0 : index
    %c0_24 = arith.constant 0 : index
    %12 = vector.load %arg2[%c2_21, %c0_22, %c0_23, %c0_24] : memref<3x3x64x64xbf16, #tpu.memory_space<vmem>>, vector<1x1x64x64xbf16>
    %13 = vector.shape_cast %12 : vector<1x1x64x64xbf16> to vector<64x64xbf16>
    %c2_25 = arith.constant 2 : index
    %c1_26 = arith.constant 1 : index
    %c0_27 = arith.constant 0 : index
    %c0_28 = arith.constant 0 : index
    %14 = vector.load %arg2[%c2_25, %c1_26, %c0_27, %c0_28] : memref<3x3x64x64xbf16, #tpu.memory_space<vmem>>, vector<1x1x64x64xbf16>
    %15 = vector.shape_cast %14 : vector<1x1x64x64xbf16> to vector<64x64xbf16>
    %c2_29 = arith.constant 2 : index
    %c2_30 = arith.constant 2 : index
    %c0_31 = arith.constant 0 : index
    %c0_32 = arith.constant 0 : index
    %16 = vector.load %arg2[%c2_29, %c2_30, %c0_31, %c0_32] : memref<3x3x64x64xbf16, #tpu.memory_space<vmem>>, vector<1x1x64x64xbf16>
    %17 = vector.shape_cast %16 : vector<1x1x64x64xbf16> to vector<64x64xbf16>
    %c0_33 = arith.constant 0 : index
    %c0_34 = arith.constant 0 : index
    %18 = vector.load %arg3[%c0_33, %c0_34] : memref<1x64xf32, #tpu.memory_space<vmem>>, vector<1x64xf32>
    %c0_i32 = arith.constant 0 : i32
    %c4_i32 = arith.constant 4 : i32
    %19 = arith.addi %c0_i32, %c4_i32 : i32
    %c1_i32 = arith.constant 1 : i32
    scf.for %arg5 = %c0_i32 to %19 step %c1_i32  : i32 {
      %cst = arith.constant 0.000000e+00 : f32
      %20 = vector.broadcast %cst : f32 to vector<4x64xf32>
      %21 = vector.broadcast %18 : vector<1x64xf32> to vector<4x64xf32>
      %22 = arith.addf %20, %21 : vector<4x64xf32>
      %c1_i32_36 = arith.constant 1 : i32
      %23 = arith.muli %arg5, %c1_i32_36 : i32
      %c0_i32_37 = arith.constant 0 : i32
      %24 = arith.addi %23, %c0_i32_37 : i32
      %c0_38 = arith.constant 0 : index
      %25 = arith.index_cast %24 : i32 to index
      %c0_39 = arith.constant 0 : index
      %c0_40 = arith.constant 0 : index
      %26 = vector.load %arg1[%c0_38, %25, %c0_39, %c0_40] : memref<1x6x6x64xbf16, #tpu.memory_space<vmem>>, vector<1x1x6x64xbf16>
      %27 = vector.shape_cast %26 : vector<1x1x6x64xbf16> to vector<6x64xbf16>
      %28 = vector.extract_strided_slice %27 {offsets = [0, 0], sizes = [4, 64], strides = [1, 1]} : vector<6x64xbf16> to vector<4x64xbf16>
      %cst_41 = arith.constant dense<0.000000e+00> : vector<4x64xf32>
      %29 = tpu.matmul %28, %1, %cst_41 {dimension_numbers = #tpu.dot_dimension_numbers<[1], [0], [0], [1], [0, 0, 1, 1], [], []>} : vector<4x64xbf16>, vector<64x64xbf16>, vector<4x64xf32> -> vector<4x64xf32>
      %30 = arith.addf %22, %29 : vector<4x64xf32>
      %31 = vector.extract_strided_slice %27 {offsets = [1, 0], sizes = [4, 64], strides = [1, 1]} : vector<6x64xbf16> to vector<4x64xbf16>
      %cst_42 = arith.constant dense<0.000000e+00> : vector<4x64xf32>
      %32 = tpu.matmul %31, %3, %cst_42 {dimension_numbers = #tpu.dot_dimension_numbers<[1], [0], [0], [1], [0, 0, 1, 1], [], []>} : vector<4x64xbf16>, vector<64x64xbf16>, vector<4x64xf32> -> vector<4x64xf32>
      %33 = arith.addf %30, %32 : vector<4x64xf32>
      %34 = vector.extract_strided_slice %27 {offsets = [2, 0], sizes = [4, 64], strides = [1, 1]} : vector<6x64xbf16> to vector<4x64xbf16>
      %cst_43 = arith.constant dense<0.000000e+00> : vector<4x64xf32>
      %35 = tpu.matmul %34, %5, %cst_43 {dimension_numbers = #tpu.dot_dimension_numbers<[1], [0], [0], [1], [0, 0, 1, 1], [], []>} : vector<4x64xbf16>, vector<64x64xbf16>, vector<4x64xf32> -> vector<4x64xf32>
      %36 = arith.addf %33, %35 : vector<4x64xf32>
      %c1_i32_44 = arith.constant 1 : i32
      %37 = arith.muli %arg5, %c1_i32_44 : i32
      %c1_i32_45 = arith.constant 1 : i32
      %38 = arith.addi %37, %c1_i32_45 : i32
      %c0_46 = arith.constant 0 : index
      %39 = arith.index_cast %38 : i32 to index
      %c0_47 = arith.constant 0 : index
      %c0_48 = arith.constant 0 : index
      %40 = vector.load %arg1[%c0_46, %39, %c0_47, %c0_48] : memref<1x6x6x64xbf16, #tpu.memory_space<vmem>>, vector<1x1x6x64xbf16>
      %41 = vector.shape_cast %40 : vector<1x1x6x64xbf16> to vector<6x64xbf16>
      %42 = vector.extract_strided_slice %41 {offsets = [0, 0], sizes = [4, 64], strides = [1, 1]} : vector<6x64xbf16> to vector<4x64xbf16>
      %cst_49 = arith.constant dense<0.000000e+00> : vector<4x64xf32>
      %43 = tpu.matmul %42, %7, %cst_49 {dimension_numbers = #tpu.dot_dimension_numbers<[1], [0], [0], [1], [0, 0, 1, 1], [], []>} : vector<4x64xbf16>, vector<64x64xbf16>, vector<4x64xf32> -> vector<4x64xf32>
      %44 = arith.addf %36, %43 : vector<4x64xf32>
      %45 = vector.extract_strided_slice %41 {offsets = [1, 0], sizes = [4, 64], strides = [1, 1]} : vector<6x64xbf16> to vector<4x64xbf16>
      %cst_50 = arith.constant dense<0.000000e+00> : vector<4x64xf32>
      %46 = tpu.matmul %45, %9, %cst_50 {dimension_numbers = #tpu.dot_dimension_numbers<[1], [0], [0], [1], [0, 0, 1, 1], [], []>} : vector<4x64xbf16>, vector<64x64xbf16>, vector<4x64xf32> -> vector<4x64xf32>
      %47 = arith.addf %44, %46 : vector<4x64xf32>
      %48 = vector.extract_strided_slice %41 {offsets = [2, 0], sizes = [4, 64], strides = [1, 1]} : vector<6x64xbf16> to vector<4x64xbf16>
      %cst_51 = arith.constant dense<0.000000e+00> : vector<4x64xf32>
      %49 = tpu.matmul %48, %11, %cst_51 {dimension_numbers = #tpu.dot_dimension_numbers<[1], [0], [0], [1], [0, 0, 1, 1], [], []>} : vector<4x64xbf16>, vector<64x64xbf16>, vector<4x64xf32> -> vector<4x64xf32>
      %50 = arith.addf %47, %49 : vector<4x64xf32>
      %c1_i32_52 = arith.constant 1 : i32
      %51 = arith.muli %arg5, %c1_i32_52 : i32
      %c2_i32 = arith.constant 2 : i32
      %52 = arith.addi %51, %c2_i32 : i32
      %c0_53 = arith.constant 0 : index
      %53 = arith.index_cast %52 : i32 to index
      %c0_54 = arith.constant 0 : index
      %c0_55 = arith.constant 0 : index
      %54 = vector.load %arg1[%c0_53, %53, %c0_54, %c0_55] : memref<1x6x6x64xbf16, #tpu.memory_space<vmem>>, vector<1x1x6x64xbf16>
      %55 = vector.shape_cast %54 : vector<1x1x6x64xbf16> to vector<6x64xbf16>
      %56 = vector.extract_strided_slice %55 {offsets = [0, 0], sizes = [4, 64], strides = [1, 1]} : vector<6x64xbf16> to vector<4x64xbf16>
      %cst_56 = arith.constant dense<0.000000e+00> : vector<4x64xf32>
      %57 = tpu.matmul %56, %13, %cst_56 {dimension_numbers = #tpu.dot_dimension_numbers<[1], [0], [0], [1], [0, 0, 1, 1], [], []>} : vector<4x64xbf16>, vector<64x64xbf16>, vector<4x64xf32> -> vector<4x64xf32>
      %58 = arith.addf %50, %57 : vector<4x64xf32>
      %59 = vector.extract_strided_slice %55 {offsets = [1, 0], sizes = [4, 64], strides = [1, 1]} : vector<6x64xbf16> to vector<4x64xbf16>
      %cst_57 = arith.constant dense<0.000000e+00> : vector<4x64xf32>
      %60 = tpu.matmul %59, %15, %cst_57 {dimension_numbers = #tpu.dot_dimension_numbers<[1], [0], [0], [1], [0, 0, 1, 1], [], []>} : vector<4x64xbf16>, vector<64x64xbf16>, vector<4x64xf32> -> vector<4x64xf32>
      %61 = arith.addf %58, %60 : vector<4x64xf32>
      %62 = vector.extract_strided_slice %55 {offsets = [2, 0], sizes = [4, 64], strides = [1, 1]} : vector<6x64xbf16> to vector<4x64xbf16>
      %cst_58 = arith.constant dense<0.000000e+00> : vector<4x64xf32>
      %63 = tpu.matmul %62, %17, %cst_58 {dimension_numbers = #tpu.dot_dimension_numbers<[1], [0], [0], [1], [0, 0, 1, 1], [], []>} : vector<4x64xbf16>, vector<64x64xbf16>, vector<4x64xf32> -> vector<4x64xf32>
      %64 = arith.addf %61, %63 : vector<4x64xf32>
      %cst_59 = arith.constant 0.000000e+00 : f32
      %65 = vector.broadcast %cst_59 : f32 to vector<4x64xf32>
      %66 = arith.maximumf %64, %65 : vector<4x64xf32>
      %67 = arith.truncf %66 : vector<4x64xf32> to vector<4x64xbf16>
      %c0_60 = arith.constant 0 : index
      %68 = arith.index_cast %arg5 : i32 to index
      %c0_61 = arith.constant 0 : index
      %c0_62 = arith.constant 0 : index
      %69 = vector.load %arg4[%c0_60, %68, %c0_61, %c0_62] : memref<1x4x4x64xbf16, #tpu.memory_space<vmem>>, vector<1x1x4x64xbf16>
      %70 = vector.shape_cast %69 : vector<1x1x4x64xbf16> to vector<4x64xbf16>
      %71 = vector.shape_cast %67 : vector<4x64xbf16> to vector<1x1x4x64xbf16>
      tpu.vector_store %arg4[%c0_60, %68, %c0_61, %c0_62], %71 {strides = array<i32>} : memref<1x4x4x64xbf16, #tpu.memory_space<vmem>>, vector<1x1x4x64xbf16>,
    }
    %c4_i32_35 = arith.constant 4 : i32
    return
  }
  func.func @transform_0(%arg0: i32) -> (i32, i32, i32, i32) {
    %c0_i32 = arith.constant 0 : i32
    %c0_i32_0 = arith.constant 0 : i32
    %c0_i32_1 = arith.constant 0 : i32
    %c0_i32_2 = arith.constant 0 : i32
    return %arg0, %c0_i32, %c0_i32_0, %c0_i32_1 : i32, i32, i32, i32
  }
  func.func @transform_1(%arg0: i32) -> (i32, i32, i32, i32) {
    %c0_i32 = arith.constant 0 : i32
    %c0_i32_0 = arith.constant 0 : i32
    %c0_i32_1 = arith.constant 0 : i32
    %c0_i32_2 = arith.constant 0 : i32
    %c0_i32_3 = arith.constant 0 : i32
    return %c0_i32, %c0_i32_0, %c0_i32_1, %c0_i32_2 : i32, i32, i32, i32
  }
  func.func @transform_2(%arg0: i32) -> (i32, i32) {
    %c0_i32 = arith.constant 0 : i32
    %c0_i32_0 = arith.constant 0 : i32
    %c0_i32_1 = arith.constant 0 : i32
    return %c0_i32, %c0_i32_0 : i32, i32
  }
  func.func @transform_3(%arg0: i32) -> (i32, i32, i32, i32) {
    %c0_i32 = arith.constant 0 : i32
    %c0_i32_0 = arith.constant 0 : i32
    %c0_i32_1 = arith.constant 0 : i32
    %c0_i32_2 = arith.constant 0 : i32
    return %arg0, %c0_i32, %c0_i32_0, %c0_i32_1 : i32, i32, i32, i32
  }
}

module attributes {stable_mosaic.version = 11 : i64} {
  func.func @_mm_ds_kernel(%arg0: i32, %arg1: memref<16x64xbf16, #tpu.memory_space<vmem>>, %arg2: memref<64x256xbf16, #tpu.memory_space<vmem>>, %arg3: memref<1x256xf32, #tpu.memory_space<vmem>>, %arg4: memref<16x128xbf16, #tpu.memory_space<vmem>>, %arg5: memref<128x256xbf16, #tpu.memory_space<vmem>>, %arg6: memref<1x256xf32, #tpu.memory_space<vmem>>, %arg7: memref<16x256xbf16, #tpu.memory_space<vmem>>) attributes {dimension_semantics = [#tpu.dimension_semantics<parallel>], iteration_bounds = array<i64: 2>, scalar_prefetch = 0 : i64, scratch_operands = 0 : i64, tpu.core_type = #tpu.core_type<tc>, window_params = [{transform_indices = @transform_0, window_bounds = array<i64: 16, 64>}, {pipeline_mode = #tpu.pipeline_mode<synchronous>, transform_indices = @transform_1, window_bounds = array<i64: 64, 256>}, {pipeline_mode = #tpu.pipeline_mode<synchronous>, transform_indices = @transform_2, window_bounds = array<i64: 1, 256>}, {transform_indices = @transform_3, window_bounds = array<i64: 16, 128>}, {pipeline_mode = #tpu.pipeline_mode<synchronous>, transform_indices = @transform_4, window_bounds = array<i64: 128, 256>}, {pipeline_mode = #tpu.pipeline_mode<synchronous>, transform_indices = @transform_5, window_bounds = array<i64: 1, 256>}, {transform_indices = @transform_6, window_bounds = array<i64: 16, 256>}]} {
    %c0 = arith.constant 0 : index
    %c0_0 = arith.constant 0 : index
    %0 = vector.load %arg1[%c0, %c0_0] : memref<16x64xbf16, #tpu.memory_space<vmem>>, vector<16x64xbf16>
    %c0_1 = arith.constant 0 : index
    %c0_2 = arith.constant 0 : index
    %1 = vector.load %arg2[%c0_1, %c0_2] : memref<64x256xbf16, #tpu.memory_space<vmem>>, vector<64x256xbf16>
    %cst = arith.constant dense<0.000000e+00> : vector<16x256xf32>
    %2 = tpu.matmul %0, %1, %cst {dimension_numbers = #tpu.dot_dimension_numbers<[1], [0], [0], [1], [0, 0, 1, 1], [], []>} : vector<16x64xbf16>, vector<64x256xbf16>, vector<16x256xf32> -> vector<16x256xf32>
    %c0_3 = arith.constant 0 : index
    %c0_4 = arith.constant 0 : index
    %3 = vector.load %arg4[%c0_3, %c0_4] : memref<16x128xbf16, #tpu.memory_space<vmem>>, vector<16x128xbf16>
    %c0_5 = arith.constant 0 : index
    %c0_6 = arith.constant 0 : index
    %4 = vector.load %arg5[%c0_5, %c0_6] : memref<128x256xbf16, #tpu.memory_space<vmem>>, vector<128x256xbf16>
    %cst_7 = arith.constant dense<0.000000e+00> : vector<16x256xf32>
    %5 = tpu.matmul %3, %4, %cst_7 {dimension_numbers = #tpu.dot_dimension_numbers<[1], [0], [0], [1], [0, 0, 1, 1], [], []>} : vector<16x128xbf16>, vector<128x256xbf16>, vector<16x256xf32> -> vector<16x256xf32>
    %6 = arith.addf %2, %5 : vector<16x256xf32>
    %c0_8 = arith.constant 0 : index
    %c0_9 = arith.constant 0 : index
    %7 = vector.load %arg3[%c0_8, %c0_9] : memref<1x256xf32, #tpu.memory_space<vmem>>, vector<1x256xf32>
    %8 = vector.broadcast %7 : vector<1x256xf32> to vector<16x256xf32>
    %9 = arith.addf %6, %8 : vector<16x256xf32>
    %c0_10 = arith.constant 0 : index
    %c0_11 = arith.constant 0 : index
    %10 = vector.load %arg6[%c0_10, %c0_11] : memref<1x256xf32, #tpu.memory_space<vmem>>, vector<1x256xf32>
    %11 = vector.broadcast %10 : vector<1x256xf32> to vector<16x256xf32>
    %12 = arith.addf %9, %11 : vector<16x256xf32>
    %cst_12 = arith.constant 0.000000e+00 : f32
    %13 = vector.broadcast %cst_12 : f32 to vector<16x256xf32>
    %14 = arith.maximumf %12, %13 : vector<16x256xf32>
    %15 = arith.truncf %14 : vector<16x256xf32> to vector<16x256xbf16>
    %c0_13 = arith.constant 0 : index
    %c0_14 = arith.constant 0 : index
    %16 = vector.load %arg7[%c0_13, %c0_14] : memref<16x256xbf16, #tpu.memory_space<vmem>>, vector<16x256xbf16>
    tpu.vector_store %arg7[%c0_13, %c0_14], %15 {strides = array<i32>} : memref<16x256xbf16, #tpu.memory_space<vmem>>, vector<16x256xbf16>,
    return
  }
  func.func @transform_0(%arg0: i32) -> (i32, i32) {
    %c0_i32 = arith.constant 0 : i32
    %c0_i32_0 = arith.constant 0 : i32
    return %arg0, %c0_i32 : i32, i32
  }
  func.func @transform_1(%arg0: i32) -> (i32, i32) {
    %c0_i32 = arith.constant 0 : i32
    %c0_i32_0 = arith.constant 0 : i32
    %c0_i32_1 = arith.constant 0 : i32
    return %c0_i32, %c0_i32_0 : i32, i32
  }
  func.func @transform_2(%arg0: i32) -> (i32, i32) {
    %c0_i32 = arith.constant 0 : i32
    %c0_i32_0 = arith.constant 0 : i32
    %c0_i32_1 = arith.constant 0 : i32
    return %c0_i32, %c0_i32_0 : i32, i32
  }
  func.func @transform_3(%arg0: i32) -> (i32, i32) {
    %c0_i32 = arith.constant 0 : i32
    %c0_i32_0 = arith.constant 0 : i32
    return %arg0, %c0_i32 : i32, i32
  }
  func.func @transform_4(%arg0: i32) -> (i32, i32) {
    %c0_i32 = arith.constant 0 : i32
    %c0_i32_0 = arith.constant 0 : i32
    %c0_i32_1 = arith.constant 0 : i32
    return %c0_i32, %c0_i32_0 : i32, i32
  }
  func.func @transform_5(%arg0: i32) -> (i32, i32) {
    %c0_i32 = arith.constant 0 : i32
    %c0_i32_0 = arith.constant 0 : i32
    %c0_i32_1 = arith.constant 0 : i32
    return %c0_i32, %c0_i32_0 : i32, i32
  }
  func.func @transform_6(%arg0: i32) -> (i32, i32) {
    %c0_i32 = arith.constant 0 : i32
    %c0_i32_0 = arith.constant 0 : i32
    return %arg0, %c0_i32 : i32, i32
  }
}

module attributes {stable_mosaic.version = 11 : i64} {
  func.func @_mm_kernel(%arg0: i32, %arg1: memref<16x256xbf16, #tpu.memory_space<vmem>>, %arg2: memref<256x64xbf16, #tpu.memory_space<vmem>>, %arg3: memref<1x64xf32, #tpu.memory_space<vmem>>, %arg4: memref<16x64xbf16, #tpu.memory_space<vmem>>) attributes {dimension_semantics = [#tpu.dimension_semantics<parallel>], iteration_bounds = array<i64: 2>, scalar_prefetch = 0 : i64, scratch_operands = 0 : i64, tpu.core_type = #tpu.core_type<tc>, window_params = [{transform_indices = @transform_0, window_bounds = array<i64: 16, 256>}, {pipeline_mode = #tpu.pipeline_mode<synchronous>, transform_indices = @transform_1, window_bounds = array<i64: 256, 64>}, {pipeline_mode = #tpu.pipeline_mode<synchronous>, transform_indices = @transform_2, window_bounds = array<i64: 1, 64>}, {transform_indices = @transform_3, window_bounds = array<i64: 16, 64>}]} {
    %c0 = arith.constant 0 : index
    %c0_0 = arith.constant 0 : index
    %0 = vector.load %arg1[%c0, %c0_0] : memref<16x256xbf16, #tpu.memory_space<vmem>>, vector<16x256xbf16>
    %c0_1 = arith.constant 0 : index
    %c0_2 = arith.constant 0 : index
    %1 = vector.load %arg2[%c0_1, %c0_2] : memref<256x64xbf16, #tpu.memory_space<vmem>>, vector<256x64xbf16>
    %cst = arith.constant dense<0.000000e+00> : vector<16x64xf32>
    %2 = tpu.matmul %0, %1, %cst {dimension_numbers = #tpu.dot_dimension_numbers<[1], [0], [0], [1], [0, 0, 1, 1], [], []>} : vector<16x256xbf16>, vector<256x64xbf16>, vector<16x64xf32> -> vector<16x64xf32>
    %c0_3 = arith.constant 0 : index
    %c0_4 = arith.constant 0 : index
    %3 = vector.load %arg3[%c0_3, %c0_4] : memref<1x64xf32, #tpu.memory_space<vmem>>, vector<1x64xf32>
    %4 = vector.broadcast %3 : vector<1x64xf32> to vector<16x64xf32>
    %5 = arith.addf %2, %4 : vector<16x64xf32>
    %cst_5 = arith.constant 0.000000e+00 : f32
    %6 = vector.broadcast %cst_5 : f32 to vector<16x64xf32>
    %7 = arith.maximumf %5, %6 : vector<16x64xf32>
    %8 = arith.truncf %7 : vector<16x64xf32> to vector<16x64xbf16>
    %c0_6 = arith.constant 0 : index
    %c0_7 = arith.constant 0 : index
    %9 = vector.load %arg4[%c0_6, %c0_7] : memref<16x64xbf16, #tpu.memory_space<vmem>>, vector<16x64xbf16>
    tpu.vector_store %arg4[%c0_6, %c0_7], %8 {strides = array<i32>} : memref<16x64xbf16, #tpu.memory_space<vmem>>, vector<16x64xbf16>,
    return
  }
  func.func @transform_0(%arg0: i32) -> (i32, i32) {
    %c0_i32 = arith.constant 0 : i32
    %c0_i32_0 = arith.constant 0 : i32
    return %arg0, %c0_i32 : i32, i32
  }
  func.func @transform_1(%arg0: i32) -> (i32, i32) {
    %c0_i32 = arith.constant 0 : i32
    %c0_i32_0 = arith.constant 0 : i32
    %c0_i32_1 = arith.constant 0 : i32
    return %c0_i32, %c0_i32_0 : i32, i32
  }
  func.func @transform_2(%arg0: i32) -> (i32, i32) {
    %c0_i32 = arith.constant 0 : i32
    %c0_i32_0 = arith.constant 0 : i32
    %c0_i32_1 = arith.constant 0 : i32
    return %c0_i32, %c0_i32_0 : i32, i32
  }
  func.func @transform_3(%arg0: i32) -> (i32, i32) {
    %c0_i32 = arith.constant 0 : i32
    %c0_i32_0 = arith.constant 0 : i32
    return %arg0, %c0_i32 : i32, i32
  }
}

module attributes {stable_mosaic.version = 11 : i64} {
  func.func @_mm_res_kernel(%arg0: i32, %arg1: memref<16x64xbf16, #tpu.memory_space<vmem>>, %arg2: memref<64x256xbf16, #tpu.memory_space<vmem>>, %arg3: memref<1x256xf32, #tpu.memory_space<vmem>>, %arg4: memref<16x256xbf16, #tpu.memory_space<vmem>>, %arg5: memref<16x256xbf16, #tpu.memory_space<vmem>>) attributes {dimension_semantics = [#tpu.dimension_semantics<parallel>], iteration_bounds = array<i64: 2>, scalar_prefetch = 0 : i64, scratch_operands = 0 : i64, tpu.core_type = #tpu.core_type<tc>, window_params = [{transform_indices = @transform_0, window_bounds = array<i64: 16, 64>}, {pipeline_mode = #tpu.pipeline_mode<synchronous>, transform_indices = @transform_1, window_bounds = array<i64: 64, 256>}, {pipeline_mode = #tpu.pipeline_mode<synchronous>, transform_indices = @transform_2, window_bounds = array<i64: 1, 256>}, {transform_indices = @transform_3, window_bounds = array<i64: 16, 256>}, {transform_indices = @transform_4, window_bounds = array<i64: 16, 256>}]} {
    %c0 = arith.constant 0 : index
    %c0_0 = arith.constant 0 : index
    %0 = vector.load %arg1[%c0, %c0_0] : memref<16x64xbf16, #tpu.memory_space<vmem>>, vector<16x64xbf16>
    %c0_1 = arith.constant 0 : index
    %c0_2 = arith.constant 0 : index
    %1 = vector.load %arg2[%c0_1, %c0_2] : memref<64x256xbf16, #tpu.memory_space<vmem>>, vector<64x256xbf16>
    %cst = arith.constant dense<0.000000e+00> : vector<16x256xf32>
    %2 = tpu.matmul %0, %1, %cst {dimension_numbers = #tpu.dot_dimension_numbers<[1], [0], [0], [1], [0, 0, 1, 1], [], []>} : vector<16x64xbf16>, vector<64x256xbf16>, vector<16x256xf32> -> vector<16x256xf32>
    %c0_3 = arith.constant 0 : index
    %c0_4 = arith.constant 0 : index
    %3 = vector.load %arg3[%c0_3, %c0_4] : memref<1x256xf32, #tpu.memory_space<vmem>>, vector<1x256xf32>
    %4 = vector.broadcast %3 : vector<1x256xf32> to vector<16x256xf32>
    %5 = arith.addf %2, %4 : vector<16x256xf32>
    %c0_5 = arith.constant 0 : index
    %c0_6 = arith.constant 0 : index
    %6 = vector.load %arg4[%c0_5, %c0_6] : memref<16x256xbf16, #tpu.memory_space<vmem>>, vector<16x256xbf16>
    %7 = arith.extf %6 : vector<16x256xbf16> to vector<16x256xf32>
    %8 = arith.addf %5, %7 : vector<16x256xf32>
    %cst_7 = arith.constant 0.000000e+00 : f32
    %9 = vector.broadcast %cst_7 : f32 to vector<16x256xf32>
    %10 = arith.maximumf %8, %9 : vector<16x256xf32>
    %11 = arith.truncf %10 : vector<16x256xf32> to vector<16x256xbf16>
    %c0_8 = arith.constant 0 : index
    %c0_9 = arith.constant 0 : index
    %12 = vector.load %arg5[%c0_8, %c0_9] : memref<16x256xbf16, #tpu.memory_space<vmem>>, vector<16x256xbf16>
    tpu.vector_store %arg5[%c0_8, %c0_9], %11 {strides = array<i32>} : memref<16x256xbf16, #tpu.memory_space<vmem>>, vector<16x256xbf16>,
    return
  }
  func.func @transform_0(%arg0: i32) -> (i32, i32) {
    %c0_i32 = arith.constant 0 : i32
    %c0_i32_0 = arith.constant 0 : i32
    return %arg0, %c0_i32 : i32, i32
  }
  func.func @transform_1(%arg0: i32) -> (i32, i32) {
    %c0_i32 = arith.constant 0 : i32
    %c0_i32_0 = arith.constant 0 : i32
    %c0_i32_1 = arith.constant 0 : i32
    return %c0_i32, %c0_i32_0 : i32, i32
  }
  func.func @transform_2(%arg0: i32) -> (i32, i32) {
    %c0_i32 = arith.constant 0 : i32
    %c0_i32_0 = arith.constant 0 : i32
    %c0_i32_1 = arith.constant 0 : i32
    return %c0_i32, %c0_i32_0 : i32, i32
  }
  func.func @transform_3(%arg0: i32) -> (i32, i32) {
    %c0_i32 = arith.constant 0 : i32
    %c0_i32_0 = arith.constant 0 : i32
    return %arg0, %c0_i32 : i32, i32
  }
  func.func @transform_4(%arg0: i32) -> (i32, i32) {
    %c0_i32 = arith.constant 0 : i32
    %c0_i32_0 = arith.constant 0 : i32
    return %arg0, %c0_i32 : i32, i32
  }
}

</mosaic_0001>

<bundles_post_ra>
// kernel: base_resnet_forward.48
= control target key start
LH: loop header
LB: loop body
LE: loop exit
PB: predicated region body
PF: predicated region fallthrough
CT: control target
= control target key end

     0   :  { %s973_s12 = smov 0   ;;  %s1137_s0 = inlined_call_operand.vmem [shape: bf16[512,8], index: 0, kind: input, shape index: {}]   ;;  %s1138_s1 = inlined_call_operand.vmem [shape: bf16[8,8], index: 1, kind: input, shape index: {}]   ;;  %s1139_s2 = inlined_call_operand.vmem [shape: f32[1,8], index: 2, kind: input, shape index: {}]   ;;  %s1140_s3 = inlined_call_operand.vmem [shape: bf16[512,8], index: 3, kind: output, shape index: {}]  }
   0x1 LB: > { %s758_s13 = sadd.s32 4294967295, %s951_s12   ;;  %p762_p0 = scmp.ge.s32.totalorder %s951_s12, 1  ;;  %s951_s12 = sphi %s973_s12, %s13_s12  }
   0x2   : > { %p138_p1 = scmp.lt.s32.totalorder %s951_s12, 3 }
   0x4   : > { %p139_p2 = pnand %p762_p0, %p138_p1 }
   0x5   : > { %v207_v0 = vld [vmem:[%s1138_s1] sm:$0xf] (!%p139_p2)  ;;  %vm344_vm0 = vcmask (!%p139_p2), 1043456   ;;  %s763_s16 = sshll.u32 (!%p139_p2), %s758_s13, 5  ;;  %vm295_vm1 = vcmask (!%p139_p2), 64512   ;;  %vm669_vm2 = vcmask (!%p139_p2), 60416  }
   0x6   : > { %142 = sbr.rel (%p139_p2) target bundleno = 265 (0x109), region = 32  ;;  %919 = vmatprep.subr.msk.bf16.mxu0 (!%p139_p2), %vm344_vm0, %v207_v0  ;;  %920 = vmatprep.subr.msk.bf16.mxu1 (!%p139_p2), %vm344_vm0, %v207_v0  ;;  %v346_v1 = vsel (!%p139_p2), %vm344_vm0, %v207_v0, 0  ;;  %p163_p3 = scmp.lt.s32.totalorder (!%p139_p2), %s763_s16, 63  ;;  %v1029_v18 = vld [vmem:[%s1139_s2] ss:$0 sm:$0xff] (!%p139_p2) }
   0x7   : > { %884 = vmatpush3.bf16.msra.mxu0 (!%p139_p2), %v346_v1  ;;  %918 = vmatpush3.bf16.msra.mxu1 (!%p139_p2), %v346_v1 }
   0xd   : > { %s1142_s16 = smov (!%p163_p3, %s763_s16), 63 }
   0xe   : > { %s764_s17 = sshll.u32 %s1142_s16, 2 }
   0xf   : > { %s992_s20 = scalar_lea.vmem %s1137_s0, %s764_s17  ;;  %s1041_s25 = scalar_lea.vmem %s1140_s3, %s764_s17 }
  0x10   : > { %v929_v2 = vld [vmem:[%s992_s20] sm:$0xff]   ;;  %v931_v4 = vld [vmem:[%s992_s20 + $0x8] sm:$0xff]   ;;  %v933_v6 = vld [vmem:[%s992_s20 + $0x10] sm:$0xff]  }
  0x11   : > { %v930_v3 = vld [vmem:[%s992_s20 + $0x40] sm:$0xff]   ;;  %885 = vmatprep.mubr.msk.bf16.mxu0 %vm295_vm1, %v929_v2  ;;  %v932_v5 = vld [vmem:[%s992_s20 + $0x48] sm:$0xff]   ;;  %v934_v7 = vld [vmem:[%s992_s20 + $0x50] sm:$0xff]  }
  0x12   : > { %901 = vmatprep.mubr.msk.bf16.mxu1 %vm295_vm1, %v930_v3  ;;  %886 = vmatmul.mubr.msk.bf16.vlgmr.msra.gmra.mrb[0].mxu0 %vm295_vm1, %v931_v4  ;;  %v935_v8 = vld [vmem:[%s992_s20 + $0x18] sm:$0xff]   ;;  %v937_v10 = vld [vmem:[%s992_s20 + $0x20] sm:$0xff]   ;;  %v939_v12 = vld [vmem:[%s992_s20 + $0x28] sm:$0xff]  }
  0x13   : > { %902 = vmatmul.mubr.msk.bf16.vlgmr.msra.gmra.mrb[0].mxu1 %vm295_vm1, %v932_v5  ;;  %889 = vmatprep.mubr.msk.bf16.mxu0 %vm295_vm1, %v933_v6  ;;  %v936_v9 = vld [vmem:[%s992_s20 + $0x58] sm:$0xff]   ;;  %v938_v11 = vld [vmem:[%s992_s20 + $0x60] sm:$0xff]   ;;  %v940_v13 = vld [vmem:[%s992_s20 + $0x68] sm:$0xff]  }
  0x14   : > { %905 = vmatprep.mubr.msk.bf16.mxu1 %vm295_vm1, %v934_v7  ;;  %v941_v14 = vld [vmem:[%s992_s20 + $0x30] sm:$0xff]   ;;  %v943_v16 = vld [vmem:[%s992_s20 + $0x38] sm:$0xff]  }
  0x15   : > { %v942_v15 = vld [vmem:[%s992_s20 + $0x70] sm:$0xff]   ;;  %v944_v17 = vld [vmem:[%s992_s20 + $0x78] sm:$0xff]  }
  0x1a   : > { %890 = vmatmul.mubr.msk.bf16.gmra.mrb[4].mxu0 %vm295_vm1, %v935_v8 }
  0x1b   : > { %906 = vmatmul.mubr.msk.bf16.gmra.mrb[4].mxu1 %vm295_vm1, %v936_v9  ;;  %893 = vmatprep.mubr.msk.bf16.mxu0 %vm295_vm1, %v937_v10 }
  0x1c   : > { %909 = vmatprep.mubr.msk.bf16.mxu1 %vm295_vm1, %v938_v11 }
  0x22   : > { %894 = vmatmul.mubr.msk.bf16.gmra.mrb[8].mxu0 %vm295_vm1, %v939_v12 }
  0x23   : > { %910 = vmatmul.mubr.msk.bf16.gmra.mrb[8].mxu1 %vm295_vm1, %v940_v13  ;;  %897 = vmatprep.mubr.msk.bf16.mxu0 %vm295_vm1, %v941_v14 }
  0x24   : > { %913 = vmatprep.mubr.msk.bf16.mxu1 %vm295_vm1, %v942_v15 }
  0x2a   : > { %898 = vmatmul.mubr.msk.bf16.gmra.mrb[12].mxu0 %vm295_vm1, %v943_v16 }
  0x2b   : > { %914 = vmatmul.mubr.msk.bf16.gmra.mrb[12].mxu1 %vm295_vm1, %v944_v17 }
  0xe5   : > { %v887_v19 = vpop.f32.mrb[0].mxu0 }
  0xe6   : > { %v391_v20 = vadd.f32 %v887_v19, %v1029_v18  ;;  %v903_v21 = vpop.f32.mrb[0].mxu1  ;;  %v382_v22 = vpop.f32.mrb[1].mxu0 }
  0xe7   : > { %v455_v23 = vadd.f32 %v903_v21, %v1029_v18  ;;  %v383_v24 = vadd.f32 %v1029_v18, %v382_v22  ;;  %v446_v25 = vpop.f32.mrb[1].mxu1  ;;  %v888_v26 = vpop.f32.mrb[2].mxu0 }
  0xe8   : > { %v511_v27 = vmax.f32 %v391_v20, 0.0  ;;  %v447_v28 = vadd.f32 %v1029_v18, %v446_v25  ;;  %v394_v29 = vadd.f32 %v888_v26, %v1029_v18  ;;  %v904_v30 = vpop.f32.mrb[2].mxu1  ;;  %v385_v31 = vpop.f32.mrb[3].mxu0 }
  0xe9   : > { %v527_v32 = vmax.f32 %v455_v23, 0.0  ;;  %v509_v33 = vmax.f32 %v383_v24, 0.0  ;;  %v458_v34 = vadd.f32 %v904_v30, %v1029_v18  ;;  %v386_v35 = vadd.f32 %v1029_v18, %v385_v31  ;;  %v449_v36 = vpop.f32.mrb[3].mxu1 }
  0xea   : > { %v836_v37 = vpack.c.bf16 %v511_v27, %v511_v27  ;;  %v525_v38 = vmax.f32 %v447_v28, 0.0  ;;  %v512_v39 = vmax.f32 %v394_v29, 0.0  ;;  %v450_v40 = vadd.f32 %v1029_v18, %v449_v36 }
  0xeb   : > { %v852_v41 = vpack.c.bf16 %v527_v32, %v527_v32  ;;  %v834_v42 = vpack.c.bf16 %v509_v33, %v509_v33  ;;  %v528_v43 = vmax.f32 %v458_v34, 0.0  ;;  %v510_v44 = vmax.f32 %v386_v35, 0.0 }
  0xec   : > { %672 = vst.msk [vmem:[%s1041_s25 + $0x8] sm:$0xf] %vm669_vm2, %v836_v37  ;;  %v850_v45 = vpack.c.bf16 %v525_v38, %v525_v38  ;;  %v837_v46 = vpack.c.bf16 %v512_v39, %v512_v39  ;;  %v526_v47 = vmax.f32 %v450_v40, 0.0 }
  0xed   : > { %688 = vst.msk [vmem:[%s1041_s25 + $0x48] sm:$0xf] %vm669_vm2, %v852_v41  ;;  %670 = vst.msk [vmem:[%s1041_s25] sm:$0xf] %vm669_vm2, %v834_v42  ;;  %v853_v48 = vpack.c.bf16 %v528_v43, %v528_v43  ;;  %v835_v49 = vpack.c.bf16 %v510_v44, %v510_v44  ;;  %v891_v50 = vpop.f32.mrb[4].mxu0 }
  0xee   : > { %686 = vst.msk [vmem:[%s1041_s25 + $0x40] sm:$0xf] %vm669_vm2, %v850_v45  ;;  %673 = vst.msk [vmem:[%s1041_s25 + $0xc] sm:$0xf] %vm669_vm2, %v837_v46  ;;  %v851_v51 = vpack.c.bf16 %v526_v47, %v526_v47  ;;  %v407_v52 = vadd.f32 %v891_v50, %v1029_v18  ;;  %v907_v53 = vpop.f32.mrb[4].mxu1  ;;  %v398_v54 = vpop.f32.mrb[5].mxu0 }
  0xef   : > { %689 = vst.msk [vmem:[%s1041_s25 + $0x4c] sm:$0xf] %vm669_vm2, %v853_v48  ;;  %671 = vst.msk [vmem:[%s1041_s25 + $0x4] sm:$0xf] %vm669_vm2, %v835_v49  ;;  %v471_v55 = vadd.f32 %v907_v53, %v1029_v18  ;;  %v399_v56 = vadd.f32 %v1029_v18, %v398_v54  ;;  %v462_v57 = vpop.f32.mrb[5].mxu1  ;;  %v892_v58 = vpop.f32.mrb[6].mxu0 }
  0xf0   : > { %687 = vst.msk [vmem:[%s1041_s25 + $0x44] sm:$0xf] %vm669_vm2, %v851_v51  ;;  %v515_v59 = vmax.f32 %v407_v52, 0.0  ;;  %v463_v60 = vadd.f32 %v1029_v18, %v462_v57  ;;  %v410_v61 = vadd.f32 %v892_v58, %v1029_v18  ;;  %v908_v62 = vpop.f32.mrb[6].mxu1  ;;  %v401_v63 = vpop.f32.mrb[7].mxu0 }
  0xf1   : > { %v531_v0 = vmax.f32 %v471_v55, 0.0  ;;  %v513_v1 = vmax.f32 %v399_v56, 0.0  ;;  %v474_v2 = vadd.f32 %v908_v62, %v1029_v18  ;;  %v402_v3 = vadd.f32 %v1029_v18, %v401_v63  ;;  %v465_v4 = vpop.f32.mrb[7].mxu1 }
  0xf2   : > { %v840_v5 = vpack.c.bf16 %v515_v59, %v515_v59  ;;  %v529_v6 = vmax.f32 %v463_v60, 0.0  ;;  %v516_v7 = vmax.f32 %v410_v61, 0.0  ;;  %v466_v8 = vadd.f32 %v1029_v18, %v465_v4 }
  0xf3   : > { %v856_v9 = vpack.c.bf16 %v531_v0, %v531_v0  ;;  %v838_v10 = vpack.c.bf16 %v513_v1, %v513_v1  ;;  %v532_v11 = vmax.f32 %v474_v2, 0.0  ;;  %v514_v12 = vmax.f32 %v402_v3, 0.0 }
  0xf4   : > { %676 = vst.msk [vmem:[%s1041_s25 + $0x18] sm:$0xf] %vm669_vm2, %v840_v5  ;;  %v854_v13 = vpack.c.bf16 %v529_v6, %v529_v6  ;;  %v841_v14 = vpack.c.bf16 %v516_v7, %v516_v7  ;;  %v530_v15 = vmax.f32 %v466_v8, 0.0 }
  0xf5   : > { %692 = vst.msk [vmem:[%s1041_s25 + $0x58] sm:$0xf] %vm669_vm2, %v856_v9  ;;  %674 = vst.msk [vmem:[%s1041_s25 + $0x10] sm:$0xf] %vm669_vm2, %v838_v10  ;;  %v857_v16 = vpack.c.bf16 %v532_v11, %v532_v11  ;;  %v839_v17 = vpack.c.bf16 %v514_v12, %v514_v12  ;;  %v895_v19 = vpop.f32.mrb[8].mxu0 }
  0xf6   : > { %690 = vst.msk [vmem:[%s1041_s25 + $0x50] sm:$0xf] %vm669_vm2, %v854_v13  ;;  %677 = vst.msk [vmem:[%s1041_s25 + $0x1c] sm:$0xf] %vm669_vm2, %v841_v14  ;;  %v855_v20 = vpack.c.bf16 %v530_v15, %v530_v15  ;;  %v423_v21 = vadd.f32 %v895_v19, %v1029_v18  ;;  %v911_v22 = vpop.f32.mrb[8].mxu1  ;;  %v414_v23 = vpop.f32.mrb[9].mxu0 }
  0xf7   : > { %693 = vst.msk [vmem:[%s1041_s25 + $0x5c] sm:$0xf] %vm669_vm2, %v857_v16  ;;  %675 = vst.msk [vmem:[%s1041_s25 + $0x14] sm:$0xf] %vm669_vm2, %v839_v17  ;;  %v487_v24 = vadd.f32 %v911_v22, %v1029_v18  ;;  %v415_v25 = vadd.f32 %v1029_v18, %v414_v23  ;;  %v478_v26 = vpop.f32.mrb[9].mxu1  ;;  %v896_v27 = vpop.f32.mrb[10].mxu0 }
  0xf8   : > { %691 = vst.msk [vmem:[%s1041_s25 + $0x54] sm:$0xf] %vm669_vm2, %v855_v20  ;;  %v519_v28 = vmax.f32 %v423_v21, 0.0  ;;  %v479_v29 = vadd.f32 %v1029_v18, %v478_v26  ;;  %v426_v30 = vadd.f32 %v896_v27, %v1029_v18  ;;  %v912_v31 = vpop.f32.mrb[10].mxu1  ;;  %v417_v32 = vpop.f32.mrb[11].mxu0 }
  0xf9   : > { %v535_v33 = vmax.f32 %v487_v24, 0.0  ;;  %v517_v34 = vmax.f32 %v415_v25, 0.0  ;;  %v490_v35 = vadd.f32 %v912_v31, %v1029_v18  ;;  %v418_v36 = vadd.f32 %v1029_v18, %v417_v32  ;;  %v481_v37 = vpop.f32.mrb[11].mxu1 }
  0xfa   : > { %v844_v38 = vpack.c.bf16 %v519_v28, %v519_v28  ;;  %v533_v39 = vmax.f32 %v479_v29, 0.0  ;;  %v520_v40 = vmax.f32 %v426_v30, 0.0  ;;  %v482_v41 = vadd.f32 %v1029_v18, %v481_v37 }
  0xfb   : > { %v860_v42 = vpack.c.bf16 %v535_v33, %v535_v33  ;;  %v842_v43 = vpack.c.bf16 %v517_v34, %v517_v34  ;;  %v536_v44 = vmax.f32 %v490_v35, 0.0  ;;  %v518_v45 = vmax.f32 %v418_v36, 0.0 }
  0xfc   : > { %680 = vst.msk [vmem:[%s1041_s25 + $0x28] sm:$0xf] %vm669_vm2, %v844_v38  ;;  %v858_v46 = vpack.c.bf16 %v533_v39, %v533_v39  ;;  %v845_v47 = vpack.c.bf16 %v520_v40, %v520_v40  ;;  %v534_v48 = vmax.f32 %v482_v41, 0.0 }
  0xfd   : > { %696 = vst.msk [vmem:[%s1041_s25 + $0x68] sm:$0xf] %vm669_vm2, %v860_v42  ;;  %678 = vst.msk [vmem:[%s1041_s25 + $0x20] sm:$0xf] %vm669_vm2, %v842_v43  ;;  %v861_v49 = vpack.c.bf16 %v536_v44, %v536_v44  ;;  %v843_v50 = vpack.c.bf16 %v518_v45, %v518_v45  ;;  %v899_v51 = vpop.f32.mrb[12].mxu0 }
  0xfe   : > { %694 = vst.msk [vmem:[%s1041_s25 + $0x60] sm:$0xf] %vm669_vm2, %v858_v46  ;;  %681 = vst.msk [vmem:[%s1041_s25 + $0x2c] sm:$0xf] %vm669_vm2, %v845_v47  ;;  %v859_v52 = vpack.c.bf16 %v534_v48, %v534_v48  ;;  %v439_v53 = vadd.f32 %v899_v51, %v1029_v18  ;;  %v915_v54 = vpop.f32.mrb[12].mxu1  ;;  %v430_v55 = vpop.f32.mrb[13].mxu0 }
  0xff   : > { %697 = vst.msk [vmem:[%s1041_s25 + $0x6c] sm:$0xf] %vm669_vm2, %v861_v49  ;;  %679 = vst.msk [vmem:[%s1041_s25 + $0x24] sm:$0xf] %vm669_vm2, %v843_v50  ;;  %v503_v56 = vadd.f32 %v915_v54, %v1029_v18  ;;  %v431_v57 = vadd.f32 %v1029_v18, %v430_v55  ;;  %v494_v58 = vpop.f32.mrb[13].mxu1  ;;  %v900_v59 = vpop.f32.mrb[14].mxu0 }
 0x100   : > { %695 = vst.msk [vmem:[%s1041_s25 + $0x64] sm:$0xf] %vm669_vm2, %v859_v52  ;;  %v523_v60 = vmax.f32 %v439_v53, 0.0  ;;  %v495_v61 = vadd.f32 %v1029_v18, %v494_v58  ;;  %v442_v62 = vadd.f32 %v900_v59, %v1029_v18  ;;  %v916_v63 = vpop.f32.mrb[14].mxu1  ;;  %v433_v0 = vpop.f32.mrb[15].mxu0 }
 0x101   : > { %v539_v1 = vmax.f32 %v503_v56, 0.0  ;;  %v521_v2 = vmax.f32 %v431_v57, 0.0  ;;  %v506_v3 = vadd.f32 %v916_v63, %v1029_v18  ;;  %v434_v4 = vadd.f32 %v1029_v18, %v433_v0  ;;  %v497_v5 = vpop.f32.mrb[15].mxu1 }
 0x102   : > { %v848_v6 = vpack.c.bf16 %v523_v60, %v523_v60  ;;  %v537_v7 = vmax.f32 %v495_v61, 0.0  ;;  %v524_v8 = vmax.f32 %v442_v62, 0.0  ;;  %v498_v9 = vadd.f32 %v1029_v18, %v497_v5 }
 0x103   : > { %v864_v10 = vpack.c.bf16 %v539_v1, %v539_v1  ;;  %v846_v11 = vpack.c.bf16 %v521_v2, %v521_v2  ;;  %v540_v12 = vmax.f32 %v506_v3, 0.0  ;;  %v522_v13 = vmax.f32 %v434_v4, 0.0 }
 0x104   : > { %684 = vst.msk [vmem:[%s1041_s25 + $0x38] sm:$0xf] %vm669_vm2, %v848_v6  ;;  %v862_v14 = vpack.c.bf16 %v537_v7, %v537_v7  ;;  %v849_v15 = vpack.c.bf16 %v524_v8, %v524_v8  ;;  %v538_v16 = vmax.f32 %v498_v9, 0.0 }
 0x105   : > { %700 = vst.msk [vmem:[%s1041_s25 + $0x78] sm:$0xf] %vm669_vm2, %v864_v10  ;;  %682 = vst.msk [vmem:[%s1041_s25 + $0x30] sm:$0xf] %vm669_vm2, %v846_v11  ;;  %v865_v17 = vpack.c.bf16 %v540_v12, %v540_v12  ;;  %v847_v19 = vpack.c.bf16 %v522_v13, %v522_v13 }
 0x106   : > { %698 = vst.msk [vmem:[%s1041_s25 + $0x70] sm:$0xf] %vm669_vm2, %v862_v14  ;;  %685 = vst.msk [vmem:[%s1041_s25 + $0x3c] sm:$0xf] %vm669_vm2, %v849_v15  ;;  %v863_v18 = vpack.c.bf16 %v538_v16, %v538_v16 }
 0x107   : > { %701 = vst.msk [vmem:[%s1041_s25 + $0x7c] sm:$0xf] %vm669_vm2, %v865_v17  ;;  %683 = vst.msk [vmem:[%s1041_s25 + $0x34] sm:$0xf] %vm669_vm2, %v847_v19 }
 0x108   : > { %699 = vst.msk [vmem:[%s1041_s25 + $0x74] sm:$0xf] %vm669_vm2, %v863_v18 }
 0x109 PF: > { %s13_s12 = sadd.s32 1, %s951_s12  }
 0x10a   : > { %p10_p4 = scmp.ge.s32.totalorder %s13_s12, 4  }
 0x10c   :  { %12 = sbr.rel (!%p10_p4) target bundleno = 1 (0x1), region = 62 }

// kernel: base_resnet_forward.49
= control target key start
LH: loop header
LB: loop body
LE: loop exit
PB: predicated region body
PF: predicated region fallthrough
CT: control target
= control target key end

     0   :  { %s1037_s12 = smov 0   ;;  %s1190_s0 = inlined_call_operand.vmem [shape: bf16[2,18,18,8], index: 0, kind: input, shape index: {}]   ;;  %s1191_s1 = inlined_call_operand.vmem [shape: bf16[3,3,8,8], index: 1, kind: input, shape index: {}]   ;;  %s1192_s2 = inlined_call_operand.vmem [shape: f32[1,8], index: 2, kind: input, shape index: {}]   ;;  %s1193_s3 = inlined_call_operand.vmem [shape: bf16[2,16,16,8], index: 3, kind: output, shape index: {}]  }
   0x1 LB: > { %s820_s13 = sadd.s32 4294967295, %s1009_s12   ;;  %p824_p0 = scmp.ge.s32.totalorder %s1009_s12, 1  ;;  %s1009_s12 = sphi %s1037_s12, %s13_s12  }
   0x2   : > { %p137_p1 = scmp.lt.s32.totalorder %s1009_s12, 3 }
   0x4   : > { %p138_p2 = pnand %p824_p0, %p137_p1 }
   0x5   : > { %p161_p3 = scmp.lt.s32.totalorder (!%p138_p2), %s820_s13, 1  ;;  %v1048_v0 = vld [vmem:[%s1191_s1] sm:$0xf] (!%p138_p2)  ;;  %v1053_v1 = vld [vmem:[%s1191_s1 + $0x4] sm:$0xf] (!%p138_p2)  ;;  %s1105_s17 = smov (!%p138_p2), 0  }
   0x6   : > { %141 = sbr.rel (%p138_p2) target bundleno = 298 (0x12a), region = 32  ;;  %v1058_v2 = vld [vmem:[%s1191_s1 + $0x8] sm:$0xf] (!%p138_p2)  ;;  %v1063_v3 = vld [vmem:[%s1191_s1 + $0xc] sm:$0xf] (!%p138_p2) }
   0x7   : > { %v1068_v4 = vld [vmem:[%s1191_s1 + $0x10] sm:$0xf] (!%p138_p2)  ;;  %v1073_v5 = vld [vmem:[%s1191_s1 + $0x14] sm:$0xf] (!%p138_p2)  ;;  %v1078_v6 = vld [vmem:[%s1191_s1 + $0x18] sm:$0xf] (!%p138_p2) }
   0x8   : > { %v1083_v7 = vld [vmem:[%s1191_s1 + $0x1c] sm:$0xf] (!%p138_p2)  ;;  %v1088_v8 = vld [vmem:[%s1191_s1 + $0x20] sm:$0xf] (!%p138_p2) }
   0x9   : > { %v1093_v9 = vld [vmem:[%s1192_s2] ss:$0 sm:$0xff] (!%p138_p2) }
   0xd   : > { %s1195_s13 = smov (!%p161_p3, %s820_s13), 1 }
   0xe   : > { %s974_s7 = smul.u32 216, %s1195_s13  ;;  %s865_s8 = sshll.u32 %s1195_s13, 7 }
   0xf   : > { %s1098_s11 = scalar_lea.vmem %s1193_s3, %s865_s8 }
  0x10   : > { %s1103_s16 = scalar_lea.vmem %s1190_s0, %s974_s7 }
  0x11 LB: >> { %vm218_vm0 = vcmask 1043456   ;;  %v1015_v10 = vmov 0.0   ;;  %vm1016_vm1 = vmmov 0   ;;  %s866_s13 = smul.u32 12, %s1013_s17  ;;  %vm214_vm2 = vcmask 64512   ;;  %s869_s19 = sshll.u32 %s1013_s17, 3  ;;  %s1013_s17 = sphi %s1105_s17, %s195_s17  }
  0x12   : >> { %888 = vmatprep.subr.bf16.mxu1 %v1015_v10  ;;  %v220_v11 = vsel %vm218_vm0, %v1048_v0, 0  ;;  %890 = vmatprep.mubr.msk.bf16.mxu1 %vm1016_vm1, %v1015_v10  ;;  %v461_v12 = vsel %vm218_vm0, %v1068_v4, 0  ;;  %v284_v14 = vsel %vm218_vm0, %v1053_v1, 0  ;;  %vm268_vm3 = vsmask.f32 7424  ;;  %s746_s20 = scalar_lea.vmem %s1098_s11, %s869_s19  ;;  %s195_s17 = sadd.s32 1, %s1013_s17  }
  0x13   : >> { %889 = vmatpush3.bf16.msra.mxu1 %v220_v11  ;;  %912 = vmatprep.subr.bf16.mxu0 %v1015_v10  ;;  %s1122_s18 = scalar_lea.vmem %s1103_s16, %s866_s13  ;;  %v513_v30 = vsel %vm218_vm0, %v1073_v5, 0  ;;  %v337_v33 = vsel %vm218_vm0, %v1058_v2, 0  ;;  %vm329_vm4 = vcmask 1046528   ;;  %v574_v39 = vsel %vm218_vm0, %v1078_v6, 0  ;;  %p192_p4 = scmp.ge.s32.totalorder %s195_s17, 16  }
  0x14   : >> { %913 = vmatpush3.bf16.msra.mxu0 %v461_v12  ;;  %914 = vmatprep.mubr.msk.bf16.mxu0 %vm1016_vm1, %v1015_v10  ;;  %v993_v13 = vld [vmem:[%s1122_s18] sm:$0xff]   ;;  %v994_v15 = vld [vmem:[%s1122_s18 + $0xc] sm:$0xff]   ;;  %v995_v16 = vld [vmem:[%s1122_s18 + $0x14] ss:$0 sps:$4 sm:$0x11]   ;;  %v398_v41 = vsel %vm218_vm0, %v1063_v3, 0 }
  0x15   : >> { %918 = vmatprep.subr.bf16.mxu0 %v1015_v10  ;;  %894 = vmatprep.subr.bf16.mxu1 %v1015_v10  ;;  %v996_v17 = vld [vmem:[%s1122_s18 + $0x8] ss:$0 sps:$4 sm:$0x11]   ;;  %v269_v18 = vshrl.u32 %v993_v13, 16  ;;  %v271_v19 = vshll.u32 %v993_v13, 16  ;;  %v446_v20 = vshrl.u32 %v994_v15, 16 }
  0x16   : >> { %891 = vmatmul.mubr.msk.bf16.vlgmr.msra.gmra.mrb[0].mxu1 %vm214_vm2, %v993_v13  ;;  %v448_v21 = vshll.u32 %v994_v15, 16  ;;  %v453_v22 = vshll.u32 %v995_v16, 16  ;;  %v276_v24 = vshll.u32 %v996_v17, 16  ;;  %v506_v34 = vrot.slane %v994_v15, 1  ;;  %v997_v42 = vld [vmem:[%s1122_s18 + $0x18] sm:$0xff]  }
  0x17   : >> { %895 = vmatpush3.bf16.msra.mxu1 %v284_v14  ;;  %896 = vmatprep.mubr.msk.bf16.mxu1 %vm1016_vm1, %v1015_v10  ;;  %v273_v23 = vrot.slane %v271_v19, 1  ;;  %v507_v35 = vrot.slane %v995_v16, 1  ;;  %v330_v36 = vrot.slane %v993_v13, 1  ;;  %v331_v37 = vrot.slane %v996_v17, 1 }
  0x18   : >> { %900 = vmatprep.subr.bf16.mxu1 %v1015_v10  ;;  %v450_v25 = vrot.slane %v448_v21, 1  ;;  %v455_v26 = vrot.slane %v453_v22, 1  ;;  %v278_v28 = vrot.slane %v276_v24, 1  ;;  %v998_v43 = vld [vmem:[%s1122_s18 + $0x20] ss:$0 sps:$4 sm:$0x11]  }
  0x19   : >> { %v274_v27 = vor.u32 %v273_v23, %v269_v18  ;;  %v508_v38 = vsel %vm329_vm4, %v506_v34, %v507_v35  ;;  %v332_v40 = vsel %vm329_vm4, %v330_v36, %v331_v37  ;;  %v624_v44 = vshll.u32 %v997_v42, 16 }
  0x1a   : >> { %v451_v29 = vor.u32 %v450_v25, %v446_v20  ;;  %v637_v45 = vsel %vm218_vm0, %v1083_v7, 0  ;;  %v622_v46 = vshrl.u32 %v997_v42, 16  ;;  %v629_v48 = vshll.u32 %v998_v43, 16 }
  0x1b   : >> { %v279_v32 = vsel %vm268_vm3, %v274_v27, %v278_v28  ;;  %v626_v47 = vrot.slane %v624_v44, 1  ;;  %v689_v52 = vsel %vm218_vm0, %v1088_v8, 0  ;;  %v682_v53 = vrot.slane %v997_v42, 1 }
  0x1c   : >> { %v456_v31 = vsel %vm268_vm3, %v451_v29, %v455_v26  ;;  %v631_v50 = vrot.slane %v629_v48, 1  ;;  %v683_v54 = vrot.slane %v998_v43, 1  ;;  %vm747_vm5 = vcmask 60416  }
  0x1d   : >> { %915 = vmatmul.mubr.msk.bf16.vlgmr.msra.gmra.mrb[0].mxu0 %vm214_vm2, %v456_v31  ;;  %v627_v49 = vor.u32 %v626_v47, %v622_v46 }
  0x1e   : >> { %919 = vmatpush3.bf16.msra.mxu0 %v513_v30  ;;  %920 = vmatprep.mubr.msk.bf16.mxu0 %vm1016_vm1, %v1015_v10  ;;  %v684_v55 = vsel %vm329_vm4, %v682_v53, %v683_v54 }
  0x1f   : >> { %924 = vmatprep.subr.bf16.mxu0 %v1015_v10  ;;  %v632_v51 = vsel %vm268_vm3, %v627_v49, %v631_v50 }
  0x22   : >> { %897 = vmatmul.mubr.msk.bf16.vlgmr.msra.gmra.mrb[0].mxu1 %vm214_vm2, %v279_v32 }
  0x23   : >> { %901 = vmatpush3.bf16.msra.mxu1 %v337_v33  ;;  %902 = vmatprep.mubr.msk.bf16.mxu1 %vm1016_vm1, %v1015_v10 }
  0x24   : >> { %906 = vmatprep.subr.bf16.mxu1 %v1015_v10 }
  0x29   : >> { %921 = vmatmul.mubr.msk.bf16.vlgmr.msra.gmra.mrb[0].mxu0 %vm214_vm2, %v508_v38 }
  0x2a   : >> { %925 = vmatpush3.bf16.msra.mxu0 %v574_v39  ;;  %926 = vmatprep.mubr.msk.bf16.mxu0 %vm1016_vm1, %v1015_v10 }
  0x2b   : >> { %930 = vmatprep.subr.bf16.mxu0 %v1015_v10 }
  0x2e   : >> { %903 = vmatmul.mubr.msk.bf16.vlgmr.msra.gmra.mrb[0].mxu1 %vm214_vm2, %v332_v40 }
  0x2f   : >> { %907 = vmatpush3.bf16.msra.mxu1 %v398_v41  ;;  %908 = vmatprep.mubr.msk.bf16.mxu1 %vm1016_vm1, %v1015_v10 }
  0x35   : >> { %927 = vmatmul.mubr.msk.bf16.vlgmr.msra.gmra.mrb[0].mxu0 %vm214_vm2, %v997_v42 }
  0x36   : >> { %931 = vmatpush3.bf16.msra.mxu0 %v637_v45  ;;  %932 = vmatprep.mubr.msk.bf16.mxu0 %vm1016_vm1, %v1015_v10 }
  0x37   : >> { %936 = vmatprep.subr.bf16.mxu0 %v1015_v10 }
  0x3a   : >> { %909 = vmatmul.mubr.msk.bf16.vlgmr.msra.gmra.mrb[0].mxu1 %vm214_vm2, %v994_v15 }
  0x41   : >> { %933 = vmatmul.mubr.msk.bf16.vlgmr.msra.gmra.mrb[0].mxu0 %vm214_vm2, %v632_v51 }
  0x42   : >> { %937 = vmatpush3.bf16.msra.mxu0 %v689_v52  ;;  %938 = vmatprep.mubr.msk.bf16.mxu0 %vm1016_vm1, %v1015_v10 }
  0x4d   : >> { %939 = vmatmul.mubr.msk.bf16.vlgmr.msra.gmra.mrb[0].mxu0 %vm214_vm2, %v684_v55 }
 0x10d   : >> { %v434_v56 = vpop.f32.mrb[0].mxu1 }
 0x10e   : >> { %v910_v57 = vpop.f32.mrb[1].mxu1  ;;  %v942_v60 = vadd.f32 %v1093_v9, %v434_v56 }
 0x10f   : >> { %v437_v58 = vpop.f32.mrb[2].mxu1 }
 0x110   : >> { %v911_v59 = vpop.f32.mrb[3].mxu1  ;;  %v944_v62 = vadd.f32 %v1093_v9, %v437_v58 }
 0x120   : >> { %v725_v61 = vpop.f32.mrb[0].mxu0 }
 0x121   : >> { %v943_v63 = vadd.f32 %v942_v60, %v725_v61  ;;  %v940_v11 = vpop.f32.mrb[1].mxu0 }
 0x122   : >> { %v728_v10 = vpop.f32.mrb[2].mxu0 }
 0x123   : >> { %v734_v12 = vmax.f32 %v943_v63, 0.0  ;;  %v945_v13 = vadd.f32 %v944_v62, %v728_v10  ;;  %v941_v14 = vpop.f32.mrb[3].mxu0  ;;  %194 = sbr.rel (!%p192_p4) target bundleno = 17 (0x11), region = 81 }
 0x125   : >> { %v867_v15 = vpack.c.bf16 %v734_v12, %v734_v12  ;;  %v735_v16 = vmax.f32 %v945_v13, 0.0 }
 0x127   : >> { %748 = vst.msk [vmem:[%s746_s20] sm:$0xf] %vm747_vm5, %v867_v15  ;;  %v868_v17 = vpack.c.bf16 %v735_v16, %v735_v16 }
 0x129   : >> { %749 = vst.msk [vmem:[%s746_s20 + $0x4] sm:$0xf] %vm747_vm5, %v868_v17 }
 0x12a PF: > { %s13_s12 = sadd.s32 1, %s1009_s12  }
 0x12b   : > { %p10_p5 = scmp.ge.s32.totalorder %s13_s12, 4  }
 0x12d   :  { %12 = sbr.rel (!%p10_p5) target bundleno = 1 (0x1), region = 92 }

// kernel: base_resnet_forward.51
= control target key start
LH: loop header
LB: loop body
LE: loop exit
PB: predicated region body
PF: predicated region fallthrough
CT: control target
= control target key end

     0   :  { %s991_s12 = smov 0   ;;  %s1158_s0 = inlined_call_operand.vmem [shape: bf16[512,32], index: 0, kind: input, shape index: {}]   ;;  %s1159_s1 = inlined_call_operand.vmem [shape: bf16[32,8], index: 1, kind: input, shape index: {}]   ;;  %s1160_s2 = inlined_call_operand.vmem [shape: f32[1,8], index: 2, kind: input, shape index: {}]   ;;  %s1161_s3 = inlined_call_operand.vmem [shape: bf16[512,8], index: 3, kind: output, shape index: {}]  }
   0x1 LB: > { %s769_s13 = sadd.s32 4294967295, %s969_s12   ;;  %p773_p0 = scmp.ge.s32.totalorder %s969_s12, 1  ;;  %s969_s12 = sphi %s991_s12, %s13_s12  }
   0x2   : > { %p138_p1 = scmp.lt.s32.totalorder %s969_s12, 3 }
   0x4   : > { %p139_p2 = pnand %p773_p0, %p138_p1 }
   0x5   : > { %v945_v0 = vld [vmem:[%s1159_s1] sm:$0xff] (!%p139_p2)   ;;  %s774_s16 = sshll.u32 (!%p139_p2), %s769_s13, 5  ;;  %v946_v1 = vld [vmem:[%s1159_s1 + $0x8] sm:$0xff] (!%p139_p2)   ;;  %vm310_vm0 = vcmask (!%p139_p2), 261120   ;;  %vm680_vm1 = vcmask (!%p139_p2), 60416  }
   0x6   : > { %142 = sbr.rel (%p139_p2) target bundleno = 265 (0x109), region = 32  ;;  %p163_p3 = scmp.lt.s32.totalorder (!%p139_p2), %s774_s16, 63  ;;  %897 = vmatprep.subr.bf16.mxu0 (!%p139_p2), %v945_v0  ;;  %933 = vmatprep.subr.bf16.mxu1 (!%p139_p2), %v945_v0  ;;  %v1050_v18 = vld [vmem:[%s1160_s2] ss:$0 sm:$0xff] (!%p139_p2) }
   0x7   : > { %898 = vmatpush3.bf16.msra.mxu0 (!%p139_p2), %v945_v0  ;;  %935 = vmatpush3.bf16.msra.mxu1 (!%p139_p2), %v945_v0 }
   0x8   : > { %899 = vmatprep.subr.bf16.mxu0 (!%p139_p2), %v946_v1  ;;  %934 = vmatprep.subr.bf16.mxu1 (!%p139_p2), %v946_v1 }
   0xb   : > { %900 = vmatpush3.bf16.msra.mxu0 (!%p139_p2), %v946_v1  ;;  %936 = vmatpush3.bf16.msra.mxu1 (!%p139_p2), %v946_v1 }
   0xd   : > { %s1163_s16 = smov (!%p163_p3, %s774_s16), 63 }
   0xe   : > { %s775_s19 = sshll.u32 %s1163_s16, 2 }
   0xf   : > { %s1013_s22 = scalar_lea.vmem %s1158_s0, %s775_s19  ;;  %s1062_s27 = scalar_lea.vmem %s1161_s3, %s775_s19 }
  0x10   : > { %v947_v2 = vld [vmem:[%s1013_s22] sm:$0xff]   ;;  %v949_v4 = vld [vmem:[%s1013_s22 + $0x8] sm:$0xff]   ;;  %v951_v6 = vld [vmem:[%s1013_s22 + $0x10] sm:$0xff]  }
  0x11   : > { %v948_v3 = vld [vmem:[%s1013_s22 + $0x40] sm:$0xff]   ;;  %901 = vmatprep.mubr.msk.bf16.mxu0 %vm310_vm0, %v947_v2  ;;  %v950_v5 = vld [vmem:[%s1013_s22 + $0x48] sm:$0xff]   ;;  %v952_v7 = vld [vmem:[%s1013_s22 + $0x50] sm:$0xff]  }
  0x12   : > { %917 = vmatprep.mubr.msk.bf16.mxu1 %vm310_vm0, %v948_v3  ;;  %902 = vmatmul.mubr.msk.bf16.vlgmr.msra.gmra.mrb[0].mxu0 %vm310_vm0, %v949_v4  ;;  %v953_v8 = vld [vmem:[%s1013_s22 + $0x18] sm:$0xff]   ;;  %v955_v10 = vld [vmem:[%s1013_s22 + $0x20] sm:$0xff]   ;;  %v957_v12 = vld [vmem:[%s1013_s22 + $0x28] sm:$0xff]  }
  0x13   : > { %918 = vmatmul.mubr.msk.bf16.vlgmr.msra.gmra.mrb[0].mxu1 %vm310_vm0, %v950_v5  ;;  %905 = vmatprep.mubr.msk.bf16.mxu0 %vm310_vm0, %v951_v6  ;;  %v954_v9 = vld [vmem:[%s1013_s22 + $0x58] sm:$0xff]   ;;  %v956_v11 = vld [vmem:[%s1013_s22 + $0x60] sm:$0xff]   ;;  %v958_v13 = vld [vmem:[%s1013_s22 + $0x68] sm:$0xff]  }
  0x14   : > { %921 = vmatprep.mubr.msk.bf16.mxu1 %vm310_vm0, %v952_v7  ;;  %v959_v14 = vld [vmem:[%s1013_s22 + $0x30] sm:$0xff]   ;;  %v961_v16 = vld [vmem:[%s1013_s22 + $0x38] sm:$0xff]  }
  0x15   : > { %v960_v15 = vld [vmem:[%s1013_s22 + $0x70] sm:$0xff]   ;;  %v962_v17 = vld [vmem:[%s1013_s22 + $0x78] sm:$0xff]  }
  0x1a   : > { %906 = vmatmul.mubr.msk.bf16.gmra.mrb[4].mxu0 %vm310_vm0, %v953_v8 }
  0x1b   : > { %922 = vmatmul.mubr.msk.bf16.gmra.mrb[4].mxu1 %vm310_vm0, %v954_v9  ;;  %909 = vmatprep.mubr.msk.bf16.mxu0 %vm310_vm0, %v955_v10 }
  0x1c   : > { %925 = vmatprep.mubr.msk.bf16.mxu1 %vm310_vm0, %v956_v11 }
  0x22   : > { %910 = vmatmul.mubr.msk.bf16.gmra.mrb[8].mxu0 %vm310_vm0, %v957_v12 }
  0x23   : > { %926 = vmatmul.mubr.msk.bf16.gmra.mrb[8].mxu1 %vm310_vm0, %v958_v13  ;;  %913 = vmatprep.mubr.msk.bf16.mxu0 %vm310_vm0, %v959_v14 }
  0x24   : > { %929 = vmatprep.mubr.msk.bf16.mxu1 %vm310_vm0, %v960_v15 }
  0x2a   : > { %914 = vmatmul.mubr.msk.bf16.gmra.mrb[12].mxu0 %vm310_vm0, %v961_v16 }
  0x2b   : > { %930 = vmatmul.mubr.msk.bf16.gmra.mrb[12].mxu1 %vm310_vm0, %v962_v17 }
  0xe5   : > { %v903_v19 = vpop.f32.mrb[0].mxu0 }
  0xe6   : > { %v402_v20 = vadd.f32 %v903_v19, %v1050_v18  ;;  %v919_v21 = vpop.f32.mrb[0].mxu1  ;;  %v393_v22 = vpop.f32.mrb[1].mxu0 }
  0xe7   : > { %v466_v23 = vadd.f32 %v919_v21, %v1050_v18  ;;  %v394_v24 = vadd.f32 %v1050_v18, %v393_v22  ;;  %v457_v25 = vpop.f32.mrb[1].mxu1  ;;  %v904_v26 = vpop.f32.mrb[2].mxu0 }
  0xe8   : > { %v522_v27 = vmax.f32 %v402_v20, 0.0  ;;  %v458_v28 = vadd.f32 %v1050_v18, %v457_v25  ;;  %v405_v29 = vadd.f32 %v904_v26, %v1050_v18  ;;  %v920_v30 = vpop.f32.mrb[2].mxu1  ;;  %v396_v31 = vpop.f32.mrb[3].mxu0 }
  0xe9   : > { %v538_v32 = vmax.f32 %v466_v23, 0.0  ;;  %v520_v33 = vmax.f32 %v394_v24, 0.0  ;;  %v469_v34 = vadd.f32 %v920_v30, %v1050_v18  ;;  %v397_v35 = vadd.f32 %v1050_v18, %v396_v31  ;;  %v460_v36 = vpop.f32.mrb[3].mxu1 }
  0xea   : > { %v849_v37 = vpack.c.bf16 %v522_v27, %v522_v27  ;;  %v536_v38 = vmax.f32 %v458_v28, 0.0  ;;  %v523_v39 = vmax.f32 %v405_v29, 0.0  ;;  %v461_v40 = vadd.f32 %v1050_v18, %v460_v36 }
  0xeb   : > { %v865_v41 = vpack.c.bf16 %v538_v32, %v538_v32  ;;  %v847_v42 = vpack.c.bf16 %v520_v33, %v520_v33  ;;  %v539_v43 = vmax.f32 %v469_v34, 0.0  ;;  %v521_v44 = vmax.f32 %v397_v35, 0.0 }
  0xec   : > { %683 = vst.msk [vmem:[%s1062_s27 + $0x8] sm:$0xf] %vm680_vm1, %v849_v37  ;;  %v863_v45 = vpack.c.bf16 %v536_v38, %v536_v38  ;;  %v850_v46 = vpack.c.bf16 %v523_v39, %v523_v39  ;;  %v537_v47 = vmax.f32 %v461_v40, 0.0 }
  0xed   : > { %699 = vst.msk [vmem:[%s1062_s27 + $0x48] sm:$0xf] %vm680_vm1, %v865_v41  ;;  %681 = vst.msk [vmem:[%s1062_s27] sm:$0xf] %vm680_vm1, %v847_v42  ;;  %v866_v48 = vpack.c.bf16 %v539_v43, %v539_v43  ;;  %v848_v49 = vpack.c.bf16 %v521_v44, %v521_v44  ;;  %v907_v50 = vpop.f32.mrb[4].mxu0 }
  0xee   : > { %697 = vst.msk [vmem:[%s1062_s27 + $0x40] sm:$0xf] %vm680_vm1, %v863_v45  ;;  %684 = vst.msk [vmem:[%s1062_s27 + $0xc] sm:$0xf] %vm680_vm1, %v850_v46  ;;  %v864_v51 = vpack.c.bf16 %v537_v47, %v537_v47  ;;  %v418_v52 = vadd.f32 %v907_v50, %v1050_v18  ;;  %v923_v53 = vpop.f32.mrb[4].mxu1  ;;  %v409_v54 = vpop.f32.mrb[5].mxu0 }
  0xef   : > { %700 = vst.msk [vmem:[%s1062_s27 + $0x4c] sm:$0xf] %vm680_vm1, %v866_v48  ;;  %682 = vst.msk [vmem:[%s1062_s27 + $0x4] sm:$0xf] %vm680_vm1, %v848_v49  ;;  %v482_v55 = vadd.f32 %v923_v53, %v1050_v18  ;;  %v410_v56 = vadd.f32 %v1050_v18, %v409_v54  ;;  %v473_v57 = vpop.f32.mrb[5].mxu1  ;;  %v908_v58 = vpop.f32.mrb[6].mxu0 }
  0xf0   : > { %698 = vst.msk [vmem:[%s1062_s27 + $0x44] sm:$0xf] %vm680_vm1, %v864_v51  ;;  %v526_v59 = vmax.f32 %v418_v52, 0.0  ;;  %v474_v60 = vadd.f32 %v1050_v18, %v473_v57  ;;  %v421_v61 = vadd.f32 %v908_v58, %v1050_v18  ;;  %v924_v62 = vpop.f32.mrb[6].mxu1  ;;  %v412_v63 = vpop.f32.mrb[7].mxu0 }
  0xf1   : > { %v542_v0 = vmax.f32 %v482_v55, 0.0  ;;  %v524_v1 = vmax.f32 %v410_v56, 0.0  ;;  %v485_v2 = vadd.f32 %v924_v62, %v1050_v18  ;;  %v413_v3 = vadd.f32 %v1050_v18, %v412_v63  ;;  %v476_v4 = vpop.f32.mrb[7].mxu1 }
  0xf2   : > { %v853_v5 = vpack.c.bf16 %v526_v59, %v526_v59  ;;  %v540_v6 = vmax.f32 %v474_v60, 0.0  ;;  %v527_v7 = vmax.f32 %v421_v61, 0.0  ;;  %v477_v8 = vadd.f32 %v1050_v18, %v476_v4 }
  0xf3   : > { %v869_v9 = vpack.c.bf16 %v542_v0, %v542_v0  ;;  %v851_v10 = vpack.c.bf16 %v524_v1, %v524_v1  ;;  %v543_v11 = vmax.f32 %v485_v2, 0.0  ;;  %v525_v12 = vmax.f32 %v413_v3, 0.0 }
  0xf4   : > { %687 = vst.msk [vmem:[%s1062_s27 + $0x18] sm:$0xf] %vm680_vm1, %v853_v5  ;;  %v867_v13 = vpack.c.bf16 %v540_v6, %v540_v6  ;;  %v854_v14 = vpack.c.bf16 %v527_v7, %v527_v7  ;;  %v541_v15 = vmax.f32 %v477_v8, 0.0 }
  0xf5   : > { %703 = vst.msk [vmem:[%s1062_s27 + $0x58] sm:$0xf] %vm680_vm1, %v869_v9  ;;  %685 = vst.msk [vmem:[%s1062_s27 + $0x10] sm:$0xf] %vm680_vm1, %v851_v10  ;;  %v870_v16 = vpack.c.bf16 %v543_v11, %v543_v11  ;;  %v852_v17 = vpack.c.bf16 %v525_v12, %v525_v12  ;;  %v911_v19 = vpop.f32.mrb[8].mxu0 }
  0xf6   : > { %701 = vst.msk [vmem:[%s1062_s27 + $0x50] sm:$0xf] %vm680_vm1, %v867_v13  ;;  %688 = vst.msk [vmem:[%s1062_s27 + $0x1c] sm:$0xf] %vm680_vm1, %v854_v14  ;;  %v868_v20 = vpack.c.bf16 %v541_v15, %v541_v15  ;;  %v434_v21 = vadd.f32 %v911_v19, %v1050_v18  ;;  %v927_v22 = vpop.f32.mrb[8].mxu1  ;;  %v425_v23 = vpop.f32.mrb[9].mxu0 }
  0xf7   : > { %704 = vst.msk [vmem:[%s1062_s27 + $0x5c] sm:$0xf] %vm680_vm1, %v870_v16  ;;  %686 = vst.msk [vmem:[%s1062_s27 + $0x14] sm:$0xf] %vm680_vm1, %v852_v17  ;;  %v498_v24 = vadd.f32 %v927_v22, %v1050_v18  ;;  %v426_v25 = vadd.f32 %v1050_v18, %v425_v23  ;;  %v489_v26 = vpop.f32.mrb[9].mxu1  ;;  %v912_v27 = vpop.f32.mrb[10].mxu0 }
  0xf8   : > { %702 = vst.msk [vmem:[%s1062_s27 + $0x54] sm:$0xf] %vm680_vm1, %v868_v20  ;;  %v530_v28 = vmax.f32 %v434_v21, 0.0  ;;  %v490_v29 = vadd.f32 %v1050_v18, %v489_v26  ;;  %v437_v30 = vadd.f32 %v912_v27, %v1050_v18  ;;  %v928_v31 = vpop.f32.mrb[10].mxu1  ;;  %v428_v32 = vpop.f32.mrb[11].mxu0 }
  0xf9   : > { %v546_v33 = vmax.f32 %v498_v24, 0.0  ;;  %v528_v34 = vmax.f32 %v426_v25, 0.0  ;;  %v501_v35 = vadd.f32 %v928_v31, %v1050_v18  ;;  %v429_v36 = vadd.f32 %v1050_v18, %v428_v32  ;;  %v492_v37 = vpop.f32.mrb[11].mxu1 }
  0xfa   : > { %v857_v38 = vpack.c.bf16 %v530_v28, %v530_v28  ;;  %v544_v39 = vmax.f32 %v490_v29, 0.0  ;;  %v531_v40 = vmax.f32 %v437_v30, 0.0  ;;  %v493_v41 = vadd.f32 %v1050_v18, %v492_v37 }
  0xfb   : > { %v873_v42 = vpack.c.bf16 %v546_v33, %v546_v33  ;;  %v855_v43 = vpack.c.bf16 %v528_v34, %v528_v34  ;;  %v547_v44 = vmax.f32 %v501_v35, 0.0  ;;  %v529_v45 = vmax.f32 %v429_v36, 0.0 }
  0xfc   : > { %691 = vst.msk [vmem:[%s1062_s27 + $0x28] sm:$0xf] %vm680_vm1, %v857_v38  ;;  %v871_v46 = vpack.c.bf16 %v544_v39, %v544_v39  ;;  %v858_v47 = vpack.c.bf16 %v531_v40, %v531_v40  ;;  %v545_v48 = vmax.f32 %v493_v41, 0.0 }
  0xfd   : > { %707 = vst.msk [vmem:[%s1062_s27 + $0x68] sm:$0xf] %vm680_vm1, %v873_v42  ;;  %689 = vst.msk [vmem:[%s1062_s27 + $0x20] sm:$0xf] %vm680_vm1, %v855_v43  ;;  %v874_v49 = vpack.c.bf16 %v547_v44, %v547_v44  ;;  %v856_v50 = vpack.c.bf16 %v529_v45, %v529_v45  ;;  %v915_v51 = vpop.f32.mrb[12].mxu0 }
  0xfe   : > { %705 = vst.msk [vmem:[%s1062_s27 + $0x60] sm:$0xf] %vm680_vm1, %v871_v46  ;;  %692 = vst.msk [vmem:[%s1062_s27 + $0x2c] sm:$0xf] %vm680_vm1, %v858_v47  ;;  %v872_v52 = vpack.c.bf16 %v545_v48, %v545_v48  ;;  %v450_v53 = vadd.f32 %v915_v51, %v1050_v18  ;;  %v931_v54 = vpop.f32.mrb[12].mxu1  ;;  %v441_v55 = vpop.f32.mrb[13].mxu0 }
  0xff   : > { %708 = vst.msk [vmem:[%s1062_s27 + $0x6c] sm:$0xf] %vm680_vm1, %v874_v49  ;;  %690 = vst.msk [vmem:[%s1062_s27 + $0x24] sm:$0xf] %vm680_vm1, %v856_v50  ;;  %v514_v56 = vadd.f32 %v931_v54, %v1050_v18  ;;  %v442_v57 = vadd.f32 %v1050_v18, %v441_v55  ;;  %v505_v58 = vpop.f32.mrb[13].mxu1  ;;  %v916_v59 = vpop.f32.mrb[14].mxu0 }
 0x100   : > { %706 = vst.msk [vmem:[%s1062_s27 + $0x64] sm:$0xf] %vm680_vm1, %v872_v52  ;;  %v534_v60 = vmax.f32 %v450_v53, 0.0  ;;  %v506_v61 = vadd.f32 %v1050_v18, %v505_v58  ;;  %v453_v62 = vadd.f32 %v916_v59, %v1050_v18  ;;  %v932_v63 = vpop.f32.mrb[14].mxu1  ;;  %v444_v0 = vpop.f32.mrb[15].mxu0 }
 0x101   : > { %v550_v1 = vmax.f32 %v514_v56, 0.0  ;;  %v532_v2 = vmax.f32 %v442_v57, 0.0  ;;  %v517_v3 = vadd.f32 %v932_v63, %v1050_v18  ;;  %v445_v4 = vadd.f32 %v1050_v18, %v444_v0  ;;  %v508_v5 = vpop.f32.mrb[15].mxu1 }
 0x102   : > { %v861_v6 = vpack.c.bf16 %v534_v60, %v534_v60  ;;  %v548_v7 = vmax.f32 %v506_v61, 0.0  ;;  %v535_v8 = vmax.f32 %v453_v62, 0.0  ;;  %v509_v9 = vadd.f32 %v1050_v18, %v508_v5 }
 0x103   : > { %v877_v10 = vpack.c.bf16 %v550_v1, %v550_v1  ;;  %v859_v11 = vpack.c.bf16 %v532_v2, %v532_v2  ;;  %v551_v12 = vmax.f32 %v517_v3, 0.0  ;;  %v533_v13 = vmax.f32 %v445_v4, 0.0 }
 0x104   : > { %695 = vst.msk [vmem:[%s1062_s27 + $0x38] sm:$0xf] %vm680_vm1, %v861_v6  ;;  %v875_v14 = vpack.c.bf16 %v548_v7, %v548_v7  ;;  %v862_v15 = vpack.c.bf16 %v535_v8, %v535_v8  ;;  %v549_v16 = vmax.f32 %v509_v9, 0.0 }
 0x105   : > { %711 = vst.msk [vmem:[%s1062_s27 + $0x78] sm:$0xf] %vm680_vm1, %v877_v10  ;;  %693 = vst.msk [vmem:[%s1062_s27 + $0x30] sm:$0xf] %vm680_vm1, %v859_v11  ;;  %v878_v17 = vpack.c.bf16 %v551_v12, %v551_v12  ;;  %v860_v19 = vpack.c.bf16 %v533_v13, %v533_v13 }
 0x106   : > { %709 = vst.msk [vmem:[%s1062_s27 + $0x70] sm:$0xf] %vm680_vm1, %v875_v14  ;;  %696 = vst.msk [vmem:[%s1062_s27 + $0x3c] sm:$0xf] %vm680_vm1, %v862_v15  ;;  %v876_v18 = vpack.c.bf16 %v549_v16, %v549_v16 }
 0x107   : > { %712 = vst.msk [vmem:[%s1062_s27 + $0x7c] sm:$0xf] %vm680_vm1, %v878_v17  ;;  %694 = vst.msk [vmem:[%s1062_s27 + $0x34] sm:$0xf] %vm680_vm1, %v860_v19 }
 0x108   : > { %710 = vst.msk [vmem:[%s1062_s27 + $0x74] sm:$0xf] %vm680_vm1, %v876_v18 }
 0x109 PF: > { %s13_s12 = sadd.s32 1, %s969_s12  }
 0x10a   : > { %p10_p4 = scmp.ge.s32.totalorder %s13_s12, 4  }
 0x10c   :  { %12 = sbr.rel (!%p10_p4) target bundleno = 1 (0x1), region = 62 }

// kernel: base_resnet_forward.50
= control target key start
LH: loop header
LB: loop body
LE: loop exit
PB: predicated region body
PF: predicated region fallthrough
CT: control target
= control target key end

     0   :  { %s1631_s21 = smov 0   ;;  %s1870_s0 = inlined_call_operand.vmem [shape: bf16[512,8], index: 0, kind: input, shape index: {}]   ;;  %s1871_s1 = inlined_call_operand.vmem [shape: bf16[8,32], index: 1, kind: input, shape index: {}]   ;;  %s1872_s2 = inlined_call_operand.vmem [shape: f32[1,32], index: 2, kind: input, shape index: {}]   ;;  %s1873_s3 = inlined_call_operand.vmem [shape: bf16[512,8], index: 3, kind: input, shape index: {}]   ;;  %s1874_s4 = inlined_call_operand.vmem [shape: bf16[8,32], index: 4, kind: input, shape index: {}]   ;;  %s1875_s5 = inlined_call_operand.vmem [shape: f32[1,32], index: 5, kind: input, shape index: {}]   ;;  %s1876_s6 = inlined_call_operand.vmem [shape: bf16[512,32], index: 6, kind: output, shape index: {}]  }
   0x1 LB: > { %s1269_s22 = sadd.s32 4294967295, %s1594_s21   ;;  %p1273_p0 = scmp.ge.s32.totalorder %s1594_s21, 1  ;;  %s1594_s21 = sphi %s1631_s21, %s16_s21  }
   0x2   : > { %p224_p1 = scmp.lt.s32.totalorder %s1594_s21, 3 }
   0x4   : > { %p225_p2 = pnand %p1273_p0, %p224_p1 }
   0x5   : > { %v343_v0 = vld [vmem:[%s1874_s4] sm:$0xf] (!%p225_p2)  ;;  %vm473_vm0 = vcmask (!%p225_p2), 1043456   ;;  %s1274_s27 = sshll.u32 (!%p225_p2), %s1269_s22, 5  ;;  %vm424_vm1 = vcmask (!%p225_p2), 64512   ;;  %vm1168_vm2 = vcmask (!%p225_p2), 257024  }
   0x6   : > { %228 = sbr.rel (%p225_p2) target bundleno = 301 (0x12d), region = 44  ;;  %v310_v1 = vld [vmem:[%s1871_s1] sm:$0xf] (!%p225_p2)  ;;  %1546 = vmatprep.subr.msk.bf16.mxu1 (!%p225_p2), %vm473_vm0, %v343_v0  ;;  %v475_v2 = vsel (!%p225_p2), %vm473_vm0, %v343_v0, 0  ;;  %p260_p3 = scmp.lt.s32.totalorder (!%p225_p2), %s1274_s27, 63 }
   0x7   : > { %1547 = vmatprep.subr.msk.bf16.mxu0 (!%p225_p2), %vm473_vm0, %v310_v1  ;;  %v767_v3 = vsel (!%p225_p2), %vm473_vm0, %v310_v1, 0  ;;  %1447 = vmatpush3.bf16.msra.mxu1 (!%p225_p2), %v475_v2  ;;  %v1726_v38 = vld [vmem:[%s1872_s2] ss:$0 sm:$0xff] (!%p225_p2) }
   0x8   : > { %1481 = vmatpush3.bf16.msra.mxu0 (!%p225_p2), %v767_v3  ;;  %v1731_v43 = vld [vmem:[%s1875_s5] ss:$0 sm:$0xff] (!%p225_p2) }
   0xd   : > { %s1878_s27 = smov (!%p260_p3, %s1274_s27), 63 }
   0xe   : > { %s1645_s28 = sshll.u32 %s1878_s27, 2 }
   0xf   : > { %s1651_s7 = scalar_lea.vmem %s1873_s3, %s1645_s28  ;;  %s1658_s10 = scalar_lea.vmem %s1870_s0, %s1645_s28 }
  0x10   : > { %v1556_v4 = vld [vmem:[%s1651_s7] sm:$0xff]   ;;  %v1558_v6 = vld [vmem:[%s1651_s7 + $0x8] sm:$0xff]   ;;  %v1560_v8 = vld [vmem:[%s1651_s7 + $0x10] sm:$0xff]   ;;  %s1744_s17 = scalar_lea.vmem %s1876_s6, %s1645_s28 }
  0x11   : > { %v1557_v5 = vld [vmem:[%s1658_s10] sm:$0xff]   ;;  %1448 = vmatprep.mubr.msk.bf16.mxu1 %vm424_vm1, %v1556_v4  ;;  %v1559_v7 = vld [vmem:[%s1658_s10 + $0x8] sm:$0xff]   ;;  %v1561_v9 = vld [vmem:[%s1658_s10 + $0x10] sm:$0xff]  }
  0x12   : > { %1482 = vmatprep.mubr.msk.bf16.mxu0 %vm424_vm1, %v1557_v5  ;;  %1449 = vmatmul.mubr.msk.bf16.vlgmr.msra.gmra.mrb[0].mxu1 %vm424_vm1, %v1558_v6  ;;  %v1562_v10 = vld [vmem:[%s1651_s7 + $0x18] sm:$0xff]   ;;  %v1564_v12 = vld [vmem:[%s1651_s7 + $0x20] sm:$0xff]   ;;  %v1566_v14 = vld [vmem:[%s1651_s7 + $0x28] sm:$0xff]  }
  0x13   : > { %1483 = vmatmul.mubr.msk.bf16.vlgmr.msra.gmra.mrb[0].mxu0 %vm424_vm1, %v1559_v7  ;;  %1452 = vmatprep.mubr.msk.bf16.mxu1 %vm424_vm1, %v1560_v8  ;;  %v1563_v11 = vld [vmem:[%s1658_s10 + $0x18] sm:$0xff]   ;;  %v1565_v13 = vld [vmem:[%s1658_s10 + $0x20] sm:$0xff]   ;;  %v1567_v15 = vld [vmem:[%s1658_s10 + $0x28] sm:$0xff]  }
  0x14   : > { %1486 = vmatprep.mubr.msk.bf16.mxu0 %vm424_vm1, %v1561_v9  ;;  %v1568_v16 = vld [vmem:[%s1651_s7 + $0x30] sm:$0xff]   ;;  %v1570_v18 = vld [vmem:[%s1651_s7 + $0x38] sm:$0xff]   ;;  %v1572_v20 = vld [vmem:[%s1651_s7 + $0x40] sm:$0xff]  }
  0x15   : > { %v1569_v17 = vld [vmem:[%s1658_s10 + $0x30] sm:$0xff]   ;;  %v1571_v19 = vld [vmem:[%s1658_s10 + $0x38] sm:$0xff]   ;;  %v1573_v21 = vld [vmem:[%s1658_s10 + $0x40] sm:$0xff]  }
  0x16   : > { %v1574_v22 = vld [vmem:[%s1651_s7 + $0x48] sm:$0xff]   ;;  %v1576_v24 = vld [vmem:[%s1651_s7 + $0x50] sm:$0xff]   ;;  %v1578_v26 = vld [vmem:[%s1651_s7 + $0x58] sm:$0xff]  }
  0x17   : > { %v1575_v23 = vld [vmem:[%s1658_s10 + $0x48] sm:$0xff]   ;;  %v1577_v25 = vld [vmem:[%s1658_s10 + $0x50] sm:$0xff]   ;;  %v1579_v27 = vld [vmem:[%s1658_s10 + $0x58] sm:$0xff]  }
  0x18   : > { %v1580_v28 = vld [vmem:[%s1651_s7 + $0x60] sm:$0xff]   ;;  %v1582_v30 = vld [vmem:[%s1651_s7 + $0x68] sm:$0xff]   ;;  %v1584_v32 = vld [vmem:[%s1651_s7 + $0x70] sm:$0xff]  }
  0x19   : > { %v1581_v29 = vld [vmem:[%s1658_s10 + $0x60] sm:$0xff]   ;;  %v1583_v31 = vld [vmem:[%s1658_s10 + $0x68] sm:$0xff]   ;;  %v1585_v33 = vld [vmem:[%s1658_s10 + $0x70] sm:$0xff]  }
  0x1a   : > { %1453 = vmatmul.mubr.msk.bf16.gmra.mrb[4].mxu1 %vm424_vm1, %v1562_v10  ;;  %v1586_v34 = vld [vmem:[%s1651_s7 + $0x78] sm:$0xff]  }
  0x1b   : > { %1487 = vmatmul.mubr.msk.bf16.gmra.mrb[4].mxu0 %vm424_vm1, %v1563_v11  ;;  %1456 = vmatprep.mubr.msk.bf16.mxu1 %vm424_vm1, %v1564_v12  ;;  %v1587_v35 = vld [vmem:[%s1658_s10 + $0x78] sm:$0xff]  }
  0x1c   : > { %1490 = vmatprep.mubr.msk.bf16.mxu0 %vm424_vm1, %v1565_v13 }
  0x22   : > { %1457 = vmatmul.mubr.msk.bf16.gmra.mrb[8].mxu1 %vm424_vm1, %v1566_v14 }
  0x23   : > { %1491 = vmatmul.mubr.msk.bf16.gmra.mrb[8].mxu0 %vm424_vm1, %v1567_v15  ;;  %1460 = vmatprep.mubr.msk.bf16.mxu1 %vm424_vm1, %v1568_v16 }
  0x24   : > { %1494 = vmatprep.mubr.msk.bf16.mxu0 %vm424_vm1, %v1569_v17 }
  0x2a   : > { %1461 = vmatmul.mubr.msk.bf16.gmra.mrb[12].mxu1 %vm424_vm1, %v1570_v18 }
  0x2b   : > { %1495 = vmatmul.mubr.msk.bf16.gmra.mrb[12].mxu0 %vm424_vm1, %v1571_v19  ;;  %1464 = vmatprep.mubr.msk.bf16.mxu1 %vm424_vm1, %v1572_v20 }
  0x2c   : > { %1498 = vmatprep.mubr.msk.bf16.mxu0 %vm424_vm1, %v1573_v21 }
  0x32   : > { %1465 = vmatmul.mubr.msk.bf16.gmra.mrb[16].mxu1 %vm424_vm1, %v1574_v22 }
  0x33   : > { %1499 = vmatmul.mubr.msk.bf16.gmra.mrb[16].mxu0 %vm424_vm1, %v1575_v23  ;;  %1468 = vmatprep.mubr.msk.bf16.mxu1 %vm424_vm1, %v1576_v24 }
  0x34   : > { %1502 = vmatprep.mubr.msk.bf16.mxu0 %vm424_vm1, %v1577_v25 }
  0x3a   : > { %1469 = vmatmul.mubr.msk.bf16.gmra.mrb[20].mxu1 %vm424_vm1, %v1578_v26 }
  0x3b   : > { %1503 = vmatmul.mubr.msk.bf16.gmra.mrb[20].mxu0 %vm424_vm1, %v1579_v27  ;;  %1472 = vmatprep.mubr.msk.bf16.mxu1 %vm424_vm1, %v1580_v28 }
  0x3c   : > { %1506 = vmatprep.mubr.msk.bf16.mxu0 %vm424_vm1, %v1581_v29 }
  0x42   : > { %1473 = vmatmul.mubr.msk.bf16.gmra.mrb[24].mxu1 %vm424_vm1, %v1582_v30 }
  0x43   : > { %1507 = vmatmul.mubr.msk.bf16.gmra.mrb[24].mxu0 %vm424_vm1, %v1583_v31  ;;  %1476 = vmatprep.mubr.msk.bf16.mxu1 %vm424_vm1, %v1584_v32 }
  0x44   : > { %1510 = vmatprep.mubr.msk.bf16.mxu0 %vm424_vm1, %v1585_v33 }
  0x4a   : > { %1477 = vmatmul.mubr.msk.bf16.gmra.mrb[28].mxu1 %vm424_vm1, %v1586_v34 }
  0x4b   : > { %1511 = vmatmul.mubr.msk.bf16.gmra.mrb[28].mxu0 %vm424_vm1, %v1587_v35 }
  0xe5   : > { %v1450_v36 = vpop.f32.mrb[0].mxu1 }
  0xe6   : > { %v1484_v37 = vpop.f32.mrb[0].mxu0  ;;  %v511_v39 = vpop.f32.mrb[1].mxu1 }
  0xe7   : > { %v812_v40 = vadd.f32 %v1484_v37, %v1450_v36  ;;  %v803_v41 = vpop.f32.mrb[1].mxu0  ;;  %v1451_v42 = vpop.f32.mrb[2].mxu1 }
  0xe8   : > { %v804_v44 = vadd.f32 %v803_v41, %v511_v39  ;;  %v1485_v45 = vpop.f32.mrb[2].mxu0  ;;  %v514_v46 = vpop.f32.mrb[3].mxu1 }
  0xe9   : > { %v939_v47 = vadd.f32 %v1726_v38, %v812_v40  ;;  %v815_v48 = vadd.f32 %v1485_v45, %v1451_v42  ;;  %v806_v49 = vpop.f32.mrb[3].mxu0 }
  0xea   : > { %v937_v50 = vadd.f32 %v1726_v38, %v804_v44  ;;  %v807_v51 = vadd.f32 %v806_v49, %v514_v46 }
  0xeb   : > { %v978_v52 = vadd.f32 %v1731_v43, %v939_v47  ;;  %v940_v53 = vadd.f32 %v1726_v38, %v815_v48 }
  0xec   : > { %v976_v54 = vadd.f32 %v1731_v43, %v937_v50  ;;  %v938_v55 = vadd.f32 %v1726_v38, %v807_v51 }
  0xed   : > { %v1010_v56 = vmax.f32 %v978_v52, 0.0  ;;  %v979_v57 = vadd.f32 %v1731_v43, %v940_v53  ;;  %v1454_v58 = vpop.f32.mrb[4].mxu1 }
  0xee   : > { %v1008_v59 = vmax.f32 %v976_v54, 0.0  ;;  %v977_v60 = vadd.f32 %v1731_v43, %v938_v55  ;;  %v1488_v61 = vpop.f32.mrb[4].mxu0  ;;  %v527_v62 = vpop.f32.mrb[5].mxu1 }
  0xef   : > { %v1382_v63 = vpack.c.bf16 %v1010_v56, %v1010_v56  ;;  %v1011_v0 = vmax.f32 %v979_v57, 0.0  ;;  %v828_v1 = vadd.f32 %v1488_v61, %v1454_v58  ;;  %v819_v2 = vpop.f32.mrb[5].mxu0  ;;  %v1455_v3 = vpop.f32.mrb[6].mxu1 }
  0xf0   : > { %v1380_v4 = vpack.c.bf16 %v1008_v59, %v1008_v59  ;;  %v1009_v5 = vmax.f32 %v977_v60, 0.0  ;;  %v820_v6 = vadd.f32 %v819_v2, %v527_v62  ;;  %v1489_v7 = vpop.f32.mrb[6].mxu0  ;;  %v530_v8 = vpop.f32.mrb[7].mxu1 }
  0xf1   : > { %1171 = vst.msk [vmem:[%s1744_s17 + $0x8] sm:$0xf] %vm1168_vm2, %v1382_v63  ;;  %v1383_v9 = vpack.c.bf16 %v1011_v0, %v1011_v0  ;;  %v943_v10 = vadd.f32 %v1726_v38, %v828_v1  ;;  %v831_v11 = vadd.f32 %v1489_v7, %v1455_v3  ;;  %v822_v12 = vpop.f32.mrb[7].mxu0 }
  0xf2   : > { %1169 = vst.msk [vmem:[%s1744_s17] sm:$0xf] %vm1168_vm2, %v1380_v4  ;;  %v1381_v13 = vpack.c.bf16 %v1009_v5, %v1009_v5  ;;  %v941_v14 = vadd.f32 %v1726_v38, %v820_v6  ;;  %v823_v15 = vadd.f32 %v822_v12, %v530_v8 }
  0xf3   : > { %1172 = vst.msk [vmem:[%s1744_s17 + $0xc] sm:$0xf] %vm1168_vm2, %v1383_v9  ;;  %v982_v16 = vadd.f32 %v1731_v43, %v943_v10  ;;  %v944_v17 = vadd.f32 %v1726_v38, %v831_v11 }
  0xf4   : > { %1170 = vst.msk [vmem:[%s1744_s17 + $0x4] sm:$0xf] %vm1168_vm2, %v1381_v13  ;;  %v980_v18 = vadd.f32 %v1731_v43, %v941_v14  ;;  %v942_v19 = vadd.f32 %v1726_v38, %v823_v15 }
  0xf5   : > { %v1014_v20 = vmax.f32 %v982_v16, 0.0  ;;  %v983_v21 = vadd.f32 %v1731_v43, %v944_v17  ;;  %v1458_v22 = vpop.f32.mrb[8].mxu1 }
  0xf6   : > { %v1012_v23 = vmax.f32 %v980_v18, 0.0  ;;  %v981_v24 = vadd.f32 %v1731_v43, %v942_v19  ;;  %v1492_v25 = vpop.f32.mrb[8].mxu0  ;;  %v543_v26 = vpop.f32.mrb[9].mxu1 }
  0xf7   : > { %v1386_v27 = vpack.c.bf16 %v1014_v20, %v1014_v20  ;;  %v1015_v28 = vmax.f32 %v983_v21, 0.0  ;;  %v844_v29 = vadd.f32 %v1492_v25, %v1458_v22  ;;  %v835_v30 = vpop.f32.mrb[9].mxu0  ;;  %v1459_v31 = vpop.f32.mrb[10].mxu1 }
  0xf8   : > { %v1384_v32 = vpack.c.bf16 %v1012_v23, %v1012_v23  ;;  %v1013_v33 = vmax.f32 %v981_v24, 0.0  ;;  %v836_v34 = vadd.f32 %v835_v30, %v543_v26  ;;  %v1493_v35 = vpop.f32.mrb[10].mxu0  ;;  %v546_v36 = vpop.f32.mrb[11].mxu1 }
  0xf9   : > { %1175 = vst.msk [vmem:[%s1744_s17 + $0x18] sm:$0xf] %vm1168_vm2, %v1386_v27  ;;  %v1387_v37 = vpack.c.bf16 %v1015_v28, %v1015_v28  ;;  %v947_v39 = vadd.f32 %v1726_v38, %v844_v29  ;;  %v847_v40 = vadd.f32 %v1493_v35, %v1459_v31  ;;  %v838_v41 = vpop.f32.mrb[11].mxu0 }
  0xfa   : > { %1173 = vst.msk [vmem:[%s1744_s17 + $0x10] sm:$0xf] %vm1168_vm2, %v1384_v32  ;;  %v1385_v42 = vpack.c.bf16 %v1013_v33, %v1013_v33  ;;  %v945_v44 = vadd.f32 %v1726_v38, %v836_v34  ;;  %v839_v45 = vadd.f32 %v838_v41, %v546_v36 }
  0xfb   : > { %1176 = vst.msk [vmem:[%s1744_s17 + $0x1c] sm:$0xf] %vm1168_vm2, %v1387_v37  ;;  %v986_v46 = vadd.f32 %v1731_v43, %v947_v39  ;;  %v948_v47 = vadd.f32 %v1726_v38, %v847_v40 }
  0xfc   : > { %1174 = vst.msk [vmem:[%s1744_s17 + $0x14] sm:$0xf] %vm1168_vm2, %v1385_v42  ;;  %v984_v48 = vadd.f32 %v1731_v43, %v945_v44  ;;  %v946_v49 = vadd.f32 %v1726_v38, %v839_v45 }
  0xfd   : > { %v1018_v50 = vmax.f32 %v986_v46, 0.0  ;;  %v987_v51 = vadd.f32 %v1731_v43, %v948_v47  ;;  %v1462_v52 = vpop.f32.mrb[12].mxu1 }
  0xfe   : > { %v1016_v53 = vmax.f32 %v984_v48, 0.0  ;;  %v985_v54 = vadd.f32 %v1731_v43, %v946_v49  ;;  %v1496_v55 = vpop.f32.mrb[12].mxu0  ;;  %v559_v56 = vpop.f32.mrb[13].mxu1 }
  0xff   : > { %v1390_v57 = vpack.c.bf16 %v1018_v50, %v1018_v50  ;;  %v1019_v58 = vmax.f32 %v987_v51, 0.0  ;;  %v860_v59 = vadd.f32 %v1496_v55, %v1462_v52  ;;  %v851_v60 = vpop.f32.mrb[13].mxu0  ;;  %v1463_v61 = vpop.f32.mrb[14].mxu1 }
 0x100   : > { %v1388_v62 = vpack.c.bf16 %v1016_v53, %v1016_v53  ;;  %v1017_v63 = vmax.f32 %v985_v54, 0.0  ;;  %v852_v0 = vadd.f32 %v851_v60, %v559_v56  ;;  %v1497_v1 = vpop.f32.mrb[14].mxu0  ;;  %v562_v2 = vpop.f32.mrb[15].mxu1 }
 0x101   : > { %1179 = vst.msk [vmem:[%s1744_s17 + $0x28] sm:$0xf] %vm1168_vm2, %v1390_v57  ;;  %v1391_v3 = vpack.c.bf16 %v1019_v58, %v1019_v58  ;;  %v951_v4 = vadd.f32 %v1726_v38, %v860_v59  ;;  %v863_v5 = vadd.f32 %v1497_v1, %v1463_v61  ;;  %v854_v6 = vpop.f32.mrb[15].mxu0 }
 0x102   : > { %1177 = vst.msk [vmem:[%s1744_s17 + $0x20] sm:$0xf] %vm1168_vm2, %v1388_v62  ;;  %v1389_v7 = vpack.c.bf16 %v1017_v63, %v1017_v63  ;;  %v949_v8 = vadd.f32 %v1726_v38, %v852_v0  ;;  %v855_v9 = vadd.f32 %v854_v6, %v562_v2 }
 0x103   : > { %1180 = vst.msk [vmem:[%s1744_s17 + $0x2c] sm:$0xf] %vm1168_vm2, %v1391_v3  ;;  %v990_v10 = vadd.f32 %v1731_v43, %v951_v4  ;;  %v952_v11 = vadd.f32 %v1726_v38, %v863_v5 }
 0x104   : > { %1178 = vst.msk [vmem:[%s1744_s17 + $0x24] sm:$0xf] %vm1168_vm2, %v1389_v7  ;;  %v988_v12 = vadd.f32 %v1731_v43, %v949_v8  ;;  %v950_v13 = vadd.f32 %v1726_v38, %v855_v9 }
 0x105   : > { %v1022_v14 = vmax.f32 %v990_v10, 0.0  ;;  %v991_v15 = vadd.f32 %v1731_v43, %v952_v11  ;;  %v1466_v16 = vpop.f32.mrb[16].mxu1 }
 0x106   : > { %v1020_v17 = vmax.f32 %v988_v12, 0.0  ;;  %v989_v18 = vadd.f32 %v1731_v43, %v950_v13  ;;  %v1500_v19 = vpop.f32.mrb[16].mxu0  ;;  %v575_v20 = vpop.f32.mrb[17].mxu1 }
 0x107   : > { %v1394_v21 = vpack.c.bf16 %v1022_v14, %v1022_v14  ;;  %v1023_v22 = vmax.f32 %v991_v15, 0.0  ;;  %v876_v23 = vadd.f32 %v1500_v19, %v1466_v16  ;;  %v867_v24 = vpop.f32.mrb[17].mxu0  ;;  %v1467_v25 = vpop.f32.mrb[18].mxu1 }
 0x108   : > { %v1392_v26 = vpack.c.bf16 %v1020_v17, %v1020_v17  ;;  %v1021_v27 = vmax.f32 %v989_v18, 0.0  ;;  %v868_v28 = vadd.f32 %v867_v24, %v575_v20  ;;  %v1501_v29 = vpop.f32.mrb[18].mxu0  ;;  %v578_v30 = vpop.f32.mrb[19].mxu1 }
 0x109   : > { %1183 = vst.msk [vmem:[%s1744_s17 + $0x38] sm:$0xf] %vm1168_vm2, %v1394_v21  ;;  %v1395_v31 = vpack.c.bf16 %v1023_v22, %v1023_v22  ;;  %v955_v32 = vadd.f32 %v1726_v38, %v876_v23  ;;  %v879_v33 = vadd.f32 %v1501_v29, %v1467_v25  ;;  %v870_v34 = vpop.f32.mrb[19].mxu0 }
 0x10a   : > { %1181 = vst.msk [vmem:[%s1744_s17 + $0x30] sm:$0xf] %vm1168_vm2, %v1392_v26  ;;  %v1393_v35 = vpack.c.bf16 %v1021_v27, %v1021_v27  ;;  %v953_v36 = vadd.f32 %v1726_v38, %v868_v28  ;;  %v871_v37 = vadd.f32 %v870_v34, %v578_v30 }
 0x10b   : > { %1184 = vst.msk [vmem:[%s1744_s17 + $0x3c] sm:$0xf] %vm1168_vm2, %v1395_v31  ;;  %v994_v39 = vadd.f32 %v1731_v43, %v955_v32  ;;  %v956_v40 = vadd.f32 %v1726_v38, %v879_v33 }
 0x10c   : > { %1182 = vst.msk [vmem:[%s1744_s17 + $0x34] sm:$0xf] %vm1168_vm2, %v1393_v35  ;;  %v992_v41 = vadd.f32 %v1731_v43, %v953_v36  ;;  %v954_v42 = vadd.f32 %v1726_v38, %v871_v37 }
 0x10d   : > { %v1026_v44 = vmax.f32 %v994_v39, 0.0  ;;  %v995_v45 = vadd.f32 %v1731_v43, %v956_v40  ;;  %v1470_v46 = vpop.f32.mrb[20].mxu1 }
 0x10e   : > { %v1024_v47 = vmax.f32 %v992_v41, 0.0  ;;  %v993_v48 = vadd.f32 %v1731_v43, %v954_v42  ;;  %v1504_v49 = vpop.f32.mrb[20].mxu0  ;;  %v591_v50 = vpop.f32.mrb[21].mxu1 }
 0x10f   : > { %v1398_v51 = vpack.c.bf16 %v1026_v44, %v1026_v44  ;;  %v1027_v52 = vmax.f32 %v995_v45, 0.0  ;;  %v892_v53 = vadd.f32 %v1504_v49, %v1470_v46  ;;  %v883_v54 = vpop.f32.mrb[21].mxu0  ;;  %v1471_v55 = vpop.f32.mrb[22].mxu1 }
 0x110   : > { %v1396_v56 = vpack.c.bf16 %v1024_v47, %v1024_v47  ;;  %v1025_v57 = vmax.f32 %v993_v48, 0.0  ;;  %v884_v58 = vadd.f32 %v883_v54, %v591_v50  ;;  %v1505_v59 = vpop.f32.mrb[22].mxu0  ;;  %v594_v60 = vpop.f32.mrb[23].mxu1 }
 0x111   : > { %1187 = vst.msk [vmem:[%s1744_s17 + $0x48] sm:$0xf] %vm1168_vm2, %v1398_v51  ;;  %v1399_v61 = vpack.c.bf16 %v1027_v52, %v1027_v52  ;;  %v959_v62 = vadd.f32 %v1726_v38, %v892_v53  ;;  %v895_v63 = vadd.f32 %v1505_v59, %v1471_v55  ;;  %v886_v0 = vpop.f32.mrb[23].mxu0 }
 0x112   : > { %1185 = vst.msk [vmem:[%s1744_s17 + $0x40] sm:$0xf] %vm1168_vm2, %v1396_v56  ;;  %v1397_v1 = vpack.c.bf16 %v1025_v57, %v1025_v57  ;;  %v957_v2 = vadd.f32 %v1726_v38, %v884_v58  ;;  %v887_v3 = vadd.f32 %v886_v0, %v594_v60 }
 0x113   : > { %1188 = vst.msk [vmem:[%s1744_s17 + $0x4c] sm:$0xf] %vm1168_vm2, %v1399_v61  ;;  %v998_v4 = vadd.f32 %v1731_v43, %v959_v62  ;;  %v960_v5 = vadd.f32 %v1726_v38, %v895_v63 }
 0x114   : > { %1186 = vst.msk [vmem:[%s1744_s17 + $0x44] sm:$0xf] %vm1168_vm2, %v1397_v1  ;;  %v996_v6 = vadd.f32 %v1731_v43, %v957_v2  ;;  %v958_v7 = vadd.f32 %v1726_v38, %v887_v3 }
 0x115   : > { %v1030_v8 = vmax.f32 %v998_v4, 0.0  ;;  %v999_v9 = vadd.f32 %v1731_v43, %v960_v5  ;;  %v1474_v10 = vpop.f32.mrb[24].mxu1 }
 0x116   : > { %v1028_v11 = vmax.f32 %v996_v6, 0.0  ;;  %v997_v12 = vadd.f32 %v1731_v43, %v958_v7  ;;  %v1508_v13 = vpop.f32.mrb[24].mxu0  ;;  %v607_v14 = vpop.f32.mrb[25].mxu1 }
 0x117   : > { %v1402_v15 = vpack.c.bf16 %v1030_v8, %v1030_v8  ;;  %v1031_v16 = vmax.f32 %v999_v9, 0.0  ;;  %v908_v17 = vadd.f32 %v1508_v13, %v1474_v10  ;;  %v899_v18 = vpop.f32.mrb[25].mxu0  ;;  %v1475_v19 = vpop.f32.mrb[26].mxu1 }
 0x118   : > { %v1400_v20 = vpack.c.bf16 %v1028_v11, %v1028_v11  ;;  %v1029_v21 = vmax.f32 %v997_v12, 0.0  ;;  %v900_v22 = vadd.f32 %v899_v18, %v607_v14  ;;  %v1509_v23 = vpop.f32.mrb[26].mxu0  ;;  %v610_v24 = vpop.f32.mrb[27].mxu1 }
 0x119   : > { %1191 = vst.msk [vmem:[%s1744_s17 + $0x58] sm:$0xf] %vm1168_vm2, %v1402_v15  ;;  %v1403_v25 = vpack.c.bf16 %v1031_v16, %v1031_v16  ;;  %v963_v26 = vadd.f32 %v1726_v38, %v908_v17  ;;  %v911_v27 = vadd.f32 %v1509_v23, %v1475_v19  ;;  %v902_v28 = vpop.f32.mrb[27].mxu0 }
 0x11a   : > { %1189 = vst.msk [vmem:[%s1744_s17 + $0x50] sm:$0xf] %vm1168_vm2, %v1400_v20  ;;  %v1401_v29 = vpack.c.bf16 %v1029_v21, %v1029_v21  ;;  %v961_v30 = vadd.f32 %v1726_v38, %v900_v22  ;;  %v903_v31 = vadd.f32 %v902_v28, %v610_v24 }
 0x11b   : > { %1192 = vst.msk [vmem:[%s1744_s17 + $0x5c] sm:$0xf] %vm1168_vm2, %v1403_v25  ;;  %v1002_v32 = vadd.f32 %v1731_v43, %v963_v26  ;;  %v964_v33 = vadd.f32 %v1726_v38, %v911_v27 }
 0x11c   : > { %1190 = vst.msk [vmem:[%s1744_s17 + $0x54] sm:$0xf] %vm1168_vm2, %v1401_v29  ;;  %v1000_v34 = vadd.f32 %v1731_v43, %v961_v30  ;;  %v962_v35 = vadd.f32 %v1726_v38, %v903_v31 }
 0x11d   : > { %v1034_v36 = vmax.f32 %v1002_v32, 0.0  ;;  %v1003_v37 = vadd.f32 %v1731_v43, %v964_v33  ;;  %v1478_v39 = vpop.f32.mrb[28].mxu1 }
 0x11e   : > { %v1032_v40 = vmax.f32 %v1000_v34, 0.0  ;;  %v1001_v41 = vadd.f32 %v1731_v43, %v962_v35  ;;  %v1512_v42 = vpop.f32.mrb[28].mxu0  ;;  %v623_v44 = vpop.f32.mrb[29].mxu1 }
 0x11f   : > { %v1406_v45 = vpack.c.bf16 %v1034_v36, %v1034_v36  ;;  %v1035_v46 = vmax.f32 %v1003_v37, 0.0  ;;  %v924_v47 = vadd.f32 %v1512_v42, %v1478_v39  ;;  %v915_v48 = vpop.f32.mrb[29].mxu0  ;;  %v1479_v49 = vpop.f32.mrb[30].mxu1 }
 0x120   : > { %v1404_v50 = vpack.c.bf16 %v1032_v40, %v1032_v40  ;;  %v1033_v51 = vmax.f32 %v1001_v41, 0.0  ;;  %v916_v52 = vadd.f32 %v915_v48, %v623_v44  ;;  %v1513_v53 = vpop.f32.mrb[30].mxu0  ;;  %v626_v54 = vpop.f32.mrb[31].mxu1 }
 0x121   : > { %1195 = vst.msk [vmem:[%s1744_s17 + $0x68] sm:$0xf] %vm1168_vm2, %v1406_v45  ;;  %v1407_v55 = vpack.c.bf16 %v1035_v46, %v1035_v46  ;;  %v967_v56 = vadd.f32 %v1726_v38, %v924_v47  ;;  %v927_v57 = vadd.f32 %v1513_v53, %v1479_v49  ;;  %v918_v58 = vpop.f32.mrb[31].mxu0 }
 0x122   : > { %1193 = vst.msk [vmem:[%s1744_s17 + $0x60] sm:$0xf] %vm1168_vm2, %v1404_v50  ;;  %v1405_v59 = vpack.c.bf16 %v1033_v51, %v1033_v51  ;;  %v965_v60 = vadd.f32 %v1726_v38, %v916_v52  ;;  %v919_v61 = vadd.f32 %v918_v58, %v626_v54 }
 0x123   : > { %1196 = vst.msk [vmem:[%s1744_s17 + $0x6c] sm:$0xf] %vm1168_vm2, %v1407_v55  ;;  %v1006_v62 = vadd.f32 %v1731_v43, %v967_v56  ;;  %v968_v63 = vadd.f32 %v1726_v38, %v927_v57 }
 0x124   : > { %1194 = vst.msk [vmem:[%s1744_s17 + $0x64] sm:$0xf] %vm1168_vm2, %v1405_v59  ;;  %v1004_v0 = vadd.f32 %v1731_v43, %v965_v60  ;;  %v966_v1 = vadd.f32 %v1726_v38, %v919_v61 }
 0x125   : > { %v1038_v2 = vmax.f32 %v1006_v62, 0.0  ;;  %v1007_v3 = vadd.f32 %v1731_v43, %v968_v63 }
 0x126   : > { %v1036_v4 = vmax.f32 %v1004_v0, 0.0  ;;  %v1005_v5 = vadd.f32 %v1731_v43, %v966_v1 }
 0x127   : > { %v1410_v6 = vpack.c.bf16 %v1038_v2, %v1038_v2  ;;  %v1039_v7 = vmax.f32 %v1007_v3, 0.0 }
 0x128   : > { %v1408_v8 = vpack.c.bf16 %v1036_v4, %v1036_v4  ;;  %v1037_v9 = vmax.f32 %v1005_v5, 0.0 }
 0x129   : > { %1199 = vst.msk [vmem:[%s1744_s17 + $0x78] sm:$0xf] %vm1168_vm2, %v1410_v6  ;;  %v1411_v10 = vpack.c.bf16 %v1039_v7, %v1039_v7 }
 0x12a   : > { %1197 = vst.msk [vmem:[%s1744_s17 + $0x70] sm:$0xf] %vm1168_vm2, %v1408_v8  ;;  %v1409_v11 = vpack.c.bf16 %v1037_v9, %v1037_v9 }
 0x12b   : > { %1200 = vst.msk [vmem:[%s1744_s17 + $0x7c] sm:$0xf] %vm1168_vm2, %v1411_v10 }
 0x12c   : > { %1198 = vst.msk [vmem:[%s1744_s17 + $0x74] sm:$0xf] %vm1168_vm2, %v1409_v11 }
 0x12d PF: > { %s16_s21 = sadd.s32 1, %s1594_s21  }
 0x12e   : > { %p13_p4 = scmp.ge.s32.totalorder %s16_s21, 4  }
 0x130   :  { %15 = sbr.rel (!%p13_p4) target bundleno = 1 (0x1), region = 77 }

// kernel: base_resnet_forward.57
= control target key start
LH: loop header
LB: loop body
LE: loop exit
PB: predicated region body
PF: predicated region fallthrough
CT: control target
= control target key end

     0   :  { %s991_s12 = smov 0   ;;  %s1158_s0 = inlined_call_operand.vmem [shape: bf16[512,32], index: 0, kind: input, shape index: {}]   ;;  %s1159_s1 = inlined_call_operand.vmem [shape: bf16[32,16], index: 1, kind: input, shape index: {}]   ;;  %s1160_s2 = inlined_call_operand.vmem [shape: f32[1,16], index: 2, kind: input, shape index: {}]   ;;  %s1161_s3 = inlined_call_operand.vmem [shape: bf16[512,16], index: 3, kind: output, shape index: {}]  }
   0x1 LB: > { %s769_s13 = sadd.s32 4294967295, %s969_s12   ;;  %p773_p0 = scmp.ge.s32.totalorder %s969_s12, 1  ;;  %s969_s12 = sphi %s991_s12, %s13_s12  }
   0x2   : > { %p138_p1 = scmp.lt.s32.totalorder %s969_s12, 3 }
   0x4   : > { %p139_p2 = pnand %p773_p0, %p138_p1 }
   0x5   : > { %v945_v0 = vld [vmem:[%s1159_s1] sm:$0xff] (!%p139_p2)   ;;  %s774_s16 = sshll.u32 (!%p139_p2), %s769_s13, 5  ;;  %v946_v1 = vld [vmem:[%s1159_s1 + $0x8] sm:$0xff] (!%p139_p2)   ;;  %vm310_vm0 = vcmask (!%p139_p2), 261120   ;;  %vm680_vm1 = vcmask (!%p139_p2), 125952  }
   0x6   : > { %142 = sbr.rel (%p139_p2) target bundleno = 265 (0x109), region = 32  ;;  %p163_p3 = scmp.lt.s32.totalorder (!%p139_p2), %s774_s16, 63  ;;  %897 = vmatprep.subr.bf16.mxu0 (!%p139_p2), %v945_v0  ;;  %933 = vmatprep.subr.bf16.mxu1 (!%p139_p2), %v945_v0  ;;  %v1050_v18 = vld [vmem:[%s1160_s2] ss:$0 sm:$0xff] (!%p139_p2) }
   0x7   : > { %898 = vmatpush3.bf16.msra.mxu0 (!%p139_p2), %v945_v0  ;;  %935 = vmatpush3.bf16.msra.mxu1 (!%p139_p2), %v945_v0 }
   0x8   : > { %899 = vmatprep.subr.bf16.mxu0 (!%p139_p2), %v946_v1  ;;  %934 = vmatprep.subr.bf16.mxu1 (!%p139_p2), %v946_v1 }
   0xb   : > { %900 = vmatpush3.bf16.msra.mxu0 (!%p139_p2), %v946_v1  ;;  %936 = vmatpush3.bf16.msra.mxu1 (!%p139_p2), %v946_v1 }
   0xd   : > { %s1163_s16 = smov (!%p163_p3, %s774_s16), 63 }
   0xe   : > { %s775_s19 = sshll.u32 %s1163_s16, 2 }
   0xf   : > { %s1013_s22 = scalar_lea.vmem %s1158_s0, %s775_s19  ;;  %s1062_s27 = scalar_lea.vmem %s1161_s3, %s775_s19 }
  0x10   : > { %v947_v2 = vld [vmem:[%s1013_s22] sm:$0xff]   ;;  %v949_v4 = vld [vmem:[%s1013_s22 + $0x8] sm:$0xff]   ;;  %v951_v6 = vld [vmem:[%s1013_s22 + $0x10] sm:$0xff]  }
  0x11   : > { %v948_v3 = vld [vmem:[%s1013_s22 + $0x40] sm:$0xff]   ;;  %901 = vmatprep.mubr.msk.bf16.mxu0 %vm310_vm0, %v947_v2  ;;  %v950_v5 = vld [vmem:[%s1013_s22 + $0x48] sm:$0xff]   ;;  %v952_v7 = vld [vmem:[%s1013_s22 + $0x50] sm:$0xff]  }
  0x12   : > { %917 = vmatprep.mubr.msk.bf16.mxu1 %vm310_vm0, %v948_v3  ;;  %902 = vmatmul.mubr.msk.bf16.vlgmr.msra.gmra.mrb[0].mxu0 %vm310_vm0, %v949_v4  ;;  %v953_v8 = vld [vmem:[%s1013_s22 + $0x18] sm:$0xff]   ;;  %v955_v10 = vld [vmem:[%s1013_s22 + $0x20] sm:$0xff]   ;;  %v957_v12 = vld [vmem:[%s1013_s22 + $0x28] sm:$0xff]  }
  0x13   : > { %918 = vmatmul.mubr.msk.bf16.vlgmr.msra.gmra.mrb[0].mxu1 %vm310_vm0, %v950_v5  ;;  %905 = vmatprep.mubr.msk.bf16.mxu0 %vm310_vm0, %v951_v6  ;;  %v954_v9 = vld [vmem:[%s1013_s22 + $0x58] sm:$0xff]   ;;  %v956_v11 = vld [vmem:[%s1013_s22 + $0x60] sm:$0xff]   ;;  %v958_v13 = vld [vmem:[%s1013_s22 + $0x68] sm:$0xff]  }
  0x14   : > { %921 = vmatprep.mubr.msk.bf16.mxu1 %vm310_vm0, %v952_v7  ;;  %v959_v14 = vld [vmem:[%s1013_s22 + $0x30] sm:$0xff]   ;;  %v961_v16 = vld [vmem:[%s1013_s22 + $0x38] sm:$0xff]  }
  0x15   : > { %v960_v15 = vld [vmem:[%s1013_s22 + $0x70] sm:$0xff]   ;;  %v962_v17 = vld [vmem:[%s1013_s22 + $0x78] sm:$0xff]  }
  0x1a   : > { %906 = vmatmul.mubr.msk.bf16.gmra.mrb[4].mxu0 %vm310_vm0, %v953_v8 }
  0x1b   : > { %922 = vmatmul.mubr.msk.bf16.gmra.mrb[4].mxu1 %vm310_vm0, %v954_v9  ;;  %909 = vmatprep.mubr.msk.bf16.mxu0 %vm310_vm0, %v955_v10 }
  0x1c   : > { %925 = vmatprep.mubr.msk.bf16.mxu1 %vm310_vm0, %v956_v11 }
  0x22   : > { %910 = vmatmul.mubr.msk.bf16.gmra.mrb[8].mxu0 %vm310_vm0, %v957_v12 }
  0x23   : > { %926 = vmatmul.mubr.msk.bf16.gmra.mrb[8].mxu1 %vm310_vm0, %v958_v13  ;;  %913 = vmatprep.mubr.msk.bf16.mxu0 %vm310_vm0, %v959_v14 }
  0x24   : > { %929 = vmatprep.mubr.msk.bf16.mxu1 %vm310_vm0, %v960_v15 }
  0x2a   : > { %914 = vmatmul.mubr.msk.bf16.gmra.mrb[12].mxu0 %vm310_vm0, %v961_v16 }
  0x2b   : > { %930 = vmatmul.mubr.msk.bf16.gmra.mrb[12].mxu1 %vm310_vm0, %v962_v17 }
  0xe5   : > { %v903_v19 = vpop.f32.mrb[0].mxu0 }
  0xe6   : > { %v402_v20 = vadd.f32 %v903_v19, %v1050_v18  ;;  %v919_v21 = vpop.f32.mrb[0].mxu1  ;;  %v393_v22 = vpop.f32.mrb[1].mxu0 }
  0xe7   : > { %v466_v23 = vadd.f32 %v919_v21, %v1050_v18  ;;  %v394_v24 = vadd.f32 %v1050_v18, %v393_v22  ;;  %v457_v25 = vpop.f32.mrb[1].mxu1  ;;  %v904_v26 = vpop.f32.mrb[2].mxu0 }
  0xe8   : > { %v522_v27 = vmax.f32 %v402_v20, 0.0  ;;  %v458_v28 = vadd.f32 %v1050_v18, %v457_v25  ;;  %v405_v29 = vadd.f32 %v904_v26, %v1050_v18  ;;  %v920_v30 = vpop.f32.mrb[2].mxu1  ;;  %v396_v31 = vpop.f32.mrb[3].mxu0 }
  0xe9   : > { %v538_v32 = vmax.f32 %v466_v23, 0.0  ;;  %v520_v33 = vmax.f32 %v394_v24, 0.0  ;;  %v469_v34 = vadd.f32 %v920_v30, %v1050_v18  ;;  %v397_v35 = vadd.f32 %v1050_v18, %v396_v31  ;;  %v460_v36 = vpop.f32.mrb[3].mxu1 }
  0xea   : > { %v849_v37 = vpack.c.bf16 %v522_v27, %v522_v27  ;;  %v536_v38 = vmax.f32 %v458_v28, 0.0  ;;  %v523_v39 = vmax.f32 %v405_v29, 0.0  ;;  %v461_v40 = vadd.f32 %v1050_v18, %v460_v36 }
  0xeb   : > { %v865_v41 = vpack.c.bf16 %v538_v32, %v538_v32  ;;  %v847_v42 = vpack.c.bf16 %v520_v33, %v520_v33  ;;  %v539_v43 = vmax.f32 %v469_v34, 0.0  ;;  %v521_v44 = vmax.f32 %v397_v35, 0.0 }
  0xec   : > { %683 = vst.msk [vmem:[%s1062_s27 + $0x8] sm:$0xf] %vm680_vm1, %v849_v37  ;;  %v863_v45 = vpack.c.bf16 %v536_v38, %v536_v38  ;;  %v850_v46 = vpack.c.bf16 %v523_v39, %v523_v39  ;;  %v537_v47 = vmax.f32 %v461_v40, 0.0 }
  0xed   : > { %699 = vst.msk [vmem:[%s1062_s27 + $0x48] sm:$0xf] %vm680_vm1, %v865_v41  ;;  %681 = vst.msk [vmem:[%s1062_s27] sm:$0xf] %vm680_vm1, %v847_v42  ;;  %v866_v48 = vpack.c.bf16 %v539_v43, %v539_v43  ;;  %v848_v49 = vpack.c.bf16 %v521_v44, %v521_v44  ;;  %v907_v50 = vpop.f32.mrb[4].mxu0 }
  0xee   : > { %697 = vst.msk [vmem:[%s1062_s27 + $0x40] sm:$0xf] %vm680_vm1, %v863_v45  ;;  %684 = vst.msk [vmem:[%s1062_s27 + $0xc] sm:$0xf] %vm680_vm1, %v850_v46  ;;  %v864_v51 = vpack.c.bf16 %v537_v47, %v537_v47  ;;  %v418_v52 = vadd.f32 %v907_v50, %v1050_v18  ;;  %v923_v53 = vpop.f32.mrb[4].mxu1  ;;  %v409_v54 = vpop.f32.mrb[5].mxu0 }
  0xef   : > { %700 = vst.msk [vmem:[%s1062_s27 + $0x4c] sm:$0xf] %vm680_vm1, %v866_v48  ;;  %682 = vst.msk [vmem:[%s1062_s27 + $0x4] sm:$0xf] %vm680_vm1, %v848_v49  ;;  %v482_v55 = vadd.f32 %v923_v53, %v1050_v18  ;;  %v410_v56 = vadd.f32 %v1050_v18, %v409_v54  ;;  %v473_v57 = vpop.f32.mrb[5].mxu1  ;;  %v908_v58 = vpop.f32.mrb[6].mxu0 }
  0xf0   : > { %698 = vst.msk [vmem:[%s1062_s27 + $0x44] sm:$0xf] %vm680_vm1, %v864_v51  ;;  %v526_v59 = vmax.f32 %v418_v52, 0.0  ;;  %v474_v60 = vadd.f32 %v1050_v18, %v473_v57  ;;  %v421_v61 = vadd.f32 %v908_v58, %v1050_v18  ;;  %v924_v62 = vpop.f32.mrb[6].mxu1  ;;  %v412_v63 = vpop.f32.mrb[7].mxu0 }
  0xf1   : > { %v542_v0 = vmax.f32 %v482_v55, 0.0  ;;  %v524_v1 = vmax.f32 %v410_v56, 0.0  ;;  %v485_v2 = vadd.f32 %v924_v62, %v1050_v18  ;;  %v413_v3 = vadd.f32 %v1050_v18, %v412_v63  ;;  %v476_v4 = vpop.f32.mrb[7].mxu1 }
  0xf2   : > { %v853_v5 = vpack.c.bf16 %v526_v59, %v526_v59  ;;  %v540_v6 = vmax.f32 %v474_v60, 0.0  ;;  %v527_v7 = vmax.f32 %v421_v61, 0.0  ;;  %v477_v8 = vadd.f32 %v1050_v18, %v476_v4 }
  0xf3   : > { %v869_v9 = vpack.c.bf16 %v542_v0, %v542_v0  ;;  %v851_v10 = vpack.c.bf16 %v524_v1, %v524_v1  ;;  %v543_v11 = vmax.f32 %v485_v2, 0.0  ;;  %v525_v12 = vmax.f32 %v413_v3, 0.0 }
  0xf4   : > { %687 = vst.msk [vmem:[%s1062_s27 + $0x18] sm:$0xf] %vm680_vm1, %v853_v5  ;;  %v867_v13 = vpack.c.bf16 %v540_v6, %v540_v6  ;;  %v854_v14 = vpack.c.bf16 %v527_v7, %v527_v7  ;;  %v541_v15 = vmax.f32 %v477_v8, 0.0 }
  0xf5   : > { %703 = vst.msk [vmem:[%s1062_s27 + $0x58] sm:$0xf] %vm680_vm1, %v869_v9  ;;  %685 = vst.msk [vmem:[%s1062_s27 + $0x10] sm:$0xf] %vm680_vm1, %v851_v10  ;;  %v870_v16 = vpack.c.bf16 %v543_v11, %v543_v11  ;;  %v852_v17 = vpack.c.bf16 %v525_v12, %v525_v12  ;;  %v911_v19 = vpop.f32.mrb[8].mxu0 }
  0xf6   : > { %701 = vst.msk [vmem:[%s1062_s27 + $0x50] sm:$0xf] %vm680_vm1, %v867_v13  ;;  %688 = vst.msk [vmem:[%s1062_s27 + $0x1c] sm:$0xf] %vm680_vm1, %v854_v14  ;;  %v868_v20 = vpack.c.bf16 %v541_v15, %v541_v15  ;;  %v434_v21 = vadd.f32 %v911_v19, %v1050_v18  ;;  %v927_v22 = vpop.f32.mrb[8].mxu1  ;;  %v425_v23 = vpop.f32.mrb[9].mxu0 }
  0xf7   : > { %704 = vst.msk [vmem:[%s1062_s27 + $0x5c] sm:$0xf] %vm680_vm1, %v870_v16  ;;  %686 = vst.msk [vmem:[%s1062_s27 + $0x14] sm:$0xf] %vm680_vm1, %v852_v17  ;;  %v498_v24 = vadd.f32 %v927_v22, %v1050_v18  ;;  %v426_v25 = vadd.f32 %v1050_v18, %v425_v23  ;;  %v489_v26 = vpop.f32.mrb[9].mxu1  ;;  %v912_v27 = vpop.f32.mrb[10].mxu0 }
  0xf8   : > { %702 = vst.msk [vmem:[%s1062_s27 + $0x54] sm:$0xf] %vm680_vm1, %v868_v20  ;;  %v530_v28 = vmax.f32 %v434_v21, 0.0  ;;  %v490_v29 = vadd.f32 %v1050_v18, %v489_v26  ;;  %v437_v30 = vadd.f32 %v912_v27, %v1050_v18  ;;  %v928_v31 = vpop.f32.mrb[10].mxu1  ;;  %v428_v32 = vpop.f32.mrb[11].mxu0 }
  0xf9   : > { %v546_v33 = vmax.f32 %v498_v24, 0.0  ;;  %v528_v34 = vmax.f32 %v426_v25, 0.0  ;;  %v501_v35 = vadd.f32 %v928_v31, %v1050_v18  ;;  %v429_v36 = vadd.f32 %v1050_v18, %v428_v32  ;;  %v492_v37 = vpop.f32.mrb[11].mxu1 }
  0xfa   : > { %v857_v38 = vpack.c.bf16 %v530_v28, %v530_v28  ;;  %v544_v39 = vmax.f32 %v490_v29, 0.0  ;;  %v531_v40 = vmax.f32 %v437_v30, 0.0  ;;  %v493_v41 = vadd.f32 %v1050_v18, %v492_v37 }
  0xfb   : > { %v873_v42 = vpack.c.bf16 %v546_v33, %v546_v33  ;;  %v855_v43 = vpack.c.bf16 %v528_v34, %v528_v34  ;;  %v547_v44 = vmax.f32 %v501_v35, 0.0  ;;  %v529_v45 = vmax.f32 %v429_v36, 0.0 }
  0xfc   : > { %691 = vst.msk [vmem:[%s1062_s27 + $0x28] sm:$0xf] %vm680_vm1, %v857_v38  ;;  %v871_v46 = vpack.c.bf16 %v544_v39, %v544_v39  ;;  %v858_v47 = vpack.c.bf16 %v531_v40, %v531_v40  ;;  %v545_v48 = vmax.f32 %v493_v41, 0.0 }
  0xfd   : > { %707 = vst.msk [vmem:[%s1062_s27 + $0x68] sm:$0xf] %vm680_vm1, %v873_v42  ;;  %689 = vst.msk [vmem:[%s1062_s27 + $0x20] sm:$0xf] %vm680_vm1, %v855_v43  ;;  %v874_v49 = vpack.c.bf16 %v547_v44, %v547_v44  ;;  %v856_v50 = vpack.c.bf16 %v529_v45, %v529_v45  ;;  %v915_v51 = vpop.f32.mrb[12].mxu0 }
  0xfe   : > { %705 = vst.msk [vmem:[%s1062_s27 + $0x60] sm:$0xf] %vm680_vm1, %v871_v46  ;;  %692 = vst.msk [vmem:[%s1062_s27 + $0x2c] sm:$0xf] %vm680_vm1, %v858_v47  ;;  %v872_v52 = vpack.c.bf16 %v545_v48, %v545_v48  ;;  %v450_v53 = vadd.f32 %v915_v51, %v1050_v18  ;;  %v931_v54 = vpop.f32.mrb[12].mxu1  ;;  %v441_v55 = vpop.f32.mrb[13].mxu0 }
  0xff   : > { %708 = vst.msk [vmem:[%s1062_s27 + $0x6c] sm:$0xf] %vm680_vm1, %v874_v49  ;;  %690 = vst.msk [vmem:[%s1062_s27 + $0x24] sm:$0xf] %vm680_vm1, %v856_v50  ;;  %v514_v56 = vadd.f32 %v931_v54, %v1050_v18  ;;  %v442_v57 = vadd.f32 %v1050_v18, %v441_v55  ;;  %v505_v58 = vpop.f32.mrb[13].mxu1  ;;  %v916_v59 = vpop.f32.mrb[14].mxu0 }
 0x100   : > { %706 = vst.msk [vmem:[%s1062_s27 + $0x64] sm:$0xf] %vm680_vm1, %v872_v52  ;;  %v534_v60 = vmax.f32 %v450_v53, 0.0  ;;  %v506_v61 = vadd.f32 %v1050_v18, %v505_v58  ;;  %v453_v62 = vadd.f32 %v916_v59, %v1050_v18  ;;  %v932_v63 = vpop.f32.mrb[14].mxu1  ;;  %v444_v0 = vpop.f32.mrb[15].mxu0 }
 0x101   : > { %v550_v1 = vmax.f32 %v514_v56, 0.0  ;;  %v532_v2 = vmax.f32 %v442_v57, 0.0  ;;  %v517_v3 = vadd.f32 %v932_v63, %v1050_v18  ;;  %v445_v4 = vadd.f32 %v1050_v18, %v444_v0  ;;  %v508_v5 = vpop.f32.mrb[15].mxu1 }
 0x102   : > { %v861_v6 = vpack.c.bf16 %v534_v60, %v534_v60  ;;  %v548_v7 = vmax.f32 %v506_v61, 0.0  ;;  %v535_v8 = vmax.f32 %v453_v62, 0.0  ;;  %v509_v9 = vadd.f32 %v1050_v18, %v508_v5 }
 0x103   : > { %v877_v10 = vpack.c.bf16 %v550_v1, %v550_v1  ;;  %v859_v11 = vpack.c.bf16 %v532_v2, %v532_v2  ;;  %v551_v12 = vmax.f32 %v517_v3, 0.0  ;;  %v533_v13 = vmax.f32 %v445_v4, 0.0 }
 0x104   : > { %695 = vst.msk [vmem:[%s1062_s27 + $0x38] sm:$0xf] %vm680_vm1, %v861_v6  ;;  %v875_v14 = vpack.c.bf16 %v548_v7, %v548_v7  ;;  %v862_v15 = vpack.c.bf16 %v535_v8, %v535_v8  ;;  %v549_v16 = vmax.f32 %v509_v9, 0.0 }
 0x105   : > { %711 = vst.msk [vmem:[%s1062_s27 + $0x78] sm:$0xf] %vm680_vm1, %v877_v10  ;;  %693 = vst.msk [vmem:[%s1062_s27 + $0x30] sm:$0xf] %vm680_vm1, %v859_v11  ;;  %v878_v17 = vpack.c.bf16 %v551_v12, %v551_v12  ;;  %v860_v19 = vpack.c.bf16 %v533_v13, %v533_v13 }
 0x106   : > { %709 = vst.msk [vmem:[%s1062_s27 + $0x70] sm:$0xf] %vm680_vm1, %v875_v14  ;;  %696 = vst.msk [vmem:[%s1062_s27 + $0x3c] sm:$0xf] %vm680_vm1, %v862_v15  ;;  %v876_v18 = vpack.c.bf16 %v549_v16, %v549_v16 }
 0x107   : > { %712 = vst.msk [vmem:[%s1062_s27 + $0x7c] sm:$0xf] %vm680_vm1, %v878_v17  ;;  %694 = vst.msk [vmem:[%s1062_s27 + $0x34] sm:$0xf] %vm680_vm1, %v860_v19 }
 0x108   : > { %710 = vst.msk [vmem:[%s1062_s27 + $0x74] sm:$0xf] %vm680_vm1, %v876_v18 }
 0x109 PF: > { %s13_s12 = sadd.s32 1, %s969_s12  }
 0x10a   : > { %p10_p4 = scmp.ge.s32.totalorder %s13_s12, 4  }
 0x10c   :  { %12 = sbr.rel (!%p10_p4) target bundleno = 1 (0x1), region = 62 }

// kernel: base_resnet_forward.53
= control target key start
LH: loop header
LB: loop body
LE: loop exit
PB: predicated region body
PF: predicated region fallthrough
CT: control target
= control target key end

     0   :  { %s1216_s15 = smov 0   ;;  %s1513_s0 = inlined_call_operand.vmem [shape: bf16[512,8], index: 0, kind: input, shape index: {}]   ;;  %s1514_s1 = inlined_call_operand.vmem [shape: bf16[8,32], index: 1, kind: input, shape index: {}]   ;;  %s1515_s2 = inlined_call_operand.vmem [shape: f32[1,32], index: 2, kind: input, shape index: {}]   ;;  %s1516_s3 = inlined_call_operand.vmem [shape: bf16[512,32], index: 3, kind: input, shape index: {}]   ;;  %s1517_s4 = inlined_call_operand.vmem [shape: bf16[512,32], index: 4, kind: output, shape index: {}]  }
   0x1 LB: > { %s915_s16 = sadd.s32 4294967295, %s1189_s15   ;;  %p919_p0 = scmp.ge.s32.totalorder %s1189_s15, 1  ;;  %s1189_s15 = sphi %s1216_s15, %s14_s15  }
   0x2   : > { %p174_p1 = scmp.lt.s32.totalorder %s1189_s15, 3 }
   0x4   : > { %p175_p2 = pnand %p919_p0, %p174_p1 }
   0x5   : > { %v256_v0 = vld [vmem:[%s1514_s1] sm:$0xf] (!%p175_p2)  ;;  %vm393_vm0 = vcmask (!%p175_p2), 1043456   ;;  %s920_s19 = sshll.u32 (!%p175_p2), %s915_s16, 5  ;;  %vm344_vm1 = vcmask (!%p175_p2), 64512   ;;  %vm814_vm2 = vcmask (!%p175_p2), 257024  }
   0x6   : > { %178 = sbr.rel (%p175_p2) target bundleno = 269 (0x10d), region = 36  ;;  %1157 = vmatprep.subr.msk.bf16.mxu0 (!%p175_p2), %vm393_vm0, %v256_v0  ;;  %1158 = vmatprep.subr.msk.bf16.mxu1 (!%p175_p2), %vm393_vm0, %v256_v0  ;;  %v395_v1 = vsel (!%p175_p2), %vm393_vm0, %v256_v0, 0  ;;  %p206_p3 = scmp.lt.s32.totalorder (!%p175_p2), %s920_s19, 63  ;;  %v1332_v46 = vld [vmem:[%s1515_s2] ss:$0 sm:$0xff] (!%p175_p2) }
   0x7   : > { %1122 = vmatpush3.bf16.msra.mxu0 (!%p175_p2), %v395_v1  ;;  %1156 = vmatpush3.bf16.msra.mxu1 (!%p175_p2), %v395_v1 }
   0xd   : > { %s1519_s19 = smov (!%p206_p3, %s920_s19), 63 }
   0xe   : > { %s1227_s20 = sshll.u32 %s1519_s19, 2 }
   0xf   : > { %s1233_s23 = scalar_lea.vmem %s1513_s0, %s1227_s20  ;;  %s1271_s26 = scalar_lea.vmem %s1516_s3, %s1227_s20 }
  0x10   : > { %v1167_v2 = vld [vmem:[%s1233_s23] sm:$0xff]   ;;  %v1169_v4 = vld [vmem:[%s1233_s23 + $0x8] sm:$0xff]   ;;  %v1171_v6 = vld [vmem:[%s1233_s23 + $0x10] sm:$0xff]   ;;  %s1370_s5 = scalar_lea.vmem %s1517_s4, %s1227_s20 }
  0x11   : > { %v1168_v3 = vld [vmem:[%s1233_s23 + $0x40] sm:$0xff]   ;;  %1123 = vmatprep.mubr.msk.bf16.mxu0 %vm344_vm1, %v1167_v2  ;;  %v1170_v5 = vld [vmem:[%s1233_s23 + $0x48] sm:$0xff]   ;;  %v1172_v7 = vld [vmem:[%s1233_s23 + $0x50] sm:$0xff]  }
  0x12   : > { %1139 = vmatprep.mubr.msk.bf16.mxu1 %vm344_vm1, %v1168_v3  ;;  %1124 = vmatmul.mubr.msk.bf16.vlgmr.msra.gmra.mrb[0].mxu0 %vm344_vm1, %v1169_v4  ;;  %v1173_v8 = vld [vmem:[%s1233_s23 + $0x18] sm:$0xff]   ;;  %v1175_v10 = vld [vmem:[%s1233_s23 + $0x20] sm:$0xff]   ;;  %v1177_v12 = vld [vmem:[%s1233_s23 + $0x28] sm:$0xff]  }
  0x13   : > { %1140 = vmatmul.mubr.msk.bf16.vlgmr.msra.gmra.mrb[0].mxu1 %vm344_vm1, %v1170_v5  ;;  %1127 = vmatprep.mubr.msk.bf16.mxu0 %vm344_vm1, %v1171_v6  ;;  %v1174_v9 = vld [vmem:[%s1233_s23 + $0x58] sm:$0xff]   ;;  %v1176_v11 = vld [vmem:[%s1233_s23 + $0x60] sm:$0xff]   ;;  %v1178_v13 = vld [vmem:[%s1233_s23 + $0x68] sm:$0xff]  }
  0x14   : > { %1143 = vmatprep.mubr.msk.bf16.mxu1 %vm344_vm1, %v1172_v7  ;;  %v1179_v14 = vld [vmem:[%s1233_s23 + $0x30] sm:$0xff]   ;;  %v1181_v16 = vld [vmem:[%s1233_s23 + $0x38] sm:$0xff]   ;;  %v1274_v18 = vld [vmem:[%s1271_s26 + $0x8] sm:$0xff]  }
  0x15   : > { %v1180_v15 = vld [vmem:[%s1233_s23 + $0x70] sm:$0xff]   ;;  %v1182_v17 = vld [vmem:[%s1233_s23 + $0x78] sm:$0xff]   ;;  %v1277_v19 = vld [vmem:[%s1271_s26 + $0x48] sm:$0xff]   ;;  %v1031_v24 = vunpack.c.l.bf16 %v1274_v18  ;;  %v1032_v30 = vunpack.c.h.bf16 %v1274_v18 }
  0x16   : > { %v1280_v20 = vld [vmem:[%s1271_s26] sm:$0xff]   ;;  %v1286_v22 = vld [vmem:[%s1271_s26 + $0x18] sm:$0xff]   ;;  %v1063_v25 = vunpack.c.l.bf16 %v1277_v19  ;;  %v1294_v26 = vld [vmem:[%s1271_s26 + $0x10] sm:$0xff]   ;;  %v1064_v31 = vunpack.c.h.bf16 %v1277_v19 }
  0x17   : > { %v1283_v21 = vld [vmem:[%s1271_s26 + $0x40] sm:$0xff]   ;;  %v1289_v23 = vld [vmem:[%s1271_s26 + $0x58] sm:$0xff]   ;;  %v1297_v27 = vld [vmem:[%s1271_s26 + $0x50] sm:$0xff]   ;;  %v1027_v28 = vunpack.c.l.bf16 %v1280_v20  ;;  %v1028_v34 = vunpack.c.h.bf16 %v1280_v20  ;;  %v1039_v36 = vunpack.c.l.bf16 %v1286_v22  ;;  %v1035_v40 = vunpack.c.l.bf16 %v1294_v26 }
  0x18   : > { %v1059_v29 = vunpack.c.l.bf16 %v1283_v21  ;;  %v1304_v32 = vld [vmem:[%s1271_s26 + $0x28] sm:$0xff]   ;;  %v1060_v35 = vunpack.c.h.bf16 %v1283_v21  ;;  %v1071_v37 = vunpack.c.l.bf16 %v1289_v23  ;;  %v1314_v38 = vld [vmem:[%s1271_s26 + $0x20] sm:$0xff]   ;;  %v1067_v41 = vunpack.c.l.bf16 %v1297_v27  ;;  %v1324_v44 = vld [vmem:[%s1271_s26 + $0x38] sm:$0xff]  }
  0x19   : > { %v1307_v33 = vld [vmem:[%s1271_s26 + $0x68] sm:$0xff]   ;;  %v1317_v39 = vld [vmem:[%s1271_s26 + $0x60] sm:$0xff]   ;;  %v1040_v42 = vunpack.c.h.bf16 %v1286_v22  ;;  %v1072_v43 = vunpack.c.h.bf16 %v1289_v23  ;;  %v1327_v45 = vld [vmem:[%s1271_s26 + $0x78] sm:$0xff]   ;;  %v1036_v47 = vunpack.c.h.bf16 %v1294_v26  ;;  %v1068_v48 = vunpack.c.h.bf16 %v1297_v27 }
  0x1a   : > { %1128 = vmatmul.mubr.msk.bf16.gmra.mrb[4].mxu0 %vm344_vm1, %v1173_v8  ;;  %v1047_v49 = vunpack.c.l.bf16 %v1304_v32  ;;  %v1079_v50 = vunpack.c.l.bf16 %v1307_v33  ;;  %v1339_v51 = vld [vmem:[%s1271_s26 + $0x30] sm:$0xff]   ;;  %v1043_v53 = vunpack.c.l.bf16 %v1314_v38  ;;  %v1075_v54 = vunpack.c.l.bf16 %v1317_v39 }
  0x1b   : > { %1144 = vmatmul.mubr.msk.bf16.gmra.mrb[4].mxu1 %vm344_vm1, %v1174_v9  ;;  %1131 = vmatprep.mubr.msk.bf16.mxu0 %vm344_vm1, %v1175_v10  ;;  %v1342_v52 = vld [vmem:[%s1271_s26 + $0x70] sm:$0xff]   ;;  %v1048_v55 = vunpack.c.h.bf16 %v1304_v32  ;;  %v1080_v56 = vunpack.c.h.bf16 %v1307_v33  ;;  %v1044_v58 = vunpack.c.h.bf16 %v1314_v38  ;;  %v1076_v59 = vunpack.c.h.bf16 %v1317_v39 }
  0x1c   : > { %1147 = vmatprep.mubr.msk.bf16.mxu1 %vm344_vm1, %v1176_v11  ;;  %v1055_v60 = vunpack.c.l.bf16 %v1324_v44  ;;  %v1087_v61 = vunpack.c.l.bf16 %v1327_v45  ;;  %v1051_v1 = vunpack.c.l.bf16 %v1339_v51  ;;  %v1083_v2 = vunpack.c.l.bf16 %v1342_v52 }
  0x1d   : > { %v1056_v3 = vunpack.c.h.bf16 %v1324_v44  ;;  %v1088_v8 = vunpack.c.h.bf16 %v1327_v45  ;;  %v1052_v9 = vunpack.c.h.bf16 %v1339_v51 }
  0x22   : > { %1132 = vmatmul.mubr.msk.bf16.gmra.mrb[8].mxu0 %vm344_vm1, %v1177_v12 }
  0x23   : > { %1148 = vmatmul.mubr.msk.bf16.gmra.mrb[8].mxu1 %vm344_vm1, %v1178_v13  ;;  %1135 = vmatprep.mubr.msk.bf16.mxu0 %vm344_vm1, %v1179_v14 }
  0x24   : > { %1151 = vmatprep.mubr.msk.bf16.mxu1 %vm344_vm1, %v1180_v15  ;;  %v1084_v15 = vunpack.c.h.bf16 %v1342_v52 }
  0x2a   : > { %1136 = vmatmul.mubr.msk.bf16.gmra.mrb[12].mxu0 %vm344_vm1, %v1181_v16 }
  0x2b   : > { %1152 = vmatmul.mubr.msk.bf16.gmra.mrb[12].mxu1 %vm344_vm1, %v1182_v17 }
  0xe5   : > { %v1125_v57 = vpop.f32.mrb[0].mxu0 }
  0xe6   : > { %v440_v62 = vadd.f32 %v1125_v57, %v1332_v46  ;;  %v1141_v63 = vpop.f32.mrb[0].mxu1  ;;  %v431_v0 = vpop.f32.mrb[1].mxu0 }
  0xe7   : > { %v504_v4 = vadd.f32 %v1141_v63, %v1332_v46  ;;  %v432_v5 = vadd.f32 %v1332_v46, %v431_v0  ;;  %v495_v6 = vpop.f32.mrb[1].mxu1  ;;  %v1126_v7 = vpop.f32.mrb[2].mxu0 }
  0xe8   : > { %v624_v10 = vadd.f32 %v1031_v24, %v440_v62  ;;  %v496_v11 = vadd.f32 %v1332_v46, %v495_v6  ;;  %v443_v12 = vadd.f32 %v1126_v7, %v1332_v46  ;;  %v1142_v13 = vpop.f32.mrb[2].mxu1  ;;  %v434_v14 = vpop.f32.mrb[3].mxu0 }
  0xe9   : > { %v640_v16 = vadd.f32 %v1063_v25, %v504_v4  ;;  %v622_v17 = vadd.f32 %v1027_v28, %v432_v5  ;;  %v507_v18 = vadd.f32 %v1142_v13, %v1332_v46  ;;  %v435_v19 = vadd.f32 %v1332_v46, %v434_v14  ;;  %v498_v20 = vpop.f32.mrb[3].mxu1 }
  0xea   : > { %v656_v57 = vmax.f32 %v624_v10, 0.0  ;;  %v638_v63 = vadd.f32 %v1059_v29, %v496_v11  ;;  %v625_v0 = vadd.f32 %v1032_v30, %v443_v12  ;;  %v499_v24 = vadd.f32 %v1332_v46, %v498_v20 }
  0xeb   : > { %v672_v62 = vmax.f32 %v640_v16, 0.0  ;;  %v654_v6 = vmax.f32 %v622_v17, 0.0  ;;  %v641_v25 = vadd.f32 %v1064_v31, %v507_v18  ;;  %v623_v28 = vadd.f32 %v1028_v34, %v435_v19 }
  0xec   : > { %v995_v4 = vpack.c.bf16 %v656_v57, %v656_v57  ;;  %v670_v5 = vmax.f32 %v638_v63, 0.0  ;;  %v657_v7 = vmax.f32 %v625_v0, 0.0  ;;  %v639_v29 = vadd.f32 %v1060_v35, %v499_v24 }
  0xed   : > { %v1011_v30 = vpack.c.bf16 %v672_v62, %v672_v62  ;;  %v993_v10 = vpack.c.bf16 %v654_v6, %v654_v6  ;;  %v673_v11 = vmax.f32 %v641_v25, 0.0  ;;  %v655_v12 = vmax.f32 %v623_v28, 0.0  ;;  %v1129_v13 = vpop.f32.mrb[4].mxu0 }
  0xee   : > { %817 = vst.msk [vmem:[%s1370_s5 + $0x8] sm:$0xf] %vm814_vm2, %v995_v4  ;;  %v1009_v14 = vpack.c.bf16 %v670_v5, %v670_v5  ;;  %v996_v31 = vpack.c.bf16 %v657_v7, %v657_v7  ;;  %v671_v34 = vmax.f32 %v639_v29, 0.0  ;;  %v456_v16 = vadd.f32 %v1129_v13, %v1332_v46  ;;  %v1145_v17 = vpop.f32.mrb[4].mxu1  ;;  %v447_v18 = vpop.f32.mrb[5].mxu0 }
  0xef   : > { %833 = vst.msk [vmem:[%s1370_s5 + $0x48] sm:$0xf] %vm814_vm2, %v1011_v30  ;;  %815 = vst.msk [vmem:[%s1370_s5] sm:$0xf] %vm814_vm2, %v993_v10  ;;  %v1012_v21 = vpack.c.bf16 %v673_v11, %v673_v11  ;;  %v994_v35 = vpack.c.bf16 %v655_v12, %v655_v12  ;;  %v520_v19 = vadd.f32 %v1145_v17, %v1332_v46  ;;  %v511_v57 = vpop.f32.mrb[5].mxu1  ;;  %v1130_v63 = vpop.f32.mrb[6].mxu0 }
  0xf0   : > { %v448_v20 = vadd.f32 %v1332_v46, %v447_v18  ;;  %831 = vst.msk [vmem:[%s1370_s5 + $0x40] sm:$0xf] %vm814_vm2, %v1009_v14  ;;  %818 = vst.msk [vmem:[%s1370_s5 + $0xc] sm:$0xf] %vm814_vm2, %v996_v31  ;;  %v1010_v0 = vpack.c.bf16 %v671_v34, %v671_v34  ;;  %v628_v24 = vadd.f32 %v1039_v36, %v456_v16  ;;  %v1146_v25 = vpop.f32.mrb[6].mxu1  ;;  %v450_v28 = vpop.f32.mrb[7].mxu0 }
  0xf1   : > { %v512_v62 = vadd.f32 %v1332_v46, %v511_v57  ;;  %v459_v6 = vadd.f32 %v1130_v63, %v1332_v46  ;;  %834 = vst.msk [vmem:[%s1370_s5 + $0x4c] sm:$0xf] %vm814_vm2, %v1012_v21  ;;  %816 = vst.msk [vmem:[%s1370_s5 + $0x4] sm:$0xf] %vm814_vm2, %v994_v35  ;;  %v644_v4 = vadd.f32 %v1071_v37, %v520_v19  ;;  %v514_v29 = vpop.f32.mrb[7].mxu1 }
  0xf2   : > { %v626_v5 = vadd.f32 %v1035_v40, %v448_v20  ;;  %v523_v7 = vadd.f32 %v1146_v25, %v1332_v46  ;;  %v451_v36 = vadd.f32 %v1332_v46, %v450_v28  ;;  %832 = vst.msk [vmem:[%s1370_s5 + $0x44] sm:$0xf] %vm814_vm2, %v1010_v0  ;;  %v660_v30 = vmax.f32 %v628_v24, 0.0 }
  0xf3   : > { %v642_v10 = vadd.f32 %v1067_v41, %v512_v62  ;;  %v629_v11 = vadd.f32 %v1040_v42, %v459_v6  ;;  %v515_v37 = vadd.f32 %v1332_v46, %v514_v29  ;;  %v676_v12 = vmax.f32 %v644_v4, 0.0 }
  0xf4   : > { %v658_v13 = vmax.f32 %v626_v5, 0.0  ;;  %v645_v40 = vadd.f32 %v1072_v43, %v523_v7  ;;  %v627_v14 = vadd.f32 %v1036_v47, %v451_v36  ;;  %v999_v31 = vpack.c.bf16 %v660_v30, %v660_v30 }
  0xf5   : > { %v674_v34 = vmax.f32 %v642_v10, 0.0  ;;  %v661_v16 = vmax.f32 %v629_v11, 0.0  ;;  %v643_v22 = vadd.f32 %v1068_v48, %v515_v37  ;;  %v1015_v41 = vpack.c.bf16 %v676_v12, %v676_v12  ;;  %v1133_v21 = vpop.f32.mrb[8].mxu0 }
  0xf6   : > { %v997_v42 = vpack.c.bf16 %v658_v13, %v658_v13  ;;  %v677_v17 = vmax.f32 %v645_v40, 0.0  ;;  %v659_v18 = vmax.f32 %v627_v14, 0.0  ;;  %821 = vst.msk [vmem:[%s1370_s5 + $0x18] sm:$0xf] %vm814_vm2, %v999_v31  ;;  %v472_v47 = vadd.f32 %v1133_v21, %v1332_v46  ;;  %v1149_v35 = vpop.f32.mrb[8].mxu1  ;;  %v463_v19 = vpop.f32.mrb[9].mxu0 }
  0xf7   : > { %v1013_v23 = vpack.c.bf16 %v674_v34, %v674_v34  ;;  %v1000_v26 = vpack.c.bf16 %v661_v16, %v661_v16  ;;  %v675_v43 = vmax.f32 %v643_v22, 0.0  ;;  %837 = vst.msk [vmem:[%s1370_s5 + $0x58] sm:$0xf] %vm814_vm2, %v1015_v41  ;;  %v536_v20 = vadd.f32 %v1149_v35, %v1332_v46  ;;  %v527_v63 = vpop.f32.mrb[9].mxu1  ;;  %v1134_v0 = vpop.f32.mrb[10].mxu0 }
  0xf8   : > { %819 = vst.msk [vmem:[%s1370_s5 + $0x10] sm:$0xf] %vm814_vm2, %v997_v42  ;;  %v1016_v27 = vpack.c.bf16 %v677_v17, %v677_v17  ;;  %v998_v48 = vpack.c.bf16 %v659_v18, %v659_v18  ;;  %v464_v57 = vadd.f32 %v1332_v46, %v463_v19  ;;  %v632_v62 = vadd.f32 %v1047_v49, %v472_v47  ;;  %v1150_v28 = vpop.f32.mrb[10].mxu1  ;;  %v466_v4 = vpop.f32.mrb[11].mxu0 }
  0xf9   : > { %835 = vst.msk [vmem:[%s1370_s5 + $0x50] sm:$0xf] %vm814_vm2, %v1013_v23  ;;  %822 = vst.msk [vmem:[%s1370_s5 + $0x1c] sm:$0xf] %vm814_vm2, %v1000_v26  ;;  %v1014_v24 = vpack.c.bf16 %v675_v43, %v675_v43  ;;  %v528_v6 = vadd.f32 %v1332_v46, %v527_v63  ;;  %v475_v25 = vadd.f32 %v1134_v0, %v1332_v46  ;;  %v530_v29 = vpop.f32.mrb[11].mxu1 }
  0xfa   : > { %838 = vst.msk [vmem:[%s1370_s5 + $0x5c] sm:$0xf] %vm814_vm2, %v1016_v27  ;;  %820 = vst.msk [vmem:[%s1370_s5 + $0x14] sm:$0xf] %vm814_vm2, %v998_v48  ;;  %v648_v5 = vadd.f32 %v1079_v50, %v536_v20  ;;  %v630_v7 = vadd.f32 %v1043_v53, %v464_v57  ;;  %v539_v36 = vadd.f32 %v1150_v28, %v1332_v46  ;;  %v664_v30 = vmax.f32 %v632_v62, 0.0 }
  0xfb   : > { %v467_v49 = vadd.f32 %v1332_v46, %v466_v4  ;;  %836 = vst.msk [vmem:[%s1370_s5 + $0x54] sm:$0xf] %vm814_vm2, %v1014_v24  ;;  %v646_v10 = vadd.f32 %v1075_v54, %v528_v6  ;;  %v633_v11 = vadd.f32 %v1048_v55, %v475_v25  ;;  %v531_v50 = vadd.f32 %v1332_v46, %v530_v29 }
  0xfc   : > { %v680_v37 = vmax.f32 %v648_v5, 0.0  ;;  %v662_v12 = vmax.f32 %v630_v7, 0.0  ;;  %v649_v53 = vadd.f32 %v1080_v56, %v539_v36  ;;  %v1003_v40 = vpack.c.bf16 %v664_v30, %v664_v30 }
  0xfd   : > { %v631_v13 = vadd.f32 %v1044_v58, %v467_v49  ;;  %v678_v14 = vmax.f32 %v646_v10, 0.0  ;;  %v665_v31 = vmax.f32 %v633_v11, 0.0  ;;  %v647_v32 = vadd.f32 %v1076_v59, %v531_v50  ;;  %v1137_v22 = vpop.f32.mrb[12].mxu0 }
  0xfe   : > { %v1019_v54 = vpack.c.bf16 %v680_v37, %v680_v37  ;;  %v1001_v55 = vpack.c.bf16 %v662_v12, %v662_v12  ;;  %v681_v34 = vmax.f32 %v649_v53, 0.0  ;;  %825 = vst.msk [vmem:[%s1370_s5 + $0x28] sm:$0xf] %vm814_vm2, %v1003_v40  ;;  %v488_v58 = vadd.f32 %v1137_v22, %v1332_v46  ;;  %v1153_v41 = vpop.f32.mrb[12].mxu1  ;;  %v479_v42 = vpop.f32.mrb[13].mxu0 }
  0xff   : > { %v663_v16 = vmax.f32 %v631_v13, 0.0  ;;  %v1017_v33 = vpack.c.bf16 %v678_v14, %v678_v14  ;;  %v1004_v38 = vpack.c.bf16 %v665_v31, %v665_v31  ;;  %v679_v56 = vmax.f32 %v647_v32, 0.0  ;;  %v543_v21 = vpop.f32.mrb[13].mxu1  ;;  %v1138_v23 = vpop.f32.mrb[14].mxu0 }
 0x100   : > { %841 = vst.msk [vmem:[%s1370_s5 + $0x68] sm:$0xf] %vm814_vm2, %v1019_v54  ;;  %823 = vst.msk [vmem:[%s1370_s5 + $0x20] sm:$0xf] %vm814_vm2, %v1001_v55  ;;  %v1020_v39 = vpack.c.bf16 %v681_v34, %v681_v34  ;;  %v552_v17 = vadd.f32 %v1153_v41, %v1332_v46  ;;  %v480_v18 = vadd.f32 %v1332_v46, %v479_v42  ;;  %v1154_v19 = vpop.f32.mrb[14].mxu1  ;;  %v482_v27 = vpop.f32.mrb[15].mxu0 }
 0x101   : > { %v1002_v59 = vpack.c.bf16 %v663_v16, %v663_v16  ;;  %839 = vst.msk [vmem:[%s1370_s5 + $0x60] sm:$0xf] %vm814_vm2, %v1017_v33  ;;  %826 = vst.msk [vmem:[%s1370_s5 + $0x2c] sm:$0xf] %vm814_vm2, %v1004_v38  ;;  %v1018_v26 = vpack.c.bf16 %v679_v56, %v679_v56  ;;  %v636_v43 = vadd.f32 %v1055_v60, %v488_v58  ;;  %v546_v63 = vpop.f32.mrb[15].mxu1 }
 0x102   : > { %v544_v47 = vadd.f32 %v1332_v46, %v543_v21  ;;  %v491_v35 = vadd.f32 %v1138_v23, %v1332_v46  ;;  %842 = vst.msk [vmem:[%s1370_s5 + $0x6c] sm:$0xf] %vm814_vm2, %v1020_v39  ;;  %v652_v48 = vadd.f32 %v1087_v61, %v552_v17  ;;  %v634_v20 = vadd.f32 %v1051_v1, %v480_v18 }
 0x103   : > { %824 = vst.msk [vmem:[%s1370_s5 + $0x24] sm:$0xf] %vm814_vm2, %v1002_v59  ;;  %v555_v57 = vadd.f32 %v1154_v19, %v1332_v46  ;;  %v483_v60 = vadd.f32 %v1332_v46, %v482_v27  ;;  %840 = vst.msk [vmem:[%s1370_s5 + $0x64] sm:$0xf] %vm814_vm2, %v1018_v26  ;;  %v668_v0 = vmax.f32 %v636_v43, 0.0  ;;  %v547_v61 = vadd.f32 %v1332_v46, %v546_v63 }
 0x104   : > { %v650_v24 = vadd.f32 %v1083_v2, %v544_v47  ;;  %v637_v62 = vadd.f32 %v1056_v3, %v491_v35  ;;  %v684_v6 = vmax.f32 %v652_v48, 0.0  ;;  %v666_v1 = vmax.f32 %v634_v20, 0.0 }
 0x105   : > { %v653_v25 = vadd.f32 %v1088_v8, %v555_v57  ;;  %v635_v28 = vadd.f32 %v1052_v9, %v483_v60  ;;  %v1007_v4 = vpack.c.bf16 %v668_v0, %v668_v0  ;;  %v651_v44 = vadd.f32 %v1084_v15, %v547_v61 }
 0x106   : > { %v682_v5 = vmax.f32 %v650_v24, 0.0  ;;  %v669_v2 = vmax.f32 %v637_v62, 0.0  ;;  %v1023_v46 = vpack.c.bf16 %v684_v6, %v684_v6  ;;  %v1005_v3 = vpack.c.bf16 %v666_v1, %v666_v1 }
 0x107   : > { %v685_v7 = vmax.f32 %v653_v25, 0.0  ;;  %v667_v45 = vmax.f32 %v635_v28, 0.0  ;;  %829 = vst.msk [vmem:[%s1370_s5 + $0x38] sm:$0xf] %vm814_vm2, %v1007_v4  ;;  %v683_v9 = vmax.f32 %v651_v44, 0.0 }
 0x108   : > { %v1021_v8 = vpack.c.bf16 %v682_v5, %v682_v5  ;;  %v1008_v51 = vpack.c.bf16 %v669_v2, %v669_v2  ;;  %845 = vst.msk [vmem:[%s1370_s5 + $0x78] sm:$0xf] %vm814_vm2, %v1023_v46  ;;  %827 = vst.msk [vmem:[%s1370_s5 + $0x30] sm:$0xf] %vm814_vm2, %v1005_v3 }
 0x109   : > { %v1024_v36 = vpack.c.bf16 %v685_v7, %v685_v7  ;;  %v1006_v49 = vpack.c.bf16 %v667_v45, %v667_v45  ;;  %v1022_v52 = vpack.c.bf16 %v683_v9, %v683_v9 }
 0x10a   : > { %843 = vst.msk [vmem:[%s1370_s5 + $0x70] sm:$0xf] %vm814_vm2, %v1021_v8  ;;  %830 = vst.msk [vmem:[%s1370_s5 + $0x3c] sm:$0xf] %vm814_vm2, %v1008_v51 }
 0x10b   : > { %846 = vst.msk [vmem:[%s1370_s5 + $0x7c] sm:$0xf] %vm814_vm2, %v1024_v36  ;;  %828 = vst.msk [vmem:[%s1370_s5 + $0x34] sm:$0xf] %vm814_vm2, %v1006_v49 }
 0x10c   : > { %844 = vst.msk [vmem:[%s1370_s5 + $0x74] sm:$0xf] %vm814_vm2, %v1022_v52 }
 0x10d PF: > { %s14_s15 = sadd.s32 1, %s1189_s15  }
 0x10e   : > { %p11_p4 = scmp.ge.s32.totalorder %s14_s15, 4  }
 0x110   :  { %13 = sbr.rel (!%p11_p4) target bundleno = 1 (0x1), region = 69 }

// kernel: base_resnet_forward.58
= control target key start
LH: loop header
LB: loop body
LE: loop exit
PB: predicated region body
PF: predicated region fallthrough
CT: control target
= control target key end

     0   :  { %s1096_s12 = smov 0   ;;  %s1294_s0 = inlined_call_operand.vmem [shape: bf16[2,18,18,16], index: 0, kind: input, shape index: {}]   ;;  %s1295_s1 = inlined_call_operand.vmem [shape: bf16[3,3,16,16], index: 1, kind: input, shape index: {}]   ;;  %s1296_s2 = inlined_call_operand.vmem [shape: f32[1,16], index: 2, kind: input, shape index: {}]   ;;  %s1297_s3 = inlined_call_operand.vmem [shape: bf16[2,8,16,16], index: 3, kind: output, shape index: {}]  }
   0x1 LB: > { %s857_s13 = sadd.s32 4294967295, %s1068_s12   ;;  %p861_p0 = scmp.ge.s32.totalorder %s1068_s12, 1  ;;  %s1068_s12 = sphi %s1096_s12, %s13_s12  }
   0x2   : > { %p137_p1 = scmp.lt.s32.totalorder %s1068_s12, 3 }
   0x4   : > { %p138_p2 = pnand %p861_p0, %p137_p1 }
   0x5   : > { %p161_p3 = scmp.lt.s32.totalorder (!%p138_p2), %s857_s13, 1  ;;  %v1107_v0 = vld [vmem:[%s1295_s1] sm:$0xf] (!%p138_p2)  ;;  %v1112_v1 = vld [vmem:[%s1295_s1 + $0x4] sm:$0xf] (!%p138_p2) }
   0x6   : > { %141 = sbr.rel (%p138_p2) target bundleno = 298 (0x12a), region = 32  ;;  %v1117_v2 = vld [vmem:[%s1295_s1 + $0x8] sm:$0xf] (!%p138_p2)  ;;  %v1122_v3 = vld [vmem:[%s1295_s1 + $0xc] sm:$0xf] (!%p138_p2) }
   0x7   : > { %v1127_v4 = vld [vmem:[%s1295_s1 + $0x10] sm:$0xf] (!%p138_p2)  ;;  %v1132_v5 = vld [vmem:[%s1295_s1 + $0x14] sm:$0xf] (!%p138_p2)  ;;  %v1137_v6 = vld [vmem:[%s1295_s1 + $0x18] sm:$0xf] (!%p138_p2) }
   0x8   : > { %v1142_v7 = vld [vmem:[%s1295_s1 + $0x1c] sm:$0xf] (!%p138_p2)  ;;  %v1147_v8 = vld [vmem:[%s1295_s1 + $0x20] sm:$0xf] (!%p138_p2)  ;;  %v1152_v9 = vld [vmem:[%s1295_s1 + $0x24] sm:$0xf] (!%p138_p2) }
   0x9   : > { %v1157_v10 = vld [vmem:[%s1295_s1 + $0x28] sm:$0xf] (!%p138_p2)  ;;  %v1162_v11 = vld [vmem:[%s1295_s1 + $0x2c] sm:$0xf] (!%p138_p2)  ;;  %v1172_v12 = vld [vmem:[%s1295_s1 + $0x30] sm:$0xf] (!%p138_p2) }
   0xa   : > { %v1177_v13 = vld [vmem:[%s1295_s1 + $0x34] sm:$0xf] (!%p138_p2)  ;;  %v1182_v14 = vld [vmem:[%s1295_s1 + $0x38] sm:$0xf] (!%p138_p2)  ;;  %v1192_v15 = vld [vmem:[%s1295_s1 + $0x3c] sm:$0xf] (!%p138_p2) }
   0xb   : > { %v1197_v16 = vld [vmem:[%s1295_s1 + $0x40] sm:$0xf] (!%p138_p2)  ;;  %v1202_v17 = vld [vmem:[%s1295_s1 + $0x44] sm:$0xf] (!%p138_p2) }
   0xc   : > { %v1207_v18 = vld [vmem:[%s1296_s2] ss:$0 sm:$0xff] (!%p138_p2) }
   0xd   : > { %s1299_s13 = smov (!%p161_p3, %s857_s13), 1 }
   0xe   : > { %s1033_s7 = smul.u32 216, %s1299_s13  ;;  %s924_s8 = sshll.u32 %s1299_s13, 6 }
   0xf   : > { %s1167_s17 = scalar_lea.vmem %s1297_s3, %s924_s8 }
  0x10   : > { %s1187_s25 = scalar_lea.vmem %s1294_s0, %s1033_s7  ;;  %s1209_s7 = smov 0  }
  0x11 LB: >> { %v886_v19 = vcombine.low %v1107_v0, %v1112_v1  ;;  %v1074_v20 = vmov 0.0   ;;  %vm1075_vm0 = vmmov 0   ;;  %v902_v21 = vcombine.low %v1147_v8, %v1152_v9  ;;  %s925_s8 = smul.u32 24, %s1072_s7  ;;  %s928_s10 = sshll.u32 %s1072_s7, 3  ;;  %s1072_s7 = sphi %s1209_s7, %s204_s7  }
  0x12   : >> { %947 = vmatprep.subr.bf16.mxu1 %v1074_v20  ;;  %949 = vmatprep.mubr.msk.bf16.mxu1 %vm1075_vm0, %v1074_v20  ;;  %vm230_vm1 = vcmask 130048   ;;  %v889_v22 = vcombine.low %v1117_v2, %v1122_v3  ;;  %vm280_vm2 = vsmask.f32 7424  ;;  %v904_v39 = vcombine.low %v1157_v10, %v1162_v11  ;;  %s781_s11 = scalar_lea.vmem %s1167_s17, %s928_s10  ;;  %s204_s7 = sadd.s32 1, %s1072_s7  }
  0x13   : >> { %948 = vmatpush3.bf16.msra.mxu1 %v886_v19  ;;  %971 = vmatprep.subr.bf16.mxu0 %v1074_v20  ;;  %s1226_s9 = scalar_lea.vmem %s1187_s25, %s925_s8  ;;  %v891_v42 = vcombine.low %v1127_v4, %v1132_v5  ;;  %vm344_vm3 = vcmask 1046528   ;;  %v912_v48 = vcombine.low %v1172_v12, %v1177_v13  ;;  %v899_v50 = vcombine.low %v1137_v6, %v1142_v7  ;;  %p201_p4 = scmp.ge.s32.totalorder %s204_s7, 8  }
  0x14   : >> { %972 = vmatpush3.bf16.msra.mxu0 %v902_v21  ;;  %973 = vmatprep.mubr.msk.bf16.mxu0 %vm1075_vm0, %v1074_v20  ;;  %v1052_v23 = vld [vmem:[%s1226_s9] sm:$0xff]   ;;  %v1053_v24 = vld [vmem:[%s1226_s9 + $0xc] sm:$0xff]   ;;  %v1054_v25 = vld [vmem:[%s1226_s9 + $0x14] ss:$0 sps:$4 sm:$0x11]   ;;  %v915_v52 = vcombine.low %v1182_v14, %v1192_v15  ;;  %v917_v61 = vcombine.low %v1197_v16, %v1202_v17  ;;  %vm782_vm4 = vcmask 125952  }
  0x15   : >> { %977 = vmatprep.subr.bf16.mxu0 %v1074_v20  ;;  %953 = vmatprep.subr.bf16.mxu1 %v1074_v20  ;;  %v1055_v26 = vld [vmem:[%s1226_s9 + $0x8] ss:$0 sps:$4 sm:$0x11]   ;;  %v281_v27 = vshrl.u32 %v1052_v23, 16  ;;  %v283_v28 = vshll.u32 %v1052_v23, 16  ;;  %v467_v29 = vshrl.u32 %v1053_v24, 16 }
  0x16   : >> { %950 = vmatmul.mubr.msk.bf16.vlgmr.msra.gmra.mrb[0].mxu1 %vm230_vm1, %v1052_v23  ;;  %v469_v30 = vshll.u32 %v1053_v24, 16  ;;  %v474_v31 = vshll.u32 %v1054_v25, 16  ;;  %v288_v33 = vshll.u32 %v1055_v26, 16  ;;  %v530_v43 = vrot.slane %v1053_v24, 1  ;;  %v1056_v51 = vld [vmem:[%s1226_s9 + $0x18] sm:$0xff]  }
  0x17   : >> { %954 = vmatpush3.bf16.msra.mxu1 %v889_v22  ;;  %955 = vmatprep.mubr.msk.bf16.mxu1 %vm1075_vm0, %v1074_v20  ;;  %v285_v32 = vrot.slane %v283_v28, 1  ;;  %v531_v44 = vrot.slane %v1054_v25, 1  ;;  %v345_v45 = vrot.slane %v1052_v23, 1  ;;  %v346_v46 = vrot.slane %v1055_v26, 1 }
  0x18   : >> { %959 = vmatprep.subr.bf16.mxu1 %v1074_v20  ;;  %v471_v34 = vrot.slane %v469_v30, 1  ;;  %v476_v35 = vrot.slane %v474_v31, 1  ;;  %v290_v37 = vrot.slane %v288_v33, 1  ;;  %v1057_v53 = vld [vmem:[%s1226_s9 + $0x20] ss:$0 sps:$4 sm:$0x11]  }
  0x19   : >> { %v286_v36 = vor.u32 %v285_v32, %v281_v27  ;;  %v532_v47 = vsel %vm344_vm3, %v530_v43, %v531_v44  ;;  %v347_v49 = vsel %vm344_vm3, %v345_v45, %v346_v46  ;;  %v654_v54 = vshll.u32 %v1056_v51, 16 }
  0x1a   : >> { %v472_v38 = vor.u32 %v471_v34, %v467_v29  ;;  %v652_v55 = vshrl.u32 %v1056_v51, 16  ;;  %v659_v57 = vshll.u32 %v1057_v53, 16  ;;  %v715_v62 = vrot.slane %v1056_v51, 1 }
  0x1b   : >> { %v291_v41 = vsel %vm280_vm2, %v286_v36, %v290_v37  ;;  %v656_v56 = vrot.slane %v654_v54, 1  ;;  %v716_v63 = vrot.slane %v1057_v53, 1 }
  0x1c   : >> { %v477_v40 = vsel %vm280_vm2, %v472_v38, %v476_v35  ;;  %v661_v59 = vrot.slane %v659_v57, 1 }
  0x1d   : >> { %974 = vmatmul.mubr.msk.bf16.vlgmr.msra.gmra.mrb[0].mxu0 %vm230_vm1, %v477_v40  ;;  %v657_v58 = vor.u32 %v656_v56, %v652_v55  ;;  %v717_v19 = vsel %vm344_vm3, %v715_v62, %v716_v63 }
  0x1e   : >> { %978 = vmatpush3.bf16.msra.mxu0 %v904_v39  ;;  %979 = vmatprep.mubr.msk.bf16.mxu0 %vm1075_vm0, %v1074_v20 }
  0x1f   : >> { %983 = vmatprep.subr.bf16.mxu0 %v1074_v20  ;;  %v662_v60 = vsel %vm280_vm2, %v657_v58, %v661_v59 }
  0x22   : >> { %956 = vmatmul.mubr.msk.bf16.vlgmr.msra.gmra.mrb[0].mxu1 %vm230_vm1, %v291_v41 }
  0x23   : >> { %960 = vmatpush3.bf16.msra.mxu1 %v891_v42  ;;  %961 = vmatprep.mubr.msk.bf16.mxu1 %vm1075_vm0, %v1074_v20 }
  0x24   : >> { %965 = vmatprep.subr.bf16.mxu1 %v1074_v20 }
  0x29   : >> { %980 = vmatmul.mubr.msk.bf16.vlgmr.msra.gmra.mrb[0].mxu0 %vm230_vm1, %v532_v47 }
  0x2a   : >> { %984 = vmatpush3.bf16.msra.mxu0 %v912_v48  ;;  %985 = vmatprep.mubr.msk.bf16.mxu0 %vm1075_vm0, %v1074_v20 }
  0x2b   : >> { %989 = vmatprep.subr.bf16.mxu0 %v1074_v20 }
  0x2e   : >> { %962 = vmatmul.mubr.msk.bf16.vlgmr.msra.gmra.mrb[0].mxu1 %vm230_vm1, %v347_v49 }
  0x2f   : >> { %966 = vmatpush3.bf16.msra.mxu1 %v899_v50  ;;  %967 = vmatprep.mubr.msk.bf16.mxu1 %vm1075_vm0, %v1074_v20 }
  0x35   : >> { %986 = vmatmul.mubr.msk.bf16.vlgmr.msra.gmra.mrb[0].mxu0 %vm230_vm1, %v1056_v51 }
  0x36   : >> { %990 = vmatpush3.bf16.msra.mxu0 %v915_v52  ;;  %991 = vmatprep.mubr.msk.bf16.mxu0 %vm1075_vm0, %v1074_v20 }
  0x37   : >> { %995 = vmatprep.subr.bf16.mxu0 %v1074_v20 }
  0x3a   : >> { %968 = vmatmul.mubr.msk.bf16.vlgmr.msra.gmra.mrb[0].mxu1 %vm230_vm1, %v1053_v24 }
  0x41   : >> { %992 = vmatmul.mubr.msk.bf16.vlgmr.msra.gmra.mrb[0].mxu0 %vm230_vm1, %v662_v60 }
  0x42   : >> { %996 = vmatpush3.bf16.msra.mxu0 %v917_v61  ;;  %997 = vmatprep.mubr.msk.bf16.mxu0 %vm1075_vm0, %v1074_v20 }
  0x4d   : >> { %998 = vmatmul.mubr.msk.bf16.vlgmr.msra.gmra.mrb[0].mxu0 %vm230_vm1, %v717_v19 }
 0x10d   : >> { %v455_v21 = vpop.f32.mrb[0].mxu1 }
 0x10e   : >> { %v969_v22 = vpop.f32.mrb[1].mxu1  ;;  %v1001_v25 = vadd.f32 %v1207_v18, %v455_v21 }
 0x10f   : >> { %v458_v23 = vpop.f32.mrb[2].mxu1 }
 0x110   : >> { %v970_v24 = vpop.f32.mrb[3].mxu1  ;;  %v1003_v27 = vadd.f32 %v1207_v18, %v458_v23 }
 0x120   : >> { %v761_v26 = vpop.f32.mrb[0].mxu0 }
 0x121   : >> { %v1002_v28 = vadd.f32 %v1001_v25, %v761_v26  ;;  %v999_v29 = vpop.f32.mrb[1].mxu0 }
 0x122   : >> { %v764_v20 = vpop.f32.mrb[2].mxu0 }
 0x123   : >> { %v770_v30 = vmax.f32 %v1002_v28, 0.0  ;;  %v1004_v31 = vadd.f32 %v1003_v27, %v764_v20  ;;  %v1000_v32 = vpop.f32.mrb[3].mxu0  ;;  %203 = sbr.rel (!%p201_p4) target bundleno = 17 (0x11), region = 81 }
 0x125   : >> { %v926_v33 = vpack.c.bf16 %v770_v30, %v770_v30  ;;  %v771_v34 = vmax.f32 %v1004_v31, 0.0 }
 0x127   : >> { %783 = vst.msk [vmem:[%s781_s11] sm:$0xf] %vm782_vm4, %v926_v33  ;;  %v927_v35 = vpack.c.bf16 %v771_v34, %v771_v34 }
 0x129   : >> { %784 = vst.msk [vmem:[%s781_s11 + $0x4] sm:$0xf] %vm782_vm4, %v927_v35 }
 0x12a PF: > { %s13_s12 = sadd.s32 1, %s1068_s12  }
 0x12b   : > { %p10_p5 = scmp.ge.s32.totalorder %s13_s12, 4  }
 0x12d   :  { %12 = sbr.rel (!%p10_p5) target bundleno = 1 (0x1), region = 92 }

// kernel: base_resnet_forward.59
= control target key start
LH: loop header
LB: loop body
LE: loop exit
PB: predicated region body
PF: predicated region fallthrough
CT: control target
= control target key end

     0   :  { %s814_s21 = smov 0   ;;  %s876_s0 = inlined_call_operand.vmem [shape: bf16[128,16], index: 0, kind: input, shape index: {}]   ;;  %s877_s1 = inlined_call_operand.vmem [shape: bf16[16,64], index: 1, kind: input, shape index: {}]   ;;  %s878_s2 = inlined_call_operand.vmem [shape: f32[1,64], index: 2, kind: input, shape index: {}]   ;;  %s879_s3 = inlined_call_operand.vmem [shape: bf16[128,32], index: 3, kind: input, shape index: {}]   ;;  %s880_s4 = inlined_call_operand.vmem [shape: bf16[32,64], index: 4, kind: input, shape index: {}]   ;;  %s881_s5 = inlined_call_operand.vmem [shape: f32[1,64], index: 5, kind: input, shape index: {}]   ;;  %s882_s6 = inlined_call_operand.vmem [shape: bf16[128,64], index: 6, kind: output, shape index: {}]  }
   0x1 LB: > { %s661_s22 = sadd.s32 4294967295, %s777_s21   ;;  %p665_p0 = scmp.ge.s32.totalorder %s777_s21, 1  ;;  %s777_s21 = sphi %s814_s21, %s16_s21  }
   0x2   : > { %p224_p1 = scmp.lt.s32.totalorder %s777_s21, 3 }
   0x4   : > { %p225_p2 = pnand %p665_p0, %p224_p1 }
   0x5   : > { %v760_v0 = vld [vmem:[%s880_s4] sm:$0xff] (!%p225_p2)   ;;  %s666_s25 = sshll.u32 (!%p225_p2), %s661_s22, 3  ;;  %v761_v1 = vld [vmem:[%s880_s4 + $0x8] sm:$0xff] (!%p225_p2)   ;;  %vm332_vm0 = vcmask (!%p225_p2), 261120   ;;  %vm436_vm1 = vcmask (!%p225_p2), 130048   ;;  %vm584_vm2 = vcmask (!%p225_p2), 519168  }
   0x6   : > { %228 = sbr.rel (%p225_p2) target bundleno = 253 (0xfd), region = 44  ;;  %p260_p3 = scmp.lt.s32.totalorder (!%p225_p2), %s666_s25, 15  ;;  %722 = vmatprep.subr.bf16.mxu1 (!%p225_p2), %v760_v0  ;;  %v762_v2 = vld [vmem:[%s877_s1] sm:$0xff] (!%p225_p2)  }
   0x7   : > { %723 = vmatpush3.bf16.msra.mxu1 (!%p225_p2), %v760_v0  ;;  %734 = vmatprep.subr.bf16.mxu0 (!%p225_p2), %v762_v2  ;;  %v691_v13 = vld [vmem:[%s878_s2] ss:$0 sm:$0xff] (!%p225_p2) }
   0x8   : > { %724 = vmatprep.subr.bf16.mxu1 (!%p225_p2), %v761_v1  ;;  %735 = vmatpush3.bf16.msra.mxu0 (!%p225_p2), %v762_v2  ;;  %v692_v18 = vld [vmem:[%s881_s5] ss:$0 sm:$0xff] (!%p225_p2) }
   0xb   : > { %725 = vmatpush3.bf16.msra.mxu1 (!%p225_p2), %v761_v1 }
   0xd   : > { %s884_s25 = smov (!%p260_p3, %s666_s25), 15 }
   0xe   : > { %s831_s30 = sshll.u32 %s884_s25, 2 }
   0xf   : > { %s269_s9 = scalar_lea.vmem %s879_s3, %s831_s30  ;;  %s263_s12 = scalar_lea.vmem %s876_s0, %s831_s30 }
  0x10   : > { %v763_v3 = vld [vmem:[%s269_s9] sm:$0xff]   ;;  %v765_v5 = vld [vmem:[%s269_s9 + $0x8] sm:$0xff]   ;;  %v767_v7 = vld [vmem:[%s269_s9 + $0x10] sm:$0xff]   ;;  %s855_s19 = scalar_lea.vmem %s882_s6, %s831_s30 }
  0x11   : > { %v764_v4 = vld [vmem:[%s263_s12] sm:$0xff]   ;;  %726 = vmatprep.mubr.msk.bf16.mxu1 %vm332_vm0, %v763_v3  ;;  %v766_v6 = vld [vmem:[%s263_s12 + $0x8] sm:$0xff]   ;;  %v768_v8 = vld [vmem:[%s263_s12 + $0x10] sm:$0xff]  }
  0x12   : > { %736 = vmatprep.mubr.msk.bf16.mxu0 %vm436_vm1, %v764_v4  ;;  %727 = vmatmul.mubr.msk.bf16.vlgmr.msra.gmra.mrb[0].mxu1 %vm332_vm0, %v765_v5  ;;  %v769_v9 = vld [vmem:[%s269_s9 + $0x18] sm:$0xff]  }
  0x13   : > { %737 = vmatmul.mubr.msk.bf16.vlgmr.msra.gmra.mrb[0].mxu0 %vm436_vm1, %v766_v6  ;;  %730 = vmatprep.mubr.msk.bf16.mxu1 %vm332_vm0, %v767_v7  ;;  %v770_v10 = vld [vmem:[%s263_s12 + $0x18] sm:$0xff]  }
  0x14   : > { %740 = vmatprep.mubr.msk.bf16.mxu0 %vm436_vm1, %v768_v8 }
  0x1a   : > { %731 = vmatmul.mubr.msk.bf16.gmra.mrb[4].mxu1 %vm332_vm0, %v769_v9 }
  0x1b   : > { %741 = vmatmul.mubr.msk.bf16.gmra.mrb[4].mxu0 %vm436_vm1, %v770_v10 }
  0xe5   : > { %v728_v11 = vpop.f32.mrb[0].mxu1 }
  0xe6   : > { %v738_v12 = vpop.f32.mrb[0].mxu0  ;;  %v379_v14 = vpop.f32.mrb[1].mxu1 }
  0xe7   : > { %v492_v15 = vadd.f32 %v738_v12, %v728_v11  ;;  %v483_v16 = vpop.f32.mrb[1].mxu0  ;;  %v729_v17 = vpop.f32.mrb[2].mxu1 }
  0xe8   : > { %v484_v19 = vadd.f32 %v483_v16, %v379_v14  ;;  %v739_v20 = vpop.f32.mrb[2].mxu0  ;;  %v382_v21 = vpop.f32.mrb[3].mxu1 }
  0xe9   : > { %v523_v22 = vadd.f32 %v691_v13, %v492_v15  ;;  %v495_v23 = vadd.f32 %v739_v20, %v729_v17  ;;  %v486_v24 = vpop.f32.mrb[3].mxu0 }
  0xea   : > { %v521_v25 = vadd.f32 %v691_v13, %v484_v19  ;;  %v487_v26 = vadd.f32 %v486_v24, %v382_v21 }
  0xeb   : > { %v538_v27 = vadd.f32 %v692_v18, %v523_v22  ;;  %v524_v28 = vadd.f32 %v691_v13, %v495_v23 }
  0xec   : > { %v536_v29 = vadd.f32 %v692_v18, %v521_v25  ;;  %v522_v30 = vadd.f32 %v691_v13, %v487_v26 }
  0xed   : > { %v546_v31 = vmax.f32 %v538_v27, 0.0  ;;  %v539_v32 = vadd.f32 %v692_v18, %v524_v28  ;;  %v732_v33 = vpop.f32.mrb[4].mxu1 }
  0xee   : > { %v544_v34 = vmax.f32 %v536_v29, 0.0  ;;  %v537_v35 = vadd.f32 %v692_v18, %v522_v30  ;;  %v742_v36 = vpop.f32.mrb[4].mxu0  ;;  %v395_v37 = vpop.f32.mrb[5].mxu1 }
  0xef   : > { %v705_v38 = vpack.c.bf16 %v546_v31, %v546_v31  ;;  %v547_v39 = vmax.f32 %v539_v32, 0.0  ;;  %v508_v40 = vadd.f32 %v742_v36, %v732_v33  ;;  %v499_v41 = vpop.f32.mrb[5].mxu0  ;;  %v733_v42 = vpop.f32.mrb[6].mxu1 }
  0xf0   : > { %v703_v43 = vpack.c.bf16 %v544_v34, %v544_v34  ;;  %v545_v44 = vmax.f32 %v537_v35, 0.0  ;;  %v500_v45 = vadd.f32 %v499_v41, %v395_v37  ;;  %v743_v46 = vpop.f32.mrb[6].mxu0  ;;  %v398_v47 = vpop.f32.mrb[7].mxu1 }
  0xf1   : > { %587 = vst.msk [vmem:[%s855_s19 + $0x8] sm:$0xf] %vm584_vm2, %v705_v38  ;;  %v706_v48 = vpack.c.bf16 %v547_v39, %v547_v39  ;;  %v527_v49 = vadd.f32 %v691_v13, %v508_v40  ;;  %v511_v50 = vadd.f32 %v743_v46, %v733_v42  ;;  %v502_v51 = vpop.f32.mrb[7].mxu0 }
  0xf2   : > { %585 = vst.msk [vmem:[%s855_s19] sm:$0xf] %vm584_vm2, %v703_v43  ;;  %v704_v52 = vpack.c.bf16 %v545_v44, %v545_v44  ;;  %v525_v53 = vadd.f32 %v691_v13, %v500_v45  ;;  %v503_v54 = vadd.f32 %v502_v51, %v398_v47 }
  0xf3   : > { %588 = vst.msk [vmem:[%s855_s19 + $0xc] sm:$0xf] %vm584_vm2, %v706_v48  ;;  %v542_v55 = vadd.f32 %v692_v18, %v527_v49  ;;  %v528_v56 = vadd.f32 %v691_v13, %v511_v50 }
  0xf4   : > { %586 = vst.msk [vmem:[%s855_s19 + $0x4] sm:$0xf] %vm584_vm2, %v704_v52  ;;  %v540_v57 = vadd.f32 %v692_v18, %v525_v53  ;;  %v526_v58 = vadd.f32 %v691_v13, %v503_v54 }
  0xf5   : > { %v550_v59 = vmax.f32 %v542_v55, 0.0  ;;  %v543_v60 = vadd.f32 %v692_v18, %v528_v56 }
  0xf6   : > { %v548_v61 = vmax.f32 %v540_v57, 0.0  ;;  %v541_v62 = vadd.f32 %v692_v18, %v526_v58 }
  0xf7   : > { %v709_v63 = vpack.c.bf16 %v550_v59, %v550_v59  ;;  %v551_v0 = vmax.f32 %v543_v60, 0.0 }
  0xf8   : > { %v707_v1 = vpack.c.bf16 %v548_v61, %v548_v61  ;;  %v549_v2 = vmax.f32 %v541_v62, 0.0 }
  0xf9   : > { %591 = vst.msk [vmem:[%s855_s19 + $0x18] sm:$0xf] %vm584_vm2, %v709_v63  ;;  %v710_v3 = vpack.c.bf16 %v551_v0, %v551_v0 }
  0xfa   : > { %589 = vst.msk [vmem:[%s855_s19 + $0x10] sm:$0xf] %vm584_vm2, %v707_v1  ;;  %v708_v4 = vpack.c.bf16 %v549_v2, %v549_v2 }
  0xfb   : > { %592 = vst.msk [vmem:[%s855_s19 + $0x1c] sm:$0xf] %vm584_vm2, %v710_v3 }
  0xfc   : > { %590 = vst.msk [vmem:[%s855_s19 + $0x14] sm:$0xf] %vm584_vm2, %v708_v4 }
  0xfd PF: > { %s16_s21 = sadd.s32 1, %s777_s21  }
  0xfe   : > { %p13_p4 = scmp.ge.s32.totalorder %s16_s21, 4  }
 0x100   :  { %15 = sbr.rel (!%p13_p4) target bundleno = 1 (0x1), region = 77 }

// kernel: base_resnet_forward.60
= control target key start
LH: loop header
LB: loop body
LE: loop exit
PB: predicated region body
PF: predicated region fallthrough
CT: control target
= control target key end

     0   :  { %s541_s12 = smov 0   ;;  %s592_s0 = inlined_call_operand.vmem [shape: bf16[128,64], index: 0, kind: input, shape index: {}]   ;;  %s593_s1 = inlined_call_operand.vmem [shape: bf16[64,16], index: 1, kind: input, shape index: {}]   ;;  %s594_s2 = inlined_call_operand.vmem [shape: f32[1,16], index: 2, kind: input, shape index: {}]   ;;  %s595_s3 = inlined_call_operand.vmem [shape: bf16[128,16], index: 3, kind: output, shape index: {}]  }
   0x1 LB: > { %s425_s13 = sadd.s32 4294967295, %s519_s12   ;;  %p429_p0 = scmp.ge.s32.totalorder %s519_s12, 1  ;;  %s519_s12 = sphi %s541_s12, %s13_s12  }
   0x2   : > { %p138_p1 = scmp.lt.s32.totalorder %s519_s12, 3 }
   0x4   : > { %p139_p2 = pnand %p429_p0, %p138_p1 }
   0x5   : > { %v505_v0 = vld [vmem:[%s593_s1] sm:$0xff] (!%p139_p2)   ;;  %s430_s16 = sshll.u32 (!%p139_p2), %s425_s13, 3  ;;  %v506_v1 = vld [vmem:[%s593_s1 + $0x8] sm:$0xff] (!%p139_p2)   ;;  %v507_v2 = vld [vmem:[%s593_s1 + $0x10] sm:$0xff] (!%p139_p2)   ;;  %vm242_vm0 = vcmask (!%p139_p2), 523264   ;;  %vm360_vm1 = vcmask (!%p139_p2), 125952  }
   0x6   : > { %142 = sbr.rel (%p139_p2) target bundleno = 244 (0xf4), region = 32  ;;  %p163_p3 = scmp.lt.s32.totalorder (!%p139_p2), %s430_s16, 15  ;;  %473 = vmatprep.subr.bf16.mxu0 (!%p139_p2), %v505_v0  ;;  %489 = vmatprep.subr.bf16.mxu1 (!%p139_p2), %v505_v0  ;;  %v508_v3 = vld [vmem:[%s593_s1 + $0x18] sm:$0xff] (!%p139_p2)   ;;  %v434_v8 = vld [vmem:[%s594_s2] ss:$0 sm:$0xff] (!%p139_p2) }
   0x7   : > { %474 = vmatpush3.bf16.msra.mxu0 (!%p139_p2), %v505_v0  ;;  %493 = vmatpush3.bf16.msra.mxu1 (!%p139_p2), %v505_v0 }
   0x8   : > { %475 = vmatprep.subr.bf16.mxu0 (!%p139_p2), %v506_v1  ;;  %490 = vmatprep.subr.bf16.mxu1 (!%p139_p2), %v506_v1 }
   0xb   : > { %476 = vmatpush3.bf16.msra.mxu0 (!%p139_p2), %v506_v1  ;;  %494 = vmatpush3.bf16.msra.mxu1 (!%p139_p2), %v506_v1 }
   0xc   : > { %477 = vmatprep.subr.bf16.mxu0 (!%p139_p2), %v507_v2  ;;  %491 = vmatprep.subr.bf16.mxu1 (!%p139_p2), %v507_v2 }
   0xd   : > { %s597_s16 = smov (!%p163_p3, %s430_s16), 15 }
   0xe   : > { %s431_s21 = sshll.u32 %s597_s16, 2 }
   0xf   : > { %s166_s26 = scalar_lea.vmem %s592_s0, %s431_s21  ;;  %478 = vmatpush3.bf16.msra.mxu0 %v507_v2  ;;  %495 = vmatpush3.bf16.msra.mxu1 %v507_v2  ;;  %s172_s4 = scalar_lea.vmem %s595_s3, %s431_s21 }
  0x10   : > { %v509_v4 = vld [vmem:[%s166_s26] sm:$0xff]   ;;  %v510_v5 = vld [vmem:[%s166_s26 + $0x10] sm:$0xff]   ;;  %479 = vmatprep.subr.bf16.mxu0 %v508_v3  ;;  %492 = vmatprep.subr.bf16.mxu1 %v508_v3  ;;  %v511_v6 = vld [vmem:[%s166_s26 + $0x8] sm:$0xff]  }
  0x11   : > { %481 = vmatprep.mubr.msk.bf16.mxu0 %vm242_vm0, %v509_v4  ;;  %485 = vmatprep.mubr.msk.bf16.mxu1 %vm242_vm0, %v510_v5  ;;  %v512_v7 = vld [vmem:[%s166_s26 + $0x18] sm:$0xff]  }
  0x13   : > { %480 = vmatpush3.bf16.msra.mxu0 %v508_v3  ;;  %496 = vmatpush3.bf16.msra.mxu1 %v508_v3 }
  0x16   : > { %482 = vmatmul.mubr.msk.bf16.vlgmr.msra.gmra.mrb[0].mxu0 %vm242_vm0, %v511_v6  ;;  %486 = vmatmul.mubr.msk.bf16.vlgmr.msra.gmra.mrb[0].mxu1 %vm242_vm0, %v512_v7 }
  0xe9   : > { %v483_v9 = vpop.f32.mrb[0].mxu0  ;;  %v487_v10 = vpop.f32.mrb[0].mxu1 }
  0xea   : > { %v298_v11 = vadd.f32 %v483_v9, %v434_v8  ;;  %v314_v12 = vadd.f32 %v487_v10, %v434_v8  ;;  %v289_v13 = vpop.f32.mrb[1].mxu0  ;;  %v305_v14 = vpop.f32.mrb[1].mxu1 }
  0xeb   : > { %v290_v15 = vadd.f32 %v434_v8, %v289_v13  ;;  %v306_v16 = vadd.f32 %v434_v8, %v305_v14  ;;  %v484_v17 = vpop.f32.mrb[2].mxu0  ;;  %v488_v18 = vpop.f32.mrb[2].mxu1 }
  0xec   : > { %v322_v19 = vmax.f32 %v298_v11, 0.0  ;;  %v326_v20 = vmax.f32 %v314_v12, 0.0  ;;  %v301_v21 = vadd.f32 %v484_v17, %v434_v8  ;;  %v317_v22 = vadd.f32 %v488_v18, %v434_v8  ;;  %v292_v23 = vpop.f32.mrb[3].mxu0  ;;  %v308_v24 = vpop.f32.mrb[3].mxu1 }
  0xed   : > { %v320_v25 = vmax.f32 %v290_v15, 0.0  ;;  %v324_v26 = vmax.f32 %v306_v16, 0.0  ;;  %v293_v27 = vadd.f32 %v434_v8, %v292_v23  ;;  %v309_v28 = vadd.f32 %v434_v8, %v308_v24 }
  0xee   : > { %v459_v29 = vpack.c.bf16 %v322_v19, %v322_v19  ;;  %v463_v30 = vpack.c.bf16 %v326_v20, %v326_v20  ;;  %v323_v31 = vmax.f32 %v301_v21, 0.0  ;;  %v327_v32 = vmax.f32 %v317_v22, 0.0 }
  0xef   : > { %v457_v33 = vpack.c.bf16 %v320_v25, %v320_v25  ;;  %v461_v34 = vpack.c.bf16 %v324_v26, %v324_v26  ;;  %v321_v35 = vmax.f32 %v293_v27, 0.0  ;;  %v325_v36 = vmax.f32 %v309_v28, 0.0 }
  0xf0   : > { %363 = vst.msk [vmem:[%s172_s4 + $0x8] sm:$0xf] %vm360_vm1, %v459_v29  ;;  %367 = vst.msk [vmem:[%s172_s4 + $0x18] sm:$0xf] %vm360_vm1, %v463_v30  ;;  %v460_v37 = vpack.c.bf16 %v323_v31, %v323_v31  ;;  %v464_v38 = vpack.c.bf16 %v327_v32, %v327_v32 }
  0xf1   : > { %361 = vst.msk [vmem:[%s172_s4] sm:$0xf] %vm360_vm1, %v457_v33  ;;  %365 = vst.msk [vmem:[%s172_s4 + $0x10] sm:$0xf] %vm360_vm1, %v461_v34  ;;  %v458_v39 = vpack.c.bf16 %v321_v35, %v321_v35  ;;  %v462_v40 = vpack.c.bf16 %v325_v36, %v325_v36 }
  0xf2   : > { %364 = vst.msk [vmem:[%s172_s4 + $0xc] sm:$0xf] %vm360_vm1, %v460_v37  ;;  %368 = vst.msk [vmem:[%s172_s4 + $0x1c] sm:$0xf] %vm360_vm1, %v464_v38 }
  0xf3   : > { %362 = vst.msk [vmem:[%s172_s4 + $0x4] sm:$0xf] %vm360_vm1, %v458_v39  ;;  %366 = vst.msk [vmem:[%s172_s4 + $0x14] sm:$0xf] %vm360_vm1, %v462_v40 }
  0xf4 PF: > { %s13_s12 = sadd.s32 1, %s519_s12  }
  0xf5   : > { %p10_p4 = scmp.ge.s32.totalorder %s13_s12, 4  }
  0xf7   :  { %12 = sbr.rel (!%p10_p4) target bundleno = 1 (0x1), region = 62 }

// kernel: base_resnet_forward.62
= control target key start
LH: loop header
LB: loop body
LE: loop exit
PB: predicated region body
PF: predicated region fallthrough
CT: control target
= control target key end

     0   :  { %s607_s15 = smov 0   ;;  %s646_s0 = inlined_call_operand.vmem [shape: bf16[128,16], index: 0, kind: input, shape index: {}]   ;;  %s647_s1 = inlined_call_operand.vmem [shape: bf16[16,64], index: 1, kind: input, shape index: {}]   ;;  %s648_s2 = inlined_call_operand.vmem [shape: f32[1,64], index: 2, kind: input, shape index: {}]   ;;  %s649_s3 = inlined_call_operand.vmem [shape: bf16[128,64], index: 3, kind: input, shape index: {}]   ;;  %s650_s4 = inlined_call_operand.vmem [shape: bf16[128,64], index: 4, kind: output, shape index: {}]  }
   0x1 LB: > { %s486_s16 = sadd.s32 4294967295, %s580_s15   ;;  %p490_p0 = scmp.ge.s32.totalorder %s580_s15, 1  ;;  %s580_s15 = sphi %s607_s15, %s14_s15  }
   0x2   : > { %p174_p1 = scmp.lt.s32.totalorder %s580_s15, 3 }
   0x4   : > { %p175_p2 = pnand %p490_p0, %p174_p1 }
   0x5   : > { %v569_v0 = vld [vmem:[%s647_s1] sm:$0xff] (!%p175_p2)   ;;  %s491_s19 = sshll.u32 (!%p175_p2), %s486_s16, 3  ;;  %vm267_vm0 = vcmask (!%p175_p2), 130048   ;;  %vm409_vm1 = vcmask (!%p175_p2), 519168  }
   0x6   : > { %178 = sbr.rel (%p175_p2) target bundleno = 242 (0xf2), region = 36  ;;  %p206_p3 = scmp.lt.s32.totalorder (!%p175_p2), %s491_s19, 15  ;;  %549 = vmatprep.subr.bf16.mxu0 (!%p175_p2), %v569_v0  ;;  %559 = vmatprep.subr.bf16.mxu1 (!%p175_p2), %v569_v0  ;;  %v497_v8 = vld [vmem:[%s648_s2] ss:$0 sm:$0xff] (!%p175_p2) }
   0x7   : > { %550 = vmatpush3.bf16.msra.mxu0 (!%p175_p2), %v569_v0  ;;  %560 = vmatpush3.bf16.msra.mxu1 (!%p175_p2), %v569_v0 }
   0xd   : > { %s652_s19 = smov (!%p206_p3, %s491_s19), 15 }
   0xe   : > { %s618_s20 = sshll.u32 %s652_s19, 2 }
   0xf   : > { %s209_s23 = scalar_lea.vmem %s646_s0, %s618_s20  ;;  %s215_s26 = scalar_lea.vmem %s649_s3, %s618_s20 }
  0x10   : > { %v570_v1 = vld [vmem:[%s209_s23] sm:$0xff]   ;;  %v571_v2 = vld [vmem:[%s209_s23 + $0x10] sm:$0xff]   ;;  %v572_v3 = vld [vmem:[%s209_s23 + $0x8] sm:$0xff]   ;;  %s221_s5 = scalar_lea.vmem %s650_s4, %s618_s20 }
  0x11   : > { %551 = vmatprep.mubr.msk.bf16.mxu0 %vm267_vm0, %v570_v1  ;;  %555 = vmatprep.mubr.msk.bf16.mxu1 %vm267_vm0, %v571_v2  ;;  %v573_v4 = vld [vmem:[%s209_s23 + $0x18] sm:$0xff]   ;;  %v541_v5 = vld [vmem:[%s215_s26 + $0x8] sm:$0xff]   ;;  %v526_v7 = vld [vmem:[%s215_s26] sm:$0xff]  }
  0x12   : > { %552 = vmatmul.mubr.msk.bf16.vlgmr.msra.gmra.mrb[0].mxu0 %vm267_vm0, %v572_v3  ;;  %556 = vmatmul.mubr.msk.bf16.vlgmr.msra.gmra.mrb[0].mxu1 %vm267_vm0, %v573_v4  ;;  %v543_v6 = vld [vmem:[%s215_s26 + $0x18] sm:$0xff]   ;;  %v542_v9 = vld [vmem:[%s215_s26 + $0x10] sm:$0xff]   ;;  %v531_v10 = vunpack.c.l.bf16 %v541_v5  ;;  %v527_v13 = vunpack.c.l.bf16 %v526_v7  ;;  %v532_v18 = vunpack.c.h.bf16 %v541_v5  ;;  %v528_v24 = vunpack.c.h.bf16 %v526_v7 }
  0x13   : > { %v539_v12 = vunpack.c.l.bf16 %v543_v6  ;;  %v535_v17 = vunpack.c.l.bf16 %v542_v9  ;;  %v540_v19 = vunpack.c.h.bf16 %v543_v6  ;;  %v536_v25 = vunpack.c.h.bf16 %v542_v9 }
  0xe5   : > { %v553_v11 = vpop.f32.mrb[0].mxu0  ;;  %v557_v15 = vpop.f32.mrb[0].mxu1 }
  0xe6   : > { %v323_v14 = vadd.f32 %v553_v11, %v497_v8  ;;  %v314_v16 = vpop.f32.mrb[1].mxu0  ;;  %v339_v20 = vadd.f32 %v557_v15, %v497_v8  ;;  %v330_v22 = vpop.f32.mrb[1].mxu1 }
  0xe7   : > { %v315_v21 = vadd.f32 %v497_v8, %v314_v16  ;;  %v554_v23 = vpop.f32.mrb[2].mxu0  ;;  %v331_v27 = vadd.f32 %v497_v8, %v330_v22  ;;  %v558_v29 = vpop.f32.mrb[2].mxu1 }
  0xe8   : > { %v363_v26 = vadd.f32 %v531_v10, %v323_v14  ;;  %v326_v28 = vadd.f32 %v554_v23, %v497_v8  ;;  %v317_v30 = vpop.f32.mrb[3].mxu0  ;;  %v367_v31 = vadd.f32 %v539_v12, %v339_v20  ;;  %v342_v33 = vadd.f32 %v558_v29, %v497_v8  ;;  %v333_v35 = vpop.f32.mrb[3].mxu1 }
  0xe9   : > { %v361_v32 = vadd.f32 %v527_v13, %v315_v21  ;;  %v318_v34 = vadd.f32 %v497_v8, %v317_v30  ;;  %v365_v37 = vadd.f32 %v535_v17, %v331_v27  ;;  %v334_v39 = vadd.f32 %v497_v8, %v333_v35 }
  0xea   : > { %v371_v36 = vmax.f32 %v363_v26, 0.0  ;;  %v364_v38 = vadd.f32 %v532_v18, %v326_v28  ;;  %v375_v40 = vmax.f32 %v367_v31, 0.0  ;;  %v368_v42 = vadd.f32 %v540_v19, %v342_v33 }
  0xeb   : > { %v369_v41 = vmax.f32 %v361_v32, 0.0  ;;  %v362_v43 = vadd.f32 %v528_v24, %v318_v34  ;;  %v373_v45 = vmax.f32 %v365_v37, 0.0  ;;  %v366_v47 = vadd.f32 %v536_v25, %v334_v39 }
  0xec   : > { %v519_v44 = vpack.c.bf16 %v371_v36, %v371_v36  ;;  %v372_v46 = vmax.f32 %v364_v38, 0.0  ;;  %v523_v48 = vpack.c.bf16 %v375_v40, %v375_v40  ;;  %v376_v50 = vmax.f32 %v368_v42, 0.0 }
  0xed   : > { %v517_v49 = vpack.c.bf16 %v369_v41, %v369_v41  ;;  %v370_v51 = vmax.f32 %v362_v43, 0.0  ;;  %v521_v52 = vpack.c.bf16 %v373_v45, %v373_v45  ;;  %v374_v54 = vmax.f32 %v366_v47, 0.0 }
  0xee   : > { %412 = vst.msk [vmem:[%s221_s5 + $0x8] sm:$0xf] %vm409_vm1, %v519_v44  ;;  %v520_v53 = vpack.c.bf16 %v372_v46, %v372_v46  ;;  %416 = vst.msk [vmem:[%s221_s5 + $0x18] sm:$0xf] %vm409_vm1, %v523_v48  ;;  %v524_v55 = vpack.c.bf16 %v376_v50, %v376_v50 }
  0xef   : > { %410 = vst.msk [vmem:[%s221_s5] sm:$0xf] %vm409_vm1, %v517_v49  ;;  %v518_v56 = vpack.c.bf16 %v370_v51, %v370_v51  ;;  %414 = vst.msk [vmem:[%s221_s5 + $0x10] sm:$0xf] %vm409_vm1, %v521_v52  ;;  %v522_v57 = vpack.c.bf16 %v374_v54, %v374_v54 }
  0xf0   : > { %413 = vst.msk [vmem:[%s221_s5 + $0xc] sm:$0xf] %vm409_vm1, %v520_v53  ;;  %417 = vst.msk [vmem:[%s221_s5 + $0x1c] sm:$0xf] %vm409_vm1, %v524_v55 }
  0xf1   : > { %411 = vst.msk [vmem:[%s221_s5 + $0x4] sm:$0xf] %vm409_vm1, %v518_v56  ;;  %415 = vst.msk [vmem:[%s221_s5 + $0x14] sm:$0xf] %vm409_vm1, %v522_v57 }
  0xf2 PF: > { %s14_s15 = sadd.s32 1, %s580_s15  }
  0xf3   : > { %p11_p4 = scmp.ge.s32.totalorder %s14_s15, 4  }
  0xf5   :  { %13 = sbr.rel (!%p11_p4) target bundleno = 1 (0x1), region = 69 }

// kernel: base_resnet_forward.61
= control target key start
LH: loop header
LB: loop body
LE: loop exit
PB: predicated region body
PF: predicated region fallthrough
CT: control target
= control target key end

     0   :  { %s1016_s12 = smov 0   ;;  %s1207_s0 = inlined_call_operand.vmem [shape: bf16[2,10,10,16], index: 0, kind: input, shape index: {}]   ;;  %s1208_s1 = inlined_call_operand.vmem [shape: bf16[3,3,16,16], index: 1, kind: input, shape index: {}]   ;;  %s1209_s2 = inlined_call_operand.vmem [shape: f32[1,16], index: 2, kind: input, shape index: {}]   ;;  %s1210_s3 = inlined_call_operand.vmem [shape: bf16[2,8,8,16], index: 3, kind: output, shape index: {}]  }
   0x1 LB: > { %s795_s13 = sadd.s32 4294967295, %s988_s12   ;;  %p799_p0 = scmp.ge.s32.totalorder %s988_s12, 1  ;;  %s988_s12 = sphi %s1016_s12, %s13_s12  }
   0x2   : > { %p137_p1 = scmp.lt.s32.totalorder %s988_s12, 3 }
   0x4   : > { %p138_p2 = pnand %p799_p0, %p137_p1 }
   0x5   : > { %p161_p3 = scmp.lt.s32.totalorder (!%p138_p2), %s795_s13, 1  ;;  %v1027_v0 = vld [vmem:[%s1208_s1] sm:$0xf] (!%p138_p2)  ;;  %v1032_v1 = vld [vmem:[%s1208_s1 + $0x4] sm:$0xf] (!%p138_p2) }
   0x6   : > { %141 = sbr.rel (%p138_p2) target bundleno = 296 (0x128), region = 32  ;;  %v1037_v2 = vld [vmem:[%s1208_s1 + $0x8] sm:$0xf] (!%p138_p2)  ;;  %v1042_v3 = vld [vmem:[%s1208_s1 + $0xc] sm:$0xf] (!%p138_p2) }
   0x7   : > { %v1047_v4 = vld [vmem:[%s1208_s1 + $0x10] sm:$0xf] (!%p138_p2)  ;;  %v1052_v5 = vld [vmem:[%s1208_s1 + $0x14] sm:$0xf] (!%p138_p2)  ;;  %v1057_v6 = vld [vmem:[%s1208_s1 + $0x18] sm:$0xf] (!%p138_p2) }
   0x8   : > { %v1062_v7 = vld [vmem:[%s1208_s1 + $0x1c] sm:$0xf] (!%p138_p2)  ;;  %v1067_v8 = vld [vmem:[%s1208_s1 + $0x20] sm:$0xf] (!%p138_p2)  ;;  %v1072_v9 = vld [vmem:[%s1208_s1 + $0x24] sm:$0xf] (!%p138_p2) }
   0x9   : > { %v1077_v10 = vld [vmem:[%s1208_s1 + $0x28] sm:$0xf] (!%p138_p2)  ;;  %v1082_v11 = vld [vmem:[%s1208_s1 + $0x2c] sm:$0xf] (!%p138_p2)  ;;  %v1092_v12 = vld [vmem:[%s1208_s1 + $0x30] sm:$0xf] (!%p138_p2) }
   0xa   : > { %v1097_v13 = vld [vmem:[%s1208_s1 + $0x34] sm:$0xf] (!%p138_p2)  ;;  %v1102_v14 = vld [vmem:[%s1208_s1 + $0x38] sm:$0xf] (!%p138_p2)  ;;  %v1112_v15 = vld [vmem:[%s1208_s1 + $0x3c] sm:$0xf] (!%p138_p2) }
   0xb   : > { %v1117_v16 = vld [vmem:[%s1208_s1 + $0x40] sm:$0xf] (!%p138_p2)  ;;  %v1122_v17 = vld [vmem:[%s1208_s1 + $0x44] sm:$0xf] (!%p138_p2) }
   0xc   : > { %v1127_v18 = vld [vmem:[%s1209_s2] ss:$0 sm:$0xff] (!%p138_p2) }
   0xd   : > { %s1212_s13 = smov (!%p161_p3, %s795_s13), 1 }
   0xe   : > { %s956_s7 = smul.u32 80, %s1212_s13  ;;  %s852_s8 = sshll.u32 %s1212_s13, 5 }
   0xf   : > { %s1087_s17 = scalar_lea.vmem %s1210_s3, %s852_s8 }
  0x10   : > { %s1107_s25 = scalar_lea.vmem %s1207_s0, %s956_s7  ;;  %s1129_s7 = smov 0  }
  0x11 LB: >> { %v822_v19 = vcombine.low %v1027_v0, %v1032_v1  ;;  %v994_v20 = vmov 0.0   ;;  %vm995_vm0 = vmmov 0   ;;  %v835_v21 = vcombine.low %v1067_v8, %v1072_v9  ;;  %s853_s8 = sshll.u32 %s992_s7, 3  ;;  %s849_s10 = sshll.u32 %s992_s7, 2  ;;  %s992_s7 = sphi %s1129_s7, %s204_s7  }
  0x12   : >> { %872 = vmatprep.subr.bf16.mxu1 %v994_v20  ;;  %874 = vmatprep.mubr.msk.bf16.mxu1 %vm995_vm0, %v994_v20  ;;  %vm223_vm1 = vcmask 130048   ;;  %v825_v22 = vcombine.low %v1037_v2, %v1042_v3  ;;  %s1146_s9 = scalar_lea.vmem %s1107_s25, %s853_s8  ;;  %v837_v35 = vcombine.low %v1077_v10, %v1082_v11  ;;  %v827_v38 = vcombine.low %v1047_v4, %v1052_v5  ;;  %s722_s11 = scalar_lea.vmem %s1087_s17, %s849_s10 }
  0x13   : >> { %873 = vmatpush3.bf16.msra.mxu1 %v822_v19  ;;  %896 = vmatprep.subr.bf16.mxu0 %v994_v20  ;;  %v215_v23 = vld [vmem:[%s1146_s9] sm:$0xf]  ;;  %v216_v24 = vld [vmem:[%s1146_s9 + $0x4] sm:$0x1]  ;;  %v830_v25 = vld [vmem:[%s1146_s9 + $0x8] sm:$0xf]  ;;  %v842_v40 = vcombine.low %v1092_v12, %v1097_v13  ;;  %v832_v42 = vcombine.low %v1057_v6, %v1062_v7  ;;  %v845_v46 = vcombine.low %v1102_v14, %v1112_v15 }
  0x14   : >> { %897 = vmatpush3.bf16.msra.mxu0 %v835_v21  ;;  %898 = vmatprep.mubr.msk.bf16.mxu0 %vm995_vm0, %v994_v20  ;;  %v824_v26 = vcombine.low %v215_v23, %v216_v24  ;;  %v831_v27 = vld [vmem:[%s1146_s9 + $0xc] sm:$0x1]  ;;  %v841_v43 = vld [vmem:[%s1146_s9 + $0x14] sm:$0x1]  ;;  %v840_v44 = vld [vmem:[%s1146_s9 + $0x10] sm:$0xf]  ;;  %v847_v51 = vcombine.low %v1117_v16, %v1122_v17 }
  0x15   : >> { %902 = vmatprep.subr.bf16.mxu0 %v994_v20  ;;  %878 = vmatprep.subr.bf16.mxu1 %v994_v20  ;;  %v834_v28 = vcombine.low %v830_v25, %v831_v27  ;;  %v844_v45 = vcombine.low %v840_v44, %v841_v43  ;;  %vm723_vm2 = vcmask 125952   ;;  %s204_s7 = sadd.s32 1, %s992_s7  }
  0x16   : >> { %875 = vmatmul.mubr.msk.bf16.vlgmr.msra.gmra.mrb[0].mxu1 %vm223_vm1, %v215_v23  ;;  %v276_v29 = vshll.u32 %v824_v26, 16  ;;  %v274_v32 = vshrl.u32 %v824_v26, 16  ;;  %v330_v41 = vrot.slane %v824_v26, 1  ;;  %p201_p4 = scmp.ge.s32.totalorder %s204_s7, 8  }
  0x17   : >> { %879 = vmatpush3.bf16.msra.mxu1 %v825_v22  ;;  %880 = vmatprep.mubr.msk.bf16.mxu1 %vm995_vm0, %v994_v20  ;;  %v443_v30 = vshrl.u32 %v834_v28, 16  ;;  %v445_v31 = vshll.u32 %v834_v28, 16  ;;  %v499_v39 = vrot.slane %v834_v28, 1  ;;  %v614_v47 = vshll.u32 %v844_v45, 16 }
  0x18   : >> { %884 = vmatprep.subr.bf16.mxu1 %v994_v20  ;;  %v278_v33 = vrot.slane %v276_v29, 1  ;;  %v612_v48 = vshrl.u32 %v844_v45, 16  ;;  %v668_v52 = vrot.slane %v844_v45, 1 }
  0x19   : >> { %v447_v34 = vrot.slane %v445_v31, 1  ;;  %v616_v49 = vrot.slane %v614_v47, 1 }
  0x1a   : >> { %v279_v37 = vor.u32 %v278_v33, %v274_v32 }
  0x1b   : >> { %v448_v36 = vor.u32 %v447_v34, %v443_v30  ;;  %v617_v50 = vor.u32 %v616_v49, %v612_v48 }
  0x1d   : >> { %899 = vmatmul.mubr.msk.bf16.vlgmr.msra.gmra.mrb[0].mxu0 %vm223_vm1, %v448_v36 }
  0x1e   : >> { %903 = vmatpush3.bf16.msra.mxu0 %v837_v35  ;;  %904 = vmatprep.mubr.msk.bf16.mxu0 %vm995_vm0, %v994_v20 }
  0x1f   : >> { %908 = vmatprep.subr.bf16.mxu0 %v994_v20 }
  0x22   : >> { %881 = vmatmul.mubr.msk.bf16.vlgmr.msra.gmra.mrb[0].mxu1 %vm223_vm1, %v279_v37 }
  0x23   : >> { %885 = vmatpush3.bf16.msra.mxu1 %v827_v38  ;;  %886 = vmatprep.mubr.msk.bf16.mxu1 %vm995_vm0, %v994_v20 }
  0x24   : >> { %890 = vmatprep.subr.bf16.mxu1 %v994_v20 }
  0x29   : >> { %905 = vmatmul.mubr.msk.bf16.vlgmr.msra.gmra.mrb[0].mxu0 %vm223_vm1, %v499_v39 }
  0x2a   : >> { %909 = vmatpush3.bf16.msra.mxu0 %v842_v40  ;;  %910 = vmatprep.mubr.msk.bf16.mxu0 %vm995_vm0, %v994_v20 }
  0x2b   : >> { %914 = vmatprep.subr.bf16.mxu0 %v994_v20 }
  0x2e   : >> { %887 = vmatmul.mubr.msk.bf16.vlgmr.msra.gmra.mrb[0].mxu1 %vm223_vm1, %v330_v41 }
  0x2f   : >> { %891 = vmatpush3.bf16.msra.mxu1 %v832_v42  ;;  %892 = vmatprep.mubr.msk.bf16.mxu1 %vm995_vm0, %v994_v20 }
  0x35   : >> { %911 = vmatmul.mubr.msk.bf16.vlgmr.msra.gmra.mrb[0].mxu0 %vm223_vm1, %v840_v44 }
  0x36   : >> { %915 = vmatpush3.bf16.msra.mxu0 %v845_v46  ;;  %916 = vmatprep.mubr.msk.bf16.mxu0 %vm995_vm0, %v994_v20 }
  0x37   : >> { %920 = vmatprep.subr.bf16.mxu0 %v994_v20 }
  0x3a   : >> { %893 = vmatmul.mubr.msk.bf16.vlgmr.msra.gmra.mrb[0].mxu1 %vm223_vm1, %v830_v25 }
  0x41   : >> { %917 = vmatmul.mubr.msk.bf16.vlgmr.msra.gmra.mrb[0].mxu0 %vm223_vm1, %v617_v50 }
  0x42   : >> { %921 = vmatpush3.bf16.msra.mxu0 %v847_v51  ;;  %922 = vmatprep.mubr.msk.bf16.mxu0 %vm995_vm0, %v994_v20 }
  0x4d   : >> { %923 = vmatmul.mubr.msk.bf16.vlgmr.msra.gmra.mrb[0].mxu0 %vm223_vm1, %v668_v52 }
 0x10d   : >> { %v430_v53 = vpop.f32.mrb[0].mxu1 }
 0x10e   : >> { %v894_v54 = vpop.f32.mrb[1].mxu1  ;;  %v926_v57 = vadd.f32 %v1127_v18, %v430_v53 }
 0x10f   : >> { %v433_v55 = vpop.f32.mrb[2].mxu1 }
 0x110   : >> { %v895_v56 = vpop.f32.mrb[3].mxu1 }
 0x120   : >> { %v712_v58 = vpop.f32.mrb[0].mxu0 }
 0x121   : >> { %v927_v59 = vadd.f32 %v926_v57, %v712_v58  ;;  %v924_v60 = vpop.f32.mrb[1].mxu0  ;;  %203 = sbr.rel (!%p201_p4) target bundleno = 17 (0x11), region = 81 }
 0x122   : >> { %v715_v61 = vpop.f32.mrb[2].mxu0 }
 0x123   : >> { %v719_v62 = vmax.f32 %v927_v59, 0.0  ;;  %v925_v63 = vpop.f32.mrb[3].mxu0 }
 0x125   : >> { %v720_v19 = vpack.c.bf16 %v719_v62, %v719_v62 }
 0x127   : >> { %724 = vst.msk [vmem:[%s722_s11] sm:$0xf] %vm723_vm2, %v720_v19 }
 0x128 PF: > { %s13_s12 = sadd.s32 1, %s988_s12  }
 0x129   : > { %p10_p5 = scmp.ge.s32.totalorder %s13_s12, 4  }
 0x12b   :  { %12 = sbr.rel (!%p10_p5) target bundleno = 1 (0x1), region = 92 }

// kernel: base_resnet_forward.69
= control target key start
LH: loop header
LB: loop body
LE: loop exit
PB: predicated region body
PF: predicated region fallthrough
CT: control target
= control target key end

     0   :  { %s541_s12 = smov 0   ;;  %s592_s0 = inlined_call_operand.vmem [shape: bf16[128,64], index: 0, kind: input, shape index: {}]   ;;  %s593_s1 = inlined_call_operand.vmem [shape: bf16[64,32], index: 1, kind: input, shape index: {}]   ;;  %s594_s2 = inlined_call_operand.vmem [shape: f32[1,32], index: 2, kind: input, shape index: {}]   ;;  %s595_s3 = inlined_call_operand.vmem [shape: bf16[128,32], index: 3, kind: output, shape index: {}]  }
   0x1 LB: > { %s425_s13 = sadd.s32 4294967295, %s519_s12   ;;  %p429_p0 = scmp.ge.s32.totalorder %s519_s12, 1  ;;  %s519_s12 = sphi %s541_s12, %s13_s12  }
   0x2   : > { %p138_p1 = scmp.lt.s32.totalorder %s519_s12, 3 }
   0x4   : > { %p139_p2 = pnand %p429_p0, %p138_p1 }
   0x5   : > { %v505_v0 = vld [vmem:[%s593_s1] sm:$0xff] (!%p139_p2)   ;;  %s430_s16 = sshll.u32 (!%p139_p2), %s425_s13, 3  ;;  %v506_v1 = vld [vmem:[%s593_s1 + $0x8] sm:$0xff] (!%p139_p2)   ;;  %v507_v2 = vld [vmem:[%s593_s1 + $0x10] sm:$0xff] (!%p139_p2)   ;;  %vm242_vm0 = vcmask (!%p139_p2), 523264   ;;  %vm360_vm1 = vcmask (!%p139_p2), 257024  }
   0x6   : > { %142 = sbr.rel (%p139_p2) target bundleno = 244 (0xf4), region = 32  ;;  %p163_p3 = scmp.lt.s32.totalorder (!%p139_p2), %s430_s16, 15  ;;  %473 = vmatprep.subr.bf16.mxu0 (!%p139_p2), %v505_v0  ;;  %489 = vmatprep.subr.bf16.mxu1 (!%p139_p2), %v505_v0  ;;  %v508_v3 = vld [vmem:[%s593_s1 + $0x18] sm:$0xff] (!%p139_p2)   ;;  %v434_v8 = vld [vmem:[%s594_s2] ss:$0 sm:$0xff] (!%p139_p2) }
   0x7   : > { %474 = vmatpush3.bf16.msra.mxu0 (!%p139_p2), %v505_v0  ;;  %493 = vmatpush3.bf16.msra.mxu1 (!%p139_p2), %v505_v0 }
   0x8   : > { %475 = vmatprep.subr.bf16.mxu0 (!%p139_p2), %v506_v1  ;;  %490 = vmatprep.subr.bf16.mxu1 (!%p139_p2), %v506_v1 }
   0xb   : > { %476 = vmatpush3.bf16.msra.mxu0 (!%p139_p2), %v506_v1  ;;  %494 = vmatpush3.bf16.msra.mxu1 (!%p139_p2), %v506_v1 }
   0xc   : > { %477 = vmatprep.subr.bf16.mxu0 (!%p139_p2), %v507_v2  ;;  %491 = vmatprep.subr.bf16.mxu1 (!%p139_p2), %v507_v2 }
   0xd   : > { %s597_s16 = smov (!%p163_p3, %s430_s16), 15 }
   0xe   : > { %s431_s21 = sshll.u32 %s597_s16, 2 }
   0xf   : > { %s166_s26 = scalar_lea.vmem %s592_s0, %s431_s21  ;;  %478 = vmatpush3.bf16.msra.mxu0 %v507_v2  ;;  %495 = vmatpush3.bf16.msra.mxu1 %v507_v2  ;;  %s172_s4 = scalar_lea.vmem %s595_s3, %s431_s21 }
  0x10   : > { %v509_v4 = vld [vmem:[%s166_s26] sm:$0xff]   ;;  %v510_v5 = vld [vmem:[%s166_s26 + $0x10] sm:$0xff]   ;;  %479 = vmatprep.subr.bf16.mxu0 %v508_v3  ;;  %492 = vmatprep.subr.bf16.mxu1 %v508_v3  ;;  %v511_v6 = vld [vmem:[%s166_s26 + $0x8] sm:$0xff]  }
  0x11   : > { %481 = vmatprep.mubr.msk.bf16.mxu0 %vm242_vm0, %v509_v4  ;;  %485 = vmatprep.mubr.msk.bf16.mxu1 %vm242_vm0, %v510_v5  ;;  %v512_v7 = vld [vmem:[%s166_s26 + $0x18] sm:$0xff]  }
  0x13   : > { %480 = vmatpush3.bf16.msra.mxu0 %v508_v3  ;;  %496 = vmatpush3.bf16.msra.mxu1 %v508_v3 }
  0x16   : > { %482 = vmatmul.mubr.msk.bf16.vlgmr.msra.gmra.mrb[0].mxu0 %vm242_vm0, %v511_v6  ;;  %486 = vmatmul.mubr.msk.bf16.vlgmr.msra.gmra.mrb[0].mxu1 %vm242_vm0, %v512_v7 }
  0xe9   : > { %v483_v9 = vpop.f32.mrb[0].mxu0  ;;  %v487_v10 = vpop.f32.mrb[0].mxu1 }
  0xea   : > { %v298_v11 = vadd.f32 %v483_v9, %v434_v8  ;;  %v314_v12 = vadd.f32 %v487_v10, %v434_v8  ;;  %v289_v13 = vpop.f32.mrb[1].mxu0  ;;  %v305_v14 = vpop.f32.mrb[1].mxu1 }
  0xeb   : > { %v290_v15 = vadd.f32 %v434_v8, %v289_v13  ;;  %v306_v16 = vadd.f32 %v434_v8, %v305_v14  ;;  %v484_v17 = vpop.f32.mrb[2].mxu0  ;;  %v488_v18 = vpop.f32.mrb[2].mxu1 }
  0xec   : > { %v322_v19 = vmax.f32 %v298_v11, 0.0  ;;  %v326_v20 = vmax.f32 %v314_v12, 0.0  ;;  %v301_v21 = vadd.f32 %v484_v17, %v434_v8  ;;  %v317_v22 = vadd.f32 %v488_v18, %v434_v8  ;;  %v292_v23 = vpop.f32.mrb[3].mxu0  ;;  %v308_v24 = vpop.f32.mrb[3].mxu1 }
  0xed   : > { %v320_v25 = vmax.f32 %v290_v15, 0.0  ;;  %v324_v26 = vmax.f32 %v306_v16, 0.0  ;;  %v293_v27 = vadd.f32 %v434_v8, %v292_v23  ;;  %v309_v28 = vadd.f32 %v434_v8, %v308_v24 }
  0xee   : > { %v459_v29 = vpack.c.bf16 %v322_v19, %v322_v19  ;;  %v463_v30 = vpack.c.bf16 %v326_v20, %v326_v20  ;;  %v323_v31 = vmax.f32 %v301_v21, 0.0  ;;  %v327_v32 = vmax.f32 %v317_v22, 0.0 }
  0xef   : > { %v457_v33 = vpack.c.bf16 %v320_v25, %v320_v25  ;;  %v461_v34 = vpack.c.bf16 %v324_v26, %v324_v26  ;;  %v321_v35 = vmax.f32 %v293_v27, 0.0  ;;  %v325_v36 = vmax.f32 %v309_v28, 0.0 }
  0xf0   : > { %363 = vst.msk [vmem:[%s172_s4 + $0x8] sm:$0xf] %vm360_vm1, %v459_v29  ;;  %367 = vst.msk [vmem:[%s172_s4 + $0x18] sm:$0xf] %vm360_vm1, %v463_v30  ;;  %v460_v37 = vpack.c.bf16 %v323_v31, %v323_v31  ;;  %v464_v38 = vpack.c.bf16 %v327_v32, %v327_v32 }
  0xf1   : > { %361 = vst.msk [vmem:[%s172_s4] sm:$0xf] %vm360_vm1, %v457_v33  ;;  %365 = vst.msk [vmem:[%s172_s4 + $0x10] sm:$0xf] %vm360_vm1, %v461_v34  ;;  %v458_v39 = vpack.c.bf16 %v321_v35, %v321_v35  ;;  %v462_v40 = vpack.c.bf16 %v325_v36, %v325_v36 }
  0xf2   : > { %364 = vst.msk [vmem:[%s172_s4 + $0xc] sm:$0xf] %vm360_vm1, %v460_v37  ;;  %368 = vst.msk [vmem:[%s172_s4 + $0x1c] sm:$0xf] %vm360_vm1, %v464_v38 }
  0xf3   : > { %362 = vst.msk [vmem:[%s172_s4 + $0x4] sm:$0xf] %vm360_vm1, %v458_v39  ;;  %366 = vst.msk [vmem:[%s172_s4 + $0x14] sm:$0xf] %vm360_vm1, %v462_v40 }
  0xf4 PF: > { %s13_s12 = sadd.s32 1, %s519_s12  }
  0xf5   : > { %p10_p4 = scmp.ge.s32.totalorder %s13_s12, 4  }
  0xf7   :  { %12 = sbr.rel (!%p10_p4) target bundleno = 1 (0x1), region = 62 }

// kernel: base_resnet_forward.72
= control target key start
LH: loop header
LB: loop body
LE: loop exit
PB: predicated region body
PF: predicated region fallthrough
CT: control target
= control target key end

     0   :  { %s467_s12 = smov 0   ;;  %s514_s0 = inlined_call_operand.vmem [shape: bf16[32,128], index: 0, kind: input, shape index: {}]   ;;  %s515_s1 = inlined_call_operand.vmem [shape: bf16[128,32], index: 1, kind: input, shape index: {}]   ;;  %s516_s2 = inlined_call_operand.vmem [shape: f32[1,32], index: 2, kind: input, shape index: {}]   ;;  %s517_s3 = inlined_call_operand.vmem [shape: bf16[32,32], index: 3, kind: output, shape index: {}]  }
   0x1 LB: > { %s364_s13 = sadd.s32 4294967295, %s443_s12   ;;  %p368_p0 = scmp.ge.s32.totalorder %s443_s12, 1  ;;  %s443_s12 = sphi %s467_s12, %s13_s12  }
   0x2   : > { %p138_p1 = scmp.lt.s32.totalorder %s443_s12, 3 }
   0x4   : > { %p139_p2 = pnand %p368_p0, %p138_p1 }
   0x5   : > { %v428_v0 = vld [vmem:[%s515_s1] sm:$0xff] (!%p139_p2)   ;;  %v445_v1 = vmov (!%p139_p2), 0.0   ;;  %v429_v2 = vld [vmem:[%s515_s1 + $0x8] sm:$0xff] (!%p139_p2)   ;;  %vm446_vm0 = vmmov (!%p139_p2), 0   ;;  %s369_s18 = sshll.u32 (!%p139_p2), %s364_s13, 1  ;;  %v430_v3 = vld [vmem:[%s515_s1 + $0x10] sm:$0xff] (!%p139_p2)  }
   0x6   : > { %142 = sbr.rel (%p139_p2) target bundleno = 259 (0x103), region = 32  ;;  %398 = vmatprep.subr.bf16.mxu0 (!%p139_p2), %v445_v1  ;;  %414 = vmatprep.mubr.msk.bf16.mxu0 (!%p139_p2), %vm446_vm0, %v445_v1  ;;  %p163_p3 = scmp.lt.s32.totalorder (!%p139_p2), %s369_s18, 3  ;;  %v431_v4 = vld [vmem:[%s515_s1 + $0x18] sm:$0xff] (!%p139_p2)   ;;  %v432_v5 = vld [vmem:[%s515_s1 + $0x20] sm:$0xff] (!%p139_p2)   ;;  %v433_v6 = vld [vmem:[%s515_s1 + $0x28] sm:$0xff] (!%p139_p2)   ;;  %vm305_vm1 = vcmask (!%p139_p2), 257024  }
   0x7   : > { %399 = vmatpush3.bf16.msra.mxu0 (!%p139_p2), %v428_v0  ;;  %v434_v7 = vld [vmem:[%s515_s1 + $0x30] sm:$0xff] (!%p139_p2)   ;;  %v435_v8 = vld [vmem:[%s515_s1 + $0x38] sm:$0xff] (!%p139_p2)   ;;  %v373_v10 = vld [vmem:[%s516_s2] ss:$0 sm:$0xff] (!%p139_p2) }
   0x8   : > { %400 = vmatprep.subr.bf16.mxu0 (!%p139_p2), %v445_v1 }
   0xb   : > { %401 = vmatpush3.bf16.msra.mxu0 (!%p139_p2), %v429_v2 }
   0xc   : > { %402 = vmatprep.subr.bf16.mxu0 (!%p139_p2), %v445_v1 }
   0xd   : > { %s519_s18 = smov (!%p163_p3, %s369_s18), 3 }
   0xe   : > { %s370_s21 = sshll.u32 %s519_s18, 2 }
   0xf   : > { %s166_s24 = scalar_lea.vmem %s514_s0, %s370_s21  ;;  %403 = vmatpush3.bf16.msra.mxu0 %v430_v3  ;;  %s172_s13 = scalar_lea.vmem %s517_s3, %s370_s21 }
  0x10   : > { %404 = vmatprep.subr.bf16.mxu0 %v445_v1  ;;  %v436_v9 = vld [vmem:[%s166_s24] sm:$0xff]  }
  0x13   : > { %405 = vmatpush3.bf16.msra.mxu0 %v431_v4 }
  0x14   : > { %406 = vmatprep.subr.bf16.mxu0 %v445_v1 }
  0x17   : > { %407 = vmatpush3.bf16.msra.mxu0 %v432_v5 }
  0x18   : > { %408 = vmatprep.subr.bf16.mxu0 %v445_v1 }
  0x1b   : > { %409 = vmatpush3.bf16.msra.mxu0 %v433_v6 }
  0x1c   : > { %410 = vmatprep.subr.bf16.mxu0 %v445_v1 }
  0x1f   : > { %411 = vmatpush3.bf16.msra.mxu0 %v434_v7 }
  0x20   : > { %412 = vmatprep.subr.bf16.mxu0 %v445_v1 }
  0x23   : > { %413 = vmatpush3.bf16.msra.mxu0 %v435_v8 }
  0x26   : > { %415 = vmatmul.mubr.bf16.vlgmr.msra.gmra.mrb[0].mxu0 %v436_v9 }
  0xf9   : > { %v288_v11 = vpop.f32.mrb[0].mxu0 }
  0xfa   : > { %v289_v12 = vadd.f32 %v373_v10, %v288_v11  ;;  %v416_v13 = vpop.f32.mrb[1].mxu0 }
  0xfb   : > { %v291_v14 = vpop.f32.mrb[2].mxu0 }
  0xfc   : > { %v295_v15 = vmax.f32 %v289_v12, 0.0  ;;  %v292_v16 = vadd.f32 %v373_v10, %v291_v14  ;;  %v417_v17 = vpop.f32.mrb[3].mxu0 }
  0xfe   : > { %v387_v18 = vpack.c.bf16 %v295_v15, %v295_v15  ;;  %v296_v19 = vmax.f32 %v292_v16, 0.0 }
 0x100   : > { %306 = vst.msk [vmem:[%s172_s13] sm:$0xf] %vm305_vm1, %v387_v18  ;;  %v388_v20 = vpack.c.bf16 %v296_v19, %v296_v19 }
 0x102   : > { %307 = vst.msk [vmem:[%s172_s13 + $0x4] sm:$0xf] %vm305_vm1, %v388_v20 }
 0x103 PF: > { %s13_s12 = sadd.s32 1, %s443_s12  }
 0x104   : > { %p10_p4 = scmp.ge.s32.totalorder %s13_s12, 4  }
 0x106   :  { %12 = sbr.rel (!%p10_p4) target bundleno = 1 (0x1), region = 62 }

// kernel: base_resnet_forward.70
= control target key start
LH: loop header
LB: loop body
LE: loop exit
PB: predicated region body
PF: predicated region fallthrough
CT: control target
= control target key end

     0   :  { %s1149_s12 = smov 0   ;;  %s1461_s0 = inlined_call_operand.vmem [shape: bf16[2,10,10,32], index: 0, kind: input, shape index: {}]   ;;  %s1462_s1 = inlined_call_operand.vmem [shape: bf16[3,3,32,32], index: 1, kind: input, shape index: {}]   ;;  %s1463_s2 = inlined_call_operand.vmem [shape: f32[1,32], index: 2, kind: input, shape index: {}]   ;;  %s1464_s3 = inlined_call_operand.vmem [shape: bf16[2,4,8,32], index: 3, kind: output, shape index: {}]  }
   0x1 LB: > { %s870_s13 = sadd.s32 4294967295, %s1121_s12   ;;  %p874_p0 = scmp.ge.s32.totalorder %s1121_s12, 1  ;;  %s1121_s12 = sphi %s1149_s12, %s13_s12  }
   0x2   : > { %p137_p1 = scmp.lt.s32.totalorder %s1121_s12, 3 }
   0x4   : > { %p138_p2 = pnand %p874_p0, %p137_p1 }
   0x5   : > { %p161_p3 = scmp.lt.s32.totalorder (!%p138_p2), %s870_s13, 1  ;;  %v1160_v0 = vld [vmem:[%s1462_s1] sm:$0xf] (!%p138_p2)  ;;  %v1165_v1 = vld [vmem:[%s1462_s1 + $0x4] sm:$0xf] (!%p138_p2)  ;;  %s1352_s21 = smov (!%p138_p2), 0  }
   0x6   : > { %141 = sbr.rel (%p138_p2) target bundleno = 298 (0x12a), region = 32  ;;  %v1170_v2 = vld [vmem:[%s1462_s1 + $0x8] sm:$0xf] (!%p138_p2)  ;;  %v1175_v3 = vld [vmem:[%s1462_s1 + $0xc] sm:$0xf] (!%p138_p2) }
   0x7   : > { %v1180_v4 = vld [vmem:[%s1462_s1 + $0x10] sm:$0xf] (!%p138_p2)  ;;  %v1185_v5 = vld [vmem:[%s1462_s1 + $0x14] sm:$0xf] (!%p138_p2)  ;;  %v1190_v6 = vld [vmem:[%s1462_s1 + $0x18] sm:$0xf] (!%p138_p2) }
   0x8   : > { %v1195_v7 = vld [vmem:[%s1462_s1 + $0x1c] sm:$0xf] (!%p138_p2)  ;;  %v1200_v8 = vld [vmem:[%s1462_s1 + $0x20] sm:$0xf] (!%p138_p2)  ;;  %v1205_v9 = vld [vmem:[%s1462_s1 + $0x24] sm:$0xf] (!%p138_p2) }
   0x9   : > { %v1210_v10 = vld [vmem:[%s1462_s1 + $0x28] sm:$0xf] (!%p138_p2)  ;;  %v1215_v11 = vld [vmem:[%s1462_s1 + $0x2c] sm:$0xf] (!%p138_p2)  ;;  %v1225_v12 = vld [vmem:[%s1462_s1 + $0x30] sm:$0xf] (!%p138_p2) }
   0xa   : > { %v1230_v13 = vld [vmem:[%s1462_s1 + $0x34] sm:$0xf] (!%p138_p2)  ;;  %v1235_v14 = vld [vmem:[%s1462_s1 + $0x38] sm:$0xf] (!%p138_p2)  ;;  %v1245_v15 = vld [vmem:[%s1462_s1 + $0x3c] sm:$0xf] (!%p138_p2) }
   0xb   : > { %v1250_v16 = vld [vmem:[%s1462_s1 + $0x40] sm:$0xf] (!%p138_p2)  ;;  %v1255_v17 = vld [vmem:[%s1462_s1 + $0x44] sm:$0xf] (!%p138_p2)  ;;  %v1260_v18 = vld [vmem:[%s1462_s1 + $0x48] sm:$0xf] (!%p138_p2) }
   0xc   : > { %v1265_v19 = vld [vmem:[%s1462_s1 + $0x4c] sm:$0xf] (!%p138_p2)  ;;  %v1270_v20 = vld [vmem:[%s1462_s1 + $0x50] sm:$0xf] (!%p138_p2)  ;;  %v1275_v21 = vld [vmem:[%s1462_s1 + $0x54] sm:$0xf] (!%p138_p2) }
   0xd   : > { %s1466_s13 = smov (!%p161_p3, %s870_s13), 1  ;;  %v1280_v22 = vld [vmem:[%s1462_s1 + $0x58] sm:$0xf]  ;;  %v1285_v23 = vld [vmem:[%s1462_s1 + $0x5c] sm:$0xf] }
   0xe   : > { %s1089_s7 = smul.u32 80, %s1466_s13  ;;  %s955_s8 = sshll.u32 %s1466_s13, 4  ;;  %v1290_v24 = vld [vmem:[%s1462_s1 + $0x60] sm:$0xf]  ;;  %v1295_v25 = vld [vmem:[%s1462_s1 + $0x64] sm:$0xf] }
   0xf   : > { %s1220_s17 = scalar_lea.vmem %s1464_s3, %s955_s8  ;;  %v1300_v26 = vld [vmem:[%s1462_s1 + $0x68] sm:$0xf]  ;;  %v1305_v27 = vld [vmem:[%s1462_s1 + $0x6c] sm:$0xf]  ;;  %v1310_v28 = vld [vmem:[%s1462_s1 + $0x70] sm:$0xf] }
  0x10   : > { %s1240_s25 = scalar_lea.vmem %s1461_s0, %s1089_s7  ;;  %v1315_v29 = vld [vmem:[%s1462_s1 + $0x74] sm:$0xf]  ;;  %v1320_v30 = vld [vmem:[%s1462_s1 + $0x78] sm:$0xf]  ;;  %v1325_v31 = vld [vmem:[%s1462_s1 + $0x7c] sm:$0xf] }
  0x11   : > { %v1330_v32 = vld [vmem:[%s1462_s1 + $0x80] sm:$0xf]  ;;  %v1335_v33 = vld [vmem:[%s1462_s1 + $0x84] sm:$0xf]  ;;  %v1340_v34 = vld [vmem:[%s1462_s1 + $0x88] sm:$0xf] }
  0x12   : > { %v1345_v35 = vld [vmem:[%s1462_s1 + $0x8c] sm:$0xf]  ;;  %v1350_v36 = vld [vmem:[%s1463_s2] ss:$0 sm:$0xff] }
  0x13 LB: >> { %v914_v37 = vcombine.low %v1160_v0, %v1165_v1  ;;  %v932_v38 = vcombine.low %v1250_v16, %v1255_v17  ;;  %v1127_v39 = vmov 0.0   ;;  %v915_v40 = vcombine.low %v1170_v2, %v1175_v3  ;;  %s957_s22 = sshll.u32 %s1125_s21, 4  ;;  %s952_s24 = sshll.u32 %s1125_s21, 2  ;;  %s1125_s21 = sphi %s1352_s21, %s222_s21  }
  0x14   : >> { %987 = vmatprep.subr.bf16.mxu1 %v1127_v39  ;;  %1019 = vmatprep.subr.bf16.mxu0 %v1127_v39  ;;  %v933_v41 = vcombine.low %v1260_v18, %v1265_v19  ;;  %vm1128_vm0 = vmmov 0   ;;  %s1372_s23 = scalar_lea.vmem %s1240_s25, %s957_s22  ;;  %vm248_vm1 = vcmask 261120   ;;  %v918_v48 = vcombine.low %v1180_v4, %v1185_v5  ;;  %s795_s26 = scalar_lea.vmem %s1220_s17, %s952_s24 }
  0x15   : >> { %988 = vmatpush3.bf16.msra.mxu1 %v914_v37  ;;  %1020 = vmatpush3.bf16.msra.mxu0 %v932_v38  ;;  %v234_v42 = vld [vmem:[%s1372_s23] sm:$0xf]  ;;  %v235_v43 = vld [vmem:[%s1372_s23 + $0x4] sm:$0x1]  ;;  %v1380_v44 = vld [vmem:[%s1372_s23 + $0x8] sm:$0xf]  ;;  %v919_v53 = vcombine.low %v1190_v6, %v1195_v7  ;;  %v935_v54 = vcombine.low %v1270_v20, %v1275_v21  ;;  %v936_v58 = vcombine.low %v1280_v22, %v1285_v23 }
  0x16   : >> { %989 = vmatprep.subr.bf16.mxu1 %v1127_v39  ;;  %991 = vmatprep.mubr.msk.bf16.mxu1 %vm1128_vm0, %v1127_v39  ;;  %v917_v45 = vcombine.low %v234_v42, %v235_v43  ;;  %v927_v46 = vld [vmem:[%s1372_s23 + $0xc] sm:$0x1]  ;;  %v921_v60 = vcombine.low %v1200_v8, %v1205_v9  ;;  %v922_v62 = vcombine.low %v1210_v10, %v1215_v11  ;;  %vm796_vm2 = vcmask 257024   ;;  %s222_s21 = sadd.s32 1, %s1125_s21  }
  0x17   : >> { %1021 = vmatprep.subr.bf16.mxu0 %v1127_v39  ;;  %1023 = vmatprep.mubr.msk.bf16.mxu0 %vm1128_vm0, %v1127_v39  ;;  %v931_v47 = vcombine.low %v1380_v44, %v927_v46  ;;  %v942_v63 = vcombine.low %v1290_v24, %v1295_v25  ;;  %v943_v37 = vcombine.low %v1300_v26, %v1305_v27  ;;  %p219_p4 = scmp.ge.s32.totalorder %s222_s21, 4  }
  0x18   : >> { %v301_v51 = vshll.u32 %v917_v45, 16  ;;  %v299_v56 = vshrl.u32 %v917_v45, 16  ;;  %v361_v38 = vrot.slane %v917_v45, 1  ;;  %v929_v46 = vcombine.low %v1235_v14, %v1245_v15 }
  0x19   : >> { %990 = vmatpush3.bf16.msra.mxu1 %v915_v40  ;;  %1022 = vmatpush3.bf16.msra.mxu0 %v933_v41  ;;  %v486_v49 = vshrl.u32 %v931_v47, 16  ;;  %v488_v50 = vshll.u32 %v931_v47, 16  ;;  %v548_v61 = vrot.slane %v931_v47, 1  ;;  %v928_v40 = vcombine.low %v1225_v12, %v1230_v13  ;;  %v941_v41 = vld [vmem:[%s1372_s23 + $0x14] sm:$0x1] }
  0x1a   : >> { %1027 = vmatprep.subr.bf16.mxu0 %v1127_v39  ;;  %995 = vmatprep.subr.bf16.mxu1 %v1127_v39  ;;  %v303_v57 = vrot.slane %v301_v51, 1  ;;  %v946_v45 = vcombine.low %v1310_v28, %v1315_v29 }
  0x1b   : >> { %v490_v52 = vrot.slane %v488_v50, 1 }
  0x1c   : >> { %992 = vmatmul.mubr.msk.bf16.vlgmr.msra.gmra.mrb[0].mxu1 %vm248_vm1, %v234_v42  ;;  %v304_v59 = vor.u32 %v303_v57, %v299_v56  ;;  %v940_v42 = vld [vmem:[%s1372_s23 + $0x10] sm:$0xf] }
  0x1d   : >> { %996 = vmatpush3.bf16.msra.mxu1 %v918_v48  ;;  %999 = vmatprep.mubr.msk.bf16.mxu1 %vm1128_vm0, %v1127_v39  ;;  %v491_v55 = vor.u32 %v490_v52, %v486_v49  ;;  %v945_v43 = vcombine.low %v940_v42, %v941_v41  ;;  %v947_v48 = vcombine.low %v1320_v30, %v1325_v31 }
  0x1e   : >> { %997 = vmatprep.subr.bf16.mxu1 %v1127_v39  ;;  %v949_v52 = vcombine.low %v1330_v32, %v1335_v33 }
  0x1f   : >> { %1024 = vmatmul.mubr.msk.bf16.vlgmr.msra.gmra.mrb[0].mxu0 %vm248_vm1, %v491_v55  ;;  %v675_v47 = vshll.u32 %v945_v43, 16  ;;  %v673_v49 = vshrl.u32 %v945_v43, 16 }
  0x20   : >> { %1028 = vmatpush3.bf16.msra.mxu0 %v935_v54  ;;  %1031 = vmatprep.mubr.msk.bf16.mxu0 %vm1128_vm0, %v1127_v39  ;;  %v735_v54 = vrot.slane %v945_v43, 1 }
  0x21   : >> { %998 = vmatpush3.bf16.msra.mxu1 %v919_v53  ;;  %1029 = vmatprep.subr.bf16.mxu0 %v1127_v39  ;;  %v677_v50 = vrot.slane %v675_v47, 1  ;;  %v950_v53 = vcombine.low %v1340_v34, %v1345_v35 }
  0x22   : >> { %1003 = vmatprep.subr.bf16.mxu1 %v1127_v39 }
  0x23   : >> { %v678_v51 = vor.u32 %v677_v50, %v673_v49 }
  0x24   : >> { %1030 = vmatpush3.bf16.msra.mxu0 %v936_v58 }
  0x25   : >> { %1035 = vmatprep.subr.bf16.mxu0 %v1127_v39 }
  0x28   : >> { %1000 = vmatmul.mubr.msk.bf16.vlgmr.msra.gmra.mrb[0].mxu1 %vm248_vm1, %v304_v59 }
  0x29   : >> { %1004 = vmatpush3.bf16.msra.mxu1 %v921_v60  ;;  %1007 = vmatprep.mubr.msk.bf16.mxu1 %vm1128_vm0, %v1127_v39 }
  0x2a   : >> { %1005 = vmatprep.subr.bf16.mxu1 %v1127_v39 }
  0x2b   : >> { %1032 = vmatmul.mubr.msk.bf16.vlgmr.msra.gmra.mrb[0].mxu0 %vm248_vm1, %v548_v61 }
  0x2c   : >> { %1036 = vmatpush3.bf16.msra.mxu0 %v942_v63  ;;  %1039 = vmatprep.mubr.msk.bf16.mxu0 %vm1128_vm0, %v1127_v39 }
  0x2d   : >> { %1006 = vmatpush3.bf16.msra.mxu1 %v922_v62  ;;  %1037 = vmatprep.subr.bf16.mxu0 %v1127_v39 }
  0x2e   : >> { %1011 = vmatprep.subr.bf16.mxu1 %v1127_v39 }
  0x30   : >> { %1038 = vmatpush3.bf16.msra.mxu0 %v943_v37 }
  0x31   : >> { %1043 = vmatprep.subr.bf16.mxu0 %v1127_v39 }
  0x34   : >> { %1008 = vmatmul.mubr.msk.bf16.vlgmr.msra.gmra.mrb[0].mxu1 %vm248_vm1, %v361_v38 }
  0x35   : >> { %1012 = vmatpush3.bf16.msra.mxu1 %v928_v40  ;;  %1015 = vmatprep.mubr.msk.bf16.mxu1 %vm1128_vm0, %v1127_v39 }
  0x36   : >> { %1013 = vmatprep.subr.bf16.mxu1 %v1127_v39 }
  0x37   : >> { %1040 = vmatmul.mubr.msk.bf16.vlgmr.msra.gmra.mrb[0].mxu0 %vm248_vm1, %v940_v42 }
  0x38   : >> { %1044 = vmatpush3.bf16.msra.mxu0 %v946_v45  ;;  %1047 = vmatprep.mubr.msk.bf16.mxu0 %vm1128_vm0, %v1127_v39 }
  0x39   : >> { %1014 = vmatpush3.bf16.msra.mxu1 %v929_v46  ;;  %1045 = vmatprep.subr.bf16.mxu0 %v1127_v39 }
  0x3c   : >> { %1046 = vmatpush3.bf16.msra.mxu0 %v947_v48 }
  0x3d   : >> { %1051 = vmatprep.subr.bf16.mxu0 %v1127_v39 }
  0x40   : >> { %1016 = vmatmul.mubr.msk.bf16.vlgmr.msra.gmra.mrb[0].mxu1 %vm248_vm1, %v1380_v44 }
  0x43   : >> { %1048 = vmatmul.mubr.msk.bf16.vlgmr.msra.gmra.mrb[0].mxu0 %vm248_vm1, %v678_v51 }
  0x44   : >> { %1052 = vmatpush3.bf16.msra.mxu0 %v949_v52  ;;  %1055 = vmatprep.mubr.msk.bf16.mxu0 %vm1128_vm0, %v1127_v39 }
  0x45   : >> { %1053 = vmatprep.subr.bf16.mxu0 %v1127_v39 }
  0x48   : >> { %1054 = vmatpush3.bf16.msra.mxu0 %v950_v53 }
  0x4f   : >> { %1056 = vmatmul.mubr.msk.bf16.vlgmr.msra.gmra.mrb[0].mxu0 %vm248_vm1, %v735_v54 }
 0x113   : >> { %v473_v44 = vpop.f32.mrb[0].mxu1 }
 0x114   : >> { %v1017_v55 = vpop.f32.mrb[1].mxu1  ;;  %v1059_v58 = vadd.f32 %v1350_v36, %v473_v44 }
 0x115   : >> { %v476_v56 = vpop.f32.mrb[2].mxu1 }
 0x116   : >> { %v1018_v57 = vpop.f32.mrb[3].mxu1 }
 0x122   : >> { %v785_v59 = vpop.f32.mrb[0].mxu0 }
 0x123   : >> { %v1060_v60 = vadd.f32 %v1059_v58, %v785_v59  ;;  %v1057_v61 = vpop.f32.mrb[1].mxu0  ;;  %221 = sbr.rel (!%p219_p4) target bundleno = 19 (0x13), region = 81 }
 0x124   : >> { %v788_v62 = vpop.f32.mrb[2].mxu0 }
 0x125   : >> { %v792_v63 = vmax.f32 %v1060_v60, 0.0  ;;  %v1058_v37 = vpop.f32.mrb[3].mxu0 }
 0x127   : >> { %v793_v39 = vpack.c.bf16 %v792_v63, %v792_v63 }
 0x129   : >> { %797 = vst.msk [vmem:[%s795_s26] sm:$0xf] %vm796_vm2, %v793_v39 }
 0x12a PF: > { %s13_s12 = sadd.s32 1, %s1121_s12  }
 0x12b   : > { %p10_p5 = scmp.ge.s32.totalorder %s13_s12, 4  }
 0x12d   :  { %12 = sbr.rel (!%p10_p5) target bundleno = 1 (0x1), region = 92 }

// kernel: base_resnet_forward.71
= control target key start
LH: loop header
LB: loop body
LE: loop exit
PB: predicated region body
PF: predicated region fallthrough
CT: control target
= control target key end

     0   :  { %s653_s21 = smov 0   ;;  %s702_s0 = inlined_call_operand.vmem [shape: bf16[32,32], index: 0, kind: input, shape index: {}]   ;;  %s703_s1 = inlined_call_operand.vmem [shape: bf16[32,128], index: 1, kind: input, shape index: {}]   ;;  %s704_s2 = inlined_call_operand.vmem [shape: f32[1,128], index: 2, kind: input, shape index: {}]   ;;  %s705_s3 = inlined_call_operand.vmem [shape: bf16[32,64], index: 3, kind: input, shape index: {}]   ;;  %s706_s4 = inlined_call_operand.vmem [shape: bf16[64,128], index: 4, kind: input, shape index: {}]   ;;  %s707_s5 = inlined_call_operand.vmem [shape: f32[1,128], index: 5, kind: input, shape index: {}]   ;;  %s708_s6 = inlined_call_operand.vmem [shape: bf16[32,128], index: 6, kind: output, shape index: {}]  }
   0x1 LB: > { %s528_s22 = sadd.s32 4294967295, %s614_s21   ;;  %p532_p0 = scmp.ge.s32.totalorder %s614_s21, 1  ;;  %s614_s21 = sphi %s653_s21, %s16_s21  }
   0x2   : > { %p224_p1 = scmp.lt.s32.totalorder %s614_s21, 3 }
   0x4   : > { %p225_p2 = pnand %p532_p0, %p224_p1 }
   0x5   : > { %v600_v0 = vld [vmem:[%s706_s4] sm:$0xff] (!%p225_p2)   ;;  %v616_v1 = vmov (!%p225_p2), 0.0   ;;  %v601_v2 = vld [vmem:[%s706_s4 + $0x8] sm:$0xff] (!%p225_p2)   ;;  %vm617_vm0 = vmmov (!%p225_p2), 0   ;;  %s533_s29 = sshll.u32 (!%p225_p2), %s528_s22, 1  ;;  %v603_v5 = vld [vmem:[%s706_s4 + $0x10] sm:$0xff] (!%p225_p2)  }
   0x6   : > { %228 = sbr.rel (%p225_p2) target bundleno = 247 (0xf7), region = 44  ;;  %570 = vmatprep.subr.bf16.mxu0 (!%p225_p2), %v616_v1  ;;  %582 = vmatprep.subr.bf16.mxu1 (!%p225_p2), %v616_v1  ;;  %v602_v3 = vld [vmem:[%s703_s1] sm:$0xff] (!%p225_p2)   ;;  %p260_p3 = scmp.lt.s32.totalorder (!%p225_p2), %s533_s29, 3  ;;  %v604_v4 = vld [vmem:[%s703_s1 + $0x8] sm:$0xff] (!%p225_p2)   ;;  %vm385_vm1 = vcmask (!%p225_p2), 261120   ;;  %v605_v7 = vld [vmem:[%s706_s4 + $0x18] sm:$0xff] (!%p225_p2)  }
   0x7   : > { %571 = vmatpush3.bf16.msra.mxu0 (!%p225_p2), %v600_v0  ;;  %586 = vmatprep.mubr.msk.bf16.mxu1 (!%p225_p2), %vm617_vm0, %v616_v1  ;;  %vm323_vm2 = vcmask (!%p225_p2), 523264   ;;  %v549_v14 = vld [vmem:[%s704_s2] ss:$0 sm:$0xff] (!%p225_p2) }
   0x8   : > { %572 = vmatprep.subr.bf16.mxu0 (!%p225_p2), %v616_v1  ;;  %578 = vmatprep.mubr.msk.bf16.mxu0 (!%p225_p2), %vm617_vm0, %v616_v1  ;;  %v550_v17 = vld [vmem:[%s707_s5] ss:$0 sm:$0xff] (!%p225_p2) }
   0x9   : > { %583 = vmatpush3.bf16.msra.mxu1 (!%p225_p2), %v602_v3 }
   0xa   : > { %584 = vmatprep.subr.bf16.mxu1 (!%p225_p2), %v616_v1 }
   0xb   : > { %573 = vmatpush3.bf16.msra.mxu0 (!%p225_p2), %v601_v2 }
   0xc   : > { %574 = vmatprep.subr.bf16.mxu0 (!%p225_p2), %v616_v1 }
   0xd   : > { %s710_s29 = smov (!%p260_p3, %s533_s29), 3  ;;  %585 = vmatpush3.bf16.msra.mxu1 %v604_v4 }
   0xe   : > { %s676_s10 = sshll.u32 %s710_s29, 2 }
   0xf   : > { %s263_s13 = scalar_lea.vmem %s702_s0, %s676_s10  ;;  %s269_s16 = scalar_lea.vmem %s705_s3, %s676_s10  ;;  %575 = vmatpush3.bf16.msra.mxu0 %v603_v5 }
  0x10   : > { %v606_v6 = vld [vmem:[%s263_s13] sm:$0xff]   ;;  %576 = vmatprep.subr.bf16.mxu0 %v616_v1  ;;  %s275_s26 = scalar_lea.vmem %s708_s6, %s676_s10 }
  0x11   : > { %587 = vmatmul.mubr.msk.bf16.vlgmr.msra.gmra.mrb[0].mxu1 %vm385_vm1, %v606_v6  ;;  %v607_v8 = vld [vmem:[%s269_s16] sm:$0xff]  }
  0x13   : > { %577 = vmatpush3.bf16.msra.mxu0 %v605_v7 }
  0x16   : > { %579 = vmatmul.mubr.msk.bf16.vlgmr.msra.gmra.mrb[0].mxu0 %vm323_vm2, %v607_v8 }
  0xe4   : > { %v423_v9 = vpop.f32.mrb[0].mxu1 }
  0xe5   : > { %v588_v10 = vpop.f32.mrb[1].mxu1 }
  0xe6   : > { %v426_v11 = vpop.f32.mrb[2].mxu1 }
  0xe7   : > { %v589_v12 = vpop.f32.mrb[3].mxu1 }
  0xe9   : > { %v361_v13 = vpop.f32.mrb[0].mxu0 }
  0xea   : > { %v424_v15 = vadd.f32 %v423_v9, %v361_v13  ;;  %v580_v16 = vpop.f32.mrb[1].mxu0 }
  0xeb   : > { %v364_v18 = vpop.f32.mrb[2].mxu0 }
  0xec   : > { %v437_v19 = vadd.f32 %v549_v14, %v424_v15  ;;  %v427_v20 = vadd.f32 %v426_v11, %v364_v18  ;;  %v581_v21 = vpop.f32.mrb[3].mxu0 }
  0xee   : > { %v446_v22 = vadd.f32 %v550_v17, %v437_v19  ;;  %v438_v23 = vadd.f32 %v549_v14, %v427_v20 }
  0xf0   : > { %v447_v24 = vadd.f32 %v550_v17, %v438_v23  ;;  %v448_v25 = vmax.f32 %v446_v22, 0.0 }
  0xf2   : > { %v449_v26 = vmax.f32 %v447_v24, 0.0 }
  0xf4   : > { %v560_v27 = vpack.c.bf16 %v449_v26, %v448_v25 }
  0xf6   : > { %561 = vst [vmem:[%s275_s26] sm:$0xff] %v560_v27  }
  0xf7 PF: > { %s16_s21 = sadd.s32 1, %s614_s21  }
  0xf8   : > { %p13_p4 = scmp.ge.s32.totalorder %s16_s21, 4  }
  0xfa   :  { %15 = sbr.rel (!%p13_p4) target bundleno = 1 (0x1), region = 77 }

// kernel: base_resnet_forward.73
= control target key start
LH: loop header
LB: loop body
LE: loop exit
PB: predicated region body
PF: predicated region fallthrough
CT: control target
= control target key end

     0   :  { %s1124_s12 = smov 0   ;;  %s1434_s0 = inlined_call_operand.vmem [shape: bf16[2,6,6,32], index: 0, kind: input, shape index: {}]   ;;  %s1435_s1 = inlined_call_operand.vmem [shape: bf16[3,3,32,32], index: 1, kind: input, shape index: {}]   ;;  %s1436_s2 = inlined_call_operand.vmem [shape: f32[1,32], index: 2, kind: input, shape index: {}]   ;;  %s1437_s3 = inlined_call_operand.vmem [shape: bf16[2,4,4,32], index: 3, kind: output, shape index: {}]  }
   0x1 LB: > { %s855_s13 = sadd.s32 4294967295, %s1096_s12   ;;  %p859_p0 = scmp.ge.s32.totalorder %s1096_s12, 1  ;;  %s1096_s12 = sphi %s1124_s12, %s13_s12  }
   0x2   : > { %p137_p1 = scmp.lt.s32.totalorder %s1096_s12, 3 }
   0x4   : > { %p138_p2 = pnand %p859_p0, %p137_p1 }
   0x5   : > { %p161_p3 = scmp.lt.s32.totalorder (!%p138_p2), %s855_s13, 1  ;;  %v1135_v0 = vld [vmem:[%s1435_s1] sm:$0xf] (!%p138_p2)  ;;  %v1140_v1 = vld [vmem:[%s1435_s1 + $0x4] sm:$0xf] (!%p138_p2)  ;;  %s1327_s21 = smov (!%p138_p2), 0  }
   0x6   : > { %141 = sbr.rel (%p138_p2) target bundleno = 297 (0x129), region = 32  ;;  %v1145_v2 = vld [vmem:[%s1435_s1 + $0x8] sm:$0xf] (!%p138_p2)  ;;  %v1150_v3 = vld [vmem:[%s1435_s1 + $0xc] sm:$0xf] (!%p138_p2) }
   0x7   : > { %v1155_v4 = vld [vmem:[%s1435_s1 + $0x10] sm:$0xf] (!%p138_p2)  ;;  %v1160_v5 = vld [vmem:[%s1435_s1 + $0x14] sm:$0xf] (!%p138_p2)  ;;  %v1165_v6 = vld [vmem:[%s1435_s1 + $0x18] sm:$0xf] (!%p138_p2) }
   0x8   : > { %v1170_v7 = vld [vmem:[%s1435_s1 + $0x1c] sm:$0xf] (!%p138_p2)  ;;  %v1175_v8 = vld [vmem:[%s1435_s1 + $0x20] sm:$0xf] (!%p138_p2)  ;;  %v1180_v9 = vld [vmem:[%s1435_s1 + $0x24] sm:$0xf] (!%p138_p2) }
   0x9   : > { %v1185_v10 = vld [vmem:[%s1435_s1 + $0x28] sm:$0xf] (!%p138_p2)  ;;  %v1190_v11 = vld [vmem:[%s1435_s1 + $0x2c] sm:$0xf] (!%p138_p2)  ;;  %v1200_v12 = vld [vmem:[%s1435_s1 + $0x30] sm:$0xf] (!%p138_p2) }
   0xa   : > { %v1205_v13 = vld [vmem:[%s1435_s1 + $0x34] sm:$0xf] (!%p138_p2)  ;;  %v1210_v14 = vld [vmem:[%s1435_s1 + $0x38] sm:$0xf] (!%p138_p2)  ;;  %v1220_v15 = vld [vmem:[%s1435_s1 + $0x3c] sm:$0xf] (!%p138_p2) }
   0xb   : > { %v1225_v16 = vld [vmem:[%s1435_s1 + $0x40] sm:$0xf] (!%p138_p2)  ;;  %v1230_v17 = vld [vmem:[%s1435_s1 + $0x44] sm:$0xf] (!%p138_p2)  ;;  %v1235_v18 = vld [vmem:[%s1435_s1 + $0x48] sm:$0xf] (!%p138_p2) }
   0xc   : > { %v1240_v19 = vld [vmem:[%s1435_s1 + $0x4c] sm:$0xf] (!%p138_p2)  ;;  %v1245_v20 = vld [vmem:[%s1435_s1 + $0x50] sm:$0xf] (!%p138_p2)  ;;  %v1250_v21 = vld [vmem:[%s1435_s1 + $0x54] sm:$0xf] (!%p138_p2) }
   0xd   : > { %s1439_s13 = smov (!%p161_p3, %s855_s13), 1  ;;  %v1255_v22 = vld [vmem:[%s1435_s1 + $0x58] sm:$0xf]  ;;  %v1260_v23 = vld [vmem:[%s1435_s1 + $0x5c] sm:$0xf] }
   0xe   : > { %s1064_s7 = smul.u32 24, %s1439_s13  ;;  %s934_s8 = sshll.u32 %s1439_s13, 3  ;;  %v1265_v24 = vld [vmem:[%s1435_s1 + $0x60] sm:$0xf]  ;;  %v1270_v25 = vld [vmem:[%s1435_s1 + $0x64] sm:$0xf] }
   0xf   : > { %s1195_s17 = scalar_lea.vmem %s1437_s3, %s934_s8  ;;  %v1275_v26 = vld [vmem:[%s1435_s1 + $0x68] sm:$0xf]  ;;  %v1280_v27 = vld [vmem:[%s1435_s1 + $0x6c] sm:$0xf]  ;;  %v1285_v28 = vld [vmem:[%s1435_s1 + $0x70] sm:$0xf] }
  0x10   : > { %s1215_s25 = scalar_lea.vmem %s1434_s0, %s1064_s7  ;;  %v1290_v29 = vld [vmem:[%s1435_s1 + $0x74] sm:$0xf]  ;;  %v1295_v30 = vld [vmem:[%s1435_s1 + $0x78] sm:$0xf]  ;;  %v1300_v31 = vld [vmem:[%s1435_s1 + $0x7c] sm:$0xf] }
  0x11   : > { %v1305_v32 = vld [vmem:[%s1435_s1 + $0x80] sm:$0xf]  ;;  %v1310_v33 = vld [vmem:[%s1435_s1 + $0x84] sm:$0xf]  ;;  %v1315_v34 = vld [vmem:[%s1435_s1 + $0x88] sm:$0xf] }
  0x12   : > { %v1320_v35 = vld [vmem:[%s1435_s1 + $0x8c] sm:$0xf]  ;;  %v1325_v36 = vld [vmem:[%s1436_s2] ss:$0 sm:$0xff] }
  0x13 LB: >> { %v897_v37 = vcombine.low %v1135_v0, %v1140_v1  ;;  %v913_v38 = vcombine.low %v1225_v16, %v1230_v17  ;;  %v1102_v39 = vmov 0.0   ;;  %v898_v40 = vcombine.low %v1145_v2, %v1150_v3  ;;  %s896_s22 = sshll.u32 %s1100_s21, 2  ;;  %s931_s24 = sshll.u32 %s1100_s21, 1  ;;  %s1100_s21 = sphi %s1327_s21, %s222_s21  }
  0x14   : >> { %962 = vmatprep.subr.bf16.mxu1 %v1102_v39  ;;  %994 = vmatprep.subr.bf16.mxu0 %v1102_v39  ;;  %v914_v41 = vcombine.low %v1235_v18, %v1240_v19  ;;  %vm1103_vm0 = vmmov 0   ;;  %s1347_s23 = scalar_lea.vmem %s1215_s25, %s896_s22  ;;  %vm245_vm1 = vcmask 261120   ;;  %v901_v46 = vcombine.low %v1155_v4, %v1160_v5  ;;  %s782_s26 = scalar_lea.vmem %s1195_s17, %s931_s24 }
  0x15   : >> { %963 = vmatpush3.bf16.msra.mxu1 %v897_v37  ;;  %995 = vmatpush3.bf16.msra.mxu0 %v913_v38  ;;  %v232_v42 = vld [vmem:[%s1347_s23] sm:$0x7]  ;;  %v1352_v43 = vld [vmem:[%s1347_s23 + $0x4] sm:$0x7]  ;;  %v902_v51 = vcombine.low %v1165_v6, %v1170_v7  ;;  %v916_v52 = vcombine.low %v1245_v20, %v1250_v21  ;;  %v917_v56 = vcombine.low %v1255_v22, %v1260_v23  ;;  %v920_v38 = vld [vmem:[%s1347_s23 + $0x8] sm:$0x7] }
  0x16   : >> { %964 = vmatprep.subr.bf16.mxu1 %v1102_v39  ;;  %966 = vmatprep.mubr.msk.bf16.mxu1 %vm1103_vm0, %v1102_v39  ;;  %v900_v44 = vcombine.low %v232_v42, %v232_v42  ;;  %v912_v45 = vcombine.low %v1352_v43, %v1352_v43  ;;  %v904_v58 = vcombine.low %v1175_v8, %v1180_v9  ;;  %vm783_vm2 = vcmask 254976   ;;  %s222_s21 = sadd.s32 1, %s1100_s21  }
  0x17   : >> { %996 = vmatprep.subr.bf16.mxu0 %v1102_v39  ;;  %998 = vmatprep.mubr.msk.bf16.mxu0 %vm1103_vm0, %v1102_v39  ;;  %v905_v60 = vcombine.low %v1185_v10, %v1190_v11  ;;  %v921_v61 = vcombine.low %v1265_v24, %v1270_v25  ;;  %v922_v62 = vcombine.low %v1275_v26, %v1280_v27  ;;  %p219_p4 = scmp.ge.s32.totalorder %s222_s21, 4  }
  0x18   : >> { %v477_v47 = vshrl.u32 %v912_v45, 16  ;;  %v479_v48 = vshll.u32 %v912_v45, 16  ;;  %v296_v49 = vshll.u32 %v900_v44, 16  ;;  %v294_v54 = vshrl.u32 %v900_v44, 16 }
  0x19   : >> { %965 = vmatpush3.bf16.msra.mxu1 %v898_v40  ;;  %997 = vmatpush3.bf16.msra.mxu0 %v914_v41  ;;  %v539_v59 = vrot.slane %v912_v45, 1  ;;  %v356_v63 = vrot.slane %v900_v44, 1  ;;  %v909_v37 = vcombine.low %v1200_v12, %v1205_v13  ;;  %v924_v40 = vcombine.low %v920_v38, %v920_v38 }
  0x1a   : >> { %1002 = vmatprep.subr.bf16.mxu0 %v1102_v39  ;;  %970 = vmatprep.subr.bf16.mxu1 %v1102_v39  ;;  %v481_v50 = vrot.slane %v479_v48, 1  ;;  %v298_v55 = vrot.slane %v296_v49, 1  ;;  %v910_v41 = vcombine.low %v1210_v14, %v1220_v15  ;;  %v926_v45 = vcombine.low %v1295_v30, %v1300_v31 }
  0x1b   : >> { %v662_v44 = vshll.u32 %v924_v40, 16  ;;  %v928_v49 = vcombine.low %v1305_v32, %v1310_v33 }
  0x1c   : >> { %967 = vmatmul.mubr.msk.bf16.vlgmr.msra.gmra.mrb[0].mxu1 %vm245_vm1, %v232_v42  ;;  %v482_v53 = vor.u32 %v481_v50, %v477_v47  ;;  %v299_v57 = vor.u32 %v298_v55, %v294_v54  ;;  %v925_v42 = vcombine.low %v1285_v28, %v1290_v29  ;;  %v929_v50 = vcombine.low %v1315_v34, %v1320_v35 }
  0x1d   : >> { %971 = vmatpush3.bf16.msra.mxu1 %v901_v46  ;;  %974 = vmatprep.mubr.msk.bf16.mxu1 %vm1103_vm0, %v1102_v39  ;;  %v660_v46 = vshrl.u32 %v924_v40, 16  ;;  %v664_v47 = vrot.slane %v662_v44, 1 }
  0x1e   : >> { %972 = vmatprep.subr.bf16.mxu1 %v1102_v39  ;;  %999 = vmatmul.mubr.msk.bf16.vlgmr.msra.gmra.mrb[0].mxu0 %vm245_vm1, %v482_v53 }
  0x1f   : >> { %1003 = vmatpush3.bf16.msra.mxu0 %v916_v52  ;;  %1006 = vmatprep.mubr.msk.bf16.mxu0 %vm1103_vm0, %v1102_v39  ;;  %v665_v48 = vor.u32 %v664_v47, %v660_v46 }
  0x20   : >> { %1004 = vmatprep.subr.bf16.mxu0 %v1102_v39 }
  0x21   : >> { %973 = vmatpush3.bf16.msra.mxu1 %v902_v51  ;;  %v722_v51 = vrot.slane %v924_v40, 1 }
  0x22   : >> { %978 = vmatprep.subr.bf16.mxu1 %v1102_v39 }
  0x23   : >> { %1005 = vmatpush3.bf16.msra.mxu0 %v917_v56 }
  0x24   : >> { %1010 = vmatprep.subr.bf16.mxu0 %v1102_v39 }
  0x28   : >> { %975 = vmatmul.mubr.msk.bf16.vlgmr.msra.gmra.mrb[0].mxu1 %vm245_vm1, %v299_v57 }
  0x29   : >> { %979 = vmatpush3.bf16.msra.mxu1 %v904_v58  ;;  %982 = vmatprep.mubr.msk.bf16.mxu1 %vm1103_vm0, %v1102_v39 }
  0x2a   : >> { %980 = vmatprep.subr.bf16.mxu1 %v1102_v39  ;;  %1007 = vmatmul.mubr.msk.bf16.vlgmr.msra.gmra.mrb[0].mxu0 %vm245_vm1, %v539_v59 }
  0x2b   : >> { %1011 = vmatpush3.bf16.msra.mxu0 %v921_v61  ;;  %1014 = vmatprep.mubr.msk.bf16.mxu0 %vm1103_vm0, %v1102_v39 }
  0x2c   : >> { %1012 = vmatprep.subr.bf16.mxu0 %v1102_v39 }
  0x2d   : >> { %981 = vmatpush3.bf16.msra.mxu1 %v905_v60 }
  0x2e   : >> { %986 = vmatprep.subr.bf16.mxu1 %v1102_v39 }
  0x2f   : >> { %1013 = vmatpush3.bf16.msra.mxu0 %v922_v62 }
  0x30   : >> { %1018 = vmatprep.subr.bf16.mxu0 %v1102_v39 }
  0x34   : >> { %983 = vmatmul.mubr.msk.bf16.vlgmr.msra.gmra.mrb[0].mxu1 %vm245_vm1, %v356_v63 }
  0x35   : >> { %987 = vmatpush3.bf16.msra.mxu1 %v909_v37  ;;  %990 = vmatprep.mubr.msk.bf16.mxu1 %vm1103_vm0, %v1102_v39 }
  0x36   : >> { %988 = vmatprep.subr.bf16.mxu1 %v1102_v39  ;;  %1015 = vmatmul.mubr.msk.bf16.vlgmr.msra.gmra.mrb[0].mxu0 %vm245_vm1, %v920_v38 }
  0x37   : >> { %1019 = vmatpush3.bf16.msra.mxu0 %v925_v42  ;;  %1022 = vmatprep.mubr.msk.bf16.mxu0 %vm1103_vm0, %v1102_v39 }
  0x38   : >> { %1020 = vmatprep.subr.bf16.mxu0 %v1102_v39 }
  0x39   : >> { %989 = vmatpush3.bf16.msra.mxu1 %v910_v41 }
  0x3b   : >> { %1021 = vmatpush3.bf16.msra.mxu0 %v926_v45 }
  0x3c   : >> { %1026 = vmatprep.subr.bf16.mxu0 %v1102_v39 }
  0x40   : >> { %991 = vmatmul.mubr.msk.bf16.vlgmr.msra.gmra.mrb[0].mxu1 %vm245_vm1, %v1352_v43 }
  0x42   : >> { %1023 = vmatmul.mubr.msk.bf16.vlgmr.msra.gmra.mrb[0].mxu0 %vm245_vm1, %v665_v48 }
  0x43   : >> { %1027 = vmatpush3.bf16.msra.mxu0 %v928_v49  ;;  %1030 = vmatprep.mubr.msk.bf16.mxu0 %vm1103_vm0, %v1102_v39 }
  0x44   : >> { %1028 = vmatprep.subr.bf16.mxu0 %v1102_v39 }
  0x47   : >> { %1029 = vmatpush3.bf16.msra.mxu0 %v929_v50 }
  0x4e   : >> { %1031 = vmatmul.mubr.msk.bf16.vlgmr.msra.gmra.mrb[0].mxu0 %vm245_vm1, %v722_v51 }
 0x113   : >> { %v466_v43 = vpop.f32.mrb[0].mxu1 }
 0x114   : >> { %v992_v52 = vpop.f32.mrb[1].mxu1  ;;  %v1034_v55 = vadd.f32 %v1325_v36, %v466_v43 }
 0x115   : >> { %v469_v53 = vpop.f32.mrb[2].mxu1 }
 0x116   : >> { %v993_v54 = vpop.f32.mrb[3].mxu1 }
 0x121   : >> { %v772_v56 = vpop.f32.mrb[0].mxu0 }
 0x122   : >> { %v1035_v57 = vadd.f32 %v1034_v55, %v772_v56  ;;  %v1032_v58 = vpop.f32.mrb[1].mxu0  ;;  %221 = sbr.rel (!%p219_p4) target bundleno = 19 (0x13), region = 81 }
 0x123   : >> { %v775_v59 = vpop.f32.mrb[2].mxu0 }
 0x124   : >> { %v779_v60 = vmax.f32 %v1035_v57, 0.0  ;;  %v1033_v61 = vpop.f32.mrb[3].mxu0 }
 0x126   : >> { %v780_v39 = vpack.c.bf16 %v779_v60, %v779_v60 }
 0x128   : >> { %784 = vst.msk [vmem:[%s782_s26] sm:$0x3] %vm783_vm2, %v780_v39 }
 0x129 PF: > { %s13_s12 = sadd.s32 1, %s1096_s12  }
 0x12a   : > { %p10_p5 = scmp.ge.s32.totalorder %s13_s12, 4  }
 0x12c   :  { %12 = sbr.rel (!%p10_p5) target bundleno = 1 (0x1), region = 92 }

// kernel: base_resnet_forward.74
= control target key start
LH: loop header
LB: loop body
LE: loop exit
PB: predicated region body
PF: predicated region fallthrough
CT: control target
= control target key end

     0   :  { %s475_s15 = smov 0   ;;  %s504_s0 = inlined_call_operand.vmem [shape: bf16[32,32], index: 0, kind: input, shape index: {}]   ;;  %s505_s1 = inlined_call_operand.vmem [shape: bf16[32,128], index: 1, kind: input, shape index: {}]   ;;  %s506_s2 = inlined_call_operand.vmem [shape: f32[1,128], index: 2, kind: input, shape index: {}]   ;;  %s507_s3 = inlined_call_operand.vmem [shape: bf16[32,128], index: 3, kind: input, shape index: {}]   ;;  %s508_s4 = inlined_call_operand.vmem [shape: bf16[32,128], index: 4, kind: output, shape index: {}]  }
   0x1 LB: > { %s385_s16 = sadd.s32 4294967295, %s446_s15   ;;  %p389_p0 = scmp.ge.s32.totalorder %s446_s15, 1  ;;  %s446_s15 = sphi %s475_s15, %s14_s15  }
   0x2   : > { %p174_p1 = scmp.lt.s32.totalorder %s446_s15, 3 }
   0x4   : > { %p175_p2 = pnand %p389_p0, %p174_p1 }
   0x5   : > { %v437_v0 = vld [vmem:[%s505_s1] sm:$0xff] (!%p175_p2)   ;;  %v448_v1 = vmov (!%p175_p2), 0.0   ;;  %v438_v2 = vld [vmem:[%s505_s1 + $0x8] sm:$0xff] (!%p175_p2)   ;;  %vm449_vm0 = vmmov (!%p175_p2), 0   ;;  %s390_s21 = sshll.u32 (!%p175_p2), %s385_s16, 1  ;;  %vm254_vm1 = vcmask (!%p175_p2), 261120  }
   0x6   : > { %178 = sbr.rel (%p175_p2) target bundleno = 240 (0xf0), region = 36  ;;  %419 = vmatprep.subr.bf16.mxu0 (!%p175_p2), %v448_v1  ;;  %423 = vmatprep.mubr.msk.bf16.mxu0 (!%p175_p2), %vm449_vm0, %v448_v1  ;;  %p206_p3 = scmp.lt.s32.totalorder (!%p175_p2), %s390_s21, 3  ;;  %v396_v5 = vld [vmem:[%s506_s2] ss:$0 sm:$0xff] (!%p175_p2) }
   0x7   : > { %420 = vmatpush3.bf16.msra.mxu0 (!%p175_p2), %v437_v0 }
   0x8   : > { %421 = vmatprep.subr.bf16.mxu0 (!%p175_p2), %v448_v1 }
   0xb   : > { %422 = vmatpush3.bf16.msra.mxu0 (!%p175_p2), %v438_v2 }
   0xd   : > { %s510_s21 = smov (!%p206_p3, %s390_s21), 3 }
   0xe   : > { %s391_s22 = sshll.u32 %s510_s21, 2 }
   0xf   : > { %s209_s25 = scalar_lea.vmem %s504_s0, %s391_s22  ;;  %s215_s28 = scalar_lea.vmem %s507_s3, %s391_s22 }
  0x10   : > { %v439_v3 = vld [vmem:[%s209_s25] sm:$0xff]   ;;  %s221_s7 = scalar_lea.vmem %s508_s4, %s391_s22 }
  0x11   : > { %424 = vmatmul.mubr.msk.bf16.vlgmr.msra.gmra.mrb[0].mxu0 %vm254_vm1, %v439_v3  ;;  %v408_v4 = vld [vmem:[%s215_s28] sm:$0xff]  }
  0x12   : > { %v409_v6 = vunpack.c.l.bf16 %v408_v4  ;;  %v410_v10 = vunpack.c.h.bf16 %v408_v4 }
  0xe4   : > { %v292_v7 = vpop.f32.mrb[0].mxu0 }
  0xe5   : > { %v293_v8 = vadd.f32 %v396_v5, %v292_v7  ;;  %v425_v9 = vpop.f32.mrb[1].mxu0 }
  0xe6   : > { %v295_v11 = vpop.f32.mrb[2].mxu0 }
  0xe7   : > { %v303_v12 = vadd.f32 %v409_v6, %v293_v8  ;;  %v296_v13 = vadd.f32 %v396_v5, %v295_v11  ;;  %v426_v14 = vpop.f32.mrb[3].mxu0 }
  0xe9   : > { %v304_v15 = vadd.f32 %v410_v10, %v296_v13  ;;  %v305_v16 = vmax.f32 %v303_v12, 0.0 }
  0xeb   : > { %v306_v17 = vmax.f32 %v304_v15, 0.0 }
  0xed   : > { %v414_v18 = vpack.c.bf16 %v306_v17, %v305_v16 }
  0xef   : > { %415 = vst [vmem:[%s221_s7] sm:$0xff] %v414_v18  }
  0xf0 PF: > { %s14_s15 = sadd.s32 1, %s446_s15  }
  0xf1   : > { %p11_p4 = scmp.ge.s32.totalorder %s14_s15, 4  }
  0xf3   :  { %13 = sbr.rel (!%p11_p4) target bundleno = 1 (0x1), region = 69 }

// kernel: base_resnet_forward.87
= control target key start
LH: loop header
LB: loop body
LE: loop exit
PB: predicated region body
PF: predicated region fallthrough
CT: control target
= control target key end

     0   :  { %s467_s12 = smov 0   ;;  %s514_s0 = inlined_call_operand.vmem [shape: bf16[32,128], index: 0, kind: input, shape index: {}]   ;;  %s515_s1 = inlined_call_operand.vmem [shape: bf16[128,64], index: 1, kind: input, shape index: {}]   ;;  %s516_s2 = inlined_call_operand.vmem [shape: f32[1,64], index: 2, kind: input, shape index: {}]   ;;  %s517_s3 = inlined_call_operand.vmem [shape: bf16[32,64], index: 3, kind: output, shape index: {}]  }
   0x1 LB: > { %s364_s13 = sadd.s32 4294967295, %s443_s12   ;;  %p368_p0 = scmp.ge.s32.totalorder %s443_s12, 1  ;;  %s443_s12 = sphi %s467_s12, %s13_s12  }
   0x2   : > { %p138_p1 = scmp.lt.s32.totalorder %s443_s12, 3 }
   0x4   : > { %p139_p2 = pnand %p368_p0, %p138_p1 }
   0x5   : > { %v428_v0 = vld [vmem:[%s515_s1] sm:$0xff] (!%p139_p2)   ;;  %v445_v1 = vmov (!%p139_p2), 0.0   ;;  %v429_v2 = vld [vmem:[%s515_s1 + $0x8] sm:$0xff] (!%p139_p2)   ;;  %vm446_vm0 = vmmov (!%p139_p2), 0   ;;  %s369_s18 = sshll.u32 (!%p139_p2), %s364_s13, 1  ;;  %v430_v3 = vld [vmem:[%s515_s1 + $0x10] sm:$0xff] (!%p139_p2)  }
   0x6   : > { %142 = sbr.rel (%p139_p2) target bundleno = 259 (0x103), region = 32  ;;  %398 = vmatprep.subr.bf16.mxu0 (!%p139_p2), %v445_v1  ;;  %414 = vmatprep.mubr.msk.bf16.mxu0 (!%p139_p2), %vm446_vm0, %v445_v1  ;;  %p163_p3 = scmp.lt.s32.totalorder (!%p139_p2), %s369_s18, 3  ;;  %v431_v4 = vld [vmem:[%s515_s1 + $0x18] sm:$0xff] (!%p139_p2)   ;;  %v432_v5 = vld [vmem:[%s515_s1 + $0x20] sm:$0xff] (!%p139_p2)   ;;  %v433_v6 = vld [vmem:[%s515_s1 + $0x28] sm:$0xff] (!%p139_p2)   ;;  %vm305_vm1 = vcmask (!%p139_p2), 519168  }
   0x7   : > { %399 = vmatpush3.bf16.msra.mxu0 (!%p139_p2), %v428_v0  ;;  %v434_v7 = vld [vmem:[%s515_s1 + $0x30] sm:$0xff] (!%p139_p2)   ;;  %v435_v8 = vld [vmem:[%s515_s1 + $0x38] sm:$0xff] (!%p139_p2)   ;;  %v373_v10 = vld [vmem:[%s516_s2] ss:$0 sm:$0xff] (!%p139_p2) }
   0x8   : > { %400 = vmatprep.subr.bf16.mxu0 (!%p139_p2), %v445_v1 }
   0xb   : > { %401 = vmatpush3.bf16.msra.mxu0 (!%p139_p2), %v429_v2 }
   0xc   : > { %402 = vmatprep.subr.bf16.mxu0 (!%p139_p2), %v445_v1 }
   0xd   : > { %s519_s18 = smov (!%p163_p3, %s369_s18), 3 }
   0xe   : > { %s370_s21 = sshll.u32 %s519_s18, 2 }
   0xf   : > { %s166_s24 = scalar_lea.vmem %s514_s0, %s370_s21  ;;  %403 = vmatpush3.bf16.msra.mxu0 %v430_v3  ;;  %s172_s13 = scalar_lea.vmem %s517_s3, %s370_s21 }
  0x10   : > { %404 = vmatprep.subr.bf16.mxu0 %v445_v1  ;;  %v436_v9 = vld [vmem:[%s166_s24] sm:$0xff]  }
  0x13   : > { %405 = vmatpush3.bf16.msra.mxu0 %v431_v4 }
  0x14   : > { %406 = vmatprep.subr.bf16.mxu0 %v445_v1 }
  0x17   : > { %407 = vmatpush3.bf16.msra.mxu0 %v432_v5 }
  0x18   : > { %408 = vmatprep.subr.bf16.mxu0 %v445_v1 }
  0x1b   : > { %409 = vmatpush3.bf16.msra.mxu0 %v433_v6 }
  0x1c   : > { %410 = vmatprep.subr.bf16.mxu0 %v445_v1 }
  0x1f   : > { %411 = vmatpush3.bf16.msra.mxu0 %v434_v7 }
  0x20   : > { %412 = vmatprep.subr.bf16.mxu0 %v445_v1 }
  0x23   : > { %413 = vmatpush3.bf16.msra.mxu0 %v435_v8 }
  0x26   : > { %415 = vmatmul.mubr.bf16.vlgmr.msra.gmra.mrb[0].mxu0 %v436_v9 }
  0xf9   : > { %v288_v11 = vpop.f32.mrb[0].mxu0 }
  0xfa   : > { %v289_v12 = vadd.f32 %v373_v10, %v288_v11  ;;  %v416_v13 = vpop.f32.mrb[1].mxu0 }
  0xfb   : > { %v291_v14 = vpop.f32.mrb[2].mxu0 }
  0xfc   : > { %v295_v15 = vmax.f32 %v289_v12, 0.0  ;;  %v292_v16 = vadd.f32 %v373_v10, %v291_v14  ;;  %v417_v17 = vpop.f32.mrb[3].mxu0 }
  0xfe   : > { %v387_v18 = vpack.c.bf16 %v295_v15, %v295_v15  ;;  %v296_v19 = vmax.f32 %v292_v16, 0.0 }
 0x100   : > { %306 = vst.msk [vmem:[%s172_s13] sm:$0xf] %vm305_vm1, %v387_v18  ;;  %v388_v20 = vpack.c.bf16 %v296_v19, %v296_v19 }
 0x102   : > { %307 = vst.msk [vmem:[%s172_s13 + $0x4] sm:$0xf] %vm305_vm1, %v388_v20 }
 0x103 PF: > { %s13_s12 = sadd.s32 1, %s443_s12  }
 0x104   : > { %p10_p4 = scmp.ge.s32.totalorder %s13_s12, 4  }
 0x106   :  { %12 = sbr.rel (!%p10_p4) target bundleno = 1 (0x1), region = 62 }

// kernel: base_resnet_forward.88
= control target key start
LH: loop header
LB: loop body
LE: loop exit
PB: predicated region body
PF: predicated region fallthrough
CT: control target
= control target key end

     0   :  { %s1372_s12 = smov 0   ;;  %s1921_s0 = inlined_call_operand.vmem [shape: bf16[2,6,6,64], index: 0, kind: input, shape index: {}]   ;;  %s1922_s1 = inlined_call_operand.vmem [shape: bf16[3,3,64,64], index: 1, kind: input, shape index: {}]   ;;  %s1923_s2 = inlined_call_operand.vmem [shape: f32[1,64], index: 2, kind: input, shape index: {}]   ;;  %s1924_s3 = inlined_call_operand.vmem [shape: bf16[2,4,4,64], index: 3, kind: output, shape index: {}]  }
   0x1 LB: > { %s999_s13 = sadd.s32 4294967295, %s1344_s12   ;;  %p1003_p0 = scmp.ge.s32.totalorder %s1344_s12, 1  ;;  %s1344_s12 = sphi %s1372_s12, %s13_s12  }
   0x2   : > { %p137_p1 = scmp.lt.s32.totalorder %s1344_s12, 3 }
   0x4   : > { %p138_p2 = pnand %p1003_p0, %p137_p1 }
   0x5   : > { %p161_p3 = scmp.lt.s32.totalorder (!%p138_p2), %s999_s13, 1  ;;  %v1383_v0 = vld [vmem:[%s1922_s1] sm:$0xf] (!%p138_p2)  ;;  %v1388_v1 = vld [vmem:[%s1922_s1 + $0x4] sm:$0xf] (!%p138_p2)  ;;  %s1755_s21 = smov (!%p138_p2), 0  }
   0x6   : > { %141 = sbr.rel (%p138_p2) target bundleno = 338 (0x152), region = 32  ;;  %1925 = vst [vmem:[#allocation2_spill] sm:$0xff] (!%p138_p2), %v1383_v0  ;;  %1926 = vst [vmem:[#allocation3_spill] sm:$0xff] (!%p138_p2), %v1388_v1  ;;  %v1393_v2 = vld [vmem:[%s1922_s1 + $0x8] sm:$0xf] (!%p138_p2) }
   0x7   : > { %1927 = vst [vmem:[#allocation4_spill] sm:$0xff] (!%p138_p2), %v1393_v2  ;;  %v1398_v3 = vld [vmem:[%s1922_s1 + $0xc] sm:$0xf] (!%p138_p2)  ;;  %v1403_v4 = vld [vmem:[%s1922_s1 + $0x10] sm:$0xf] (!%p138_p2) }
   0x8   : > { %1928 = vst [vmem:[#allocation5_spill] sm:$0xff] (!%p138_p2), %v1398_v3  ;;  %1929 = vst [vmem:[#allocation6_spill] sm:$0xff] (!%p138_p2), %v1403_v4  ;;  %v1408_v5 = vld [vmem:[%s1922_s1 + $0x14] sm:$0xf] (!%p138_p2)  ;;  %v1413_v6 = vld [vmem:[%s1922_s1 + $0x18] sm:$0xf] (!%p138_p2) }
   0x9   : > { %1930 = vst [vmem:[#allocation7_spill] sm:$0xff] (!%p138_p2), %v1408_v5  ;;  %1931 = vst [vmem:[#allocation8_spill] sm:$0xff] (!%p138_p2), %v1413_v6  ;;  %v1418_v7 = vld [vmem:[%s1922_s1 + $0x1c] sm:$0xf] (!%p138_p2)  ;;  %v1423_v8 = vld [vmem:[%s1922_s1 + $0x20] sm:$0xf] (!%p138_p2) }
   0xa   : > { %1932 = vst [vmem:[#allocation9_spill] sm:$0xff] (!%p138_p2), %v1418_v7  ;;  %1933 = vst [vmem:[#allocation10_spill] sm:$0xff] (!%p138_p2), %v1423_v8  ;;  %v1428_v9 = vld [vmem:[%s1922_s1 + $0x24] sm:$0xf] (!%p138_p2)  ;;  %v1433_v10 = vld [vmem:[%s1922_s1 + $0x28] sm:$0xf] (!%p138_p2) }
   0xb   : > { %1934 = vst [vmem:[#allocation11_spill] sm:$0xff] (!%p138_p2), %v1428_v9  ;;  %1935 = vst [vmem:[#allocation12_spill] sm:$0xff] (!%p138_p2), %v1433_v10  ;;  %v1438_v11 = vld [vmem:[%s1922_s1 + $0x2c] sm:$0xf] (!%p138_p2)  ;;  %v1448_v12 = vld [vmem:[%s1922_s1 + $0x30] sm:$0xf] (!%p138_p2) }
   0xc   : > { %1936 = vst [vmem:[#allocation13_spill] sm:$0xff] (!%p138_p2), %v1438_v11  ;;  %v1453_v13 = vld [vmem:[%s1922_s1 + $0x34] sm:$0xf] (!%p138_p2)  ;;  %v1458_v14 = vld [vmem:[%s1922_s1 + $0x38] sm:$0xf] (!%p138_p2) }
   0xd   : > { %s1980_s13 = smov (!%p161_p3, %s999_s13), 1  ;;  %v1468_v15 = vld [vmem:[%s1922_s1 + $0x3c] sm:$0xf]  ;;  %v1473_v16 = vld [vmem:[%s1922_s1 + $0x40] sm:$0xf] }
   0xe   : > { %s1312_s7 = smul.u32 24, %s1980_s13  ;;  %s1128_s8 = sshll.u32 %s1980_s13, 3  ;;  %v1478_v17 = vld [vmem:[%s1922_s1 + $0x44] sm:$0xf]  ;;  %v1483_v18 = vld [vmem:[%s1922_s1 + $0x48] sm:$0xf] }
   0xf   : > { %s1443_s17 = scalar_lea.vmem %s1924_s3, %s1128_s8  ;;  %v1488_v19 = vld [vmem:[%s1922_s1 + $0x4c] sm:$0xf]  ;;  %v1493_v20 = vld [vmem:[%s1922_s1 + $0x50] sm:$0xf]  ;;  %v1498_v21 = vld [vmem:[%s1922_s1 + $0x54] sm:$0xf] }
  0x10   : > { %s1463_s25 = scalar_lea.vmem %s1921_s0, %s1312_s7  ;;  %v1503_v22 = vld [vmem:[%s1922_s1 + $0x58] sm:$0xf]  ;;  %v1508_v23 = vld [vmem:[%s1922_s1 + $0x5c] sm:$0xf]  ;;  %v1513_v24 = vld [vmem:[%s1922_s1 + $0x60] sm:$0xf] }
  0x11   : > { %v1518_v25 = vld [vmem:[%s1922_s1 + $0x64] sm:$0xf]  ;;  %v1523_v26 = vld [vmem:[%s1922_s1 + $0x68] sm:$0xf]  ;;  %v1528_v27 = vld [vmem:[%s1922_s1 + $0x6c] sm:$0xf] }
  0x12   : > { %v1533_v28 = vld [vmem:[%s1922_s1 + $0x70] sm:$0xf]  ;;  %v1538_v29 = vld [vmem:[%s1922_s1 + $0x74] sm:$0xf]  ;;  %v1543_v30 = vld [vmem:[%s1922_s1 + $0x78] sm:$0xf] }
  0x13   : > { %1937 = vst [vmem:[#allocation14_spill] sm:$0xff] %v1543_v30  ;;  %v1548_v31 = vld [vmem:[%s1922_s1 + $0x7c] sm:$0xf]  ;;  %v1553_v32 = vld [vmem:[%s1922_s1 + $0x80] sm:$0xf] }
  0x14   : > { %1938 = vst [vmem:[#allocation15_spill] sm:$0xff] %v1548_v31  ;;  %1939 = vst [vmem:[#allocation16_spill] sm:$0xff] %v1553_v32  ;;  %v1558_v33 = vld [vmem:[%s1922_s1 + $0x84] sm:$0xf]  ;;  %v1563_v34 = vld [vmem:[%s1922_s1 + $0x88] sm:$0xf] }
  0x15   : > { %v1568_v35 = vld [vmem:[%s1922_s1 + $0x8c] sm:$0xf]  ;;  %v1573_v36 = vld [vmem:[%s1922_s1 + $0x90] sm:$0xf]  ;;  %v1578_v37 = vld [vmem:[%s1922_s1 + $0x94] sm:$0xf] }
  0x16   : > { %v1583_v38 = vld [vmem:[%s1922_s1 + $0x98] sm:$0xf]  ;;  %v1588_v39 = vld [vmem:[%s1922_s1 + $0x9c] sm:$0xf]  ;;  %v1593_v40 = vld [vmem:[%s1922_s1 + $0xa0] sm:$0xf] }
  0x17   : > { %v1598_v41 = vld [vmem:[%s1922_s1 + $0xa4] sm:$0xf]  ;;  %v1603_v42 = vld [vmem:[%s1922_s1 + $0xa8] sm:$0xf]  ;;  %v1608_v43 = vld [vmem:[%s1922_s1 + $0xac] sm:$0xf] }
  0x18   : > { %v1613_v44 = vld [vmem:[%s1922_s1 + $0xb0] sm:$0xf]  ;;  %v1618_v45 = vld [vmem:[%s1922_s1 + $0xb4] sm:$0xf]  ;;  %v1623_v46 = vld [vmem:[%s1922_s1 + $0xb8] sm:$0xf] }
  0x19   : > { %v1628_v47 = vld [vmem:[%s1922_s1 + $0xbc] sm:$0xf]  ;;  %v1633_v48 = vld [vmem:[%s1922_s1 + $0xc0] sm:$0xf]  ;;  %v1638_v49 = vld [vmem:[%s1922_s1 + $0xc4] sm:$0xf] }
  0x1a   : > { %v1643_v50 = vld [vmem:[%s1922_s1 + $0xc8] sm:$0xf]  ;;  %v1648_v51 = vld [vmem:[%s1922_s1 + $0xcc] sm:$0xf]  ;;  %v1653_v52 = vld [vmem:[%s1922_s1 + $0xd0] sm:$0xf] }
  0x1b   : > { %v1658_v53 = vld [vmem:[%s1922_s1 + $0xd4] sm:$0xf]  ;;  %v1663_v54 = vld [vmem:[%s1922_s1 + $0xd8] sm:$0xf]  ;;  %v1668_v55 = vld [vmem:[%s1922_s1 + $0xdc] sm:$0xf] }
  0x1c   : > { %v1673_v56 = vld [vmem:[%s1922_s1 + $0xe0] sm:$0xf]  ;;  %v1678_v57 = vld [vmem:[%s1922_s1 + $0xe4] sm:$0xf]  ;;  %v1683_v58 = vld [vmem:[%s1922_s1 + $0xe8] sm:$0xf] }
  0x1d   : > { %v1688_v59 = vld [vmem:[%s1922_s1 + $0xec] sm:$0xf]  ;;  %v1693_v60 = vld [vmem:[%s1922_s1 + $0xf0] sm:$0xf]  ;;  %v1698_v61 = vld [vmem:[%s1922_s1 + $0xf4] sm:$0xf] }
  0x1e   : > { %1940 = vst [vmem:[#allocation17_spill] sm:$0xff] %v1693_v60  ;;  %v1703_v62 = vld [vmem:[%s1922_s1 + $0xf8] sm:$0xf]  ;;  %v1708_v63 = vld [vmem:[%s1922_s1 + $0xfc] sm:$0xf] }
  0x1f   : > { %1941 = vst [vmem:[#allocation18_spill] sm:$0xff] %v1703_v62  ;;  %1942 = vst [vmem:[#allocation19_spill] sm:$0xff] %v1708_v63  ;;  %v1713_v30 = vld [vmem:[%s1922_s1 + $0x100] sm:$0xf]  ;;  %v1718_v31 = vld [vmem:[%s1922_s1 + $0x104] sm:$0xf] }
  0x20   : > { %1943 = vst [vmem:[#allocation20_spill] sm:$0xff] %v1713_v30  ;;  %1944 = vst [vmem:[#allocation21_spill] sm:$0xff] %v1718_v31  ;;  %v1723_v60 = vld [vmem:[%s1922_s1 + $0x108] sm:$0xf]  ;;  %v1728_v62 = vld [vmem:[%s1922_s1 + $0x10c] sm:$0xf] }
  0x21   : > { %1945 = vst [vmem:[#allocation22_spill] sm:$0xff] %v1723_v60  ;;  %1946 = vst [vmem:[#allocation23_spill] sm:$0xff] %v1728_v62  ;;  %v1733_v63 = vld [vmem:[%s1922_s1 + $0x110] sm:$0xf]  ;;  %v1738_v30 = vld [vmem:[%s1922_s1 + $0x114] sm:$0xf] }
  0x22   : > { %1947 = vst [vmem:[#allocation24_spill] sm:$0xff] %v1733_v63  ;;  %1948 = vst [vmem:[#allocation25_spill] sm:$0xff] %v1738_v30  ;;  %v1743_v31 = vld [vmem:[%s1922_s1 + $0x118] sm:$0xf]  ;;  %v1748_v60 = vld [vmem:[%s1922_s1 + $0x11c] sm:$0xf] }
  0x23   : > { %1949 = vst [vmem:[#allocation26_spill] sm:$0xff] %v1743_v31  ;;  %1950 = vst [vmem:[#allocation27_spill] sm:$0xff] %v1748_v60  ;;  %v1753_v62 = vld [vmem:[%s1923_s2] ss:$0 sm:$0xff] }
  0x24   : > { %1951 = vst [vmem:[#allocation28_spill] sm:$0xff] %v1753_v62 }
  0x25 LB: >> { %v1952_v1 = vld [vmem:[#allocation3_spill] sm:$0xff]  ;;  %v1953_v0 = vld [vmem:[#allocation2_spill] sm:$0xff]  ;;  %v1954_v32 = vld [vmem:[#allocation16_spill] sm:$0xff]  ;;  %v1350_v63 = vmov 0.0   ;;  %v1098_v30 = vcombine.low %v1563_v34, %v1568_v35  ;;  %s1072_s22 = sshll.u32 %s1348_s21, 2  ;;  %vm1351_vm0 = vmmov 0   ;;  %s1348_s21 = sphi %s1755_s21, %s258_s21  }
  0x26   : >> { %v1073_v31 = vcombine.low %v1953_v0, %v1952_v1  ;;  %v1097_v60 = vcombine.low %v1954_v32, %v1558_v33  ;;  %1174 = vmatprep.subr.bf16.mxu1 %v1350_v63  ;;  %1222 = vmatprep.subr.bf16.mxu0 %v1350_v63  ;;  %v1955_v3 = vld [vmem:[#allocation5_spill] sm:$0xff]  ;;  %v1956_v2 = vld [vmem:[#allocation4_spill] sm:$0xff]  ;;  %s1774_s23 = scalar_lea.vmem %s1463_s25, %s1072_s22  ;;  %v1957_v5 = vld [vmem:[#allocation7_spill] sm:$0xff]  ;;  %v1099_v1 = vcombine.low %v1573_v36, %v1578_v37  ;;  %vm293_vm1 = vcmask 523264   ;;  %s1125_s24 = sshll.u32 %s1348_s21, 1 }
  0x27   : >> { %v1074_v62 = vcombine.low %v1956_v2, %v1955_v3  ;;  %1182 = vmatprep.mubr.msk.bf16.mxu1 %vm1351_vm0, %v1350_v63  ;;  %1230 = vmatprep.mubr.msk.bf16.mxu0 %vm1351_vm0, %v1350_v63  ;;  %v1958_v4 = vld [vmem:[#allocation6_spill] sm:$0xff]  ;;  %v1959_v7 = vld [vmem:[#allocation9_spill] sm:$0xff]  ;;  %v1960_v6 = vld [vmem:[#allocation8_spill] sm:$0xff]  ;;  %s926_s26 = scalar_lea.vmem %s1443_s17, %s1125_s24  ;;  %vm927_vm2 = vcmask 517120   ;;  %s258_s21 = sadd.s32 1, %s1348_s21  }
  0x28   : >> { %1175 = vmatpush3.bf16.msra.mxu1 %v1073_v31  ;;  %1223 = vmatpush3.bf16.msra.mxu0 %v1097_v60  ;;  %v1781_v31 = vld [vmem:[%s1774_s23 + $0x4] sm:$0x7]  ;;  %v1075_v0 = vcombine.low %v1958_v4, %v1957_v5  ;;  %v1076_v32 = vcombine.low %v1960_v6, %v1959_v7  ;;  %v268_v5 = vld [vmem:[%s1774_s23] sm:$0x7]  ;;  %v1961_v9 = vld [vmem:[#allocation11_spill] sm:$0xff]  ;;  %v1084_v7 = vcombine.low %v1473_v16, %v1478_v17  ;;  %p255_p4 = scmp.ge.s32.totalorder %s258_s21, 4  }
  0x29   : >> { %1176 = vmatprep.subr.bf16.mxu1 %v1350_v63  ;;  %1224 = vmatprep.subr.bf16.mxu0 %v1350_v63  ;;  %v1096_v60 = vcombine.low %v1781_v31, %v1781_v31  ;;  %v1962_v8 = vld [vmem:[#allocation10_spill] sm:$0xff]  ;;  %v1963_v11 = vld [vmem:[#allocation13_spill] sm:$0xff]  ;;  %v1964_v10 = vld [vmem:[#allocation12_spill] sm:$0xff] }
  0x2b   : >> { %v563_v2 = vshll.u32 %v1096_v60, 16  ;;  %v561_v3 = vshrl.u32 %v1096_v60, 16  ;;  %v635_v6 = vrot.slane %v1096_v60, 1  ;;  %v1085_v60 = vcombine.low %v1483_v18, %v1488_v19 }
  0x2c   : >> { %1177 = vmatpush3.bf16.msra.mxu1 %v1074_v62  ;;  %1225 = vmatpush3.bf16.msra.mxu0 %v1098_v30  ;;  %v1100_v30 = vcombine.low %v1583_v38, %v1588_v39 }
  0x2d   : >> { %1178 = vmatprep.subr.bf16.mxu1 %v1350_v63  ;;  %1226 = vmatprep.subr.bf16.mxu0 %v1350_v63  ;;  %v565_v62 = vrot.slane %v563_v2, 1  ;;  %v1805_v2 = vcombine.low %v268_v5, %v268_v5 }
  0x2f   : >> { %v566_v4 = vor.u32 %v565_v62, %v561_v3  ;;  %v1080_v3 = vcombine.low %v1964_v10, %v1963_v11  ;;  %v342_v62 = vshrl.u32 %v1805_v2, 16  ;;  %v1971_v10 = vld [vmem:[#allocation20_spill] sm:$0xff] }
  0x30   : >> { %1179 = vmatpush3.bf16.msra.mxu1 %v1075_v0  ;;  %1227 = vmatpush3.bf16.msra.mxu0 %v1099_v1  ;;  %v1079_v0 = vcombine.low %v1962_v8, %v1961_v9  ;;  %v1102_v1 = vcombine.low %v1593_v40, %v1598_v41  ;;  %v1968_v8 = vld [vmem:[#allocation19_spill] sm:$0xff] }
  0x31   : >> { %1180 = vmatprep.subr.bf16.mxu1 %v1350_v63  ;;  %1228 = vmatprep.subr.bf16.mxu0 %v1350_v63 }
  0x34   : >> { %1181 = vmatpush3.bf16.msra.mxu1 %v1076_v32  ;;  %1229 = vmatpush3.bf16.msra.mxu0 %v1100_v30  ;;  %v1103_v32 = vcombine.low %v1603_v42, %v1608_v43  ;;  %v1104_v30 = vcombine.low %v1613_v44, %v1618_v45 }
  0x35   : >> { %1186 = vmatprep.subr.bf16.mxu1 %v1350_v63  ;;  %1234 = vmatprep.subr.bf16.mxu0 %v1350_v63 }
  0x37   : >> { %1183 = vmatmul.mubr.msk.bf16.vlgmr.msra.gmra.mrb[0].mxu1 %vm293_vm1, %v268_v5  ;;  %1231 = vmatmul.mubr.msk.bf16.vlgmr.msra.gmra.mrb[0].mxu0 %vm293_vm1, %v566_v4  ;;  %v344_v4 = vshll.u32 %v1805_v2, 16  ;;  %v1081_v5 = vcombine.low %v1448_v12, %v1453_v13 }
  0x38   : >> { %1187 = vmatpush3.bf16.msra.mxu1 %v1079_v0  ;;  %1235 = vmatpush3.bf16.msra.mxu0 %v1102_v1  ;;  %v1082_v1 = vcombine.low %v1458_v14, %v1468_v15 }
  0x39   : >> { %1188 = vmatprep.subr.bf16.mxu1 %v1350_v63  ;;  %1236 = vmatprep.subr.bf16.mxu0 %v1350_v63  ;;  %v346_v0 = vrot.slane %v344_v4, 1  ;;  %v1109_v4 = vcombine.low %v1633_v48, %v1638_v49 }
  0x3a   : >> { %1194 = vmatprep.mubr.msk.bf16.mxu1 %vm1351_vm0, %v1350_v63  ;;  %1242 = vmatprep.mubr.msk.bf16.mxu0 %vm1351_vm0, %v1350_v63 }
  0x3c   : >> { %1189 = vmatpush3.bf16.msra.mxu1 %v1080_v3  ;;  %1237 = vmatpush3.bf16.msra.mxu0 %v1103_v32  ;;  %v1105_v3 = vcombine.low %v1623_v46, %v1628_v47  ;;  %v347_v32 = vor.u32 %v346_v0, %v342_v62  ;;  %v1112_v62 = vcombine.low %v1663_v54, %v1668_v55  ;;  %v416_v0 = vrot.slane %v1805_v2, 1 }
  0x3d   : >> { %1190 = vmatprep.subr.bf16.mxu1 %v1350_v63  ;;  %1238 = vmatprep.subr.bf16.mxu0 %v1350_v63  ;;  %v1092_v2 = vcombine.low %v1523_v26, %v1528_v27 }
  0x40   : >> { %1191 = vmatpush3.bf16.msra.mxu1 %v1081_v5  ;;  %1239 = vmatpush3.bf16.msra.mxu0 %v1104_v30  ;;  %v1110_v5 = vcombine.low %v1643_v50, %v1648_v51  ;;  %v1087_v30 = vcombine.low %v1503_v22, %v1508_v23 }
  0x41   : >> { %1192 = vmatprep.subr.bf16.mxu1 %v1350_v63  ;;  %1240 = vmatprep.subr.bf16.mxu0 %v1350_v63 }
  0x44   : >> { %1193 = vmatpush3.bf16.msra.mxu1 %v1082_v1  ;;  %1241 = vmatpush3.bf16.msra.mxu0 %v1105_v3  ;;  %v1091_v1 = vcombine.low %v1513_v24, %v1518_v25  ;;  %v1108_v3 = vld [vmem:[%s1774_s23 + $0x8] sm:$0x7] }
  0x45   : >> { %1198 = vmatprep.subr.bf16.mxu1 %v1350_v63  ;;  %1246 = vmatprep.subr.bf16.mxu0 %v1350_v63 }
  0x47   : >> { %1195 = vmatmul.mubr.msk.bf16.vlgmr.msra.gmra.mrb[0].mxu1 %vm293_vm1, %v347_v32  ;;  %1243 = vmatmul.mubr.msk.bf16.vlgmr.msra.gmra.mrb[0].mxu0 %vm293_vm1, %v635_v6  ;;  %v1086_v6 = vcombine.low %v1493_v20, %v1498_v21  ;;  %v1115_v32 = vcombine.low %v1673_v56, %v1678_v57 }
  0x48   : >> { %1199 = vmatpush3.bf16.msra.mxu1 %v1084_v7  ;;  %1247 = vmatpush3.bf16.msra.mxu0 %v1109_v4  ;;  %v1111_v7 = vcombine.low %v1653_v52, %v1658_v53  ;;  %v1114_v4 = vcombine.low %v1108_v3, %v1108_v3 }
  0x49   : >> { %1200 = vmatprep.subr.bf16.mxu1 %v1350_v63  ;;  %1248 = vmatprep.subr.bf16.mxu0 %v1350_v63 }
  0x4a   : >> { %1206 = vmatprep.mubr.msk.bf16.mxu1 %vm1351_vm0, %v1350_v63  ;;  %1254 = vmatprep.mubr.msk.bf16.mxu0 %vm1351_vm0, %v1350_v63 }
  0x4c   : >> { %1201 = vmatpush3.bf16.msra.mxu1 %v1085_v60  ;;  %1249 = vmatpush3.bf16.msra.mxu0 %v1110_v5  ;;  %v1116_v60 = vcombine.low %v1683_v58, %v1688_v59  ;;  %v782_v5 = vshll.u32 %v1114_v4, 16 }
  0x4d   : >> { %1202 = vmatprep.subr.bf16.mxu1 %v1350_v63  ;;  %1250 = vmatprep.subr.bf16.mxu0 %v1350_v63 }
  0x50   : >> { %1203 = vmatpush3.bf16.msra.mxu1 %v1086_v6  ;;  %1251 = vmatpush3.bf16.msra.mxu0 %v1111_v7  ;;  %v1093_v6 = vcombine.low %v1533_v28, %v1538_v29  ;;  %v1965_v7 = vld [vmem:[#allocation17_spill] sm:$0xff] }
  0x51   : >> { %1204 = vmatprep.subr.bf16.mxu1 %v1350_v63  ;;  %1252 = vmatprep.subr.bf16.mxu0 %v1350_v63 }
  0x54   : >> { %1205 = vmatpush3.bf16.msra.mxu1 %v1087_v30  ;;  %1253 = vmatpush3.bf16.msra.mxu0 %v1112_v62  ;;  %v1117_v30 = vcombine.low %v1965_v7, %v1698_v61  ;;  %v780_v62 = vshrl.u32 %v1114_v4, 16  ;;  %v1970_v7 = vld [vmem:[#allocation21_spill] sm:$0xff] }
  0x55   : >> { %1210 = vmatprep.subr.bf16.mxu1 %v1350_v63  ;;  %1258 = vmatprep.subr.bf16.mxu0 %v1350_v63  ;;  %v1120_v11 = vcombine.low %v1971_v10, %v1970_v7  ;;  %v1975_v10 = vld [vmem:[#allocation24_spill] sm:$0xff] }
  0x57   : >> { %1207 = vmatmul.mubr.msk.bf16.vlgmr.msra.gmra.mrb[0].mxu1 %vm293_vm1, %v416_v0  ;;  %1255 = vmatmul.mubr.msk.bf16.vlgmr.msra.gmra.mrb[0].mxu0 %vm293_vm1, %v1108_v3  ;;  %v784_v0 = vrot.slane %v782_v5, 1  ;;  %v1967_v3 = vld [vmem:[#allocation14_spill] sm:$0xff]  ;;  %v1972_v5 = vld [vmem:[#allocation23_spill] sm:$0xff] }
  0x58   : >> { %1211 = vmatpush3.bf16.msra.mxu1 %v1091_v1  ;;  %1259 = vmatpush3.bf16.msra.mxu0 %v1115_v32  ;;  %v1966_v1 = vld [vmem:[#allocation15_spill] sm:$0xff] }
  0x59   : >> { %1212 = vmatprep.subr.bf16.mxu1 %v1350_v63  ;;  %1260 = vmatprep.subr.bf16.mxu0 %v1350_v63  ;;  %v1094_v32 = vcombine.low %v1967_v3, %v1966_v1  ;;  %v785_v9 = vor.u32 %v784_v0, %v780_v62  ;;  %v1977_v0 = vld [vmem:[#allocation26_spill] sm:$0xff] }
  0x5a   : >> { %1218 = vmatprep.mubr.msk.bf16.mxu1 %vm1351_vm0, %v1350_v63  ;;  %1266 = vmatprep.mubr.msk.bf16.mxu0 %vm1351_vm0, %v1350_v63 }
  0x5c   : >> { %1213 = vmatpush3.bf16.msra.mxu1 %v1092_v2  ;;  %1261 = vmatpush3.bf16.msra.mxu0 %v1116_v60  ;;  %v1969_v2 = vld [vmem:[#allocation18_spill] sm:$0xff] }
  0x5d   : >> { %1214 = vmatprep.subr.bf16.mxu1 %v1350_v63  ;;  %1262 = vmatprep.subr.bf16.mxu0 %v1350_v63  ;;  %v1118_v60 = vcombine.low %v1969_v2, %v1968_v8  ;;  %v1973_v8 = vld [vmem:[#allocation22_spill] sm:$0xff] }
  0x60   : >> { %1215 = vmatpush3.bf16.msra.mxu1 %v1093_v6  ;;  %1263 = vmatpush3.bf16.msra.mxu0 %v1117_v30  ;;  %v1121_v6 = vcombine.low %v1973_v8, %v1972_v5  ;;  %v1974_v30 = vld [vmem:[#allocation25_spill] sm:$0xff] }
  0x61   : >> { %1216 = vmatprep.subr.bf16.mxu1 %v1350_v63  ;;  %1264 = vmatprep.subr.bf16.mxu0 %v1350_v63  ;;  %v1122_v62 = vcombine.low %v1975_v10, %v1974_v30 }
  0x64   : >> { %1217 = vmatpush3.bf16.msra.mxu1 %v1094_v32  ;;  %1265 = vmatpush3.bf16.msra.mxu0 %v1118_v60  ;;  %v1978_v60 = vld [vmem:[#allocation28_spill] sm:$0xff] }
  0x65   : >> { %1270 = vmatprep.subr.bf16.mxu0 %v1350_v63 }
  0x67   : >> { %1219 = vmatmul.mubr.msk.bf16.vlgmr.msra.gmra.mrb[0].mxu1 %vm293_vm1, %v1781_v31  ;;  %1267 = vmatmul.mubr.msk.bf16.vlgmr.msra.gmra.mrb[0].mxu0 %vm293_vm1, %v785_v9  ;;  %v1976_v31 = vld [vmem:[#allocation27_spill] sm:$0xff] }
  0x68   : >> { %1271 = vmatpush3.bf16.msra.mxu0 %v1120_v11  ;;  %1278 = vmatprep.mubr.msk.bf16.mxu0 %vm1351_vm0, %v1350_v63  ;;  %v1123_v9 = vcombine.low %v1977_v0, %v1976_v31  ;;  %v854_v11 = vrot.slane %v1114_v4, 1 }
  0x69   : >> { %1272 = vmatprep.subr.bf16.mxu0 %v1350_v63 }
  0x6c   : >> { %1273 = vmatpush3.bf16.msra.mxu0 %v1121_v6 }
  0x6d   : >> { %1274 = vmatprep.subr.bf16.mxu0 %v1350_v63 }
  0x70   : >> { %1275 = vmatpush3.bf16.msra.mxu0 %v1122_v62 }
  0x71   : >> { %1276 = vmatprep.subr.bf16.mxu0 %v1350_v63 }
  0x74   : >> { %1277 = vmatpush3.bf16.msra.mxu0 %v1123_v9 }
  0x77   : >> { %1279 = vmatmul.mubr.msk.bf16.vlgmr.msra.gmra.mrb[0].mxu0 %vm293_vm1, %v854_v11 }
 0x13a   : >> { %v550_v1 = vpop.f32.mrb[0].mxu1 }
 0x13b   : >> { %v1220_v3 = vpop.f32.mrb[1].mxu1  ;;  %v1282_v7 = vadd.f32 %v1978_v60, %v550_v1 }
 0x13c   : >> { %v553_v32 = vpop.f32.mrb[2].mxu1 }
 0x13d   : >> { %v1221_v2 = vpop.f32.mrb[3].mxu1 }
 0x14a   : >> { %v916_v5 = vpop.f32.mrb[0].mxu0 }
 0x14b   : >> { %v1283_v8 = vadd.f32 %v1282_v7, %v916_v5  ;;  %v1280_v6 = vpop.f32.mrb[1].mxu0  ;;  %257 = sbr.rel (!%p255_p4) target bundleno = 37 (0x25), region = 81 }
 0x14c   : >> { %v919_v30 = vpop.f32.mrb[2].mxu0 }
 0x14d   : >> { %v923_v10 = vmax.f32 %v1283_v8, 0.0  ;;  %v1281_v62 = vpop.f32.mrb[3].mxu0 }
 0x14f   : >> { %v924_v63 = vpack.c.bf16 %v923_v10, %v923_v10 }
 0x151   : >> { %928 = vst.msk [vmem:[%s926_s26] sm:$0x3] %vm927_vm2, %v924_v63 }
 0x152 PF: > { %s13_s12 = sadd.s32 1, %s1344_s12  }
 0x153   : > { %p10_p5 = scmp.ge.s32.totalorder %s13_s12, 4  }
 0x155   :  { %12 = sbr.rel (!%p10_p5) target bundleno = 1 (0x1), region = 92 }

// kernel: base_resnet_forward.90
= control target key start
LH: loop header
LB: loop body
LE: loop exit
PB: predicated region body
PF: predicated region fallthrough
CT: control target
= control target key end

     0   :  { %s548_s12 = smov 0   ;;  %s620_s0 = inlined_call_operand.vmem [shape: bf16[32,256], index: 0, kind: input, shape index: {}]   ;;  %s621_s1 = inlined_call_operand.vmem [shape: bf16[256,64], index: 1, kind: input, shape index: {}]   ;;  %s622_s2 = inlined_call_operand.vmem [shape: f32[1,64], index: 2, kind: input, shape index: {}]   ;;  %s623_s3 = inlined_call_operand.vmem [shape: bf16[32,64], index: 3, kind: output, shape index: {}]  }
   0x1 LB: > { %s435_s13 = sadd.s32 4294967295, %s526_s12   ;;  %p439_p0 = scmp.ge.s32.totalorder %s526_s12, 1  ;;  %s526_s12 = sphi %s548_s12, %s13_s12  }
   0x2   : > { %p139_p1 = scmp.lt.s32.totalorder %s526_s12, 3 }
   0x4   : > { %p140_p2 = pnand %p439_p0, %p139_p1 }
   0x5   : > { %v501_v0 = vld [vmem:[%s621_s1 + $0x40] sm:$0xff] (!%p140_p2)   ;;  %s440_s16 = sshll.u32 (!%p140_p2), %s435_s13, 1  ;;  %v503_v2 = vld [vmem:[%s621_s1 + $0x48] sm:$0xff] (!%p140_p2)   ;;  %v505_v4 = vld [vmem:[%s621_s1 + $0x50] sm:$0xff] (!%p140_p2)   ;;  %vm376_vm0 = vcmask (!%p140_p2), 519168  }
   0x6   : > { %143 = sbr.rel (%p140_p2) target bundleno = 262 (0x106), region = 32  ;;  %v502_v1 = vld [vmem:[%s621_s1] sm:$0xff] (!%p140_p2)   ;;  %471 = vmatprep.subr.bf16.mxu0 (!%p140_p2), %v501_v0  ;;  %v504_v3 = vld [vmem:[%s621_s1 + $0x8] sm:$0xff] (!%p140_p2)   ;;  %p165_p3 = scmp.lt.s32.totalorder (!%p140_p2), %s440_s16, 3  ;;  %v506_v5 = vld [vmem:[%s621_s1 + $0x10] sm:$0xff] (!%p140_p2)  }
   0x7   : > { %472 = vmatpush3.bf16.msra.mxu0 (!%p140_p2), %v502_v1  ;;  %v507_v6 = vld [vmem:[%s621_s1 + $0x58] sm:$0xff] (!%p140_p2)   ;;  %v509_v8 = vld [vmem:[%s621_s1 + $0x60] sm:$0xff] (!%p140_p2)   ;;  %v511_v10 = vld [vmem:[%s621_s1 + $0x68] sm:$0xff] (!%p140_p2)  }
   0x8   : > { %473 = vmatprep.subr.bf16.mxu0 (!%p140_p2), %v503_v2  ;;  %v508_v7 = vld [vmem:[%s621_s1 + $0x18] sm:$0xff] (!%p140_p2)   ;;  %v510_v9 = vld [vmem:[%s621_s1 + $0x20] sm:$0xff] (!%p140_p2)   ;;  %v512_v12 = vld [vmem:[%s621_s1 + $0x28] sm:$0xff] (!%p140_p2)  }
   0x9   : > { %v513_v13 = vld [vmem:[%s621_s1 + $0x70] sm:$0xff] (!%p140_p2)   ;;  %v515_v15 = vld [vmem:[%s621_s1 + $0x78] sm:$0xff] (!%p140_p2)   ;;  %v445_v19 = vld [vmem:[%s622_s2] ss:$0 sm:$0xff] (!%p140_p2) }
   0xa   : > { %v514_v14 = vld [vmem:[%s621_s1 + $0x30] sm:$0xff] (!%p140_p2)   ;;  %v516_v16 = vld [vmem:[%s621_s1 + $0x38] sm:$0xff] (!%p140_p2)  }
   0xb   : > { %474 = vmatpush3.bf16.msra.mxu0 (!%p140_p2), %v504_v3 }
   0xc   : > { %475 = vmatprep.subr.bf16.mxu0 (!%p140_p2), %v505_v4 }
   0xd   : > { %s625_s16 = smov (!%p165_p3, %s440_s16), 3 }
   0xe   : > { %s468_s4 = sshll.u32 %s625_s16, 3  ;;  %s444_s28 = sshll.u32 %s625_s16, 2 }
   0xf   : > { %476 = vmatpush3.bf16.msra.mxu0 %v506_v5  ;;  %s169_s9 = scalar_lea.vmem %s620_s0, %s468_s4  ;;  %s175_s4 = scalar_lea.vmem %s623_s3, %s444_s28 }
  0x10   : > { %477 = vmatprep.subr.bf16.mxu0 %v507_v6  ;;  %v519_v11 = vld [vmem:[%s169_s9 + $0x4] ss:$8 sps:$4 sm:$0xff]   ;;  %v517_v17 = vld [vmem:[%s169_s9] ss:$8 sps:$4 sm:$0xff]  }
  0x11   : > { %357 = vmatprep.mubr.bf16.mxu0 %v519_v11 }
  0x13   : > { %478 = vmatpush3.bf16.msra.mxu0 %v508_v7 }
  0x14   : > { %479 = vmatprep.subr.bf16.mxu0 %v509_v8 }
  0x17   : > { %480 = vmatpush3.bf16.msra.mxu0 %v510_v9 }
  0x18   : > { %481 = vmatprep.subr.bf16.mxu0 %v511_v10 }
  0x1b   : > { %482 = vmatpush3.bf16.msra.mxu0 %v512_v12 }
  0x1c   : > { %483 = vmatprep.subr.bf16.mxu0 %v513_v13 }
  0x1f   : > { %484 = vmatpush3.bf16.msra.mxu0 %v514_v14 }
  0x20   : > { %485 = vmatprep.subr.bf16.mxu0 %v515_v15 }
  0x23   : > { %486 = vmatpush3.bf16.msra.mxu0 %v516_v16 }
  0x26   : > { %358 = vmatmul.mubr.bf16.vlgmr.msra.gmra.mrb[0].mxu0 %v517_v17 }
  0xf9   : > { %v487_v18 = vpop.f32.mrb[0].mxu0 }
  0xfa   : > { %v488_v20 = vpop.f32.mrb[1].mxu0 }
  0xfb   : > { %v489_v21 = vadd.f32 %v488_v20, %v487_v18  ;;  %v490_v22 = vpop.f32.mrb[2].mxu0 }
  0xfc   : > { %v491_v23 = vpop.f32.mrb[3].mxu0 }
  0xfd   : > { %v360_v24 = vadd.f32 %v489_v21, %v445_v19  ;;  %v492_v25 = vadd.f32 %v491_v23, %v490_v22 }
  0xff   : > { %v366_v26 = vmax.f32 %v360_v24, 0.0  ;;  %v363_v27 = vadd.f32 %v492_v25, %v445_v19 }
 0x101   : > { %v469_v28 = vpack.c.bf16 %v366_v26, %v366_v26  ;;  %v367_v29 = vmax.f32 %v363_v27, 0.0 }
 0x103   : > { %377 = vst.msk [vmem:[%s175_s4] sm:$0xf] %vm376_vm0, %v469_v28  ;;  %v470_v30 = vpack.c.bf16 %v367_v29, %v367_v29 }
 0x105   : > { %378 = vst.msk [vmem:[%s175_s4 + $0x4] sm:$0xf] %vm376_vm0, %v470_v30 }
 0x106 PF: > { %s13_s12 = sadd.s32 1, %s526_s12  }
 0x107   : > { %p10_p4 = scmp.ge.s32.totalorder %s13_s12, 4  }
 0x109   :  { %12 = sbr.rel (!%p10_p4) target bundleno = 1 (0x1), region = 62 }

// kernel: base_resnet_forward.92
= control target key start
LH: loop header
LB: loop body
LE: loop exit
PB: predicated region body
PF: predicated region fallthrough
CT: control target
= control target key end

     0   :  { %s528_s15 = smov 0   ;;  %s579_s0 = inlined_call_operand.vmem [shape: bf16[32,64], index: 0, kind: input, shape index: {}]   ;;  %s580_s1 = inlined_call_operand.vmem [shape: bf16[64,256], index: 1, kind: input, shape index: {}]   ;;  %s581_s2 = inlined_call_operand.vmem [shape: f32[1,256], index: 2, kind: input, shape index: {}]   ;;  %s582_s3 = inlined_call_operand.vmem [shape: bf16[32,256], index: 3, kind: input, shape index: {}]   ;;  %s583_s4 = inlined_call_operand.vmem [shape: bf16[32,256], index: 4, kind: output, shape index: {}]  }
   0x1 LB: > { %s441_s16 = sadd.s32 4294967295, %s500_s15   ;;  %p445_p0 = scmp.ge.s32.totalorder %s500_s15, 1  ;;  %s500_s15 = sphi %s528_s15, %s14_s15  }
   0x2   : > { %p175_p1 = scmp.lt.s32.totalorder %s500_s15, 3 }
   0x4   : > { %p176_p2 = pnand %p445_p0, %p175_p1 }
   0x5   : > { %v481_v0 = vld [vmem:[%s580_s1 + $0x4] ss:$8 sps:$4 sm:$0xff] (!%p176_p2)   ;;  %s446_s19 = sshll.u32 (!%p176_p2), %s441_s16, 1  ;;  %v483_v1 = vld [vmem:[%s580_s1] ss:$8 sps:$4 sm:$0xff] (!%p176_p2)   ;;  %v502_v2 = vmov (!%p176_p2), 0   ;;  %v241_v10 = vlaneseq (!%p176_p2) }
   0x6   : > { %179 = sbr.rel (%p176_p2) target bundleno = 246 (0xf6), region = 36  ;;  %332 = vmatprep.mubr.bf16.mxu0 (!%p176_p2), %v502_v2  ;;  %p209_p3 = scmp.lt.s32.totalorder (!%p176_p2), %s446_s19, 3  ;;  %300 = vmatprep.subr.bf16.mxu0 (!%p176_p2), %v481_v0  ;;  %v484_v3 = vld [vmem:[%s580_s1 + $0x14] ss:$8 sps:$4 sm:$0xff] (!%p176_p2)   ;;  %v486_v4 = vld [vmem:[%s580_s1 + $0x10] ss:$8 sps:$4 sm:$0xff] (!%p176_p2)  }
   0x7   : > { %301 = vmatpush1.bf16.msra.mxu0 (!%p176_p2), %v483_v1  ;;  %v487_v5 = vld [vmem:[%s580_s1 + $0x24] ss:$8 sps:$4 sm:$0xff] (!%p176_p2)   ;;  %v489_v6 = vld [vmem:[%s580_s1 + $0x20] ss:$8 sps:$4 sm:$0xff] (!%p176_p2)   ;;  %v490_v7 = vld [vmem:[%s580_s1 + $0x34] ss:$8 sps:$4 sm:$0xff] (!%p176_p2)  }
   0x8   : > { %302 = vmatprep.subr.bf16.mxu0 (!%p176_p2), %v484_v3  ;;  %v492_v8 = vld [vmem:[%s580_s1 + $0x30] ss:$8 sps:$4 sm:$0xff] (!%p176_p2)   ;;  %vm296_vm0 = vcmask (!%p176_p2), 523264   ;;  %v242_v11 = vshrl.u32 (!%p176_p2), %v241_v10, 7  ;;  %v239_v13 = vld [vmem:[%s581_s2] sm:$0x3] (!%p176_p2) }
   0xa   : > { %v243_v12 = vsub.s32 (!%p176_p2), 0, %v242_v11  ;;  %v247_v14 = vsub.s32 (!%p176_p2), 1, %v242_v11 }
   0xb   : > { %303 = vmatpush1.bf16.msra.mxu0 (!%p176_p2), %v486_v4 }
   0xc   : > { %304 = vmatprep.subr.bf16.mxu0 (!%p176_p2), %v487_v5  ;;  %v244_v16 = vrot.slane (!%p176_p2), %v239_v13, %v243_v12  ;;  %v248_v17 = vrot.slane (!%p176_p2), %v239_v13, %v247_v14 }
   0xd   : > { %s585_s19 = smov (!%p209_p3, %s446_s19), 3 }
   0xe   : > { %s447_s28 = sshll.u32 %s585_s19, 2  ;;  %s468_s12 = sshll.u32 %s585_s19, 3 }
   0xf   : > { %s212_s5 = scalar_lea.vmem %s579_s0, %s447_s28  ;;  %305 = vmatpush1.bf16.msra.mxu0 %v489_v6  ;;  %s219_s16 = scalar_lea.vmem %s582_s3, %s468_s12 }
  0x10   : > { %306 = vmatprep.subr.bf16.mxu0 %v490_v7  ;;  %v493_v9 = vld [vmem:[%s212_s5] sm:$0xff]   ;;  %v344_v18 = vld [vmem:[%s219_s16 + $0x8] sm:$0xff]  ;;  %s226_s21 = scalar_lea.vmem %s583_s4, %s468_s12 }
  0x11   : > { %v343_v15 = vld [vmem:[%s219_s16] sm:$0xff]  ;;  %v347_v24 = vunpack.c.l.bf16 %v344_v18  ;;  %v348_v27 = vunpack.c.h.bf16 %v344_v18 }
  0x12   : > { %v345_v19 = vunpack.c.l.bf16 %v343_v15  ;;  %v346_v21 = vunpack.c.h.bf16 %v343_v15 }
  0x13   : > { %307 = vmatpush1.bf16.msra.mxu0 %v492_v8 }
  0x16   : > { %463 = vmatmul.mubr.msk.bf16.vlgmr.msra.gmra.mrb[0].mxu0 %vm296_vm0, %v493_v9 }
  0xe9   : > { %v334_v20 = vpop.f32.mrb[0].mxu0 }
  0xea   : > { %v335_v22 = vadd.f32 %v334_v20, %v244_v16  ;;  %v336_v23 = vpop.f32.mrb[1].mxu0 }
  0xeb   : > { %v337_v25 = vadd.f32 %v336_v23, %v248_v17  ;;  %v338_v26 = vpop.f32.mrb[2].mxu0 }
  0xec   : > { %v349_v28 = vadd.f32 %v345_v19, %v335_v22  ;;  %v339_v29 = vadd.f32 %v338_v26, %v244_v16  ;;  %v340_v30 = vpop.f32.mrb[3].mxu0 }
  0xed   : > { %v350_v31 = vadd.f32 %v346_v21, %v337_v25  ;;  %v341_v32 = vadd.f32 %v340_v30, %v248_v17 }
  0xee   : > { %v353_v33 = vmax.f32 %v349_v28, 0.0  ;;  %v351_v34 = vadd.f32 %v347_v24, %v339_v29 }
  0xef   : > { %v354_v35 = vmax.f32 %v350_v31, 0.0  ;;  %v352_v36 = vadd.f32 %v348_v27, %v341_v32 }
  0xf0   : > { %v355_v37 = vmax.f32 %v351_v34, 0.0 }
  0xf1   : > { %v470_v38 = vpack.c.bf16 %v354_v35, %v353_v33  ;;  %v356_v39 = vmax.f32 %v352_v36, 0.0 }
  0xf3   : > { %369 = vst [vmem:[%s226_s21] sm:$0xff] %v470_v38  ;;  %v471_v40 = vpack.c.bf16 %v356_v39, %v355_v37 }
  0xf5   : > { %370 = vst [vmem:[%s226_s21 + $0x8] sm:$0xff] %v471_v40 }
  0xf6 PF: > { %s14_s15 = sadd.s32 1, %s500_s15  }
  0xf7   : > { %p11_p4 = scmp.ge.s32.totalorder %s14_s15, 4  }
  0xf9   :  { %13 = sbr.rel (!%p11_p4) target bundleno = 1 (0x1), region = 69 }

// kernel: base_resnet_forward.89
= control target key start
LH: loop header
LB: loop body
LE: loop exit
PB: predicated region body
PF: predicated region fallthrough
CT: control target
= control target key end

     0   :  { %s790_s21 = smov 0   ;;  %s892_s0 = inlined_call_operand.vmem [shape: bf16[32,64], index: 0, kind: input, shape index: {}]   ;;  %s893_s1 = inlined_call_operand.vmem [shape: bf16[64,256], index: 1, kind: input, shape index: {}]   ;;  %s894_s2 = inlined_call_operand.vmem [shape: f32[1,256], index: 2, kind: input, shape index: {}]   ;;  %s895_s3 = inlined_call_operand.vmem [shape: bf16[32,128], index: 3, kind: input, shape index: {}]   ;;  %s896_s4 = inlined_call_operand.vmem [shape: bf16[128,256], index: 4, kind: input, shape index: {}]   ;;  %s897_s5 = inlined_call_operand.vmem [shape: f32[1,256], index: 5, kind: input, shape index: {}]   ;;  %s898_s6 = inlined_call_operand.vmem [shape: bf16[32,256], index: 6, kind: output, shape index: {}]  }
   0x1 LB: > { %s649_s22 = sadd.s32 4294967295, %s752_s21   ;;  %p653_p0 = scmp.ge.s32.totalorder %s752_s21, 1  ;;  %s752_s21 = sphi %s790_s21, %s16_s21  }
   0x2   : > { %p224_p1 = scmp.lt.s32.totalorder %s752_s21, 3 }
   0x4   : > { %p225_p2 = pnand %p653_p0, %p224_p1 }
   0x5   : > { %v708_v0 = vld [vmem:[%s896_s4 + $0x4] ss:$8 sps:$4 sm:$0xff] (!%p225_p2)   ;;  %v710_v1 = vld [vmem:[%s896_s4] ss:$8 sps:$4 sm:$0xff] (!%p225_p2)   ;;  %v754_v2 = vmov (!%p225_p2), 0   ;;  %s654_s27 = sshll.u32 (!%p225_p2), %s649_s22, 1  ;;  %v531_v27 = vlaneseq (!%p225_p2) }
   0x6   : > { %228 = sbr.rel (%p225_p2) target bundleno = 265 (0x109), region = 44  ;;  %518 = vmatprep.mubr.bf16.mxu0 (!%p225_p2), %v754_v2  ;;  %426 = vmatprep.mubr.bf16.mxu1 (!%p225_p2), %v754_v2  ;;  %v711_v3 = vld [vmem:[%s896_s4 + $0x14] ss:$8 sps:$4 sm:$0xff] (!%p225_p2)   ;;  %v713_v4 = vld [vmem:[%s896_s4 + $0x10] ss:$8 sps:$4 sm:$0xff] (!%p225_p2)   ;;  %p261_p3 = scmp.lt.s32.totalorder (!%p225_p2), %s654_s27, 3 }
   0x7   : > { %394 = vmatprep.subr.bf16.mxu1 (!%p225_p2), %v708_v0  ;;  %v714_v5 = vld [vmem:[%s896_s4 + $0x24] ss:$8 sps:$4 sm:$0xff] (!%p225_p2)   ;;  %v722_v7 = vld [vmem:[%s893_s1] ss:$8 sps:$4 sm:$0xff] (!%p225_p2)   ;;  %v717_v9 = vld [vmem:[%s896_s4 + $0x34] ss:$8 sps:$4 sm:$0xff] (!%p225_p2)  }
   0x8   : > { %395 = vmatpush1.bf16.msra.mxu1 (!%p225_p2), %v710_v1  ;;  %v720_v6 = vld [vmem:[%s893_s1 + $0x4] ss:$8 sps:$4 sm:$0xff] (!%p225_p2)   ;;  %v716_v8 = vld [vmem:[%s896_s4 + $0x20] ss:$8 sps:$4 sm:$0xff] (!%p225_p2)   ;;  %v726_v10 = vld [vmem:[%s893_s1 + $0x14] ss:$8 sps:$4 sm:$0xff] (!%p225_p2)  }
   0x9   : > { %396 = vmatprep.subr.bf16.mxu1 (!%p225_p2), %v711_v3  ;;  %486 = vmatprep.subr.bf16.mxu0 (!%p225_p2), %v720_v6  ;;  %v728_v11 = vld [vmem:[%s893_s1 + $0x10] ss:$8 sps:$4 sm:$0xff] (!%p225_p2)   ;;  %v732_v13 = vld [vmem:[%s893_s1 + $0x24] ss:$8 sps:$4 sm:$0xff] (!%p225_p2)   ;;  %v734_v15 = vld [vmem:[%s893_s1 + $0x20] ss:$8 sps:$4 sm:$0xff] (!%p225_p2)  }
   0xa   : > { %487 = vmatpush1.bf16.msra.mxu0 (!%p225_p2), %v722_v7  ;;  %v719_v12 = vld [vmem:[%s896_s4 + $0x30] ss:$8 sps:$4 sm:$0xff] (!%p225_p2)   ;;  %v723_v14 = vld [vmem:[%s896_s4 + $0x44] ss:$8 sps:$4 sm:$0xff] (!%p225_p2)   ;;  %v738_v16 = vld [vmem:[%s893_s1 + $0x34] ss:$8 sps:$4 sm:$0xff] (!%p225_p2)  }
   0xb   : > { %488 = vmatprep.subr.bf16.mxu0 (!%p225_p2), %v726_v10  ;;  %v725_v17 = vld [vmem:[%s896_s4 + $0x40] ss:$8 sps:$4 sm:$0xff] (!%p225_p2)   ;;  %v729_v18 = vld [vmem:[%s896_s4 + $0x54] ss:$8 sps:$4 sm:$0xff] (!%p225_p2)   ;;  %v740_v19 = vld [vmem:[%s893_s1 + $0x30] ss:$8 sps:$4 sm:$0xff] (!%p225_p2)  }
   0xc   : > { %397 = vmatpush1.bf16.msra.mxu1 (!%p225_p2), %v713_v4  ;;  %v731_v20 = vld [vmem:[%s896_s4 + $0x50] ss:$8 sps:$4 sm:$0xff] (!%p225_p2)   ;;  %v735_v21 = vld [vmem:[%s896_s4 + $0x64] ss:$8 sps:$4 sm:$0xff] (!%p225_p2)   ;;  %vm482_vm0 = vcmask (!%p225_p2), 523264   ;;  %v532_v30 = vshrl.u32 (!%p225_p2), %v531_v27, 7 }
   0xd   : > { %398 = vmatprep.subr.bf16.mxu1 %v714_v5  ;;  %s900_s27 = smov (!%p261_p3, %s654_s27), 3  ;;  %v737_v23 = vld [vmem:[%s896_s4 + $0x60] ss:$8 sps:$4 sm:$0xff]   ;;  %v741_v24 = vld [vmem:[%s896_s4 + $0x74] ss:$8 sps:$4 sm:$0xff]  }
   0xe   : > { %s655_s30 = sshll.u32 %s900_s27, 2  ;;  %489 = vmatpush1.bf16.msra.mxu0 %v728_v11  ;;  %v743_v25 = vld [vmem:[%s896_s4 + $0x70] ss:$8 sps:$4 sm:$0xff]   ;;  %v533_v33 = vsub.s32 0, %v532_v30  ;;  %v529_v34 = vld [vmem:[%s894_s2] sm:$0x3] }
   0xf   : > { %490 = vmatprep.subr.bf16.mxu0 %v732_v13  ;;  %s264_s15 = scalar_lea.vmem %s892_s0, %s655_s30  ;;  %s270_s20 = scalar_lea.vmem %s895_s3, %s655_s30  ;;  %v537_v35 = vsub.s32 1, %v532_v30  ;;  %v545_v36 = vld [vmem:[%s897_s5] sm:$0x3] }
  0x10   : > { %399 = vmatpush1.bf16.msra.mxu1 %v716_v8  ;;  %v744_v22 = vld [vmem:[%s264_s15] sm:$0xff]   ;;  %v534_v37 = vrot.slane %v529_v34, %v533_v33  ;;  %v550_v41 = vrot.slane %v545_v36, %v533_v33  ;;  %s692_s15 = sshll.u32 %s900_s27, 3 }
  0x11   : > { %400 = vmatprep.subr.bf16.mxu1 %v717_v9  ;;  %v745_v26 = vld [vmem:[%s270_s20] sm:$0xff]   ;;  %v538_v39 = vrot.slane %v529_v34, %v537_v35  ;;  %v554_v44 = vrot.slane %v545_v36, %v537_v35  ;;  %s277_s18 = scalar_lea.vmem %s898_s6, %s692_s15 }
  0x12   : > { %491 = vmatpush1.bf16.msra.mxu0 %v734_v15 }
  0x13   : > { %492 = vmatprep.subr.bf16.mxu0 %v738_v16 }
  0x14   : > { %401 = vmatpush1.bf16.msra.mxu1 %v719_v12 }
  0x15   : > { %402 = vmatprep.subr.bf16.mxu1 %v723_v14 }
  0x16   : > { %493 = vmatpush1.bf16.msra.mxu0 %v740_v19 }
  0x18   : > { %403 = vmatpush1.bf16.msra.mxu1 %v725_v17 }
  0x19   : > { %404 = vmatprep.subr.bf16.mxu1 %v729_v18  ;;  %687 = vmatmul.mubr.msk.bf16.vlgmr.msra.gmra.mrb[0].mxu0 %vm482_vm0, %v744_v22 }
  0x1c   : > { %405 = vmatpush1.bf16.msra.mxu1 %v731_v20 }
  0x1d   : > { %406 = vmatprep.subr.bf16.mxu1 %v735_v21 }
  0x20   : > { %407 = vmatpush1.bf16.msra.mxu1 %v737_v23 }
  0x21   : > { %408 = vmatprep.subr.bf16.mxu1 %v741_v24 }
  0x24   : > { %409 = vmatpush1.bf16.msra.mxu1 %v743_v25 }
  0x27   : > { %427 = vmatmul.mubr.bf16.vlgmr.msra.gmra.mrb[0].mxu1 %v745_v26 }
  0xec   : > { %v520_v28 = vpop.f32.mrb[0].mxu0 }
  0xed   : > { %v522_v29 = vpop.f32.mrb[1].mxu0 }
  0xee   : > { %v524_v31 = vpop.f32.mrb[2].mxu0 }
  0xef   : > { %v526_v32 = vpop.f32.mrb[3].mxu0 }
  0xfa   : > { %v428_v38 = vpop.f32.mrb[0].mxu1 }
  0xfb   : > { %v521_v40 = vadd.f32 %v520_v28, %v428_v38  ;;  %v430_v42 = vpop.f32.mrb[1].mxu1 }
  0xfc   : > { %v523_v43 = vadd.f32 %v522_v29, %v430_v42  ;;  %v432_v45 = vpop.f32.mrb[2].mxu1 }
  0xfd   : > { %v541_v46 = vadd.f32 %v534_v37, %v521_v40  ;;  %v525_v47 = vadd.f32 %v524_v31, %v432_v45  ;;  %v434_v48 = vpop.f32.mrb[3].mxu1 }
  0xfe   : > { %v542_v49 = vadd.f32 %v538_v39, %v523_v43  ;;  %v527_v50 = vadd.f32 %v526_v32, %v434_v48 }
  0xff   : > { %v557_v51 = vadd.f32 %v550_v41, %v541_v46  ;;  %v543_v52 = vadd.f32 %v534_v37, %v525_v47 }
 0x100   : > { %v558_v53 = vadd.f32 %v554_v44, %v542_v49  ;;  %v544_v54 = vadd.f32 %v538_v39, %v527_v50 }
 0x101   : > { %v561_v55 = vmax.f32 %v557_v51, 0.0  ;;  %v559_v56 = vadd.f32 %v550_v41, %v543_v52 }
 0x102   : > { %v562_v57 = vmax.f32 %v558_v53, 0.0  ;;  %v560_v58 = vadd.f32 %v554_v44, %v544_v54 }
 0x103   : > { %v563_v59 = vmax.f32 %v559_v56, 0.0 }
 0x104   : > { %v693_v60 = vpack.c.bf16 %v562_v57, %v561_v55  ;;  %v564_v61 = vmax.f32 %v560_v58, 0.0 }
 0x106   : > { %577 = vst [vmem:[%s277_s18] sm:$0xff] %v693_v60  ;;  %v694_v62 = vpack.c.bf16 %v564_v61, %v563_v59 }
 0x108   : > { %578 = vst [vmem:[%s277_s18 + $0x8] sm:$0xff] %v694_v62 }
 0x109 PF: > { %s16_s21 = sadd.s32 1, %s752_s21  }
 0x10a   : > { %p13_p4 = scmp.ge.s32.totalorder %s16_s21, 4  }
 0x10c   :  { %15 = sbr.rel (!%p13_p4) target bundleno = 1 (0x1), region = 77 }

</bundles_post_ra>
